<compile_context>
chip_gen: v5e
topology: v5e:2x2
jax: 0.10.0
libtpu: 0.0.40
codegen_flags: <defaults>
</compile_context>

<pallas_src>
import numpy as np
import jax
import jax.numpy as jnp
from jax import lax
from jax.experimental import pallas as pl
from jax.experimental.pallas import tpu as pltpu

IMG = 28                 # image height / width
WIN = 11                 # SSIM gaussian window size
SIG = 1.5                # SSIM gaussian sigma
OUT = IMG - WIN + 1      # 18 : valid-conv output size
K1, K2 = 0.01, 0.03      # SSIM constants
LG = 4                   # images packed side-by-side per lane group
GRP = 32                 # lanes per image group (28 data + 4 pad lanes)
LANES = LG * GRP         # 128 : full vreg lane width


# ---------------------------------------------------------------------------
# Deterministic constants (numpy, built once)
# ---------------------------------------------------------------------------
def _gauss_win():
    coords = np.arange(WIN, dtype=np.float64) - WIN // 2
    g = np.exp(-(coords ** 2) / (2.0 * SIG ** 2))
    return (g / g.sum()).astype(np.float32)


_GWIN = tuple(float(v) for v in _gauss_win())


def _conv_valid_matrix_packed():
    """Block-diagonal (128,128): per 32-lane group, blk[r, c] = g[r - c] (valid conv on W)."""
    g = _gauss_win()
    blk = np.zeros((GRP, GRP), np.float32)
    for j in range(OUT):
        blk[j:j + WIN, j] = g                       # rows 28..31 / cols 18..31 stay zero
    A = np.zeros((LANES, LANES), np.float32)
    for grp in range(LG):
        A[grp * GRP:(grp + 1) * GRP, grp * GRP:(grp + 1) * GRP] = blk
    return A


# ---------------------------------------------------------------------------
# Pallas kernel: emits 5 reduction scalars packed into one (1, 5) store
#   [sse, ssim_sum, cov_xy, cov_xx, cov_yy]
# ---------------------------------------------------------------------------
def _make_kernel(B, n_grp):
    NBR = n_grp * IMG            # rows of one packed slab
    B_pad = n_grp * LG
    padded = B_pad != B
    f32 = jnp.float32
    gw = _GWIN
    half = WIN // 2

    def roll(a, shift, axis):
        s = shift % a.shape[axis]
        return a if s == 0 else pltpu.roll(a, s, axis)

    def kernel(x_ref, y_ref, a_ref, dr_ref, o_ref):
        x = x_ref[...]                               # (NBR, 128)
        y = y_ref[...]                               # (NBR, 128)
        A = a_ref[...]                               # (128, 128) block-diag gaussian
        dr = dr_ref[0, 0]                            # global target max - min

        # ---------- cheap boundary masks from (rows,1) / (1,128) iotas ----------
        r1 = lax.broadcasted_iota(jnp.int32, (NBR, 1), 0).astype(f32)
        r2 = lax.broadcasted_iota(jnp.int32, (2 * NBR, 1), 0).astype(f32)
        c1 = lax.broadcasted_iota(jnp.int32, (1, LANES), 1).astype(f32)

        rm1 = r1 - IMG * jnp.floor(r1 / IMG)         # row within image (x/y slab)
        rb1 = jnp.floor(r1 / IMG)                    # image row-block index (x/y slab)
        rm2 = r2 - IMG * jnp.floor(r2 / IMG)         # row within image (sobel stack)
        rs2 = r2 - NBR * jnp.floor(r2 / NBR)         # row within [x;y] sub-stack

        at_top = rm2 < 0.5                           # first row of each image
        at_bot = rm2 > IMG - 1.5                     # last row of each image
        first_blk = rs2 < IMG - 0.5                  # first image row-block of a sub-stack
        last_blk = rs2 > NBR - IMG - 0.5             # last image row-block of a sub-stack

        cm = c1 - GRP * jnp.floor(c1 / GRP)          # lane within its 32-lane group
        col_left = cm < 0.5                          # first image column
        col_right = cm > IMG - 1.5                   # last image column (27..31 -> clamp)
        data_col = cm < IMG - 0.5                    # real image column (not a pad lane)
        ssim_col = cm < OUT - 0.5                    # valid SSIM output column
        col_g0 = c1 < GRP - 0.5                      # first lane group
        col_g3 = c1 > LANES - GRP - 0.5              # last lane group

        if padded:
            img_ok = (LG * rb1 + jnp.floor(c1 / GRP)) < (B - 0.5)     # (NBR, 128)
            valid = jnp.logical_and(data_col, img_ok)
        else:
            valid = data_col

        # ---------------- MSE sufficient statistic ----------------------------
        d = x - y
        sse = jnp.sum(jnp.where(valid, d * d, 0.0))

        C1c = (K1 * dr) ** 2
        C2c = (K2 * dr) ** 2

        # ---------------- SSIM (pytorch_msssim, valid 11x11 gaussian) ---------
        # W pass: ONE block-diagonal MXU matmul over all 5 quantities of all images.
        stk = jnp.concatenate([x, y, x * x, y * y, x * y], axis=0)    # (5*NBR, 128)
        P = jnp.dot(stk, A, preferred_element_type=f32)               # (5*NBR, 128)

        # H pass: symmetric 11-tap gaussian -> 6 multiplies via tap pairing.
        R = gw[half] * roll(P, -half, 0)
        R = R + gw[0] * (P + roll(P, -(WIN - 1), 0))
        for k in range(1, half):
            R = R + gw[k] * (roll(P, -k, 0) + roll(P, -(WIN - 1 - k), 0))
        # Valid output rows (row-in-image < 18) never cross an image boundary
        # (17 + 10 < 28); roll wraparound lands only in masked rows.

        mu1 = R[0 * NBR:1 * NBR]
        mu2 = R[1 * NBR:2 * NBR]
        fx2 = R[2 * NBR:3 * NBR]
        fy2 = R[3 * NBR:4 * NBR]
        fxy = R[4 * NBR:5 * NBR]

        m11 = mu1 * mu1
        m22 = mu2 * mu2
        m12 = mu1 * mu2
        s11 = fx2 - m11
        s22 = fy2 - m22
        s12 = fxy - m12
        num = (2.0 * m12 + C1c) * (2.0 * s12 + C2c)
        den = (m11 + m22 + C1c) * (s11 + s22 + C2c)
        # EUP reciprocal instead of a VALU divide (approx=True is available if the
        # accuracy budget allows; exact kept to match the reference numerics).
        ssim_map = num * pl.reciprocal(den, approx=False)

        ssim_valid = jnp.logical_and(rm1 < OUT - 0.5, ssim_col)
        if padded:
            ssim_valid = jnp.logical_and(ssim_valid, img_ok)
        ssim_sum = jnp.sum(jnp.where(ssim_valid, ssim_map, 0.0))

        # ---------------- skimage 4-D Sobel edges, x and y in ONE pass --------
        S = jnp.concatenate([x, y], axis=0)                            # (2*NBR, 128)

        def prev_row(a):
            return jnp.where(at_top, a, roll(a, 1, 0))

        def next_row(a):
            return jnp.where(at_bot, a, roll(a, -1, 0))

        def prev_col(a):
            return jnp.where(col_left, a, roll(a, 1, 1))

        def next_col(a):
            return jnp.where(col_right, a, roll(a, -1, 1))

        # Batch-axis neighbours in the packed layout: a lane-group roll, plus a
        # row-block roll for the first/last group, edge-clamped at the batch ends.
        Lb = roll(S, GRP, 1)
        prev_b = jnp.where(col_g0, jnp.where(first_blk, S, roll(Lb, IMG, 0)), Lb)
        Rb = roll(S, -GRP, 1)
        next_b = jnp.where(col_g3, jnp.where(last_blk, S, roll(Rb, -IMG, 0)), Rb)

        # Un-normalized [1,2,1] smoothing / [-1,0,1] derivative: every axis response
        # carries exactly two smoothing factors, so the uniform scale (and the final
        # 1/sqrt(4)) cancels in the Pearson correlation.
        d_b = next_b - prev_b                        # derivative along batch axis
        s_b = prev_b + 2.0 * S + next_b              # smoothing along batch axis

        t = prev_col(d_b) + 2.0 * d_b + next_col(d_b)
        e_b = prev_row(t) + 2.0 * t + next_row(t)    # smooth_h . smooth_w . deriv_b
        mag2 = e_b * e_b

        sb_l = prev_col(s_b)
        sb_r = next_col(s_b)
        sb_sw = sb_l + 2.0 * s_b + sb_r              # smooth_w . smooth_b
        sb_dw = sb_r - sb_l                          # deriv_w  . smooth_b

        e_h = next_row(sb_sw) - prev_row(sb_sw)      # deriv_h . smooth_w . smooth_b
        mag2 = mag2 + e_h * e_h
        e_w = prev_row(sb_dw) + 2.0 * sb_dw + next_row(sb_dw)   # smooth_h . deriv_w . smooth_b
        mag2 = mag2 + e_w * e_w
        # Channel axis (size 1) contributes 0 (reflect smoothing = identity, derivative = 0).

        E = jnp.sqrt(mag2)
        ex = E[:NBR]
        ey = E[NBR:]

        # Centered Pearson sufficient statistics over the real pixels only.
        inv_n = 1.0 / (float(B) * IMG * IMG)
        mx = jnp.sum(jnp.where(valid, ex, 0.0)) * inv_n
        my = jnp.sum(jnp.where(valid, ey, 0.0)) * inv_n
        dx = jnp.where(valid, ex - mx, 0.0)
        dy = jnp.where(valid, ey - my, 0.0)
        cxy = jnp.sum(dx * dy)
        cxx = jnp.sum(dx * dx)
        cyy = jnp.sum(dy * dy)

        # ---------------- single packed store of all results -------------------
        o_ref[...] = jnp.concatenate(
            [jnp.reshape(sse, (1, 1)), jnp.reshape(ssim_sum, (1, 1)),
             jnp.reshape(cxy, (1, 1)), jnp.reshape(cxx, (1, 1)),
             jnp.reshape(cyy, (1, 1))], axis=1)

    return kernel


# ---------------------------------------------------------------------------
# Wrapper: equivalent of CombinedMSESSIMLoss.forward(output, target)
# ---------------------------------------------------------------------------
def combined_mse_ssim_loss(output, target, mse_weight, ssim_weight,
                           epi_weight, psnr_weight):
    output = jnp.asarray(output, jnp.float32)
    target = jnp.asarray(target, jnp.float32)
    B = output.shape[0]

    # Pad the batch to a multiple of 8 images (edge replication == the scipy 'reflect'
    # batch-boundary clamp; padded images are masked out of every reduction), so every
    # packed slab has 128 lanes and a row count that is a multiple of 8 sublanes.
    n_grp = -(-B // LG)
    if n_grp % 2:
        n_grp += 1
    B_pad = n_grp * LG
    NBR = n_grp * IMG

    def pack(a):
        a = a.reshape(B, IMG, IMG)
        a = jnp.pad(a, ((0, B_pad - B), (0, 0), (0, GRP - IMG)), mode="edge")
        return (a.reshape(n_grp, LG, IMG, GRP)
                 .transpose(0, 2, 1, 3)
                 .reshape(NBR, LANES))

    xp = pack(output)                                  # layout plumbing (tiny HBM repack)
    yp = pack(target)
    A = jnp.asarray(_conv_valid_matrix_packed())
    # Global data_range for SSIM's C1/C2 (one tiny XLA reduce; passed as an SMEM scalar).
    dr = (jnp.max(target) - jnp.min(target)).reshape(1, 1).astype(jnp.float32)

    slab_bytes = NBR * LANES * 4
    vmem_limit = int(min(max(48 * slab_bytes, 32 << 20), 64 << 20))

    vmem = pl.BlockSpec(memory_space=pltpu.MemorySpace.VMEM)
    smem = pl.BlockSpec(memory_space=pltpu.MemorySpace.SMEM)
    stats = pl.pallas_call(
        _make_kernel(B, n_grp),
        out_shape=jax.ShapeDtypeStruct((1, 5), jnp.float32),
        in_specs=[vmem, vmem, vmem, smem],
        out_specs=vmem,
        compiler_params=pltpu.CompilerParams(vmem_limit_bytes=vmem_limit),
    )(xp, yp, A, dr)

    sse, ssim_sum = stats[0, 0], stats[0, 1]
    cxy, cxx, cyy = stats[0, 2], stats[0, 3], stats[0, 4]

    n_elem = B * IMG * IMG
    mse = sse / n_elem                                 # nn.MSELoss (mean)
    ssim_val = ssim_sum / (B * OUT * OUT)              # pytorch_msssim, size_average=True
    loss_ssim = 1.0 - ssim_val
    psnr_val = 10.0 * jnp.log10(1.0 / mse)             # skimage PSNR with data_range=1.0
    epi_loss = cxy / jnp.sqrt(cxx * cyy)               # scipy.stats.pearsonr on sobel edges

    # TODO(synk): the .detach().cpu().numpy() host round-trip in the reference is a semantic
    # no-op and is not reproduced.  For batches of many hundreds of images, add a batch-tiled
    # grid (per-tile partial sums, one halo row-block for the batch-axis Sobel, and a leading
    # "parallel" axis so v7x's two TensorCores split the batch).
    return (mse_weight * mse + ssim_weight * loss_ssim
            + epi_weight * epi_loss + psnr_weight * psnr_val)


if __name__ == "__main__":
    key = jax.random.PRNGKey(0)
    k1, k2 = jax.random.split(key)
    B = 2
    output = jax.random.uniform(k1, (B, IMG * IMG), dtype=jnp.float32)
    target = jax.random.uniform(k2, (B, IMG * IMG), dtype=jnp.float32)

    mse_w, ssim_w, epi_w, psnr_w = 1.0, 0.5, 0.1, 0.01
    loss = combined_mse_ssim_loss(output, target, mse_w, ssim_w, epi_w, psnr_w)
    loss = jax.block_until_ready(loss)
    assert bool(jnp.isfinite(loss)), "loss is not finite"
    print("KERNEL_OK")
</pallas_src>

<mosaic_0001>
module attributes {stable_mosaic.version = 11 : i64} {
  func.func @kernel(%arg0: memref<56x128xf32, #tpu.memory_space<vmem>>, %arg1: memref<56x128xf32, #tpu.memory_space<vmem>>, %arg2: memref<128x128xf32, #tpu.memory_space<vmem>>, %arg3: memref<1x1xf32, #tpu.memory_space<smem>>, %arg4: memref<1x5xf32, #tpu.memory_space<vmem>>) attributes {dimension_semantics = [], scalar_prefetch = 0 : i64, scratch_operands = 0 : i64, tpu.core_type = #tpu.core_type<tc>} {
    %c0 = arith.constant 0 : index
    %c0_0 = arith.constant 0 : index
    %0 = vector.load %arg0[%c0, %c0_0] : memref<56x128xf32, #tpu.memory_space<vmem>>, vector<56x128xf32>
    %c0_1 = arith.constant 0 : index
    %c0_2 = arith.constant 0 : index
    %1 = vector.load %arg1[%c0_1, %c0_2] : memref<56x128xf32, #tpu.memory_space<vmem>>, vector<56x128xf32>
    %c0_3 = arith.constant 0 : index
    %c0_4 = arith.constant 0 : index
    %2 = vector.load %arg2[%c0_3, %c0_4] : memref<128x128xf32, #tpu.memory_space<vmem>>, vector<128x128xf32>
    %c0_5 = arith.constant 0 : index
    %c0_6 = arith.constant 0 : index
    %3 = memref.load %arg3[%c0_5, %c0_6] : memref<1x1xf32, #tpu.memory_space<smem>>
    %4 = tpu.iota {dimensions = array<i32: 0>} : vector<56x1xi32>
    %5 = arith.sitofp %4 : vector<56x1xi32> to vector<56x1xf32>
    %6 = tpu.iota {dimensions = array<i32: 0>} : vector<112x1xi32>
    %7 = arith.sitofp %6 : vector<112x1xi32> to vector<112x1xf32>
    %8 = tpu.iota {dimensions = array<i32: 1>} : vector<1x128xi32>
    %9 = arith.sitofp %8 : vector<1x128xi32> to vector<1x128xf32>
    %cst = arith.constant 2.800000e+01 : f32
    %10 = vector.broadcast %cst : f32 to vector<56x1xf32>
    %11 = arith.divf %5, %10 : vector<56x1xf32>
    %12 = math.floor %11 : vector<56x1xf32>
    %cst_7 = arith.constant 2.800000e+01 : f32
    %13 = vector.broadcast %cst_7 : f32 to vector<56x1xf32>
    %14 = arith.mulf %13, %12 : vector<56x1xf32>
    %15 = arith.subf %5, %14 : vector<56x1xf32>
    %cst_8 = arith.constant 2.800000e+01 : f32
    %16 = vector.broadcast %cst_8 : f32 to vector<56x1xf32>
    %17 = arith.divf %5, %16 : vector<56x1xf32>
    %18 = math.floor %17 : vector<56x1xf32>
    %cst_9 = arith.constant 2.800000e+01 : f32
    %19 = vector.broadcast %cst_9 : f32 to vector<112x1xf32>
    %20 = arith.divf %7, %19 : vector<112x1xf32>
    %21 = math.floor %20 : vector<112x1xf32>
    %cst_10 = arith.constant 2.800000e+01 : f32
    %22 = vector.broadcast %cst_10 : f32 to vector<112x1xf32>
    %23 = arith.mulf %22, %21 : vector<112x1xf32>
    %24 = arith.subf %7, %23 : vector<112x1xf32>
    %cst_11 = arith.constant 5.600000e+01 : f32
    %25 = vector.broadcast %cst_11 : f32 to vector<112x1xf32>
    %26 = arith.divf %7, %25 : vector<112x1xf32>
    %27 = math.floor %26 : vector<112x1xf32>
    %cst_12 = arith.constant 5.600000e+01 : f32
    %28 = vector.broadcast %cst_12 : f32 to vector<112x1xf32>
    %29 = arith.mulf %28, %27 : vector<112x1xf32>
    %30 = arith.subf %7, %29 : vector<112x1xf32>
    %cst_13 = arith.constant 5.000000e-01 : f32
    %31 = vector.broadcast %cst_13 : f32 to vector<112x1xf32>
    %32 = arith.cmpf olt, %24, %31 : vector<112x1xf32>
    %cst_14 = arith.constant 2.650000e+01 : f32
    %33 = vector.broadcast %cst_14 : f32 to vector<112x1xf32>
    %34 = arith.cmpf ogt, %24, %33 : vector<112x1xf32>
    %cst_15 = arith.constant 2.750000e+01 : f32
    %35 = vector.broadcast %cst_15 : f32 to vector<112x1xf32>
    %36 = arith.cmpf olt, %30, %35 : vector<112x1xf32>
    %cst_16 = arith.constant 2.750000e+01 : f32
    %37 = vector.broadcast %cst_16 : f32 to vector<112x1xf32>
    %38 = arith.cmpf ogt, %30, %37 : vector<112x1xf32>
    %cst_17 = arith.constant 3.200000e+01 : f32
    %39 = vector.broadcast %cst_17 : f32 to vector<1x128xf32>
    %40 = arith.divf %9, %39 : vector<1x128xf32>
    %41 = math.floor %40 : vector<1x128xf32>
    %cst_18 = arith.constant 3.200000e+01 : f32
    %42 = vector.broadcast %cst_18 : f32 to vector<1x128xf32>
    %43 = arith.mulf %42, %41 : vector<1x128xf32>
    %44 = arith.subf %9, %43 : vector<1x128xf32>
    %cst_19 = arith.constant 5.000000e-01 : f32
    %45 = vector.broadcast %cst_19 : f32 to vector<1x128xf32>
    %46 = arith.cmpf olt, %44, %45 : vector<1x128xf32>
    %cst_20 = arith.constant 2.650000e+01 : f32
    %47 = vector.broadcast %cst_20 : f32 to vector<1x128xf32>
    %48 = arith.cmpf ogt, %44, %47 : vector<1x128xf32>
    %cst_21 = arith.constant 2.750000e+01 : f32
    %49 = vector.broadcast %cst_21 : f32 to vector<1x128xf32>
    %50 = arith.cmpf olt, %44, %49 : vector<1x128xf32>
    %cst_22 = arith.constant 1.750000e+01 : f32
    %51 = vector.broadcast %cst_22 : f32 to vector<1x128xf32>
    %52 = arith.cmpf olt, %44, %51 : vector<1x128xf32>
    %cst_23 = arith.constant 3.150000e+01 : f32
    %53 = vector.broadcast %cst_23 : f32 to vector<1x128xf32>
    %54 = arith.cmpf olt, %9, %53 : vector<1x128xf32>
    %cst_24 = arith.constant 9.550000e+01 : f32
    %55 = vector.broadcast %cst_24 : f32 to vector<1x128xf32>
    %56 = arith.cmpf ogt, %9, %55 : vector<1x128xf32>
    %cst_25 = arith.constant 4.000000e+00 : f32
    %57 = vector.broadcast %cst_25 : f32 to vector<56x1xf32>
    %58 = arith.mulf %57, %18 : vector<56x1xf32>
    %cst_26 = arith.constant 3.200000e+01 : f32
    %59 = vector.broadcast %cst_26 : f32 to vector<1x128xf32>
    %60 = arith.divf %9, %59 : vector<1x128xf32>
    %61 = math.floor %60 : vector<1x128xf32>
    %62 = vector.broadcast %58 : vector<56x1xf32> to vector<56x128xf32>
    %63 = vector.broadcast %61 : vector<1x128xf32> to vector<56x128xf32>
    %64 = arith.addf %62, %63 : vector<56x128xf32>
    %cst_27 = arith.constant 1.500000e+00 : f32
    %65 = vector.broadcast %cst_27 : f32 to vector<56x128xf32>
    %66 = arith.cmpf olt, %64, %65 : vector<56x128xf32>
    %67 = vector.broadcast %50 : vector<1x128xi1> to vector<56x128xi1>
    %68 = arith.andi %67, %66 : vector<56x128xi1>
    %69 = arith.subf %0, %1 : vector<56x128xf32>
    %70 = arith.mulf %69, %69 : vector<56x128xf32>
    %cst_28 = arith.constant 0.000000e+00 : f32
    %71 = vector.broadcast %cst_28 : f32 to vector<56x128xf32>
    %72 = arith.select %68, %70, %71 : vector<56x128xi1>, vector<56x128xf32>
    %73 = vector.shape_cast %72 : vector<56x128xf32> to vector<1x56x128xf32>
    %cst_29 = arith.constant dense<0.000000e+00> : vector<1xf32>
    %74 = vector.multi_reduction <add>, %73, %cst_29 [1, 2] : vector<1x56x128xf32> to vector<1xf32>
    %75 = vector.shape_cast %74 : vector<1xf32> to vector<1x1x1xf32>
    %76 = vector.extract %75[0, 0, 0] : f32 from vector<1x1x1xf32>
    %cst_30 = arith.constant 0.00999999977 : f32
    %77 = arith.mulf %cst_30, %3 : f32
    %78 = arith.mulf %77, %77 : f32
    %cst_31 = arith.constant 3.000000e-02 : f32
    %79 = arith.mulf %cst_31, %3 : f32
    %80 = arith.mulf %79, %79 : f32
    %81 = arith.mulf %0, %0 : vector<56x128xf32>
    %82 = arith.mulf %1, %1 : vector<56x128xf32>
    %83 = arith.mulf %0, %1 : vector<56x128xf32>
    %84 = tpu.concatenate %0, %1, %81, %82, %83 in 0 : vector<56x128xf32>, vector<56x128xf32>, vector<56x128xf32>, vector<56x128xf32>, vector<56x128xf32> -> vector<280x128xf32>
    %cst_32 = arith.constant dense<0.000000e+00> : vector<280x128xf32>
    %85 = tpu.matmul %84, %2, %cst_32 {dimension_numbers = #tpu.dot_dimension_numbers<[1], [0], [0], [1], [0, 0, 1, 1], [], []>} : vector<280x128xf32>, vector<128x128xf32>, vector<280x128xf32> -> vector<280x128xf32>
    %c275_i32 = arith.constant 275 : i32
    %86 = tpu.dynamic_rotate %85 by %c275_i32 dim 0 : vector<280x128xf32>, i32 -> vector<280x128xf32>
    %cst_33 = arith.constant 0.266011715 : f32
    %87 = vector.broadcast %cst_33 : f32 to vector<280x128xf32>
    %88 = arith.mulf %87, %86 : vector<280x128xf32>
    %c270_i32 = arith.constant 270 : i32
    %89 = tpu.dynamic_rotate %85 by %c270_i32 dim 0 : vector<280x128xf32>, i32 -> vector<280x128xf32>
    %90 = arith.addf %85, %89 : vector<280x128xf32>
    %cst_34 = arith.constant 0.00102838012 : f32
    %91 = vector.broadcast %cst_34 : f32 to vector<280x128xf32>
    %92 = arith.mulf %91, %90 : vector<280x128xf32>
    %93 = arith.addf %88, %92 : vector<280x128xf32>
    %c279_i32 = arith.constant 279 : i32
    %94 = tpu.dynamic_rotate %85 by %c279_i32 dim 0 : vector<280x128xf32>, i32 -> vector<280x128xf32>
    %c271_i32 = arith.constant 271 : i32
    %95 = tpu.dynamic_rotate %85 by %c271_i32 dim 0 : vector<280x128xf32>, i32 -> vector<280x128xf32>
    %96 = arith.addf %94, %95 : vector<280x128xf32>
    %cst_35 = arith.constant 0.00759875821 : f32
    %97 = vector.broadcast %cst_35 : f32 to vector<280x128xf32>
    %98 = arith.mulf %97, %96 : vector<280x128xf32>
    %99 = arith.addf %93, %98 : vector<280x128xf32>
    %c278_i32 = arith.constant 278 : i32
    %100 = tpu.dynamic_rotate %85 by %c278_i32 dim 0 : vector<280x128xf32>, i32 -> vector<280x128xf32>
    %c272_i32 = arith.constant 272 : i32
    %101 = tpu.dynamic_rotate %85 by %c272_i32 dim 0 : vector<280x128xf32>, i32 -> vector<280x128xf32>
    %102 = arith.addf %100, %101 : vector<280x128xf32>
    %cst_36 = arith.constant 0.0360007733 : f32
    %103 = vector.broadcast %cst_36 : f32 to vector<280x128xf32>
    %104 = arith.mulf %103, %102 : vector<280x128xf32>
    %105 = arith.addf %99, %104 : vector<280x128xf32>
    %c277_i32 = arith.constant 277 : i32
    %106 = tpu.dynamic_rotate %85 by %c277_i32 dim 0 : vector<280x128xf32>, i32 -> vector<280x128xf32>
    %c273_i32 = arith.constant 273 : i32
    %107 = tpu.dynamic_rotate %85 by %c273_i32 dim 0 : vector<280x128xf32>, i32 -> vector<280x128xf32>
    %108 = arith.addf %106, %107 : vector<280x128xf32>
    %cst_37 = arith.constant 0.109360687 : f32
    %109 = vector.broadcast %cst_37 : f32 to vector<280x128xf32>
    %110 = arith.mulf %109, %108 : vector<280x128xf32>
    %111 = arith.addf %105, %110 : vector<280x128xf32>
    %c276_i32 = arith.constant 276 : i32
    %112 = tpu.dynamic_rotate %85 by %c276_i32 dim 0 : vector<280x128xf32>, i32 -> vector<280x128xf32>
    %c274_i32 = arith.constant 274 : i32
    %113 = tpu.dynamic_rotate %85 by %c274_i32 dim 0 : vector<280x128xf32>, i32 -> vector<280x128xf32>
    %114 = arith.addf %112, %113 : vector<280x128xf32>
    %cst_38 = arith.constant 0.213005543 : f32
    %115 = vector.broadcast %cst_38 : f32 to vector<280x128xf32>
    %116 = arith.mulf %115, %114 : vector<280x128xf32>
    %117 = arith.addf %111, %116 : vector<280x128xf32>
    %118 = vector.extract_strided_slice %117 {offsets = [0, 0], sizes = [56, 128], strides = [1, 1]} : vector<280x128xf32> to vector<56x128xf32>
    %119 = vector.extract_strided_slice %117 {offsets = [56, 0], sizes = [56, 128], strides = [1, 1]} : vector<280x128xf32> to vector<56x128xf32>
    %120 = vector.extract_strided_slice %117 {offsets = [112, 0], sizes = [56, 128], strides = [1, 1]} : vector<280x128xf32> to vector<56x128xf32>
    %121 = vector.extract_strided_slice %117 {offsets = [168, 0], sizes = [56, 128], strides = [1, 1]} : vector<280x128xf32> to vector<56x128xf32>
    %122 = vector.extract_strided_slice %117 {offsets = [224, 0], sizes = [56, 128], strides = [1, 1]} : vector<280x128xf32> to vector<56x128xf32>
    %123 = arith.mulf %118, %118 : vector<56x128xf32>
    %124 = arith.mulf %119, %119 : vector<56x128xf32>
    %125 = arith.mulf %118, %119 : vector<56x128xf32>
    %126 = arith.subf %120, %123 : vector<56x128xf32>
    %127 = arith.subf %121, %124 : vector<56x128xf32>
    %128 = arith.subf %122, %125 : vector<56x128xf32>
    %cst_39 = arith.constant 2.000000e+00 : f32
    %129 = vector.broadcast %cst_39 : f32 to vector<56x128xf32>
    %130 = arith.mulf %129, %125 : vector<56x128xf32>
    %131 = vector.broadcast %78 : f32 to vector<56x128xf32>
    %132 = arith.addf %130, %131 : vector<56x128xf32>
    %cst_40 = arith.constant 2.000000e+00 : f32
    %133 = vector.broadcast %cst_40 : f32 to vector<56x128xf32>
    %134 = arith.mulf %133, %128 : vector<56x128xf32>
    %135 = vector.broadcast %80 : f32 to vector<56x128xf32>
    %136 = arith.addf %134, %135 : vector<56x128xf32>
    %137 = arith.mulf %132, %136 : vector<56x128xf32>
    %138 = arith.addf %123, %124 : vector<56x128xf32>
    %139 = vector.broadcast %78 : f32 to vector<56x128xf32>
    %140 = arith.addf %138, %139 : vector<56x128xf32>
    %141 = arith.addf %126, %127 : vector<56x128xf32>
    %142 = vector.broadcast %80 : f32 to vector<56x128xf32>
    %143 = arith.addf %141, %142 : vector<56x128xf32>
    %144 = arith.mulf %140, %143 : vector<56x128xf32>
    %145 = tpu.reciprocal %144 : vector<56x128xf32> -> vector<56x128xf32>
    %146 = arith.mulf %137, %145 : vector<56x128xf32>
    %cst_41 = arith.constant 1.750000e+01 : f32
    %147 = vector.broadcast %cst_41 : f32 to vector<56x1xf32>
    %148 = arith.cmpf olt, %15, %147 : vector<56x1xf32>
    %149 = vector.broadcast %148 : vector<56x1xi1> to vector<56x128xi1>
    %150 = vector.broadcast %52 : vector<1x128xi1> to vector<56x128xi1>
    %151 = arith.andi %149, %150 : vector<56x128xi1>
    %152 = arith.andi %151, %66 : vector<56x128xi1>
    %cst_42 = arith.constant 0.000000e+00 : f32
    %153 = vector.broadcast %cst_42 : f32 to vector<56x128xf32>
    %154 = arith.select %152, %146, %153 : vector<56x128xi1>, vector<56x128xf32>
    %155 = vector.shape_cast %154 : vector<56x128xf32> to vector<1x56x128xf32>
    %cst_43 = arith.constant dense<0.000000e+00> : vector<1xf32>
    %156 = vector.multi_reduction <add>, %155, %cst_43 [1, 2] : vector<1x56x128xf32> to vector<1xf32>
    %157 = vector.shape_cast %156 : vector<1xf32> to vector<1x1x1xf32>
    %158 = vector.extract %157[0, 0, 0] : f32 from vector<1x1x1xf32>
    %159 = tpu.concatenate %0, %1 in 0 : vector<56x128xf32>, vector<56x128xf32> -> vector<112x128xf32>
    %c32_i32 = arith.constant 32 : i32
    %160 = tpu.dynamic_rotate %159 by %c32_i32 dim 1 : vector<112x128xf32>, i32 -> vector<112x128xf32>
    %c28_i32 = arith.constant 28 : i32
    %161 = tpu.dynamic_rotate %160 by %c28_i32 dim 0 : vector<112x128xf32>, i32 -> vector<112x128xf32>
    %162 = vector.shape_cast %36 : vector<112x1xi1> to vector<112x1xi1>
    %163 = vector.broadcast %162 : vector<112x1xi1> to vector<112x128xi1>
    %164 = arith.select %163, %159, %161 : vector<112x128xi1>, vector<112x128xf32>
    %165 = vector.shape_cast %54 : vector<1x128xi1> to vector<1x128xi1>
    %166 = vector.broadcast %165 : vector<1x128xi1> to vector<112x128xi1>
    %167 = arith.select %166, %164, %160 : vector<112x128xi1>, vector<112x128xf32>
    %c96_i32 = arith.constant 96 : i32
    %168 = tpu.dynamic_rotate %159 by %c96_i32 dim 1 : vector<112x128xf32>, i32 -> vector<112x128xf32>
    %c84_i32 = arith.constant 84 : i32
    %169 = tpu.dynamic_rotate %168 by %c84_i32 dim 0 : vector<112x128xf32>, i32 -> vector<112x128xf32>
    %170 = vector.shape_cast %38 : vector<112x1xi1> to vector<112x1xi1>
    %171 = vector.broadcast %170 : vector<112x1xi1> to vector<112x128xi1>
    %172 = arith.select %171, %159, %169 : vector<112x128xi1>, vector<112x128xf32>
    %173 = vector.shape_cast %56 : vector<1x128xi1> to vector<1x128xi1>
    %174 = vector.broadcast %173 : vector<1x128xi1> to vector<112x128xi1>
    %175 = arith.select %174, %172, %168 : vector<112x128xi1>, vector<112x128xf32>
    %176 = arith.subf %175, %167 : vector<112x128xf32>
    %cst_44 = arith.constant 2.000000e+00 : f32
    %177 = vector.broadcast %cst_44 : f32 to vector<112x128xf32>
    %178 = arith.mulf %177, %159 : vector<112x128xf32>
    %179 = arith.addf %167, %178 : vector<112x128xf32>
    %180 = arith.addf %179, %175 : vector<112x128xf32>
    %c1_i32 = arith.constant 1 : i32
    %181 = tpu.dynamic_rotate %176 by %c1_i32 dim 1 : vector<112x128xf32>, i32 -> vector<112x128xf32>
    %182 = vector.shape_cast %46 : vector<1x128xi1> to vector<1x128xi1>
    %183 = vector.broadcast %182 : vector<1x128xi1> to vector<112x128xi1>
    %184 = arith.select %183, %176, %181 : vector<112x128xi1>, vector<112x128xf32>
    %cst_45 = arith.constant 2.000000e+00 : f32
    %185 = vector.broadcast %cst_45 : f32 to vector<112x128xf32>
    %186 = arith.mulf %185, %176 : vector<112x128xf32>
    %187 = arith.addf %184, %186 : vector<112x128xf32>
    %c127_i32 = arith.constant 127 : i32
    %188 = tpu.dynamic_rotate %176 by %c127_i32 dim 1 : vector<112x128xf32>, i32 -> vector<112x128xf32>
    %189 = vector.shape_cast %48 : vector<1x128xi1> to vector<1x128xi1>
    %190 = vector.broadcast %189 : vector<1x128xi1> to vector<112x128xi1>
    %191 = arith.select %190, %176, %188 : vector<112x128xi1>, vector<112x128xf32>
    %192 = arith.addf %187, %191 : vector<112x128xf32>
    %c1_i32_46 = arith.constant 1 : i32
    %193 = tpu.dynamic_rotate %192 by %c1_i32_46 dim 0 : vector<112x128xf32>, i32 -> vector<112x128xf32>
    %194 = vector.shape_cast %32 : vector<112x1xi1> to vector<112x1xi1>
    %195 = vector.broadcast %194 : vector<112x1xi1> to vector<112x128xi1>
    %196 = arith.select %195, %192, %193 : vector<112x128xi1>, vector<112x128xf32>
    %cst_47 = arith.constant 2.000000e+00 : f32
    %197 = vector.broadcast %cst_47 : f32 to vector<112x128xf32>
    %198 = arith.mulf %197, %192 : vector<112x128xf32>
    %199 = arith.addf %196, %198 : vector<112x128xf32>
    %c111_i32 = arith.constant 111 : i32
    %200 = tpu.dynamic_rotate %192 by %c111_i32 dim 0 : vector<112x128xf32>, i32 -> vector<112x128xf32>
    %201 = vector.shape_cast %34 : vector<112x1xi1> to vector<112x1xi1>
    %202 = vector.broadcast %201 : vector<112x1xi1> to vector<112x128xi1>
    %203 = arith.select %202, %192, %200 : vector<112x128xi1>, vector<112x128xf32>
    %204 = arith.addf %199, %203 : vector<112x128xf32>
    %205 = arith.mulf %204, %204 : vector<112x128xf32>
    %c1_i32_48 = arith.constant 1 : i32
    %206 = tpu.dynamic_rotate %180 by %c1_i32_48 dim 1 : vector<112x128xf32>, i32 -> vector<112x128xf32>
    %207 = vector.shape_cast %46 : vector<1x128xi1> to vector<1x128xi1>
    %208 = vector.broadcast %207 : vector<1x128xi1> to vector<112x128xi1>
    %209 = arith.select %208, %180, %206 : vector<112x128xi1>, vector<112x128xf32>
    %c127_i32_49 = arith.constant 127 : i32
    %210 = tpu.dynamic_rotate %180 by %c127_i32_49 dim 1 : vector<112x128xf32>, i32 -> vector<112x128xf32>
    %211 = vector.shape_cast %48 : vector<1x128xi1> to vector<1x128xi1>
    %212 = vector.broadcast %211 : vector<1x128xi1> to vector<112x128xi1>
    %213 = arith.select %212, %180, %210 : vector<112x128xi1>, vector<112x128xf32>
    %cst_50 = arith.constant 2.000000e+00 : f32
    %214 = vector.broadcast %cst_50 : f32 to vector<112x128xf32>
    %215 = arith.mulf %214, %180 : vector<112x128xf32>
    %216 = arith.addf %209, %215 : vector<112x128xf32>
    %217 = arith.addf %216, %213 : vector<112x128xf32>
    %218 = arith.subf %213, %209 : vector<112x128xf32>
    %c111_i32_51 = arith.constant 111 : i32
    %219 = tpu.dynamic_rotate %217 by %c111_i32_51 dim 0 : vector<112x128xf32>, i32 -> vector<112x128xf32>
    %220 = vector.shape_cast %34 : vector<112x1xi1> to vector<112x1xi1>
    %221 = vector.broadcast %220 : vector<112x1xi1> to vector<112x128xi1>
    %222 = arith.select %221, %217, %219 : vector<112x128xi1>, vector<112x128xf32>
    %c1_i32_52 = arith.constant 1 : i32
    %223 = tpu.dynamic_rotate %217 by %c1_i32_52 dim 0 : vector<112x128xf32>, i32 -> vector<112x128xf32>
    %224 = vector.shape_cast %32 : vector<112x1xi1> to vector<112x1xi1>
    %225 = vector.broadcast %224 : vector<112x1xi1> to vector<112x128xi1>
    %226 = arith.select %225, %217, %223 : vector<112x128xi1>, vector<112x128xf32>
    %227 = arith.subf %222, %226 : vector<112x128xf32>
    %228 = arith.mulf %227, %227 : vector<112x128xf32>
    %229 = arith.addf %205, %228 : vector<112x128xf32>
    %c1_i32_53 = arith.constant 1 : i32
    %230 = tpu.dynamic_rotate %218 by %c1_i32_53 dim 0 : vector<112x128xf32>, i32 -> vector<112x128xf32>
    %231 = vector.shape_cast %32 : vector<112x1xi1> to vector<112x1xi1>
    %232 = vector.broadcast %231 : vector<112x1xi1> to vector<112x128xi1>
    %233 = arith.select %232, %218, %230 : vector<112x128xi1>, vector<112x128xf32>
    %cst_54 = arith.constant 2.000000e+00 : f32
    %234 = vector.broadcast %cst_54 : f32 to vector<112x128xf32>
    %235 = arith.mulf %234, %218 : vector<112x128xf32>
    %236 = arith.addf %233, %235 : vector<112x128xf32>
    %c111_i32_55 = arith.constant 111 : i32
    %237 = tpu.dynamic_rotate %218 by %c111_i32_55 dim 0 : vector<112x128xf32>, i32 -> vector<112x128xf32>
    %238 = vector.shape_cast %34 : vector<112x1xi1> to vector<112x1xi1>
    %239 = vector.broadcast %238 : vector<112x1xi1> to vector<112x128xi1>
    %240 = arith.select %239, %218, %237 : vector<112x128xi1>, vector<112x128xf32>
    %241 = arith.addf %236, %240 : vector<112x128xf32>
    %242 = arith.mulf %241, %241 : vector<112x128xf32>
    %243 = arith.addf %229, %242 : vector<112x128xf32>
    %244 = math.sqrt %243 : vector<112x128xf32>
    %245 = vector.extract_strided_slice %244 {offsets = [0, 0], sizes = [56, 128], strides = [1, 1]} : vector<112x128xf32> to vector<56x128xf32>
    %246 = vector.extract_strided_slice %244 {offsets = [56, 0], sizes = [56, 128], strides = [1, 1]} : vector<112x128xf32> to vector<56x128xf32>
    %cst_56 = arith.constant 0.000000e+00 : f32
    %247 = vector.broadcast %cst_56 : f32 to vector<56x128xf32>
    %248 = arith.select %68, %245, %247 : vector<56x128xi1>, vector<56x128xf32>
    %249 = vector.shape_cast %248 : vector<56x128xf32> to vector<1x56x128xf32>
    %cst_57 = arith.constant dense<0.000000e+00> : vector<1xf32>
    %250 = vector.multi_reduction <add>, %249, %cst_57 [1, 2] : vector<1x56x128xf32> to vector<1xf32>
    %251 = vector.shape_cast %250 : vector<1xf32> to vector<1x1x1xf32>
    %252 = vector.extract %251[0, 0, 0] : f32 from vector<1x1x1xf32>
    %cst_58 = arith.constant 6.37755089E-4 : f32
    %253 = arith.mulf %252, %cst_58 : f32
    %cst_59 = arith.constant 0.000000e+00 : f32
    %254 = vector.broadcast %cst_59 : f32 to vector<56x128xf32>
    %255 = arith.select %68, %246, %254 : vector<56x128xi1>, vector<56x128xf32>
    %256 = vector.shape_cast %255 : vector<56x128xf32> to vector<1x56x128xf32>
    %cst_60 = arith.constant dense<0.000000e+00> : vector<1xf32>
    %257 = vector.multi_reduction <add>, %256, %cst_60 [1, 2] : vector<1x56x128xf32> to vector<1xf32>
    %258 = vector.shape_cast %257 : vector<1xf32> to vector<1x1x1xf32>
    %259 = vector.extract %258[0, 0, 0] : f32 from vector<1x1x1xf32>
    %cst_61 = arith.constant 6.37755089E-4 : f32
    %260 = arith.mulf %259, %cst_61 : f32
    %261 = vector.broadcast %253 : f32 to vector<56x128xf32>
    %262 = arith.subf %245, %261 : vector<56x128xf32>
    %cst_62 = arith.constant 0.000000e+00 : f32
    %263 = vector.broadcast %cst_62 : f32 to vector<56x128xf32>
    %264 = arith.select %68, %262, %263 : vector<56x128xi1>, vector<56x128xf32>
    %265 = vector.broadcast %260 : f32 to vector<56x128xf32>
    %266 = arith.subf %246, %265 : vector<56x128xf32>
    %cst_63 = arith.constant 0.000000e+00 : f32
    %267 = vector.broadcast %cst_63 : f32 to vector<56x128xf32>
    %268 = arith.select %68, %266, %267 : vector<56x128xi1>, vector<56x128xf32>
    %269 = arith.mulf %264, %268 : vector<56x128xf32>
    %270 = vector.shape_cast %269 : vector<56x128xf32> to vector<1x56x128xf32>
    %cst_64 = arith.constant dense<0.000000e+00> : vector<1xf32>
    %271 = vector.multi_reduction <add>, %270, %cst_64 [1, 2] : vector<1x56x128xf32> to vector<1xf32>
    %272 = vector.shape_cast %271 : vector<1xf32> to vector<1x1x1xf32>
    %273 = vector.extract %272[0, 0, 0] : f32 from vector<1x1x1xf32>
    %274 = arith.mulf %264, %264 : vector<56x128xf32>
    %275 = vector.shape_cast %274 : vector<56x128xf32> to vector<1x56x128xf32>
    %cst_65 = arith.constant dense<0.000000e+00> : vector<1xf32>
    %276 = vector.multi_reduction <add>, %275, %cst_65 [1, 2] : vector<1x56x128xf32> to vector<1xf32>
    %277 = vector.shape_cast %276 : vector<1xf32> to vector<1x1x1xf32>
    %278 = vector.extract %277[0, 0, 0] : f32 from vector<1x1x1xf32>
    %279 = arith.mulf %268, %268 : vector<56x128xf32>
    %280 = vector.shape_cast %279 : vector<56x128xf32> to vector<1x56x128xf32>
    %cst_66 = arith.constant dense<0.000000e+00> : vector<1xf32>
    %281 = vector.multi_reduction <add>, %280, %cst_66 [1, 2] : vector<1x56x128xf32> to vector<1xf32>
    %282 = vector.shape_cast %281 : vector<1xf32> to vector<1x1x1xf32>
    %283 = vector.extract %282[0, 0, 0] : f32 from vector<1x1x1xf32>
    %284 = vector.broadcast %76 : f32 to vector<1x1xf32>
    %285 = vector.broadcast %158 : f32 to vector<1x1xf32>
    %286 = vector.broadcast %273 : f32 to vector<1x1xf32>
    %287 = vector.broadcast %278 : f32 to vector<1x1xf32>
    %288 = vector.broadcast %283 : f32 to vector<1x1xf32>
    %289 = tpu.concatenate %284, %285, %286, %287, %288 in 1 : vector<1x1xf32>, vector<1x1xf32>, vector<1x1xf32>, vector<1x1xf32>, vector<1x1xf32> -> vector<1x5xf32>
    %c0_67 = arith.constant 0 : index
    %c0_68 = arith.constant 0 : index
    %290 = vector.load %arg4[%c0_67, %c0_68] : memref<1x5xf32, #tpu.memory_space<vmem>>, vector<1x5xf32>
    tpu.vector_store %arg4[%c0_67, %c0_68], %289 {strides = array<i32>} : memref<1x5xf32, #tpu.memory_space<vmem>>, vector<1x5xf32>,
    return
  }
}

</mosaic_0001>

<bundles_post_ra>
// kernel: tpu_custom_call.1
= control target key start
LH: loop header
LB: loop body
LE: loop exit
PB: predicated region body
PF: predicated region fallthrough
CT: control target
= control target key end

     0   :  { %10 = vsyncpa [#allocation4], 0  ;;  %s9088_s0 = inlined_call_operand.hbm [shape: f32[56,128], index: 0, kind: input, shape index: {}]   ;;  %s9089_s1 = inlined_call_operand.hbm [shape: f32[56,128], index: 1, kind: input, shape index: {}]   ;;  %s9090_s2 = inlined_call_operand.hbm [shape: f32[128,128], index: 2, kind: input, shape index: {}]   ;;  %s9091_s3 = inlined_call_operand.<no memory space> [shape: f32[1,1], index: 3, kind: input, shape index: {}]   ;;  %s9092_s4 = inlined_call_operand.hbm [shape: f32[1,5], index: 4, kind: output, shape index: {}]  }
   0x1   :  { %11 = vsyncpa [#allocation7], 0 }
   0x2   :  { %12 = vsyncpa [#allocation5], 0  ;;  %s30_s17 = sshll.u32 %s9089_s1, 4  ;;  %s3490_s18 = smov [#allocation6]   ;;  %s31_s17 = int_to_ptr.hbm [resolvable:$true] %s30_s17 }
   0x3   :  { %s32_s19 = sshll.u32 %s3490_s18, 4  ;;  %s17_s22 = sshll.u32 %s9088_s0, 4  ;;  %s33_s19 = int_to_ptr.vmem [resolvable:$true] %s32_s19  ;;  %s18_s22 = int_to_ptr.hbm [resolvable:$true] %s17_s22 }
   0x4   :  { %s3491_s23 = smov 128   ;;  %s3492_s24 = smov 8  }
   0x5   :  { %38 = dma.hbm_to_vmem [thread:$0]  %s31_s17, 896, %s33_s19, [#allocation7], %s3491_s23, %s3491_s23, %s3492_s24  }
   0x6   :  { %s3493_s25 = smov [#allocation3]   ;;  %s43_s29 = sshll.u32 %s9090_s2, 4  ;;  %s44_s29 = int_to_ptr.hbm [resolvable:$true] %s43_s29 }
   0x7   :  { %s19_s26 = sshll.u32 %s3493_s25, 4  ;;  %s3494_s1 = smov [#allocation8]   ;;  %s20_s26 = int_to_ptr.vmem [resolvable:$true] %s19_s26 }
   0x8   :  { %25 = dma.hbm_to_vmem [thread:$0]  %s18_s22, 896, %s20_s26, [#allocation4], %s3491_s23, %s3491_s23, %s3492_s24  }
   0x9   :  { %s45_s30 = sshll.u32 %s3494_s1, 4  ;;  %s46_s30 = int_to_ptr.vmem [resolvable:$true] %s45_s30 }
   0xa   :  { %51 = dma.hbm_to_vmem [thread:$0]  %s44_s29, 2048, %s46_s30, [#allocation7], %s3491_s23, %s3491_s23, %s3492_s24  }
   0xb   :  { %3484 = dma.done.wait [#allocation4], 896  }
   0xc   :  { %3485 = vsyncadd [#allocation4], 4294966400 }
   0xd   :  { %3486 = dma.done.wait [#allocation7], 2944  }
   0xe   :  { %3487 = vsyncadd [#allocation7], 4294964352  ;;  %v3537_v0 = vld [vmem:[#allocation3 + $0x30] sm:$0xff]  ;;  %v3539_v1 = vld [vmem:[#allocation3 + $0x20] sm:$0xff]  ;;  %s3495_s0 = smov 32   ;;  %s3496_s2 = smov 96   ;;  %v97_v28 = vlaneseq }
   0xf   :  { %9451 = vst [vmem:[#allocation13_spill] sm:$0xff] %v3537_v0  ;;  %v3541_v2 = vld [vmem:[#allocation3 + $0x10] sm:$0xff]  ;;  %1888 = vrot.lane.b32.xlu2 %v3537_v0, %s3495_s0  ;;  %1884 = vrot.lane.b32.xlu1 %v3539_v1, %s3495_s0  ;;  %v3549_v3 = vld [vmem:[#allocation6 + $0x10] sm:$0xff]  ;;  %v3553_v5 = vld [vmem:[#allocation3 + $0x18] sm:$0xff]  ;;  %v3497_v20 = vmov 56.0   ;;  %v402_v46 = vmul.f32 %v3539_v1, %v3539_v1  ;;  %s3498_s5 = smov 1  }
  0x10   :  { %1880 = vrot.lane.b32.xlu0 %v3541_v2, %s3495_s0  ;;  %9452 = vst [vmem:[#allocation14_spill] sm:$0xff] %v3549_v3  ;;  %v3551_v4 = vld [vmem:[#allocation3 + $0x28] sm:$0xff]  ;;  %v3561_v6 = vld [vmem:[#allocation6 + $0x28] sm:$0xff]  ;;  %v3563_v7 = vld [vmem:[#allocation6 + $0x20] sm:$0xff]  ;;  %3324 = vrcp.f32 %v3497_v20  ;;  %v3623_v32 = vshrl.u32 %v97_v28, 7  ;;  %v401_v41 = vmul.f32 %v3553_v5, %v3553_v5  ;;  %v127_v52 = vand.u32 127, %v97_v28 }
  0x11   :  { %9453 = vst [vmem:[#allocation15_spill] sm:$0xff] %v3551_v4  ;;  %v3565_v8 = vld [vmem:[#allocation6 + $0x18] sm:$0xff]  ;;  %v3573_v9 = vld [vmem:[#allocation6 + $0x30] sm:$0xff]  ;;  %v3593_v10 = vld [vmem:[#allocation6] sm:$0xff]  ;;  %v403_v53 = vmul.f32 %v3551_v4, %v3551_v4  ;;  %v410_v60 = vmul.f32 %v3561_v6, %v3561_v6  ;;  %s3499_s6 = smov 127   ;;  %s3238_s22 = sshll.u32 %s9092_s4, 4  ;;  %s3239_s22 = int_to_ptr.hbm [resolvable:$true] %s3238_s22 }
  0x12   :  { %9454 = vst [vmem:[#allocation16_spill] sm:$0xff] %v3561_v6  ;;  %v3595_v11 = vld [vmem:[#allocation3] sm:$0xff]  ;;  %v3605_v13 = vld [vmem:[#allocation3 + $0x8] sm:$0xff]  ;;  %v93_v16 = vld [vmem:[#allocation8 + $0x68] sm:$0xff]  ;;  %v114_v37 = vadd.s32 72, %v3623_v32  ;;  %v3656_v55 = vcvt.s32.f32 %v127_v52  ;;  %vm1386_vm1 = vcmp.lt.s32.totalorder %v3623_v32, 4 }
  0x13   :  { %v3603_v12 = vld [vmem:[#allocation6 + $0x8] sm:$0xff]  ;;  %v95_v14 = vld [vmem:[#allocation8 + $0x78] sm:$0xff]  ;;  %v92_v17 = vld [vmem:[#allocation8 + $0x60] sm:$0xff]  ;;  %9455 = vst [vmem:[#allocation17_spill] sm:$0xff] %v3623_v32  ;;  %v104_v59 = vadd.s32 48, %v3623_v32  ;;  %v117_v63 = vadd.s32 96, %v3623_v32 }
  0x14   :  { %v94_v15 = vld [vmem:[#allocation8 + $0x70] sm:$0xff]  ;;  %3250 = vmatpush.msra.mxu2 %v95_v14  ;;  %419 = vmatpush.msra.mxu0 %v95_v14  ;;  %v91_v18 = vld [vmem:[#allocation8 + $0x58] sm:$0xff]  ;;  %v89_v21 = vld [vmem:[#allocation8 + $0x48] sm:$0xff]  ;;  %v3630_v42 = vcvt.s32.f32 %v114_v37  ;;  %vm326_vm3 = vcmp.lt.f32.partialorder %v3656_v55, 31.5  ;;  %v118_v20 = vadd.s32 104, %v3623_v32  ;;  %v101_v37 = vadd.s32 24, %v3623_v32 }
  0x15   :  { %3249 = vmatpush.msra.mxu1 %v95_v14  ;;  %3251 = vmatpush.msra.mxu3 %v95_v14  ;;  %v90_v19 = vld [vmem:[#allocation8 + $0x50] sm:$0xff]  ;;  %v88_v22 = vld [vmem:[#allocation8 + $0x40] sm:$0xff]  ;;  %v87_v24 = vld [vmem:[#allocation8 + $0x38] sm:$0xff]  ;;  %vm327_vm7 = vcmp.gt.f32.partialorder %v3656_v55, 95.5  ;;  %s394_s9 = smul.f32 0.01, %s9091_s3 }
  0x16   :  { %3253 = vmatpush.msra.mxu2 %v94_v15  ;;  %420 = vmatpush.msra.mxu0 %v94_v15  ;;  %v3325_v23 = vpop.eup %3324  ;;  %v86_v25 = vld [vmem:[#allocation8 + $0x30] sm:$0xff]  ;;  %v85_v29 = vld [vmem:[#allocation8 + $0x28] sm:$0xff]  ;;  %v84_v31 = vld [vmem:[#allocation8 + $0x20] sm:$0xff]  ;;  %9456 = vst [vmem:[#allocation18_spill] sm:$0xff] %v3630_v42  ;;  %s396_s12 = smul.f32 0.03, %s9091_s3 }
  0x17   :  { %1894 = vrot.lane.b32.xlu2 %v3549_v3, %s3495_s0  ;;  %1886 = vrot.lane.b32.xlu1 %v3551_v4, %s3495_s0  ;;  %v193_v26 = vmul.f32 56.0, %v3325_v23  ;;  %v83_v33 = vld [vmem:[#allocation8 + $0x18] sm:$0xff]  ;;  %v82_v35 = vld [vmem:[#allocation8 + $0x10] sm:$0xff]  ;;  %v81_v38 = vld [vmem:[#allocation8 + $0x8] sm:$0xff]  ;;  %vm197_vm0 = vweird.f32 %v3325_v23  ;;  %s395_s3 = smul.f32 %s394_s9, %s394_s9  ;;  %s3502_s24 = smov [#allocation9]  }
  0x18   :  { %1882 = vrot.lane.b32.xlu0 %v3553_v5, %s3495_s0  ;;  %3252 = vmatpush.msra.mxu1 %v94_v15  ;;  %v80_v40 = vld [vmem:[#allocation8] sm:$0xff]  ;;  %s397_s13 = smul.f32 %s396_s12, %s396_s12  ;;  %s3236_s25 = sshll.u32 %s3502_s24, 4  ;;  %s3237_s25 = int_to_ptr.vmem [resolvable:$true] %s3236_s25 }
  0x19   :  { %3254 = vmatpush.msra.mxu3 %v94_v15  ;;  %3256 = vmatpush.msra.mxu2 %v93_v16  ;;  %v194_v30 = vsub.f32 1.0, %v193_v26  ;;  %v404_v15 = vmul.f32 %v3537_v0, %v3537_v0 }
  0x1a   :  { %421 = vmatpush.msra.mxu0 %v93_v16  ;;  %3255 = vmatpush.msra.mxu1 %v93_v16 }
  0x1b   :  { %3257 = vmatpush.msra.mxu3 %v93_v16  ;;  %3259 = vmatpush.msra.mxu2 %v92_v17  ;;  %v195_v34 = vmul.f32 %v3325_v23, %v194_v30  ;;  %v112_v16 = vadd.s32 56, %v3623_v32 }
  0x1c   :  { %422 = vmatpush.msra.mxu0 %v92_v17  ;;  %3258 = vmatpush.msra.mxu1 %v92_v17 }
  0x1d   :  { %3260 = vmatpush.msra.mxu3 %v92_v17  ;;  %3262 = vmatpush.msra.mxu2 %v91_v18  ;;  %v196_v39 = vadd.f32 %v3325_v23, %v195_v34  ;;  %v3715_v34 = vcvt.s32.f32 %v3623_v32 }
  0x1e   :  { %423 = vmatpush.msra.mxu0 %v91_v18  ;;  %3261 = vmatpush.msra.mxu1 %v91_v18 }
  0x1f   :  { %1900 = vrot.lane.b32.xlu2 %v3561_v6, %s3495_s0  ;;  %1898 = vrot.lane.b32.xlu1 %v3563_v7, %s3495_s0  ;;  %v3633_v43 = vsel %vm197_vm0, %v3325_v23, %v196_v39  ;;  %v3696_v23 = vcvt.s32.f32 %v112_v16  ;;  %9465 = vst [vmem:[#allocation27_spill] sm:$0xff] %v3715_v34  ;;  %v115_v16 = vadd.s32 80, %v3623_v32 }
  0x20   :  { %1896 = vrot.lane.b32.xlu0 %v3565_v8, %s3495_s0  ;;  %3263 = vmatpush.msra.mxu3 %v91_v18  ;;  %v208_v45 = vmul.f32 %v3633_v43, %v3630_v42  ;;  %v3684_v18 = vcvt.s32.f32 %v104_v59 }
  0x21   :  { %3265 = vmatpush.msra.mxu2 %v90_v19  ;;  %424 = vmatpush.msra.mxu0 %v90_v19  ;;  %9462 = vst [vmem:[#allocation24_spill] sm:$0xff] %v3696_v23 }
  0x22   :  { %3264 = vmatpush.msra.mxu1 %v90_v19  ;;  %3266 = vmatpush.msra.mxu3 %v90_v19  ;;  %v222_v47 = vfloor.f32 %v208_v45  ;;  %9459 = vst [vmem:[#allocation21_spill] sm:$0xff] %v3684_v18 }
  0x23   :  { %3268 = vmatpush.msra.mxu2 %v89_v21  ;;  %425 = vmatpush.msra.mxu0 %v89_v21 }
  0x24   :  { %3267 = vmatpush.msra.mxu1 %v89_v21  ;;  %3269 = vmatpush.msra.mxu3 %v89_v21  ;;  %v236_v51 = vmul.f32 56.0, %v222_v47  ;;  %v3692_v21 = vcvt.s32.f32 %v117_v63 }
  0x25   :  { %3271 = vmatpush.msra.mxu2 %v88_v22  ;;  %426 = vmatpush.msra.mxu0 %v88_v22 }
  0x26   :  { %3270 = vmatpush.msra.mxu1 %v88_v22  ;;  %3272 = vmatpush.msra.mxu3 %v88_v22  ;;  %v3653_v54 = vsub.f32 %v3630_v42, %v236_v51  ;;  %9461 = vst [vmem:[#allocation23_spill] sm:$0xff] %v3692_v21  ;;  %v113_v22 = vadd.s32 64, %v3623_v32  ;;  %v211_v30 = vmul.f32 %v3633_v43, %v3692_v21 }
  0x27   :  { %1996 = vrot.lane.b32.xlu2 %v3553_v5, %s3496_s2  ;;  %1994 = vrot.lane.b32.xlu1 %v3541_v2, %s3496_s2  ;;  %v199_v51 = vmul.f32 %v3633_v43, %v3715_v34 }
  0x28   :  { %1902 = vrot.lane.b32.xlu0 %v3573_v9, %s3495_s0  ;;  %3274 = vmatpush.msra.mxu2 %v87_v24  ;;  %9457 = vst [vmem:[#allocation19_spill] sm:$0xff] %v3653_v54  ;;  %vm292_vm2 = vcmp.lt.f32.partialorder %v3653_v54, 27.5  ;;  %v225_v45 = vfloor.f32 %v211_v30 }
  0x29   :  { %427 = vmatpush.msra.mxu0 %v87_v24  ;;  %3273 = vmatpush.msra.mxu1 %v87_v24 }
  0x2a   :  { %3275 = vmatpush.msra.mxu3 %v87_v24  ;;  %3277 = vmatpush.msra.mxu2 %v86_v25  ;;  %v205_v24 = vmul.f32 %v3633_v43, %v3684_v18 }
  0x2b   :  { %428 = vmatpush.msra.mxu0 %v86_v25  ;;  %3276 = vmatpush.msra.mxu1 %v86_v25 }
  0x2c   :  { %3278 = vmatpush.msra.mxu3 %v86_v25  ;;  %3280 = vmatpush.msra.mxu2 %v85_v29  ;;  %v219_v39 = vfloor.f32 %v205_v24  ;;  %v116_v24 = vadd.s32 88, %v3623_v32 }
  0x2d   :  { %429 = vmatpush.msra.mxu0 %v85_v29  ;;  %3279 = vmatpush.msra.mxu1 %v85_v29 }
  0x2e   :  { %3281 = vmatpush.msra.mxu3 %v85_v29  ;;  %3283 = vmatpush.msra.mxu2 %v84_v31  ;;  %v3707_v29 = vcvt.s32.f32 %v118_v20  ;;  %v233_v63 = vmul.f32 56.0, %v219_v39 }
  0x2f   :  { %2008 = vrot.lane.b32.xlu2 %v3549_v3, %s3496_s2  ;;  %2000 = vrot.lane.b32.xlu1 %v3551_v4, %s3496_s2 }
  0x30   :  { %1998 = vrot.lane.b32.xlu0 %v3539_v1, %s3496_s2  ;;  %430 = vmatpush.msra.mxu0 %v84_v31  ;;  %9463 = vst [vmem:[#allocation25_spill] sm:$0xff] %v3707_v29 }
  0x31   :  { %3282 = vmatpush.msra.mxu1 %v84_v31  ;;  %3284 = vmatpush.msra.mxu3 %v84_v31  ;;  %v100_v31 = vadd.s32 16, %v3623_v32 }
  0x32   :  { %3286 = vmatpush.msra.mxu2 %v83_v33  ;;  %431 = vmatpush.msra.mxu0 %v83_v33 }
  0x33   :  { %3285 = vmatpush.msra.mxu1 %v83_v33  ;;  %3287 = vmatpush.msra.mxu3 %v83_v33  ;;  %v3712_v33 = vcvt.s32.f32 %v113_v22  ;;  %v239_v22 = vmul.f32 56.0, %v225_v45  ;;  %v412_v45 = vmul.f32 %v3593_v10, %v3595_v11 }
  0x34   :  { %3289 = vmatpush.msra.mxu2 %v82_v35  ;;  %432 = vmatpush.msra.mxu0 %v82_v35 }
  0x35   :  { %3288 = vmatpush.msra.mxu1 %v82_v35  ;;  %3290 = vmatpush.msra.mxu3 %v82_v35  ;;  %9464 = vst [vmem:[#allocation26_spill] sm:$0xff] %v3712_v33  ;;  %v99_v35 = vadd.s32 8, %v3623_v32  ;;  %v207_v47 = vmul.f32 %v3633_v43, %v3712_v33 }
  0x36   :  { %3292 = vmatpush.msra.mxu2 %v81_v38  ;;  %433 = vmatpush.msra.mxu0 %v81_v38 }
  0x37   :  { %2014 = vrot.lane.b32.xlu2 %v3561_v6, %s3496_s2  ;;  %2012 = vrot.lane.b32.xlu1 %v3563_v7, %s3496_s2  ;;  %v3732_v52 = vcvt.s32.f32 %v99_v35  ;;  %v213_v35 = vfloor.f32 %v199_v51 }
  0x38   :  { %2010 = vrot.lane.b32.xlu0 %v3565_v8, %s3496_s2  ;;  %3291 = vmatpush.msra.mxu1 %v81_v38 }
  0x39   :  { %3293 = vmatpush.msra.mxu3 %v81_v38  ;;  %3295 = vmatpush.msra.mxu2 %v80_v40  ;;  %v206_v38 = vmul.f32 %v3633_v43, %v3696_v23  ;;  %9467 = vst [vmem:[#allocation29_spill] sm:$0xff] %v3732_v52  ;;  %v227_v42 = vmul.f32 56.0, %v213_v35  ;;  %v103_v35 = vadd.s32 40, %v3623_v32 }
  0x3a   :  { %434 = vmatpush.msra.mxu0 %v80_v40  ;;  %486 = vmatmul.f32.vlgmr.msra.gmra.mxu2 %v401_v41  ;;  %v212_v41 = vmul.f32 %v3633_v43, %v3707_v29 }
  0x3b   :  { %435 = vmatmul.f32.vlgmr.msra.gmra.mxu0 %v3595_v11  ;;  %3294 = vmatpush.msra.mxu1 %v80_v40  ;;  %v220_v59 = vfloor.f32 %v206_v38 }
  0x3c   :  { %3296 = vmatpush.msra.mxu3 %v80_v40  ;;  %462 = vmatmul.f32.vlgmr.msra.gmra.mxu1 %v3549_v3  ;;  %v411_v40 = vmul.f32 %v3573_v9, %v3573_v9 }
  0x3d   :  { %513 = vmatmul.f32.vlgmr.msra.gmra.mxu3 %v410_v60  ;;  %v405_v60 = vmul.f32 %v3593_v10, %v3593_v10  ;;  %v234_v39 = vmul.f32 56.0, %v220_v59 }
  0x3f   :  { %2002 = vrot.lane.b32.xlu2 %v3537_v0, %s3496_s2  ;;  %1890 = vrot.lane.b32.xlu1 %v3593_v10, %s3495_s0 }
  0x40   :  { %1876 = vrot.lane.b32.xlu0 %v3595_v11, %s3495_s0 }
  0x42   :  { %489 = vmatmul.f32.gmra.mxu2 %v402_v46  ;;  %v3726_v46 = vcvt.s32.f32 %v100_v31  ;;  %v221_v31 = vfloor.f32 %v207_v47  ;;  %v3763_v47 = vcvt.s32.f32 %v116_v24 }
  0x43   :  { %438 = vmatmul.f32.gmra.mxu0 %v3605_v13 }
  0x44   :  { %465 = vmatmul.f32.gmra.mxu1 %v3565_v8  ;;  %9466 = vst [vmem:[#allocation28_spill] sm:$0xff] %v3726_v46  ;;  %v201_v30 = vmul.f32 %v3633_v43, %v3726_v46 }
  0x45   :  { %516 = vmatmul.f32.gmra.mxu3 %v411_v40  ;;  %v3754_v40 = vsub.f32 %v3684_v18, %v233_v63  ;;  %9472 = vst [vmem:[#allocation34_spill] sm:$0xff] %v3763_v47  ;;  %v102_v18 = vadd.s32 32, %v3623_v32 }
  0x46   :  { %v215_v51 = vfloor.f32 %v201_v30 }
  0x47   :  { %1892 = vrot.lane.b32.xlu2 %v3603_v12, %s3495_s0  ;;  %1878 = vrot.lane.b32.xlu1 %v3605_v13, %s3495_s0  ;;  %vm289_vm4 = vcmp.lt.f32.partialorder %v3754_v40, 27.5  ;;  %vm303_vm8 = vcmp.gt.f32.partialorder %v3754_v40, 27.5 }
  0x48   :  { %2016 = vrot.lane.b32.xlu0 %v3573_v9, %s3496_s2 }
  0x4a   :  { %492 = vmatmul.f32.gmra.mxu2 %v403_v53  ;;  %v3734_v53 = vcvt.s32.f32 %v101_v37  ;;  %v200_v37 = vmul.f32 %v3633_v43, %v3732_v52 }
  0x4b   :  { %441 = vmatmul.f32.gmra.mxu0 %v3541_v2 }
  0x4c   :  { %468 = vmatmul.f32.gmra.mxu1 %v3563_v7  ;;  %9468 = vst [vmem:[#allocation30_spill] sm:$0xff] %v3734_v53  ;;  %v202_v38 = vmul.f32 %v3633_v43, %v3734_v53  ;;  %v214_v59 = vfloor.f32 %v200_v37 }
  0x4d   :  { %519 = vmatmul.f32.gmra.mxu3 %v412_v45  ;;  %v210_v45 = vmul.f32 %v3633_v43, %v3763_v47 }
  0x4e   :  { %v216_v63 = vfloor.f32 %v202_v38 }
  0x4f   :  { %2004 = vrot.lane.b32.xlu2 %v3593_v10, %s3496_s2  ;;  %1992 = vrot.lane.b32.xlu1 %v3605_v13, %s3496_s2 }
  0x50   :  { %1990 = vrot.lane.b32.xlu0 %v3595_v11, %s3496_s2 }
  0x52   :  { %495 = vmatmul.f32.gmra.mxu2 %v404_v15 }
  0x53   :  { %444 = vmatmul.f32.gmra.mxu0 %v3553_v5 }
  0x54   :  { %471 = vmatmul.f32.gmra.mxu1 %v3561_v6 }
  0x58   :  { %2006 = vrot.lane.b32.xlu0 %v3603_v12, %s3496_s2 }
  0x5a   :  { %498 = vmatmul.f32.gmra.mxu2 %v405_v60 }
  0x5b   :  { %447 = vmatmul.f32.gmra.mxu0 %v3539_v1 }
  0x5c   :  { %474 = vmatmul.f32.gmra.mxu1 %v3573_v9 }
  0x63   :  { %450 = vmatmul.f32.gmra.mxu0 %v3551_v4  ;;  %v3803_v4 = vcvt.s32.f32 %v102_v18  ;;  %v407_v18 = vmul.f32 %v3549_v3, %v3549_v3 }
  0x65   :  { %9474 = vst [vmem:[#allocation35_spill] sm:$0xff] %v3803_v4 }
  0x69   :  { %v3621_v27 = vpop.permute.xlu2 %1888 }
  0x6a   :  { %v9093_v56 = vrot.slane %v3621_v27, 4 }
  0x6b   :  { %453 = vmatmul.f32.gmra.mxu0 %v3537_v0 }
  0x71   :  { %v3625_v36 = vpop.permute.xlu2 %1894 }
  0x73   :  { %456 = vmatmul.f32.gmra.mxu0 %v3593_v10 }
  0x79   :  { %v3636_v44 = vpop.permute.xlu2 %1900 }
  0x7b   :  { %459 = vmatmul.f32.gmra.mxu0 %v3603_v12 }
  0x81   :  { %v3644_v48 = vpop.permute.xlu1 %1884  ;;  %v3646_v49 = vpop.permute.xlu2 %1996 }
  0x82   :  { %v3648_v50 = vpop.permute.xlu0 %1880 }
  0x89   :  { %v3661_v57 = vpop.permute.xlu1 %1886  ;;  %v3663_v58 = vpop.permute.xlu2 %2008 }
  0x8a   :  { %9458 = vst [vmem:[#allocation20_spill] sm:$0xff] %v3663_v58  ;;  %v9094_v61 = vrot.slane %v3661_v57, 4  ;;  %v3670_v62 = vpop.permute.xlu0 %1882  ;;  %v9479_v40 = vrot.slane %v3663_v58, 4  ;;  %v3891_v58 = vmul.f32 2.0, %v3565_v8 }
  0x8c   :  { %v1925_v14 = vsel %vm1386_vm1, %v9094_v61, %v9093_v56  ;;  %v3761_v56 = vsub.f32 %v3692_v21, %v239_v22  ;;  %v235_v61 = vmul.f32 56.0, %v221_v31  ;;  %v229_v22 = vmul.f32 56.0, %v215_v51 }
  0x8d   :  { %v1969_v17 = vsel %vm292_vm2, %v3549_v3, %v1925_v14 }
  0x8e   :  { %v3689_v19 = vsel %vm326_vm3, %v1969_v17, %v3625_v36  ;;  %v226_v17 = vfloor.f32 %v212_v41  ;;  %v3756_v41 = vcvt.s32.f32 %v115_v16  ;;  %9471 = vst [vmem:[#allocation33_spill] sm:$0xff] %v3761_v56  ;;  %v3767_v16 = vsub.f32 %v3696_v23, %v234_v39 }
  0x8f   :  { %9460 = vst [vmem:[#allocation22_spill] sm:$0xff] %v3689_v19  ;;  %vm295_vm5 = vcmp.lt.f32.partialorder %v3761_v56, 27.5  ;;  %v3791_v21 = vsub.f32 %v3712_v33, %v235_v61  ;;  %v3794_v23 = vsub.f32 %v3715_v34, %v227_v42  ;;  %v228_v19 = vmul.f32 56.0, %v214_v59 }
  0x90   :  { %9470 = vst [vmem:[#allocation32_spill] sm:$0xff] %v3756_v41  ;;  %v240_v60 = vmul.f32 56.0, %v226_v17  ;;  %v406_v17 = vmul.f32 %v3603_v12, %v3603_v12  ;;  %v209_v31 = vmul.f32 %v3633_v43, %v3756_v41  ;;  %v230_v56 = vmul.f32 56.0, %v216_v63 }
  0x91   :  { %v3701_v25 = vpop.permute.xlu1 %1898  ;;  %v3703_v26 = vpop.permute.xlu2 %2014  ;;  %v3807_v42 = vcvt.s32.f32 %v103_v35  ;;  %v1908_v59 = vrot.slane %v3644_v48, 4  ;;  %v9117_v33 = vrot.slane %v3648_v50, 4  ;;  %v3819_v63 = vsub.f32 %v3726_v46, %v229_v22 }
  0x92   :  { %v3705_v28 = vpop.permute.xlu0 %1896  ;;  %v3782_v37 = vsub.f32 %v3707_v29, %v240_v60  ;;  %501 = vmatmul.f32.gmra.mxu2 %v406_v17  ;;  %v1907_v60 = vrot.slane %v3670_v62, 4  ;;  %v9473_v29 = vrot.slane %v3625_v36, 4  ;;  %v223_v17 = vfloor.f32 %v209_v31 }
  0x93   :  { %9475 = vst [vmem:[#allocation36_spill] sm:$0xff] %v3807_v42  ;;  %vm291_vm6 = vcmp.lt.f32.partialorder %v3791_v21, 27.5  ;;  %v9477_v35 = vrot.slane %v3661_v57, 4  ;;  %v203_v22 = vmul.f32 %v3633_v43, %v3803_v4  ;;  %vm290_vm15 = vcmp.lt.f32.partialorder %v3767_v16, 27.5 }
  0x94   :  { %9476 = vst [vmem:[#allocation37_spill] sm:$0xff] %v3819_v63  ;;  %v1928_v31 = vsel %vm1386_vm1, %v9117_v33, %v1907_v60  ;;  %v413_v33 = vmul.f32 %v3603_v12, %v3605_v13  ;;  %v398_v63 = vmul.f32 %v3595_v11, %v3595_v11  ;;  %vm296_vm10 = vcmp.lt.f32.partialorder %v3782_v37, 27.5 }
  0x95   :  { %vm310_vm11 = vcmp.gt.f32.partialorder %v3782_v37, 27.5  ;;  %vm283_vm0 = vcmp.lt.f32.partialorder %v3794_v23, 27.5 }
  0x96   :  { %522 = vmatmul.f32.gmra.mxu3 %v413_v33  ;;  %477 = vmatmul.f32.gmra.mxu1 %v398_v63  ;;  %v3909_v63 = vsel %vm1386_vm1, %v1907_v60, %v1908_v59 }
  0x99   :  { %v3739_v14 = vpop.permute.xlu2 %2002  ;;  %v3741_v15 = vpop.permute.xlu1 %1994 }
  0x9a   :  { %9469 = vst [vmem:[#allocation31_spill] sm:$0xff] %v3739_v14  ;;  %v3744_v20 = vpop.permute.xlu0 %1902  ;;  %504 = vmatmul.f32.gmra.mxu2 %v407_v18 }
  0xa1   :  { %v3774_v24 = vpop.permute.xlu2 %1892  ;;  %v3776_v30 = vpop.permute.xlu1 %2000 }
  0xa2   :  { %v9116_v38 = vrot.slane %v3774_v24, 4  ;;  %v3786_v39 = vpop.permute.xlu0 %1998 }
  0xa4   :  { %v1922_v54 = vsel %vm1386_vm1, %v9116_v38, %v9473_v29  ;;  %v224_v29 = vfloor.f32 %v210_v45  ;;  %v1926_v45 = vsel %vm1386_vm1, %v1908_v59, %v9477_v35  ;;  %v204_v38 = vmul.f32 %v3633_v43, %v3807_v42 }
  0xa5   :  { %v1972_v61 = vsel %vm295_vm5, %v3561_v6, %v1922_v54  ;;  %v3823_v54 = vsub.f32 %v3732_v52, %v228_v19  ;;  %v237_v19 = vmul.f32 56.0, %v223_v17  ;;  %v1966_v43 = vsel %vm289_vm4, %v3537_v0, %v1928_v31 }
  0xa6   :  { %v3814_v34 = vsel %vm326_vm3, %v1972_v61, %v3636_v44  ;;  %v3834_v61 = vsub.f32 %v3734_v53, %v230_v56  ;;  %v3848_v56 = vmul.f32 2.0, %v3561_v6  ;;  %v238_v17 = vmul.f32 56.0, %v224_v29 }
  0xa7   :  { %v3861_v52 = vsel %vm291_vm6, %v3603_v12, %v1926_v45  ;;  %v217_v29 = vfloor.f32 %v203_v22  ;;  %v3878_v18 = vsub.f32 %v3756_v41, %v237_v19  ;;  %v218_v45 = vfloor.f32 %v204_v38 }
  0xa8   :  { %vm300_vm9 = vcmp.gt.f32.partialorder %v3834_v61, 27.5  ;;  %v3884_v22 = vsel %vm326_vm3, %v1966_v43, %v3621_v27  ;;  %v3888_v6 = vsub.f32 %v3763_v47, %v238_v17  ;;  %v414_v43 = vmul.f32 %v3549_v3, %v3541_v2 }
  0xa9   :  { %v3838_v51 = vpop.permute.xlu1 %2012  ;;  %v3851_v53 = vpop.permute.xlu2 %2004  ;;  %9480 = vst [vmem:[#allocation39_spill] sm:$0xff] %v3884_v22  ;;  %v9484_v38 = vrot.slane %v3625_v36, 4  ;;  %v9486_v41 = vrot.slane %v3739_v14, 4  ;;  %vm293_vm12 = vcmp.lt.f32.partialorder %v3878_v18, 27.5  ;;  %v232_v59 = vmul.f32 56.0, %v218_v45 }
  0xaa   :  { %9478 = vst [vmem:[#allocation38_spill] sm:$0xff] %v3851_v53  ;;  %v3853_v46 = vpop.permute.xlu0 %2010  ;;  %v9485_v47 = vrot.slane %v3851_v53, 4  ;;  %vm294_vm13 = vcmp.lt.f32.partialorder %v3888_v6, 27.5  ;;  %vm286_vm14 = vcmp.lt.f32.partialorder %v3834_v61, 27.5  ;;  %525 = vmatmul.f32.gmra.mxu3 %v414_v43  ;;  %vm284_vm2 = vcmp.lt.f32.partialorder %v3823_v54, 27.5 }
  0xab   :  { %v9129_v35 = vrot.slane %v3853_v46, 4  ;;  %v3974_v43 = vsub.f32 %v3807_v42, %v232_v59  ;;  %vm298_vm4 = vcmp.gt.f32.partialorder %v3823_v54, 27.5  ;;  %vm304_vm5 = vcmp.gt.f32.partialorder %v3767_v16, 27.5 }
  0xac   :  { %vm297_vm6 = vcmp.gt.f32.partialorder %v3794_v23, 27.5 }
  0xad   :  { %v2035_v33 = vsel %vm1386_vm1, %v9479_v40, %v9129_v35  ;;  %v408_v35 = vmul.f32 %v3565_v8, %v3565_v8 }
  0xae   :  { %v2080_v31 = vsel %vm303_vm8, %v3537_v0, %v2035_v33  ;;  %v231_v33 = vmul.f32 56.0, %v217_v29 }
  0xaf   :  { %v3898_v40 = vsel %vm327_vm7, %v2080_v31, %v3739_v14  ;;  %v9483_v31 = vrot.slane %v3705_v28, 4  ;;  %507 = vmatmul.f32.gmra.mxu2 %v408_v35  ;;  %v9490_v14 = vrot.slane %v3621_v27, 4  ;;  %v9491_v27 = vrot.slane %v3744_v20, 4 }
  0xb0   :  { %9481 = vst [vmem:[#allocation40_spill] sm:$0xff] %v3898_v40  ;;  %v3905_v17 = vsub.f32 %v3898_v40, %v3884_v22  ;;  %v2038_v40 = vsel %vm1386_vm1, %v9486_v41, %v9485_v47  ;;  %v399_v41 = vmul.f32 %v3605_v13, %v3605_v13  ;;  %v9488_v22 = vrot.slane %v3741_v15, 4 }
  0xb1   :  { %v1921_v19 = vsel %vm1386_vm1, %v9484_v38, %v9483_v31  ;;  %v3926_v60 = vpop.permute.xlu1 %1890  ;;  %v2121_v38 = vmul.f32 2.0, %v3553_v5  ;;  %v9487_v31 = vrot.slane %v3646_v49, 4  ;;  %v2077_v0 = vsel %vm300_vm9, %v3553_v5, %v2038_v40 }
  0xb2   :  { %9482 = vst [vmem:[#allocation41_spill] sm:$0xff] %v3905_v17  ;;  %v1911_v29 = vrot.slane %v3926_v60, 4  ;;  %2172 = vrot.lane.b32.xlu0 %v3905_v17, %s3498_s5  ;;  %v3933_v36 = vpop.permute.xlu0 %1876  ;;  %v9489_v47 = vrot.slane %v3774_v24, 4  ;;  %v3960_v35 = vsub.f32 %v3803_v4, %v231_v33  ;;  %v1915_v33 = vrot.slane %v3701_v25, 4  ;;  %480 = vmatmul.f32.gmra.mxu1 %v399_v41 }
  0xb3   :  { %v1904_v45 = vrot.slane %v3933_v36, 4  ;;  %v2042_v17 = vsel %vm1386_vm1, %v9488_v22, %v9487_v31  ;;  %v415_v31 = vmul.f32 %v3565_v8, %v3553_v5  ;;  %v1973_v61 = vsel %vm296_vm10, %v3573_v9, %v1921_v19 }
  0xb4   :  { %v1923_v3 = vsel %vm1386_vm1, %v1911_v29, %v9489_v47  ;;  %v1924_v53 = vsel %vm1386_vm1, %v9490_v14, %v1911_v29  ;;  %v2093_v29 = vsel %vm327_vm7, %v2077_v0, %v3646_v49  ;;  %v2087_v0 = vsel %vm310_vm11, %v3573_v9, %v2042_v17 }
  0xb5   :  { %v1970_v22 = vsel %vm293_vm12, %v3565_v8, %v1924_v53  ;;  %v1971_v40 = vsel %vm294_vm13, %v3563_v7, %v1923_v3  ;;  %v1931_v14 = vsel %vm1386_vm1, %v9491_v27, %v1904_v45  ;;  %vm287_vm8 = vcmp.lt.f32.partialorder %v3960_v35, 27.5  ;;  %528 = vmatmul.f32.gmra.mxu3 %v415_v31 }
  0xb6   :  { %v3982_v53 = vsel %vm326_vm3, %v1970_v22, %v3705_v28  ;;  %v3987_v3 = vsel %vm326_vm3, %v1971_v40, %v3701_v25  ;;  %v1963_v59 = vsel %vm286_vm14, %v3553_v5, %v1931_v14  ;;  %v409_v25 = vmul.f32 %v3563_v7, %v3563_v7 }
  0xb7   :  { %v1979_v47 = vsel %vm326_vm3, %v1963_v59, %v3670_v62  ;;  %v2022_v5 = vrot.slane %v3786_v39, 4  ;;  %vm288_vm9 = vcmp.lt.f32.partialorder %v3974_v43, 27.5  ;;  %v2029_v27 = vrot.slane %v3838_v51, 4 }
  0xb8   :  { %v4007_v41 = vsub.f32 %v2093_v29, %v1979_v47  ;;  %v2135_v22 = vadd.f32 %v2121_v38, %v1979_v47  ;;  %v400_v38 = vmul.f32 %v3541_v2, %v3541_v2  ;;  %v4027_v17 = vsel %vm326_vm3, %v1973_v61, %v3744_v20  ;;  %510 = vmatmul.f32.gmra.mxu2 %v409_v25 }
  0xb9   :  { %v1879_v40 = vpop.permute.xlu1 %1878  ;;  %v9494_v47 = vrot.slane %v3636_v44, 4  ;;  %v9496_v61 = vrot.slane %v3648_v50, 4  ;;  %v9498_v25 = vrot.slane %v3776_v30, 4  ;;  %vm307_vm11 = vcmp.gt.f32.partialorder %v3878_v18, 27.5 }
  0xba   :  { %9492 = vst [vmem:[#allocation42_spill] sm:$0xff] %v4007_v41  ;;  %v1905_v14 = vrot.slane %v1879_v40, 4  ;;  %v4017_v19 = vpop.permute.xlu0 %2016  ;;  %v4021_v59 = vadd.f32 %v2135_v22, %v2093_v29  ;;  %v9495_v29 = vrot.slane %v3705_v28, 4  ;;  %v9497_v28 = vld [vmem:[#allocation15_spill] sm:$0xff]  ;;  %483 = vmatmul.f32.gmra.mxu1 %v400_v38  ;;  %v9501_v38 = vld [vmem:[#allocation33_spill] sm:$0xff]  ;;  %vm308_vm12 = vcmp.gt.f32.partialorder %v3888_v6, 27.5 }
  0xbb   :  { %v1919_v62 = vsel %vm1386_vm1, %v1915_v33, %v9494_v47  ;;  %v4036_v42 = vsel %vm327_vm7, %v2087_v0, %v4017_v19  ;;  %v2040_v0 = vsel %vm1386_vm1, %v2022_v5, %v9498_v25  ;;  %vm309_vm10 = vcmp.gt.f32.partialorder %v9501_v38, 27.5 }
  0xbc   :  { %9493 = vst [vmem:[#allocation43_spill] sm:$0xff] %v4021_v59  ;;  %v1920_v22 = vsel %vm1386_vm1, %v9495_v29, %v1915_v33  ;;  %v1929_v37 = vsel %vm1386_vm1, %v1905_v14, %v9496_v61  ;;  %v1930_v47 = vsel %vm1386_vm1, %v1904_v45, %v1905_v14  ;;  %v4050_v4 = vsub.f32 %v4036_v42, %v4027_v17 }
  0xbd   :  { %v1964_v31 = vsel %vm287_vm8, %v3539_v1, %v1930_v47  ;;  %v1965_v33 = vsel %vm288_vm9, %v9497_v28, %v1929_v37  ;;  %v9499_v29 = vrot.slane %v3646_v49, 4  ;;  %v9500_v14 = vrot.slane %v3853_v46, 4 }
  0xbe   :  { %v2129_v47 = vmul.f32 2.0, %v3563_v7  ;;  %v4074_v37 = vsel %vm326_vm3, %v1964_v31, %v3644_v48  ;;  %v4079_v25 = vsel %vm326_vm3, %v1965_v33, %v3661_v57  ;;  %2186 = vrot.lane.b32.xlu0 %v4050_v4, %s3498_s5  ;;  %v1967_v49 = vsel %vm290_vm15, %v3593_v10, %v3909_v63 }
  0xbf   :  { %v2041_v45 = vsel %vm1386_vm1, %v9499_v29, %v2022_v5  ;;  %v2034_v61 = vsel %vm1386_vm1, %v9500_v14, %v2029_v27  ;;  %v1960_v5 = vsel %vm283_vm0, %v3595_v11, %v1920_v22  ;;  %v1961_v48 = vsel %vm284_vm2, %v3605_v13, %v1919_v62 }
  0xc0   :  { %v416_v57 = vmul.f32 %v3563_v7, %v3539_v1  ;;  %v2144_v31 = vadd.f32 %v3848_v56, %v3814_v34  ;;  %v2075_v63 = vsel %vm298_vm4, %v3605_v13, %v2040_v0  ;;  %v2081_v22 = vsel %vm304_vm5, %v3593_v10, %v2034_v61 }
  0xc1   :  { %v1993_v33 = vpop.permute.xlu1 %1992  ;;  %v2074_v62 = vsel %vm297_vm6, %v3595_v11, %v2041_v45  ;;  %v9502_v56 = vrot.slane %v3703_v26, 4  ;;  %v4116_v54 = vsel %vm326_vm3, %v1960_v5, %v3933_v36  ;;  %v4120_v16 = vsel %vm326_vm3, %v1961_v48, %v1879_v40  ;;  %v9503_v40 = vld [vmem:[#allocation37_spill] sm:$0xff] }
  0xc2   :  { %v2019_v0 = vrot.slane %v1993_v33, 4  ;;  %v4124_v14 = vsel %vm327_vm7, %v2075_v63, %v1993_v33  ;;  %v1991_v23 = vpop.permute.xlu0 %1990  ;;  %v2031_v45 = vrot.slane %v4017_v19, 4  ;;  %531 = vmatmul.f32.gmra.mxu3 %v416_v57  ;;  %vm299_vm13 = vcmp.gt.f32.partialorder %v9503_v40, 27.5 }
  0xc3   :  { %v2033_v29 = vsel %vm1386_vm1, %v2029_v27, %v9502_v56  ;;  %v4129_v27 = vsub.f32 %v4124_v14, %v4120_v16  ;;  %v2018_v61 = vrot.slane %v1991_v23, 4  ;;  %v4133_v36 = vsel %vm327_vm7, %v2074_v62, %v1991_v23  ;;  %v9505_v56 = vld [vmem:[#allocation16_spill] sm:$0xff] }
  0xc4   :  { %v2142_v5 = vadd.f32 %v3891_v58, %v3982_v53  ;;  %v2143_v48 = vadd.f32 %v2129_v47, %v3987_v3  ;;  %v9504_v63 = vrot.slane %v3741_v15, 4  ;;  %v4145_v33 = vsub.f32 %v4133_v36, %v4116_v54 }
  0xc5   :  { %v2044_v62 = vsel %vm1386_vm1, %v2018_v61, %v2019_v0  ;;  %v2045_v58 = vsel %vm1386_vm1, %v2031_v45, %v2018_v61  ;;  %2162 = vrot.lane.b32.xlu2 %v4129_v27, %s3498_s5  ;;  %v417_v47 = vmul.f32 %v9505_v56, %v9497_v28  ;;  %vm285_vm14 = vcmp.lt.f32.partialorder %v9503_v40, 27.5 }
  0xc6   :  { %v2043_v19 = vsel %vm1386_vm1, %v2019_v0, %v9504_v63  ;;  %v2084_v38 = vsel %vm307_vm11, %v3565_v8, %v2045_v58  ;;  %v2085_v0 = vsel %vm308_vm12, %v3563_v7, %v2044_v62  ;;  %2232 = vrot.lane.b32.xlu0 %v4145_v33, %s3499_s6  ;;  %2160 = vrot.lane.b32.xlu1 %v4145_v33, %s3498_s5  ;;  %vm305_vm15 = vcmp.gt.f32.partialorder %v3791_v21, 27.5 }
  0xc7   :  { %v2086_v57 = vsel %vm309_vm10, %v9505_v56, %v2043_v19  ;;  %v2100_v8 = vsel %vm327_vm7, %v2084_v38, %v3853_v46  ;;  %v2101_v6 = vsel %vm327_vm7, %v2085_v0, %v3838_v51  ;;  %v2122_v46 = vmul.f32 2.0, %v3539_v1  ;;  %v9512_v51 = vld [vmem:[#allocation19_spill] sm:$0xff]  ;;  %v9522_v38 = vld [vmem:[#allocation20_spill] sm:$0xff] }
  0xc8   :  { %v2102_v23 = vsel %vm327_vm7, %v2086_v57, %v3703_v26  ;;  %v4185_v7 = vsub.f32 %v2100_v8, %v3982_v53  ;;  %v4188_v18 = vsub.f32 %v2101_v6, %v3987_v3  ;;  %v4190_v19 = vadd.f32 %v2142_v5, %v2100_v8 }
  0xc9   :  { %v4174_v61 = vsub.f32 %v2102_v23, %v3814_v34  ;;  %v4176_v63 = vadd.f32 %v2144_v31, %v2102_v23  ;;  %v4192_v34 = vadd.f32 %v2143_v48, %v2101_v6  ;;  %v4197_v31 = vsel %vm326_vm3, %v1967_v49, %v3926_v60  ;;  %v9514_v48 = vld [vmem:[#allocation38_spill] sm:$0xff] }
  0xca   :  { %9508 = vst [vmem:[#allocation37_spill] sm:$0xff] %v4185_v7  ;;  %v2123_v56 = vmul.f32 2.0, %v9497_v28  ;;  %vm306_vm0 = vcmp.gt.f32.partialorder %v9512_v51, 27.5  ;;  %v4206_v53 = vsel %vm326_vm3, %v3861_v52, %v3774_v24  ;;  %v9513_v3 = vrot.slane %v3703_v26, 4  ;;  %v2007_v49 = vpop.permute.xlu0 %2006  ;;  %534 = vmatmul.f32.gmra.mxu3 %v417_v47 }
  0xcb   :  { %9506 = vst [vmem:[#allocation15_spill] sm:$0xff] %v4174_v61  ;;  %vm301_vm2 = vcmp.gt.f32.partialorder %v3960_v35, 27.5  ;;  %v2082_v60 = vsel %vm305_vm15, %v3603_v12, %v2033_v29  ;;  %v4219_v57 = vsel %vm327_vm7, %v2081_v22, %v9514_v48  ;;  %vm302_vm4 = vcmp.gt.f32.partialorder %v3974_v43, 27.5  ;;  %v9517_v29 = vld [vmem:[#allocation31_spill] sm:$0xff]  ;;  %v9525_v35 = vld [vmem:[#allocation13_spill] sm:$0xff] }
  0xcc   :  { %9507 = vst [vmem:[#allocation33_spill] sm:$0xff] %v4176_v63  ;;  %v2032_v5 = vsel %vm1386_vm1, %v9513_v3, %v2031_v45  ;;  %v2026_v52 = vrot.slane %v2007_v49, 4  ;;  %v4224_v26 = vsel %vm327_vm7, %v2082_v60, %v2007_v49  ;;  %v9515_v24 = vrot.slane %v3744_v20, 4  ;;  %v9521_v20 = vld [vmem:[#allocation14_spill] sm:$0xff] }
  0xcd   :  { %9509 = vst [vmem:[#allocation16_spill] sm:$0xff] %v4188_v18  ;;  %v9516_v45 = vrot.slane %v3636_v44, 4  ;;  %v9518_v62 = vrot.slane %v9517_v29, 4  ;;  %v9519_v22 = vrot.slane %v3776_v30, 4  ;;  %v4240_v58 = vsub.f32 %v4219_v57, %v4197_v31 }
  0xce   :  { %9510 = vst [vmem:[#allocation44_spill] sm:$0xff] %v4190_v19  ;;  %v4244_v47 = vsub.f32 %v4224_v26, %v4206_v53  ;;  %v2136_v44 = vadd.f32 %v2122_v46, %v4074_v37  ;;  %v2083_v23 = vsel %vm306_vm0, %v9521_v20, %v2032_v5  ;;  %v9523_v0 = vrot.slane %v9522_v38, 4 }
  0xcf   :  { %9511 = vst [vmem:[#allocation45_spill] sm:$0xff] %v4192_v34  ;;  %v1918_v21 = vsel %vm1386_vm1, %v9516_v45, %v9515_v24  ;;  %v2039_v43 = vsel %vm1386_vm1, %v9519_v22, %v9518_v62  ;;  %v9524_v6 = vrot.slane %v9514_v48, 4  ;;  %v2118_v60 = vmul.f32 2.0, %v3595_v11  ;;  %2246 = vrot.lane.b32.xlu0 %v4240_v58, %s3499_s6  ;;  %2174 = vrot.lane.b32.xlu1 %v4240_v58, %s3498_s5  ;;  %v9530_v45 = vld [vmem:[#allocation22_spill] sm:$0xff] }
  0xd0   :  { %9520 = vst [vmem:[#allocation19_spill] sm:$0xff] %v4244_v47  ;;  %v2036_v8 = vsel %vm1386_vm1, %v2026_v52, %v9523_v0  ;;  %v2137_v49 = vadd.f32 %v2123_v56, %v4079_v25  ;;  %2176 = vrot.lane.b32.xlu2 %v4244_v47, %s3498_s5  ;;  %v2076_v5 = vsel %vm299_vm13, %v3541_v2, %v2039_v43  ;;  %v2127_v22 = vmul.f32 2.0, %v9521_v20  ;;  %v9535_v43 = vld [vmem:[#allocation41_spill] sm:$0xff] }
  0xd1   :  { %v2037_v3 = vsel %vm1386_vm1, %v9524_v6, %v2026_v52  ;;  %v2079_v51 = vsel %vm302_vm4, %v9497_v28, %v2036_v8  ;;  %v418_v28 = vmul.f32 %v3573_v9, %v9525_v35  ;;  %v2092_v9 = vsel %vm327_vm7, %v2076_v5, %v3741_v15 }
  0xd2   :  { %v2078_v46 = vsel %vm301_vm2, %v3539_v1, %v2037_v3  ;;  %v2095_v1 = vsel %vm327_vm7, %v2079_v51, %v3776_v30  ;;  %v1962_v30 = vsel %vm285_vm14, %v3541_v2, %v1918_v21  ;;  %v2124_v21 = vmul.f32 2.0, %v9525_v35  ;;  %v3372_v51 = vld [vmem:[#allocation3 + $0x10] sm:$0xff] }
  0xd3   :  { %v2094_v11 = vsel %vm327_vm7, %v2078_v46, %v3786_v39  ;;  %v4285_v48 = vsub.f32 %v2095_v1, %v4079_v25  ;;  %v4289_v24 = vadd.f32 %v2137_v49, %v2095_v1  ;;  %v2099_v39 = vsel %vm327_vm7, %v2083_v23, %v9522_v38  ;;  %537 = vmatmul.f32.gmra.mxu3 %v418_v28  ;;  %v4352_v1 = vpop.f32.mrf.mxu0 }
  0xd4   :  { %v4282_v56 = vsub.f32 %v2094_v11, %v4074_v37  ;;  %v4287_v52 = vadd.f32 %v2136_v44, %v2094_v11  ;;  %v2132_v37 = vadd.f32 %v2118_v60, %v4116_v54  ;;  %v1978_v25 = vsel %vm326_vm3, %v1962_v30, %v3648_v50  ;;  %v9532_v50 = vld [vmem:[#allocation39_spill] sm:$0xff]  ;;  %v9533_v54 = vld [vmem:[#allocation40_spill] sm:$0xff]  ;;  %9538 = vst [vmem:[#allocation41_spill] sm:$0xff] %v4352_v1 }
  0xd5   :  { %9527 = vst [vmem:[#allocation31_spill] sm:$0xff] %v4285_v48  ;;  %v4305_v29 = vsub.f32 %v2099_v39, %v9530_v45  ;;  %v4310_v40 = vsub.f32 %v2092_v9, %v1978_v25  ;;  %v2138_v15 = vadd.f32 %v2124_v21, %v9532_v50  ;;  %v2141_v23 = vadd.f32 %v2127_v22, %v9530_v45  ;;  %v9542_v45 = vld [vmem:[#allocation27_spill] sm:$0xff]  ;;  %v4373_v50 = vpop.f32.mrf.mxu2 }
  0xd6   :  { %9526 = vst [vmem:[#allocation38_spill] sm:$0xff] %v4282_v56  ;;  %v4308_v2 = vadd.f32 %v2132_v37, %v4133_v36  ;;  %v3500_v36 = vmov 28.0   ;;  %v2119_v20 = vmul.f32 2.0, %v3605_v13  ;;  %v3501_v3 = vmov 32.0  }
  0xd7   :  { %9528 = vst [vmem:[#allocation14_spill] sm:$0xff] %v4287_v52  ;;  %2164 = vrot.lane.b32.xlu1 %v4310_v40, %s3498_s5  ;;  %v4321_v62 = vadd.f32 %v2138_v15, %v9533_v54  ;;  %3326 = vrcp.f32 %v3500_v36  ;;  %v4331_v38 = vadd.f32 %v2141_v23, %v2099_v39  ;;  %v2125_v60 = vmul.f32 2.0, %v3593_v10 }
  0xd8   :  { %9529 = vst [vmem:[#allocation20_spill] sm:$0xff] %v4289_v24  ;;  %2178 = vrot.lane.b32.xlu2 %v4305_v29, %s3498_s5  ;;  %2486 = vrot.lane.b32.xlu0 %v4308_v2, %s3498_s5  ;;  %v2133_v6 = vadd.f32 %v2119_v20, %v4120_v16  ;;  %3328 = vrcp.f32 %v3501_v3  ;;  %v2120_v5 = vmul.f32 2.0, %v3372_v51  ;;  %v2126_v37 = vmul.f32 2.0, %v3603_v12 }
  0xd9   :  { %9531 = vst [vmem:[#allocation13_spill] sm:$0xff] %v4310_v40  ;;  %v2139_v13 = vadd.f32 %v2125_v60, %v4197_v31  ;;  %v3373_v31 = vld [vmem:[#allocation6 + $0x30] sm:$0xff]  ;;  %v4402_v20 = vmul.f32 2.0, %v4050_v4  ;;  %v4416_v3 = vmul.f32 2.0, %v4305_v29  ;;  %v4419_v60 = vmul.f32 2.0, %v4145_v33 }
  0xda   :  { %9534 = vst [vmem:[#allocation22_spill] sm:$0xff] %v4321_v62  ;;  %v4343_v46 = vadd.f32 %v2133_v6, %v4124_v14  ;;  %v2134_v10 = vadd.f32 %v2120_v5, %v1978_v25  ;;  %v2131_v25 = vmul.f32 2.0, %v3373_v31  ;;  %v2140_v21 = vadd.f32 %v2126_v37, %v4206_v53 }
  0xdb   :  { %9536 = vst [vmem:[#allocation39_spill] sm:$0xff] %v4331_v38  ;;  %v4357_v28 = vadd.f32 %v2139_v13, %v4219_v57  ;;  %v4380_v22 = vpop.f32.mrf.mxu0  ;;  %v4389_v53 = vmul.f32 2.0, %v9535_v43  ;;  %v4413_v6 = vmul.f32 2.0, %v4129_v27  ;;  %v4427_v13 = vmul.f32 2.0, %v4244_v47 }
  0xdc   :  { %9537 = vst [vmem:[#allocation40_spill] sm:$0xff] %v4343_v46  ;;  %v4354_v35 = vadd.f32 %v2134_v10, %v2092_v9  ;;  %v2145_v15 = vadd.f32 %v2131_v25, %v4027_v17  ;;  %v4378_v36 = vadd.f32 %v2140_v21, %v4224_v26  ;;  %v4395_v17 = vmul.f32 2.0, %v4321_v62 }
  0xdd   :  { %v3327_v44 = vpop.eup %3326  ;;  %9540 = vst [vmem:[#allocation47_spill] sm:$0xff] %v4357_v28  ;;  %v9151_v5 = vrot.slane %v4380_v22, 5  ;;  %vm576_vm5 = vcmp.lt.s32.totalorder %v3623_v32, 3  ;;  %v4442_v37 = vmul.f32 2.0, %v4185_v7  ;;  %v4445_v31 = vmul.f32 2.0, %v4343_v46  ;;  %v4465_v21 = vpop.f32.mrf.mxu2 }
  0xde   :  { %v130_v0 = vmul.f32 28.0, %v3327_v44  ;;  %v3329_v11 = vpop.eup %3328  ;;  %vm134_vm3 = vweird.f32 %v3327_v44  ;;  %9539 = vst [vmem:[#allocation46_spill] sm:$0xff] %v4354_v35  ;;  %v4386_v23 = vadd.f32 %v2145_v15, %v4036_v42  ;;  %v4405_v42 = vmul.f32 2.0, %v4240_v58 }
  0xdf   :  { %2234 = vrot.lane.b32.xlu1 %v4129_v27, %s3499_s6  ;;  %v312_v14 = vmul.f32 32.0, %v3329_v11  ;;  %9544 = vst [vmem:[#allocation50_spill] sm:$0xff] %v4373_v50  ;;  %vm316_vm7 = vweird.f32 %v3329_v11  ;;  %v4435_v10 = vmul.f32 2.0, %v4378_v36  ;;  %v4448_v25 = vmul.f32 2.0, %v4021_v59 }
  0xe0   :  { %2244 = vrot.lane.b32.xlu2 %v9535_v43, %s3499_s6  ;;  %2498 = vrot.lane.b32.xlu0 %v4321_v62, %s3498_s5  ;;  %v131_v8 = vsub.f32 1.0, %v130_v0  ;;  %9545 = vst [vmem:[#allocation51_spill] sm:$0xff] %v4378_v36  ;;  %v4392_v0 = vmul.f32 2.0, %v4354_v35  ;;  %vm682_vm6 = vcmp.lt.s32.totalorder %v3623_v32, 6  ;;  %v9562_v51 = vrot.slane %v4465_v21, 5 }
  0xe1   :  { %v313_v39 = vsub.f32 1.0, %v312_v14  ;;  %9546 = vst [vmem:[#allocation52_spill] sm:$0xff] %v4380_v22  ;;  %v4438_v14 = vmul.f32 2.0, %v4357_v28  ;;  %vm1139_vm8 = vcmp.lt.s32.totalorder %v3623_v32, 5  ;;  %vm9421_vm9 = vcmp.lt.s32.totalorder %v3623_v32, 1 }
  0xe2   :  { %v132_v49 = vmul.f32 %v3327_v44, %v131_v8  ;;  %9547 = vst [vmem:[#allocation53_spill] sm:$0xff] %v4386_v23  ;;  %v4408_v8 = vmul.f32 2.0, %v4007_v41  ;;  %vm1457_vm10 = vcmp.lt.s32.totalorder %v3623_v32, 2  ;;  %vm9424_vm12 = vcmp.lt.s32.totalorder %v3623_v32, 7 }
  0xe3   :  { %v314_v9 = vmul.f32 %v3329_v11, %v313_v39  ;;  %9548 = vst [vmem:[#allocation54_spill] sm:$0xff] %v4392_v0  ;;  %v4480_v54 = vpop.f32.mrf.mxu0 }
  0xe4   :  { %v133_v16 = vadd.f32 %v3327_v44, %v132_v49  ;;  %9549 = vst [vmem:[#allocation55_spill] sm:$0xff] %v4395_v17  ;;  %v4422_v49 = vmul.f32 2.0, %v4308_v2  ;;  %v9595_v17 = vrot.slane %v4465_v21, 5 }
  0xe5   :  { %v315_v12 = vadd.f32 %v3329_v11, %v314_v9  ;;  %9551 = vst [vmem:[#allocation57_spill] sm:$0xff] %v4435_v10 }
  0xe6   :  { %v4359_v30 = vsel %vm134_vm3, %v3327_v44, %v133_v16  ;;  %v4383_v44 = vmul.f32 2.0, %v4310_v40  ;;  %v4430_v16 = vmul.f32 2.0, %v4331_v38  ;;  %9552 = vst [vmem:[#allocation58_spill] sm:$0xff] %v4438_v14  ;;  %v9564_v14 = vrot.slane %v4465_v21, 3 }
  0xe7   :  { %2248 = vrot.lane.b32.xlu1 %v4244_v47, %s3499_s6  ;;  %9541 = vst [vmem:[#allocation48_spill] sm:$0xff] %v4359_v30  ;;  %v4370_v57 = vmul.f32 %v4359_v30, %v9542_v45  ;;  %v317_v26 = vsel %vm316_vm7, %v3329_v11, %v315_v12  ;;  %v9557_v45 = vrot.slane %v4352_v1, 5  ;;  %v649_v12 = vrot.slane %v4480_v54, 2 }
  0xe8   :  { %2258 = vrot.lane.b32.xlu2 %v4050_v4, %s3499_s6  ;;  %2504 = vrot.lane.b32.xlu0 %v4331_v38, %s3498_s5  ;;  %9550 = vst [vmem:[#allocation56_spill] sm:$0xff] %v4430_v16  ;;  %v318_v11 = vmul.f32 %v317_v26, %v3656_v55  ;;  %v4454_v26 = vpop.f32.mrf.mxu1  ;;  %v9584_v16 = vrot.slane %v4380_v22, 3 }
  0xe9   :  { %9543 = vst [vmem:[#allocation49_spill] sm:$0xff] %v4370_v57  ;;  %v610_v9 = vsel %vm576_vm5, %v9557_v45, %v9151_v5  ;;  %v9563_v45 = vrot.slane %v4373_v50, 5  ;;  %v543_v5 = vrot.slane %v4480_v54, 5  ;;  %v9570_v57 = vrot.slane %v4465_v21, 7 }
  0xea   :  { %9553 = vst [vmem:[#allocation59_spill] sm:$0xff] %v4442_v37  ;;  %v4470_v39 = vfloor.f32 %v318_v11  ;;  %v4484_v11 = vmul.f32 0.26601171, %v610_v9  ;;  %v9571_v9 = vrot.slane %v4373_v50, 7  ;;  %v9576_v37 = vrot.slane %v4465_v21, 4 }
  0xeb   :  { %9554 = vst [vmem:[#allocation60_spill] sm:$0xff] %v4445_v31  ;;  %v593_v15 = vsel %vm576_vm5, %v9563_v45, %v9562_v51  ;;  %v9567_v51 = vrot.slane %v4380_v22, 2 }
  0xec   :  { %9555 = vst [vmem:[#allocation61_spill] sm:$0xff] %v4448_v25 }
  0xed   :  { %9556 = vst [vmem:[#allocation62_spill] sm:$0xff] %v4454_v26  ;;  %v715_v45 = vsel %vm682_vm6, %v9567_v51, %v649_v12  ;;  %v4551_v51 = vpop.f32.mrf.mxu2 }
  0xee   :  { %9558 = vst [vmem:[#allocation63_spill] sm:$0xff] %v4465_v21  ;;  %v666_v30 = vrot.slane %v4551_v51, 2  ;;  %v1000_v10 = vadd.f32 %v715_v45, %v4480_v54 }
  0xef   :  { %2488 = vrot.lane.b32.xlu1 %v4343_v46, %s3498_s5  ;;  %9559 = vst [vmem:[#allocation64_spill] sm:$0xff] %v4470_v39 }
  0xf0   :  { %2166 = vrot.lane.b32.xlu2 %v4007_v41, %s3498_s5  ;;  %2180 = vrot.lane.b32.xlu0 %v4185_v7, %s3498_s5  ;;  %9560 = vst [vmem:[#allocation65_spill] sm:$0xff] %v4480_v54 }
  0xf1   :  { %9561 = vst [vmem:[#allocation66_spill] sm:$0xff] %v4484_v11  ;;  %v4527_v11 = vmul.f32 0.26601171, %v593_v15  ;;  %v9580_v15 = vrot.slane %v4373_v50, 6 }
  0xf2   :  { %9575 = vst [vmem:[#allocation72_spill] sm:$0xff] %v4551_v51 }
  0xf3   :  { %9569 = vst [vmem:[#allocation69_spill] sm:$0xff] %v4527_v11 }
  0xf7   :  { %2500 = vrot.lane.b32.xlu1 %v4357_v28, %s3498_s5 }
  0xf8   :  { %2490 = vrot.lane.b32.xlu2 %v4354_v35, %s3498_s5  ;;  %2492 = vrot.lane.b32.xlu0 %v4021_v59, %s3498_s5 }
  0xff   :  { %2512 = vrot.lane.b32.xlu1 %v4386_v23, %s3498_s5 }
 0x100   :  { %2502 = vrot.lane.b32.xlu2 %v4378_v36, %s3498_s5  ;;  %2530 = vrot.lane.b32.xlu0 %v4343_v46, %s3499_s6 }
 0x107   :  { %2236 = vrot.lane.b32.xlu1 %v4310_v40, %s3499_s6 }
 0x108   :  { %2250 = vrot.lane.b32.xlu2 %v4305_v29, %s3499_s6  ;;  %2542 = vrot.lane.b32.xlu0 %v4357_v28, %s3499_s6  ;;  %v320_v28 = vmul.f32 32.0, %v4470_v39  ;;  %v9565_v39 = vrot.slane %v4373_v50, 3 }
 0x10a   :  { %v4517_v31 = vsel %vm1139_vm8, %v9565_v39, %v9564_v14  ;;  %v4525_v25 = vsub.f32 %v3656_v55, %v320_v28  ;;  %v4535_v14 = vsel %vm9421_vm9, %v9571_v9, %v9570_v57  ;;  %v4538_v39 = vpop.f32.mrf.mxu1  ;;  %v9574_v55 = vrot.slane %v4380_v22, 5 }
 0x10b   :  { %9566 = vst [vmem:[#allocation67_spill] sm:$0xff] %v4517_v31  ;;  %v718_v57 = vadd.f32 %v715_v45, %v4352_v1  ;;  %v9589_v31 = vrot.slane %v4538_v39, 5 }
 0x10c   :  { %9568 = vst [vmem:[#allocation68_spill] sm:$0xff] %v4525_v25  ;;  %v609_v28 = vsel %vm576_vm5, %v9574_v55, %v543_v5  ;;  %v9579_v55 = vrot.slane %v4465_v21, 6  ;;  %vm9422_vm11 = vcmp.lt.f32.partialorder %v4525_v25, 0.5  ;;  %vm9423_vm13 = vcmp.gt.f32.partialorder %v4525_v25, 26.5 }
 0x10d   :  { %9572 = vst [vmem:[#allocation70_spill] sm:$0xff] %v4535_v14  ;;  %v9586_v14 = vrot.slane %v4480_v54, 7  ;;  %v4607_v11 = vmul.f32 0.0010283801, %v718_v57 }
 0x10e   :  { %9573 = vst [vmem:[#allocation71_spill] sm:$0xff] %v4538_v39  ;;  %v4569_v9 = vsel %vm1457_vm10, %v9580_v15, %v9579_v55  ;;  %v9590_v15 = vrot.slane %v4454_v26, 5 }
 0x10f   :  { %2506 = vrot.lane.b32.xlu1 %v4190_v19, %s3498_s5  ;;  %9581 = vst [vmem:[#allocation74_spill] sm:$0xff] %v4569_v9  ;;  %v9583_v9 = vrot.slane %v4480_v54, 3 }
 0x110   :  { %2528 = vrot.lane.b32.xlu2 %v4308_v2, %s3499_s6  ;;  %2554 = vrot.lane.b32.xlu0 %v4386_v23, %s3499_s6  ;;  %v9577_v23 = vrot.slane %v4373_v50, 4  ;;  %v601_v55 = vsel %vm576_vm5, %v9590_v15, %v9589_v31  ;;  %9591 = vst [vmem:[#allocation78_spill] sm:$0xff] %v4607_v11  ;;  %v4671_v11 = vpop.f32.mrf.mxu2 }
 0x111   :  { %v4590_v45 = vsel %vm1139_vm8, %v9584_v16, %v9583_v9  ;;  %v4625_v16 = vmul.f32 0.26601171, %v601_v55  ;;  %9606 = vst [vmem:[#allocation84_spill] sm:$0xff] %v4671_v11  ;;  %v9612_v15 = vrot.slane %v4671_v11, 2 }
 0x112   :  { %v4561_v46 = vsel %vm1386_vm1, %v9577_v23, %v9576_v37  ;;  %v4577_v37 = vpop.f32.mrf.mxu0  ;;  %9585 = vst [vmem:[#allocation76_spill] sm:$0xff] %v4590_v45  ;;  %v9587_v23 = vrot.slane %v4380_v22, 7  ;;  %v9592_v45 = vrot.slane %v4465_v21, 2  ;;  %v4651_v57 = vpop.f32.mrf.mxu1 }
 0x113   :  { %9578 = vst [vmem:[#allocation73_spill] sm:$0xff] %v4561_v46  ;;  %v4579_v46 = vmul.f32 0.26601171, %v609_v28  ;;  %v9598_v9 = vrot.slane %v4577_v37, 5 }
 0x114   :  { %9582 = vst [vmem:[#allocation75_spill] sm:$0xff] %v4577_v37  ;;  %v4598_v28 = vsel %vm9421_vm9, %v9587_v23, %v9586_v14  ;;  %v698_v14 = vsel %vm682_vm6, %v9592_v45, %v666_v30  ;;  %v4615_v23 = vmul.f32 0.036000773, %v1000_v10  ;;  %v9597_v10 = vrot.slane %v4577_v37, 2 }
 0x115   :  { %9588 = vst [vmem:[#allocation77_spill] sm:$0xff] %v4598_v28  ;;  %v9594_v28 = vrot.slane %v4551_v51, 5  ;;  %v735_v55 = vadd.f32 %v698_v14, %v4373_v50  ;;  %v608_v1 = vsel %vm576_vm5, %v543_v5, %v9598_v9  ;;  %v9603_v9 = vrot.slane %v4551_v51, 7 }
 0x116   :  { %9593 = vst [vmem:[#allocation79_spill] sm:$0xff] %v4615_v23  ;;  %v714_v45 = vsel %vm682_vm6, %v649_v12, %v9597_v10  ;;  %v9601_v23 = vrot.slane %v4465_v21, 3  ;;  %v4673_v50 = vmul.f32 0.26601171, %v608_v1  ;;  %v697_v1 = vsel %vm682_vm6, %v666_v30, %v9612_v15 }
 0x117   :  { %v592_v31 = vsel %vm576_vm5, %v9595_v17, %v9594_v28  ;;  %9596 = vst [vmem:[#allocation80_spill] sm:$0xff] %v4625_v16  ;;  %v1017_v28 = vadd.f32 %v698_v14, %v4551_v51  ;;  %2532 = vrot.lane.b32.xlu1 %v4354_v35, %s3499_s6  ;;  %v9600_v14 = vrot.slane %v4551_v51, 3  ;;  %v719_v17 = vadd.f32 %v714_v45, %v4380_v22 }
 0x118   :  { %2540 = vrot.lane.b32.xlu2 %v4321_v62, %s3499_s6  ;;  %2238 = vrot.lane.b32.xlu0 %v4007_v41, %s3499_s6  ;;  %v4646_v12 = vmul.f32 0.26601171, %v592_v31  ;;  %9599 = vst [vmem:[#allocation81_spill] sm:$0xff] %v4651_v57  ;;  %v9604_v31 = vrot.slane %v4465_v21, 7  ;;  %v9616_v16 = vrot.slane %v4538_v39, 5  ;;  %v736_v30 = vadd.f32 %v697_v1, %v4465_v21 }
 0x119   :  { %v4659_v5 = vsel %vm1139_vm8, %v9601_v23, %v9600_v14  ;;  %v754_v22 = vmul.f32 0.0010283801, %v719_v17  ;;  %v9615_v23 = vrot.slane %v4651_v57, 5  ;;  %v1018_v0 = vadd.f32 %v697_v1, %v4671_v11 }
 0x11a   :  { %9602 = vst [vmem:[#allocation82_spill] sm:$0xff] %v4659_v5  ;;  %v4667_v10 = vsel %vm9421_vm9, %v9604_v31, %v9603_v9  ;;  %v4679_v5 = vmul.f32 0.0010283801, %v735_v55  ;;  %v4681_v9 = vmul.f32 0.036000773, %v1017_v28  ;;  %v1001_v31 = vadd.f32 %v714_v45, %v4577_v37  ;;  %v4706_v14 = vpop.f32.mrf.mxu0 }
 0x11b   :  { %9605 = vst [vmem:[#allocation83_spill] sm:$0xff] %v4667_v10  ;;  %v4685_v10 = vpop.f32.mrf.mxu3  ;;  %v9610_v28 = vrot.slane %v4651_v57, 2  ;;  %v600_v55 = vsel %vm576_vm5, %v9616_v16, %v9615_v23  ;;  %v4729_v15 = vadd.f32 %v754_v22, %v4579_v46  ;;  %v9618_v16 = vrot.slane %v4671_v11, 5 }
 0x11c   :  { %9607 = vst [vmem:[#allocation85_spill] sm:$0xff] %v4679_v5  ;;  %v9619_v23 = vrot.slane %v4551_v51, 5  ;;  %v9620_v46 = vrot.slane %v4706_v14, 2  ;;  %v9621_v22 = vrot.slane %v4577_v37, 2  ;;  %v771_v21 = vmul.f32 0.0010283801, %v736_v30 }
 0x11d   :  { %9608 = vst [vmem:[#allocation86_spill] sm:$0xff] %v4681_v9  ;;  %v9611_v9 = vrot.slane %v4538_v39, 2 }
 0x11e   :  { %9609 = vst [vmem:[#allocation87_spill] sm:$0xff] %v4685_v10 }
 0x11f   :  { %v706_v45 = vsel %vm682_vm6, %v9611_v9, %v9610_v28  ;;  %9613 = vst [vmem:[#allocation88_spill] sm:$0xff] %v4706_v14  ;;  %v4712_v9 = vmul.f32 0.036000773, %v1001_v31  ;;  %2544 = vrot.lane.b32.xlu1 %v4378_v36, %s3499_s6  ;;  %v2163_v17 = vpop.permute.xlu2 %2162  ;;  %v9178_v36 = vrot.slane %v4706_v14, 5 }
 0x120   :  { %2546 = vrot.lane.b32.xlu2 %v4331_v38, %s3499_s6  ;;  %2508 = vrot.lane.b32.xlu0 %v4192_v34, %s3498_s5  ;;  %v727_v31 = vadd.f32 %v706_v45, %v4454_v26  ;;  %9617 = vst [vmem:[#allocation90_spill] sm:$0xff] %v4729_v15  ;;  %v1009_v28 = vadd.f32 %v706_v45, %v4651_v57  ;;  %v4748_v38 = vmul.f32 0.26601171, %v600_v55  ;;  %v9625_v55 = vrot.slane %v4671_v11, 1 }
 0x121   :  { %9614 = vst [vmem:[#allocation89_spill] sm:$0xff] %v4712_v9  ;;  %v591_v9 = vsel %vm576_vm5, %v9619_v23, %v9618_v16  ;;  %v713_v45 = vsel %vm682_vm6, %v9621_v22, %v9620_v46  ;;  %v9626_v46 = vrot.slane %v4551_v51, 1  ;;  %v2191_v30 = vsel %vm9422_vm11, %v4129_v27, %v2163_v17 }
 0x122   :  { %9622 = vst [vmem:[#allocation91_spill] sm:$0xff] %v4748_v38  ;;  %v4753_v15 = vmul.f32 0.0010283801, %v727_v31  ;;  %v4757_v23 = vmul.f32 0.036000773, %v1009_v28  ;;  %v720_v31 = vadd.f32 %v713_v45, %v4480_v54  ;;  %v9629_v17 = vrot.slane %v4577_v37, 5  ;;  %v4802_v54 = vpop.f32.mrf.mxu2 }
 0x123   :  { %v4759_v26 = vmul.f32 0.26601171, %v591_v9  ;;  %v4767_v1 = vsel %vm9424_vm12, %v9626_v46, %v9625_v55  ;;  %v4776_v5 = vpop.f32.mrf.mxu3  ;;  %v4782_v55 = vmul.f32 0.036000773, %v1018_v0  ;;  %v1002_v28 = vadd.f32 %v713_v45, %v4706_v14  ;;  %9632 = vst [vmem:[#allocation98_spill] sm:$0xff] %v4802_v54 }
 0x124   :  { %9623 = vst [vmem:[#allocation92_spill] sm:$0xff] %v4753_v15  ;;  %v607_v46 = vsel %vm576_vm5, %v9629_v17, %v9178_v36  ;;  %v4795_v22 = vadd.f32 %v771_v21, %v4646_v12  ;;  %v4805_v45 = vadd.f32 %v4413_v6, %v2191_v30  ;;  %v2173_v17 = vpop.permute.xlu0 %2172  ;;  %v755_v9 = vmul.f32 0.0010283801, %v720_v31 }
 0x125   :  { %9624 = vst [vmem:[#allocation93_spill] sm:$0xff] %v4757_v23  ;;  %v4800_v23 = vpop.f32.mrf.mxu1  ;;  %v9179_v21 = vrot.slane %v4802_v54, 2  ;;  %v4809_v12 = vmul.f32 0.26601171, %v607_v46  ;;  %v9635_v6 = vrot.slane %v4776_v5, 5  ;;  %v9636_v30 = vrot.slane %v4685_v10, 5 }
 0x126   :  { %9627 = vst [vmem:[#allocation94_spill] sm:$0xff] %v4776_v5  ;;  %v9637_v46 = vrot.slane %v4671_v11, 2  ;;  %v9184_v0 = vrot.slane %v4802_v54, 5 }
 0x127   :  { %9628 = vst [vmem:[#allocation95_spill] sm:$0xff] %v4782_v55  ;;  %2168 = vrot.lane.b32.xlu1 %v4282_v56, %s3498_s5  ;;  %v584_v31 = vsel %vm576_vm5, %v9636_v30, %v9635_v6  ;;  %v4835_v6 = vpop.f32.mrf.mxu0  ;;  %v4838_v30 = vadd.f32 %v755_v9, %v4673_v50 }
 0x128   :  { %2182 = vrot.lane.b32.xlu2 %v4188_v18, %s3498_s5  ;;  %2170 = vrot.lane.b32.xlu0 %v4285_v48, %s3498_s5  ;;  %9630 = vst [vmem:[#allocation96_spill] sm:$0xff] %v4795_v22  ;;  %v4814_v22 = vmul.f32 0.036000773, %v1002_v28  ;;  %v696_v55 = vsel %vm682_vm6, %v9637_v46, %v9179_v21  ;;  %v2196_v28 = vsel %vm9422_vm11, %v9535_v43, %v2173_v17  ;;  %v9641_v46 = vrot.slane %v4651_v57, 2 }
 0x129   :  { %9631 = vst [vmem:[#allocation97_spill] sm:$0xff] %v4800_v23  ;;  %v4848_v21 = vmul.f32 0.26601171, %v584_v31  ;;  %v737_v50 = vadd.f32 %v696_v55, %v4551_v51  ;;  %v2224_v9 = vadd.f32 %v4389_v53, %v2196_v28 }
 0x12a   :  { %v2177_v36 = vpop.permute.xlu2 %2176  ;;  %9633 = vst [vmem:[#allocation99_spill] sm:$0xff] %v4809_v12  ;;  %v9640_v12 = vrot.slane %v4800_v23, 2 }
 0x12b   :  { %9634 = vst [vmem:[#allocation100_spill] sm:$0xff] %v4814_v22  ;;  %v2198_v38 = vsel %vm9422_vm11, %v4244_v47, %v2177_v36  ;;  %v9643_v22 = vmov %v9618_v16  ;;  %v9645_v36 = vrot.slane %v4802_v54, 1 }
 0x12c   :  { %9638 = vst [vmem:[#allocation101_spill] sm:$0xff] %v4835_v6  ;;  %v705_v17 = vsel %vm682_vm6, %v9641_v46, %v9640_v12  ;;  %v590_v46 = vsel %vm576_vm5, %v9643_v22, %v9184_v0  ;;  %v4874_v12 = vpop.f32.mrf.mxu3  ;;  %v9649_v22 = vrot.slane %v4706_v14, 2  ;;  %v4896_v57 = vadd.f32 %v4427_v13, %v2198_v38 }
 0x12d   :  { %9639 = vst [vmem:[#allocation102_spill] sm:$0xff] %v4838_v30  ;;  %v728_v53 = vadd.f32 %v705_v17, %v4538_v39  ;;  %v9646_v30 = vrot.slane %v4671_v11, 1  ;;  %v9192_v15 = vrot.slane %v4874_v12, 5 }
 0x12e   :  { %9642 = vst [vmem:[#allocation103_spill] sm:$0xff] %v4848_v21  ;;  %v772_v21 = vmul.f32 0.0010283801, %v737_v50 }
 0x12f   :  { %2252 = vrot.lane.b32.xlu1 %v4185_v7, %s3499_s6  ;;  %9644 = vst [vmem:[#allocation104_spill] sm:$0xff] %v4874_v12  ;;  %v4883_v28 = vsel %vm9424_vm12, %v9646_v30, %v9645_v36  ;;  %v9648_v7 = vrot.slane %v4835_v6, 2  ;;  %v4899_v30 = vadd.f32 %v705_v17, %v4800_v23  ;;  %v9193_v36 = vrot.slane %v4874_v12, 2 }
 0x130   :  { %2494 = vrot.lane.b32.xlu2 %v4287_v52, %s3498_s5  ;;  %2254 = vrot.lane.b32.xlu0 %v4188_v18, %s3499_s6  ;;  %v2187_v31 = vpop.permute.xlu0 %2186  ;;  %9647 = vst [vmem:[#allocation105_spill] sm:$0xff] %v4883_v28  ;;  %v1019_v18 = vadd.f32 %v696_v55, %v4802_v54  ;;  %v4901_v55 = vmul.f32 0.26601171, %v590_v46  ;;  %v4904_v14 = vmul.f32 0.0010283801, %v728_v53  ;;  %v4921_v53 = vadd.f32 %v772_v21, %v4759_v26 }
 0x131   :  { %v712_v0 = vsel %vm682_vm6, %v9649_v22, %v9648_v7  ;;  %9650 = vst [vmem:[#allocation106_spill] sm:$0xff] %v4899_v30  ;;  %v4908_v7 = vadd.f32 %v4767_v1, %v4883_v28  ;;  %v2203_v17 = vsel %vm9422_vm11, %v4050_v4, %v2187_v31  ;;  %v9658_v21 = vrot.slane %v4776_v5, 2 }
 0x132   :  { %v2179_v16 = vpop.permute.xlu2 %2178  ;;  %9651 = vst [vmem:[#allocation107_spill] sm:$0xff] %v4901_v55  ;;  %v721_v22 = vadd.f32 %v712_v0, %v4577_v37  ;;  %v4912_v51 = vmul.f32 0.036000773, %v1019_v18  ;;  %v9656_v18 = vrot.slane %v4776_v5, 5  ;;  %v4938_v26 = vadd.f32 %v712_v0, %v4835_v6 }
 0x133   :  { %9652 = vst [vmem:[#allocation108_spill] sm:$0xff] %v4904_v14  ;;  %v2199_v46 = vsel %vm9422_vm11, %v4305_v29, %v2179_v16  ;;  %v9680_v28 = vrot.slane %v4802_v54, 1 }
 0x134   :  { %9653 = vst [vmem:[#allocation109_spill] sm:$0xff] %v4908_v7  ;;  %v583_v38 = vsel %vm576_vm5, %v9656_v18, %v9192_v15  ;;  %v689_v18 = vsel %vm682_vm6, %v9658_v21, %v9193_v36  ;;  %v4949_v31 = vmul.f32 0.0010283801, %v721_v22  ;;  %v4954_v15 = vpop.f32.mrf.mxu2  ;;  %v4957_v16 = vadd.f32 %v4416_v3, %v2199_v46 }
 0x135   :  { %9654 = vst [vmem:[#allocation110_spill] sm:$0xff] %v4912_v51  ;;  %v4959_v30 = vmul.f32 0.26601171, %v583_v38  ;;  %v2231_v36 = vadd.f32 %v4402_v20, %v2203_v17  ;;  %v744_v47 = vadd.f32 %v689_v18, %v4685_v10  ;;  %v9194_v3 = vrot.slane %v4954_v15, 2 }
 0x136   :  { %9655 = vst [vmem:[#allocation111_spill] sm:$0xff] %v4921_v53  ;;  %v1026_v21 = vadd.f32 %v689_v18, %v4874_v12  ;;  %v9663_v18 = vrot.slane %v4954_v15, 3  ;;  %v9666_v17 = vrot.slane %v4802_v54, 7  ;;  %v9674_v53 = vrot.slane %v4954_v15, 4 }
 0x137   :  { %9657 = vst [vmem:[#allocation112_spill] sm:$0xff] %v4938_v26  ;;  %2534 = vrot.lane.b32.xlu1 %v4021_v59, %s3499_s6  ;;  %v9714_v23 = vrot.slane %v4954_v15, 6 }
 0x138   :  { %2548 = vrot.lane.b32.xlu2 %v4190_v19, %s3499_s6  ;;  %2536 = vrot.lane.b32.xlu0 %v4287_v52, %s3499_s6  ;;  %9659 = vst [vmem:[#allocation113_spill] sm:$0xff] %v4949_v31  ;;  %v2233_v51 = vpop.permute.xlu0 %2232  ;;  %v2161_v0 = vpop.permute.xlu1 %2160  ;;  %v5025_v26 = vmul.f32 0.036000773, %v1026_v21  ;;  %v9677_v21 = vrot.slane %v4802_v54, 6  ;;  %v9702_v31 = vrot.slane %v4954_v15, 3 }
 0x139   :  { %9660 = vst [vmem:[#allocation114_spill] sm:$0xff] %v4959_v30  ;;  %v2190_v38 = vsel %vm9422_vm11, %v4145_v33, %v2161_v0  ;;  %v9664_v0 = vrot.slane %v4802_v54, 3 }
 0x13a   :  { %v2245_v50 = vpop.permute.xlu2 %2244  ;;  %v2218_v20 = vadd.f32 %v4419_v60, %v2190_v38  ;;  %v9665_v38 = vrot.slane %v4954_v15, 7  ;;  %9671 = vst [vmem:[#allocation118_spill] sm:$0xff] %v5025_v26 }
 0x13b   :  { %v2268_v13 = vsel %vm9423_vm13, %v9535_v43, %v2245_v50  ;;  %v9662_v43 = vrot.slane %v4802_v54, 2  ;;  %v1152_v60 = vsel %vm1139_vm8, %v9664_v0, %v9663_v18  ;;  %v5028_v18 = vpop.f32.mrf.mxu0 }
 0x13c   :  { %v4969_v46 = vadd.f32 %v2268_v13, %v2224_v9  ;;  %v2262_v13 = vsel %vm9423_vm13, %v4145_v33, %v2233_v51  ;;  %v5004_v51 = vpop.f32.mrf.mxu1  ;;  %v5023_v33 = vmul.f32 0.0010283801, %v744_v47  ;;  %9672 = vst [vmem:[#allocation119_spill] sm:$0xff] %v5028_v18  ;;  %v9676_v47 = vrot.slane %v4954_v15, 6 }
 0x13d   :  { %v695_v9 = vsel %vm682_vm6, %v9662_v43, %v9194_v3  ;;  %v1223_v43 = vsel %vm9421_vm9, %v9666_v17, %v9665_v38  ;;  %v5001_v50 = vadd.f32 %v2262_v13, %v2218_v20  ;;  %9668 = vst [vmem:[#allocation117_spill] sm:$0xff] %v5004_v51  ;;  %v9669_v20 = vrot.slane %v4954_v15, 5 }
 0x13e   :  { %9661 = vst [vmem:[#allocation115_spill] sm:$0xff] %v4969_v46  ;;  %v738_v22 = vadd.f32 %v695_v9, %v4671_v11  ;;  %v9670_v13 = vrot.slane %v4802_v54, 5  ;;  %v1020_v38 = vadd.f32 %v695_v9, %v4954_v15  ;;  %v1267_v3 = vadd.f32 %v1223_v43, %v1152_v60 }
 0x13f   :  { %9667 = vst [vmem:[#allocation116_spill] sm:$0xff] %v5001_v50  ;;  %2184 = vrot.lane.b32.xlu1 %v4174_v61, %s3498_s5 }
 0x140   :  { %2240 = vrot.lane.b32.xlu2 %v4282_v56, %s3499_s6  ;;  %2256 = vrot.lane.b32.xlu0 %v4174_v61, %s3499_s6  ;;  %v589_v0 = vsel %vm576_vm5, %v9670_v13, %v9669_v20  ;;  %v5030_v56 = vpop.f32.mrf.mxu3  ;;  %v9675_v20 = vrot.slane %v4802_v54, 4  ;;  %v1470_v13 = vsel %vm1457_vm10, %v9677_v21, %v9676_v47  ;;  %v5070_v60 = vmul.f32 0.10936069, %v1267_v3 }
 0x141   :  { %9673 = vst [vmem:[#allocation120_spill] sm:$0xff] %v5030_v56  ;;  %v2247_v61 = vpop.permute.xlu0 %2246  ;;  %v2175_v26 = vpop.permute.xlu1 %2174  ;;  %v5049_v7 = vmul.f32 0.26601171, %v589_v0  ;;  %v9206_v0 = vrot.slane %v5030_v56, 5  ;;  %v9693_v3 = vrot.slane %v4874_v12, 1 }
 0x142   :  { %v2259_v11 = vpop.permute.xlu2 %2258  ;;  %v1399_v9 = vsel %vm1386_vm1, %v9675_v20, %v9674_v53  ;;  %v5051_v53 = vmul.f32 0.0010283801, %v738_v22  ;;  %v9679_v20 = vrot.slane %v4954_v15, 1  ;;  %9683 = vst [vmem:[#allocation124_spill] sm:$0xff] %v5070_v60 }
 0x143   :  { %v2275_v17 = vsel %vm9423_vm13, %v4050_v4, %v2259_v11  ;;  %v2197_v4 = vsel %vm9422_vm11, %v4240_v58, %v2175_v26  ;;  %v5066_v11 = vmul.f32 0.036000773, %v1020_v38  ;;  %v1514_v43 = vadd.f32 %v1470_v13, %v1399_v9 }
 0x144   :  { %9678 = vst [vmem:[#allocation121_spill] sm:$0xff] %v5051_v53  ;;  %v5059_v47 = vsel %vm9424_vm12, %v9680_v28, %v9679_v20  ;;  %v5061_v21 = vadd.f32 %v2275_v17, %v2231_v36  ;;  %v2225_v22 = vadd.f32 %v4405_v42, %v2197_v4  ;;  %v9205_v28 = vrot.slane %v5001_v50, 7  ;;  %v5091_v4 = vpop.f32.mrf.mxu2 }
 0x145   :  { %9681 = vst [vmem:[#allocation122_spill] sm:$0xff] %v5059_v47  ;;  %v2269_v17 = vsel %vm9423_vm13, %v4240_v58, %v2247_v61  ;;  %v9684_v26 = vrot.slane %v5030_v56, 2  ;;  %v9685_v38 = vrot.slane %v4874_v12, 2  ;;  %v5086_v9 = vmul.f32 2.0, %v4969_v46 }
 0x146   :  { %9682 = vst [vmem:[#allocation123_spill] sm:$0xff] %v5061_v21  ;;  %v9204_v36 = vrot.slane %v5061_v21, 7  ;;  %v5089_v20 = vadd.f32 %v2269_v17, %v2225_v22  ;;  %v9689_v58 = vrot.slane %v4874_v12, 5  ;;  %v9697_v13 = vrot.slane %v4954_v15, 2 }
 0x147   :  { %v688_v42 = vsel %vm682_vm6, %v9685_v38, %v9684_v26  ;;  %9686 = vst [vmem:[#allocation125_spill] sm:$0xff] %v5086_v9  ;;  %v5111_v38 = vmul.f32 0.21300554, %v1514_v43  ;;  %2496 = vrot.lane.b32.xlu1 %v4289_v24, %s3498_s5  ;;  %v5123_v43 = vmul.f32 2.0, %v5001_v50  ;;  %v5154_v53 = vmul.f32 2.0, %v5061_v21 }
 0x148   :  { %9687 = vst [vmem:[#allocation126_spill] sm:$0xff] %v5089_v20  ;;  %v5099_v61 = vsel %vm9421_vm9, %v9204_v36, %v9205_v28  ;;  %2510 = vrot.lane.b32.xlu2 %v4176_v63, %s3498_s5  ;;  %v582_v22 = vsel %vm576_vm5, %v9689_v58, %v9206_v0  ;;  %v745_v36 = vadd.f32 %v688_v42, %v4776_v5  ;;  %v5138_v58 = vpop.f32.mrf.mxu1  ;;  %v9701_v14 = vrot.slane %v5091_v4, 3 }
 0x149   :  { %9688 = vst [vmem:[#allocation127_spill] sm:$0xff] %v5099_v61  ;;  %v1027_v37 = vadd.f32 %v688_v42, %v5030_v56  ;;  %v5126_v26 = vmul.f32 0.26601171, %v582_v22  ;;  %v2165_v9 = vpop.permute.xlu1 %2164  ;;  %v9692_v42 = vrot.slane %v5030_v56, 1  ;;  %v9696_v22 = vrot.slane %v5091_v4, 2 }
 0x14a   :  { %9690 = vst [vmem:[#allocation128_spill] sm:$0xff] %v5111_v38  ;;  %v5147_v60 = vmul.f32 0.0010283801, %v745_v36  ;;  %v2167_v0 = vpop.permute.xlu2 %2166  ;;  %v2487_v55 = vpop.permute.xlu0 %2486  ;;  %v1151_v36 = vsel %vm1139_vm8, %v9702_v31, %v9701_v14  ;;  %v9706_v31 = vrot.slane %v5091_v4, 5 }
 0x14b   :  { %9691 = vst [vmem:[#allocation129_spill] sm:$0xff] %v5123_v43  ;;  %v5135_v28 = vsel %vm9424_vm12, %v9693_v3, %v9692_v42  ;;  %v694_v17 = vsel %vm682_vm6, %v9697_v13, %v9696_v22  ;;  %v5149_v30 = vmul.f32 0.036000773, %v1027_v37  ;;  %v9703_v37 = vrot.slane %v5091_v4, 7 }
 0x14c   :  { %9694 = vst [vmem:[#allocation130_spill] sm:$0xff] %v5135_v28  ;;  %v9704_v13 = vrot.slane %v4954_v15, 7  ;;  %v739_v42 = vadd.f32 %v694_v17, %v4802_v54  ;;  %v2193_v14 = vsel %vm9422_vm11, %v4007_v41, %v2167_v0  ;;  %v1021_v0 = vadd.f32 %v694_v17, %v5091_v4  ;;  %v5194_v54 = vpop.f32.mrf.mxu0 }
 0x14d   :  { %9695 = vst [vmem:[#allocation131_spill] sm:$0xff] %v5138_v58  ;;  %v5222_v51 = vadd.f32 %v4408_v8, %v2193_v14 }
 0x14e   :  { %9698 = vst [vmem:[#allocation132_spill] sm:$0xff] %v5147_v60  ;;  %v1222_v22 = vsel %vm9421_vm9, %v9704_v13, %v9703_v37  ;;  %v9707_v60 = vrot.slane %v4954_v15, 5  ;;  %v5201_v13 = vmul.f32 2.0, %v5089_v20 }
 0x14f   :  { %9699 = vst [vmem:[#allocation133_spill] sm:$0xff] %v5149_v30  ;;  %v5173_v30 = vpop.f32.mrf.mxu3  ;;  %v1268_v38 = vadd.f32 %v1222_v22, %v1151_v36  ;;  %2550 = vrot.lane.b32.xlu1 %v4192_v34, %s3499_s6  ;;  %v774_v36 = vmul.f32 0.0010283801, %v739_v42  ;;  %v9711_v22 = vrot.slane %v5091_v4, 4 }
 0x150   :  { %9700 = vst [vmem:[#allocation134_spill] sm:$0xff] %v5154_v53  ;;  %v588_v37 = vsel %vm576_vm5, %v9707_v60, %v9706_v31  ;;  %2242 = vrot.lane.b32.xlu2 %v4285_v48, %s3499_s6  ;;  %v5191_v53 = vsel %vm9422_vm11, %v4308_v2, %v2487_v55  ;;  %v2192_v55 = vsel %vm9422_vm11, %v4310_v40, %v2165_v9  ;;  %v9712_v48 = vrot.slane %v4954_v15, 4 }
 0x151   :  { %9705 = vst [vmem:[#allocation135_spill] sm:$0xff] %v5173_v30  ;;  %v5207_v17 = vmul.f32 0.26601171, %v588_v37  ;;  %v9713_v31 = vrot.slane %v5091_v4, 6  ;;  %v5226_v9 = vadd.f32 %v4422_v49, %v5191_v53  ;;  %v9716_v37 = vrot.slane %v5173_v30, 2  ;;  %v2235_v42 = vpop.permute.xlu1 %2234 }
 0x152   :  { %9708 = vst [vmem:[#allocation136_spill] sm:$0xff] %v5191_v53  ;;  %v1398_v60 = vsel %vm1386_vm1, %v9712_v48, %v9711_v22  ;;  %v9717_v48 = vrot.slane %v5030_v56, 2  ;;  %v5236_v6 = vadd.f32 %v4383_v44, %v2192_v55  ;;  %v5240_v8 = vmul.f32 0.10936069, %v1268_v38  ;;  %v2491_v44 = vpop.permute.xlu2 %2490  ;;  %v2499_v38 = vpop.permute.xlu0 %2498 }
 0x153   :  { %9709 = vst [vmem:[#allocation137_spill] sm:$0xff] %v5194_v54  ;;  %v1469_v3 = vsel %vm1457_vm10, %v9714_v23, %v9713_v31  ;;  %v5238_v23 = vmul.f32 0.036000773, %v1021_v0  ;;  %v9720_v14 = vrot.slane %v5173_v30, 1  ;;  %v9721_v49 = vrot.slane %v5030_v56, 1 }
 0x154   :  { %9710 = vst [vmem:[#allocation138_spill] sm:$0xff] %v5201_v13  ;;  %v687_v22 = vsel %vm682_vm6, %v9717_v48, %v9716_v37  ;;  %v1515_v34 = vadd.f32 %v1469_v3, %v1398_v60  ;;  %v5254_v0 = vadd.f32 %v774_v36, %v5049_v7  ;;  %v9724_v3 = vrot.slane %v5030_v56, 5 }
 0x155   :  { %9715 = vst [vmem:[#allocation139_spill] sm:$0xff] %v5222_v51  ;;  %v5248_v31 = vsel %vm9424_vm12, %v9721_v49, %v9720_v14  ;;  %v746_v48 = vadd.f32 %v687_v22, %v4874_v12  ;;  %v9723_v14 = vrot.slane %v5173_v30, 5  ;;  %v2263_v36 = vsel %vm9423_vm13, %v4129_v27, %v2235_v42 }
 0x156   :  { %9718 = vst [vmem:[#allocation140_spill] sm:$0xff] %v5236_v6  ;;  %v922_v49 = vadd.f32 %v5135_v28, %v5248_v31  ;;  %v1028_v27 = vadd.f32 %v687_v22, %v5173_v30  ;;  %v9727_v55 = vrot.slane %v5138_v58, 2  ;;  %v9751_v51 = vrot.slane %v4538_v39, 1 }
 0x157   :  { %9719 = vst [vmem:[#allocation141_spill] sm:$0xff] %v5240_v8  ;;  %v5259_v8 = vpop.f32.mrf.mxu1  ;;  %v581_v60 = vsel %vm576_vm5, %v9724_v3, %v9723_v14  ;;  %v5279_v14 = vadd.f32 %v2263_v36, %v4805_v45  ;;  %2538 = vrot.lane.b32.xlu1 %v4289_v24, %s3499_s6  ;;  %v5283_v3 = vmul.f32 0.21300554, %v1515_v34  ;;  %v781_v36 = vmul.f32 0.0010283801, %v746_v48  ;;  %v5299_v24 = vpop.f32.mrf.mxu0 }
 0x158   :  { %9722 = vst [vmem:[#allocation142_spill] sm:$0xff] %v5259_v8  ;;  %v9225_v7 = vrot.slane %v5259_v8, 2  ;;  %2552 = vrot.lane.b32.xlu2 %v4176_v63, %s3499_s6  ;;  %v5295_v45 = vmul.f32 0.26601171, %v581_v60  ;;  %v5301_v22 = vmul.f32 0.007598758, %v922_v49  ;;  %v5310_v60 = vpop.f32.mrf.mxu2 }
 0x159   :  { %9725 = vst [vmem:[#allocation143_spill] sm:$0xff] %v5279_v14  ;;  %v9228_v34 = vrot.slane %v5279_v14, 1  ;;  %v9733_v49 = vrot.slane %v5001_v50, 1  ;;  %v5328_v42 = vmul.f32 0.036000773, %v1028_v27  ;;  %v9739_v27 = vld [vmem:[#allocation55_spill] sm:$0xff] }
 0x15a   :  { %9726 = vst [vmem:[#allocation144_spill] sm:$0xff] %v5283_v3  ;;  %v5293_v37 = vsel %vm682_vm6, %v9727_v55, %v9225_v7  ;;  %v5308_v55 = vsel %vm9422_vm11, %v4354_v35, %v2491_v44  ;;  %v5317_v7 = vsel %vm9422_vm11, %v4321_v62, %v2499_v38  ;;  %v549_v3 = vrot.slane %v5299_v24, 5  ;;  %v9742_v35 = vld [vmem:[#allocation62_spill] sm:$0xff] }
 0x15b   :  { %9728 = vst [vmem:[#allocation145_spill] sm:$0xff] %v5293_v37  ;;  %v1013_v48 = vadd.f32 %v5293_v37, %v5259_v8  ;;  %v5325_v63 = vsel %vm9424_vm12, %v9733_v49, %v9228_v34  ;;  %v5334_v38 = vadd.f32 %v781_v36, %v5126_v26  ;;  %v9737_v49 = vld [vmem:[#allocation54_spill] sm:$0xff]  ;;  %v5344_v44 = vadd.f32 %v9739_v27, %v5317_v7 }
 0x15c   :  { %9729 = vst [vmem:[#allocation146_spill] sm:$0xff] %v5299_v24  ;;  %v5340_v34 = vadd.f32 %v9737_v49, %v5308_v55  ;;  %v9743_v19 = vrot.slane %v9742_v35, 2  ;;  %v9746_v28 = vrot.slane %v5310_v60, 2  ;;  %v9747_v27 = vrot.slane %v5091_v4, 2 }
 0x15d   :  { %9730 = vst [vmem:[#allocation147_spill] sm:$0xff] %v5301_v22  ;;  %v655_v22 = vrot.slane %v5299_v24, 2  ;;  %v5357_v49 = vmul.f32 0.036000773, %v1013_v48  ;;  %v831_v48 = vrot.slane %v5299_v24, 1  ;;  %v9755_v41 = vrot.slane %v9742_v35, 1 }
 0x15e   :  { %9731 = vst [vmem:[#allocation148_spill] sm:$0xff] %v5308_v55  ;;  %v9744_v36 = vmov %v9743_v19  ;;  %v693_v52 = vsel %vm682_vm6, %v9747_v27, %v9746_v28  ;;  %v9753_v27 = vrot.slane %v5194_v54, 5  ;;  %v5407_v21 = vmul.f32 2.0, %v5279_v14 }
 0x15f   :  { %9732 = vst [vmem:[#allocation149_spill] sm:$0xff] %v5317_v7  ;;  %v708_v37 = vsel %vm682_vm6, %v655_v22, %v9744_v36  ;;  %v1022_v43 = vadd.f32 %v693_v52, %v5310_v60  ;;  %v9760_v40 = vrot.slane %v5194_v54, 2  ;;  %v9762_v7 = vrot.slane %v5091_v4, 3 }
 0x160   :  { %9734 = vst [vmem:[#allocation150_spill] sm:$0xff] %v5325_v63  ;;  %v9771_v59 = vrot.slane %v9742_v35, 3 }
 0x161   :  { %9735 = vst [vmem:[#allocation151_spill] sm:$0xff] %v5328_v42  ;;  %v9741_v42 = vrot.slane %v4538_v39, 2 }
 0x162   :  { %9736 = vst [vmem:[#allocation152_spill] sm:$0xff] %v5334_v38  ;;  %v603_v38 = vsel %vm576_vm5, %v9753_v27, %v549_v3 }
 0x163   :  { %9738 = vst [vmem:[#allocation54_spill] sm:$0xff] %v5340_v34  ;;  %v707_v26 = vsel %vm682_vm6, %v9743_v19, %v9741_v42  ;;  %v9748_v42 = vrot.slane %v9742_v35, 5  ;;  %v725_v19 = vadd.f32 %v708_v37, %v5194_v54 }
 0x164   :  { %9740 = vst [vmem:[#allocation55_spill] sm:$0xff] %v5344_v44  ;;  %v726_v55 = vadd.f32 %v707_v26, %v5299_v24  ;;  %v1008_v44 = vadd.f32 %v707_v26, %v4538_v39  ;;  %v9769_v26 = vrot.slane %v5310_v60, 6 }
 0x165   :  { %9745 = vst [vmem:[#allocation153_spill] sm:$0xff] %v5357_v49  ;;  %v602_v36 = vsel %vm576_vm5, %v549_v3, %v9748_v42  ;;  %v9749_v49 = vld [vmem:[#allocation81_spill] sm:$0xff]  ;;  %v9754_v42 = vmov %v9751_v51  ;;  %v9757_v3 = vrot.slane %v5194_v54, 1 }
 0x166   :  { %v9750_v34 = vrot.slane %v9749_v49, 1  ;;  %v883_v49 = vsel %vm9424_vm12, %v9755_v41, %v9754_v42  ;;  %9759 = vst [vmem:[#allocation156_spill] sm:$0xff] %v5407_v21  ;;  %v620_v6 = vmul.f32 0.26601171, %v602_v36  ;;  %v9761_v21 = vrot.slane %v5310_v60, 3 }
 0x167   :  { %v5402_v27 = vsel %vm9424_vm12, %v9757_v3, %v831_v48  ;;  %v760_v3 = vmul.f32 0.0010283801, %v725_v19  ;;  %v9768_v19 = vrot.slane %v5091_v4, 4 }
 0x168   :  { %v5379_v28 = vsel %vm9424_vm12, %v9751_v51, %v9750_v34  ;;  %v9756_v51 = vmov %v9755_v41  ;;  %9758 = vst [vmem:[#allocation155_spill] sm:$0xff] %v5402_v27  ;;  %v740_v41 = vadd.f32 %v693_v52, %v4954_v15  ;;  %v1150_v42 = vsel %vm1139_vm8, %v9762_v7, %v9761_v21  ;;  %v9763_v52 = vld [vmem:[#allocation80_spill] sm:$0xff] }
 0x169   :  { %9752 = vst [vmem:[#allocation154_spill] sm:$0xff] %v5379_v28  ;;  %v884_v34 = vsel %vm9424_vm12, %v831_v48, %v9756_v51  ;;  %v903_v61 = vadd.f32 %v883_v49, %v5379_v28  ;;  %v619_v51 = vmul.f32 0.26601171, %v603_v38  ;;  %v709_v48 = vsel %vm682_vm6, %v9760_v40, %v655_v22  ;;  %v9764_v38 = vld [vmem:[#allocation92_spill] sm:$0xff] }
 0x16a   :  { %v761_v28 = vmul.f32 0.0010283801, %v726_v55  ;;  %v901_v13 = vadd.f32 %v5402_v27, %v884_v34  ;;  %v902_v46 = vadd.f32 %v884_v34, %v883_v49  ;;  %v797_v36 = vadd.f32 %v9764_v38, %v9763_v52 }
 0x16b   :  { %v938_v63 = vmul.f32 0.007598758, %v903_v61  ;;  %v9765_v40 = vrot.slane %v5310_v60, 7  ;;  %v9766_v22 = vrot.slane %v5091_v4, 7  ;;  %v9767_v49 = vrot.slane %v5310_v60, 4 }
 0x16c   :  { %v1112_v7 = vrot.slane %v5299_v24, 3  ;;  %v1183_v61 = vrot.slane %v5299_v24, 7  ;;  %v775_v34 = vmul.f32 0.0010283801, %v740_v41  ;;  %v9770_v52 = vrot.slane %v5091_v4, 6 }
 0x16d   :  { %v1221_v55 = vsel %vm9421_vm9, %v9766_v22, %v9765_v40  ;;  %v1397_v21 = vsel %vm1386_vm1, %v9768_v19, %v9767_v49  ;;  %v1006_v40 = vadd.f32 %v709_v48, %v5299_v24  ;;  %v1007_v22 = vadd.f32 %v708_v37, %v9742_v35 }
 0x16e   :  { %v1468_v38 = vsel %vm1457_vm10, %v9770_v52, %v9769_v26  ;;  %v795_v39 = vadd.f32 %v760_v3, %v619_v51  ;;  %v796_v27 = vadd.f32 %v761_v28, %v620_v6  ;;  %v936_v62 = vmul.f32 0.007598758, %v901_v13 }
 0x16f   :  { %v937_v49 = vmul.f32 0.007598758, %v902_v46  ;;  %v1269_v19 = vadd.f32 %v1221_v55, %v1150_v42  ;;  %v724_v50 = vadd.f32 %v709_v48, %v5028_v18  ;;  %v973_v14 = vadd.f32 %v938_v63, %v797_v36  ;;  %v5471_v42 = vpop.f32.mrf.mxu1 }
 0x170   :  { %v1043_v41 = vmul.f32 0.036000773, %v1008_v44  ;;  %v1165_v53 = vsel %vm1139_vm8, %v1112_v7, %v9771_v59  ;;  %v9772_v26 = vrot.slane %v5194_v54, 3  ;;  %v9773_v37 = vrot.slane %v9742_v35, 7 }
 0x171   :  { %v9774_v46 = vrot.slane %v5194_v54, 7  ;;  %v5465_v13 = vmul.f32 0.036000773, %v1022_v43  ;;  %v5467_v44 = vadd.f32 %v1468_v38, %v1397_v21  ;;  %v9253_v59 = vrot.slane %v5299_v24, 4  ;;  %v5482_v38 = vpop.f32.mrf.mxu3 }
 0x172   :  { %v1166_v52 = vsel %vm1139_vm8, %v9772_v26, %v1112_v7  ;;  %v1236_v6 = vsel %vm9421_vm9, %v1183_v61, %v9773_v37  ;;  %v9252_v28 = vrot.slane %v5299_v24, 6  ;;  %v971_v51 = vadd.f32 %v936_v62, %v795_v39  ;;  %9778 = vst [vmem:[#allocation158_spill] sm:$0xff] %v5482_v38 }
 0x173   :  { %v1237_v63 = vsel %vm9421_vm9, %v9774_v46, %v1183_v61  ;;  %9775 = vst [vmem:[#allocation80_spill] sm:$0xff] %v5467_v44  ;;  %v972_v48 = vadd.f32 %v937_v49, %v796_v27  ;;  %v1041_v3 = vmul.f32 0.036000773, %v1006_v40  ;;  %v1042_v36 = vmul.f32 0.036000773, %v1007_v22  ;;  %v9783_v40 = vld [vmem:[#allocation50_spill] sm:$0xff] }
 0x174   :  { %v5474_v55 = vadd.f32 %v775_v34, %v5207_v17  ;;  %v5476_v7 = vmul.f32 0.10936069, %v1269_v19  ;;  %v1253_v61 = vadd.f32 %v1237_v63, %v1166_v52  ;;  %v1254_v43 = vadd.f32 %v1236_v6, %v1165_v53 }
 0x175   :  { %v5478_v26 = vmul.f32 0.0010283801, %v724_v50  ;;  %v5480_v21 = vadd.f32 %v1043_v41, %v973_v14  ;;  %v557_v37 = vrot.slane %v5471_v42, 5  ;;  %v663_v62 = vrot.slane %v5471_v42, 2  ;;  %v9781_v14 = vld [vmem:[#allocation63_spill] sm:$0xff] }
 0x176   :  { %v9779_v39 = vrot.slane %v9742_v35, 4  ;;  %v9780_v27 = vrot.slane %v9742_v35, 6  ;;  %v9254_v53 = vrot.slane %v5482_v38, 5  ;;  %v9782_v34 = vrot.slane %v9781_v14, 2 }
 0x177   :  { %9776 = vst [vmem:[#allocation92_spill] sm:$0xff] %v5478_v26  ;;  %v9784_v22 = vrot.slane %v9783_v40, 2  ;;  %v1076_v19 = vadd.f32 %v1041_v3, %v971_v51  ;;  %v5505_v41 = vadd.f32 %v1042_v36, %v972_v48  ;;  %v9257_v52 = vrot.slane %v5482_v38, 2 }
 0x178   :  { %9777 = vst [vmem:[#allocation157_spill] sm:$0xff] %v5480_v21  ;;  %v1412_v17 = vsel %vm1386_vm1, %v9253_v59, %v9779_v39  ;;  %v1483_v50 = vsel %vm1457_vm10, %v9252_v28, %v9780_v27  ;;  %v1288_v63 = vmul.f32 0.10936069, %v1253_v61  ;;  %v5512_v39 = vmul.f32 0.10936069, %v1254_v43 }
 0x179   :  { %v699_v49 = vsel %vm682_vm6, %v9784_v22, %v9782_v34  ;;  %9785 = vst [vmem:[#allocation50_spill] sm:$0xff] %v5505_v41  ;;  %v9786_v6 = vmov %v9784_v22  ;;  %v1501_v59 = vadd.f32 %v1483_v50, %v1412_v17  ;;  %v9788_v34 = vrot.slane %v5259_v8, 5  ;;  %v9791_v22 = vld [vmem:[#allocation72_spill] sm:$0xff] }
 0x17a   :  { %v700_v46 = vsel %vm682_vm6, %v663_v62, %v9786_v6  ;;  %9787 = vst [vmem:[#allocation159_spill] sm:$0xff] %v5512_v39  ;;  %v734_v48 = vadd.f32 %v699_v49, %v5471_v42  ;;  %v839_v3 = vrot.slane %v5471_v42, 1  ;;  %v9789_v36 = vrot.slane %v5173_v30, 5 }
 0x17b   :  { %v733_v28 = vadd.f32 %v700_v46, %v5259_v8  ;;  %v595_v51 = vsel %vm576_vm5, %v9788_v34, %v557_v37  ;;  %v9790_v17 = vrot.slane %v9783_v40, 5  ;;  %v9792_v6 = vrot.slane %v9791_v22, 1 }
 0x17c   :  { %v580_v61 = vsel %vm576_vm5, %v9789_v36, %v9254_v53  ;;  %v9793_v34 = vrot.slane %v9781_v14, 1  ;;  %v9794_v44 = vrot.slane %v5173_v30, 2  ;;  %v9796_v53 = vrot.slane %v9783_v40, 1 }
 0x17d   :  { %v594_v50 = vsel %vm576_vm5, %v557_v37, %v9790_v17  ;;  %v768_v39 = vmul.f32 0.0010283801, %v733_v28  ;;  %v5574_v22 = vadd.f32 %v1288_v63, %v1076_v19  ;;  %v5576_v26 = vmul.f32 0.21300554, %v1501_v59 }
 0x17e   :  { %v874_v27 = vsel %vm9424_vm12, %v9793_v34, %v9792_v6  ;;  %v686_v36 = vsel %vm682_vm6, %v9794_v44, %v9257_v52  ;;  %v9795_v43 = vmov %v9793_v34  ;;  %v9797_v17 = vmov %v9796_v53 }
 0x17f   :  { %v875_v37 = vsel %vm9424_vm12, %v9796_v53, %v9795_v43  ;;  %v876_v24 = vsel %vm9424_vm12, %v839_v3, %v9797_v17  ;;  %v9798_v6 = vrot.slane %v5259_v8, 1  ;;  %v9800_v44 = vrot.slane %v5482_v38, 1  ;;  %9803 = vst [vmem:[#allocation161_spill] sm:$0xff] %v5574_v22 }
 0x180   :  { %v9801_v52 = vrot.slane %v5173_v30, 1  ;;  %v627_v43 = vmul.f32 0.26601171, %v595_v51  ;;  %v628_v41 = vmul.f32 0.26601171, %v594_v50  ;;  %v9802_v17 = vrot.slane %v5259_v8, 2 }
 0x181   :  { %v5559_v34 = vsel %vm9424_vm12, %v9798_v6, %v839_v3  ;;  %v769_v3 = vmul.f32 0.0010283801, %v734_v48  ;;  %v911_v6 = vadd.f32 %v875_v37, %v874_v27  ;;  %9804 = vst [vmem:[#allocation162_spill] sm:$0xff] %v5576_v26  ;;  %v747_v51 = vadd.f32 %v686_v36, %v5030_v56  ;;  %v9808_v48 = vld [vmem:[#allocation69_spill] sm:$0xff] }
 0x182   :  { %9799 = vst [vmem:[#allocation160_spill] sm:$0xff] %v5559_v34  ;;  %v5567_v21 = vsel %vm9424_vm12, %v9801_v52, %v9800_v44  ;;  %v701_v35 = vsel %vm682_vm6, %v9802_v17, %v663_v62  ;;  %v909_v18 = vadd.f32 %v5559_v34, %v876_v24  ;;  %v910_v52 = vadd.f32 %v876_v24, %v875_v37  ;;  %v9809_v17 = vld [vmem:[#allocation85_spill] sm:$0xff] }
 0x183   :  { %v5579_v44 = vmul.f32 0.26601171, %v580_v61  ;;  %v923_v28 = vadd.f32 %v5248_v31, %v5567_v21  ;;  %v9806_v50 = vrot.slane %v5259_v8, 5  ;;  %v9807_v62 = vrot.slane %v5138_v58, 5 }
 0x184   :  { %v732_v59 = vadd.f32 %v701_v35, %v5138_v58  ;;  %v803_v63 = vadd.f32 %v768_v39, %v627_v43  ;;  %v805_v24 = vadd.f32 %v9809_v17, %v9808_v48  ;;  %v1014_v61 = vadd.f32 %v701_v35, %v5471_v42  ;;  %v9810_v17 = vld [vmem:[#allocation67_spill] sm:$0xff] }
 0x185   :  { %9805 = vst [vmem:[#allocation163_spill] sm:$0xff] %v5579_v44  ;;  %v596_v19 = vsel %vm576_vm5, %v9807_v62, %v9806_v50  ;;  %v804_v37 = vadd.f32 %v769_v3, %v628_v41  ;;  %v946_v53 = vmul.f32 0.007598758, %v911_v6  ;;  %v1015_v22 = vadd.f32 %v700_v46, %v9783_v40  ;;  %v2249_v6 = vpop.permute.xlu1 %2248 }
 0x186   :  { %v1016_v31 = vadd.f32 %v699_v49, %v9781_v14  ;;  %v944_v26 = vmul.f32 0.007598758, %v909_v18  ;;  %v945_v56 = vmul.f32 0.007598758, %v910_v52  ;;  %v1120_v34 = vrot.slane %v5471_v42, 3  ;;  %v9811_v14 = vld [vmem:[#allocation70_spill] sm:$0xff] }
 0x187   :  { %v1191_v50 = vrot.slane %v5471_v42, 7  ;;  %v782_v62 = vmul.f32 0.0010283801, %v747_v51  ;;  %v1029_v39 = vadd.f32 %v686_v36, %v5482_v38  ;;  %v626_v35 = vmul.f32 0.26601171, %v596_v19 }
 0x188   :  { %v767_v41 = vmul.f32 0.0010283801, %v732_v59  ;;  %v912_v3 = vadd.f32 %v874_v27, %v4767_v1  ;;  %v1049_v46 = vmul.f32 0.036000773, %v1014_v61  ;;  %v981_v49 = vadd.f32 %v946_v53, %v805_v24 }
 0x189   :  { %v1050_v18 = vmul.f32 0.036000773, %v1015_v22  ;;  %v1051_v52 = vmul.f32 0.036000773, %v1016_v31  ;;  %v1263_v44 = vadd.f32 %v9811_v14, %v9810_v17  ;;  %v979_v58 = vadd.f32 %v944_v26, %v803_v63  ;;  %v9816_v14 = vld [vmem:[#allocation19_spill] sm:$0xff] }
 0x18a   :  { %v980_v51 = vadd.f32 %v945_v56, %v804_v37  ;;  %v9812_v36 = vrot.slane %v5259_v8, 3  ;;  %v9813_v19 = vrot.slane %v5259_v8, 7  ;;  %v9814_v27 = vrot.slane %v9783_v40, 3 }
 0x18b   :  { %v9815_v53 = vrot.slane %v9783_v40, 7  ;;  %v1367_v26 = vrot.slane %v5471_v42, 4  ;;  %v2270_v59 = vsel %vm9423_vm13, %v9816_v14, %v2249_v6  ;;  %v5625_v63 = vadd.f32 %v782_v62, %v5295_v45 }
 0x18c   :  { %v1158_v43 = vsel %vm1139_vm8, %v9812_v36, %v1120_v34  ;;  %v1229_v1 = vsel %vm9421_vm9, %v9813_v19, %v1191_v50  ;;  %v1157_v22 = vsel %vm1139_vm8, %v1120_v34, %v9814_v27  ;;  %v5627_v24 = vmul.f32 0.007598758, %v923_v28  ;;  %v2503_v36 = vpop.permute.xlu2 %2502  ;;  %v5635_v19 = vpop.f32.mrf.mxu2 }
 0x18d   :  { %v1228_v56 = vsel %vm9421_vm9, %v1191_v50, %v9815_v53  ;;  %9817 = vst [vmem:[#allocation69_spill] sm:$0xff] %v5625_v63  ;;  %v5629_v61 = vmul.f32 0.036000773, %v1029_v39  ;;  %v1438_v34 = vrot.slane %v5471_v42, 6  ;;  %v1086_v37 = vadd.f32 %v1051_v52, %v981_v49 }
 0x18e   :  { %9818 = vst [vmem:[#allocation85_spill] sm:$0xff] %v5627_v24  ;;  %v1261_v31 = vadd.f32 %v1229_v1, %v1158_v43  ;;  %v1298_v17 = vmul.f32 0.10936069, %v1263_v44  ;;  %v5633_v50 = vadd.f32 %v2270_v59, %v4896_v57  ;;  %v5637_v27 = vadd.f32 %v767_v41, %v626_v35  ;;  %v2505_v1 = vpop.permute.xlu0 %2504 }
 0x18f   :  { %9819 = vst [vmem:[#allocation67_spill] sm:$0xff] %v5629_v61  ;;  %v5639_v6 = vmul.f32 0.007598758, %v912_v3  ;;  %v1084_v45 = vadd.f32 %v1049_v46, %v979_v58  ;;  %v1262_v28 = vadd.f32 %v1228_v56, %v1157_v22  ;;  %v1085_v62 = vadd.f32 %v1050_v18, %v980_v51  ;;  %v9826_v46 = vld [vmem:[#allocation51_spill] sm:$0xff] }
 0x190   :  { %9820 = vst [vmem:[#allocation70_spill] sm:$0xff] %v5637_v27  ;;  %v9822_v39 = vrot.slane %v9783_v40, 4  ;;  %v9823_v44 = vrot.slane %v5259_v8, 4  ;;  %v9267_v43 = vrot.slane %v5633_v50, 1  ;;  %v9824_v35 = vrot.slane %v9783_v40, 6 }
 0x191   :  { %9821 = vst [vmem:[#allocation19_spill] sm:$0xff] %v5639_v6  ;;  %v9825_v58 = vrot.slane %v5259_v8, 6  ;;  %v5661_v49 = vsel %vm9422_vm11, %v9826_v46, %v2503_v36  ;;  %v672_v18 = vrot.slane %v5635_v19, 2  ;;  %v1296_v52 = vmul.f32 0.10936069, %v1261_v31  ;;  %v9832_v36 = vld [vmem:[#allocation57_spill] sm:$0xff] }
 0x192   :  { %v1404_v42 = vsel %vm1386_vm1, %v1367_v26, %v9822_v39  ;;  %v1405_v57 = vsel %vm1386_vm1, %v9823_v44, %v1367_v26  ;;  %v1475_v41 = vsel %vm1457_vm10, %v1438_v34, %v9824_v35  ;;  %9827 = vst [vmem:[#allocation51_spill] sm:$0xff] %v5661_v49  ;;  %v5664_v51 = vadd.f32 %v1298_v17, %v1086_v37 }
 0x193   :  { %v1476_v3 = vsel %vm1457_vm10, %v9825_v58, %v1438_v34  ;;  %v9829_v40 = vrot.slane %v5089_v20, 1  ;;  %v848_v53 = vrot.slane %v5635_v19, 1  ;;  %v1297_v56 = vmul.f32 0.10936069, %v1262_v28  ;;  %v9835_v58 = vld [vmem:[#allocation39_spill] sm:$0xff] }
 0x194   :  { %9828 = vst [vmem:[#allocation164_spill] sm:$0xff] %v5664_v51  ;;  %v566_v26 = vrot.slane %v5635_v19, 5  ;;  %v9830_v14 = vrot.slane %v4685_v10, 2  ;;  %v9831_v34 = vrot.slane %v5310_v60, 2  ;;  %v1508_v31 = vadd.f32 %v1476_v3, %v1405_v57  ;;  %v2251_v8 = vpop.permute.xlu2 %2250 }
 0x195   :  { %v5672_v22 = vsel %vm9424_vm12, %v9829_v40, %v9267_v43  ;;  %v1509_v17 = vadd.f32 %v1475_v41, %v1404_v42  ;;  %v5686_v39 = vadd.f32 %v9832_v36, %v5661_v49  ;;  %v9833_v28 = vrot.slane %v4776_v5, 2  ;;  %v9855_v49 = vld [vmem:[#allocation103_spill] sm:$0xff] }
 0x196   :  { %v691_v59 = vsel %vm682_vm6, %v672_v18, %v9830_v14  ;;  %v692_v37 = vsel %vm682_vm6, %v9831_v34, %v672_v18  ;;  %v9834_v44 = vmov %v9830_v14  ;;  %v5697_v40 = vsel %vm9422_vm11, %v9835_v58, %v2505_v1 }
 0x197   :  { %v690_v35 = vsel %vm682_vm6, %v9834_v44, %v9833_v28  ;;  %v741_v18 = vadd.f32 %v692_v37, %v5091_v4  ;;  %v9836_v42 = vrot.slane %v5310_v60, 1  ;;  %v9837_v57 = vrot.slane %v5091_v4, 1 }
 0x198   :  { %v9839_v14 = vrot.slane %v4954_v15, 1  ;;  %v1331_v36 = vadd.f32 %v1296_v52, %v1084_v45  ;;  %v9840_v1 = vrot.slane %v5310_v60, 5  ;;  %v9841_v28 = vrot.slane %v5091_v4, 5 }
 0x199   :  { %v869_v41 = vsel %vm9424_vm12, %v9837_v57, %v9836_v42  ;;  %v9838_v3 = vmov %v9837_v57  ;;  %v742_v48 = vadd.f32 %v691_v59, %v5310_v60  ;;  %v9842_v43 = vmov %v9836_v42 }
 0x19a   :  { %v870_v34 = vsel %vm9424_vm12, %v9839_v14, %v9838_v3  ;;  %v587_v44 = vsel %vm576_vm5, %v9841_v28, %v9840_v1  ;;  %v868_v42 = vsel %vm9424_vm12, %v9842_v43, %v848_v53  ;;  %v1332_v57 = vadd.f32 %v1297_v56, %v1085_v62 }
 0x19b   :  { %v9843_v15 = vmov %v9840_v1  ;;  %v743_v52 = vadd.f32 %v690_v35, %v5635_v19  ;;  %v9844_v4 = vrot.slane %v4685_v10, 1  ;;  %v9845_v14 = vrot.slane %v4685_v10, 5 }
 0x19c   :  { %v586_v45 = vsel %vm576_vm5, %v9843_v15, %v566_v26  ;;  %v9846_v43 = vrot.slane %v4776_v5, 1  ;;  %v915_v28 = vadd.f32 %v5059_v47, %v870_v34  ;;  %v916_v15 = vadd.f32 %v870_v34, %v869_v41 }
 0x19d   :  { %v867_v3 = vsel %vm9424_vm12, %v848_v53, %v9844_v4  ;;  %v585_v1 = vsel %vm576_vm5, %v566_v26, %v9845_v14  ;;  %v9847_v62 = vmov %v9844_v4  ;;  %v635_v51 = vmul.f32 0.26601171, %v587_v44  ;;  %v5751_v44 = vpop.f32.mrf.mxu3 }
 0x19e   :  { %v866_v56 = vsel %vm9424_vm12, %v9847_v62, %v9846_v43  ;;  %v776_v61 = vmul.f32 0.0010283801, %v741_v18  ;;  %v9848_v24 = vrot.slane %v4874_v12, 1  ;;  %v9849_v53 = vmov %v9846_v43  ;;  %9851 = vst [vmem:[#allocation39_spill] sm:$0xff] %v5751_v44  ;;  %v9852_v18 = vld [vmem:[#allocation56_spill] sm:$0xff] }
 0x19f   :  { %v917_v26 = vadd.f32 %v869_v41, %v868_v42  ;;  %v1543_v14 = vmul.f32 0.21300554, %v1508_v31  ;;  %v636_v63 = vmul.f32 0.26601171, %v586_v45  ;;  %v777_v27 = vmul.f32 0.0010283801, %v742_v48 }
 0x1a0   :  { %v5749_v4 = vsel %vm9424_vm12, %v9849_v53, %v9848_v24  ;;  %v918_v6 = vadd.f32 %v868_v42, %v867_v3  ;;  %v1544_v43 = vmul.f32 0.21300554, %v1509_v17  ;;  %v637_v62 = vmul.f32 0.26601171, %v585_v1 }
 0x1a1   :  { %9850 = vst [vmem:[#allocation57_spill] sm:$0xff] %v5749_v4  ;;  %v778_v47 = vmul.f32 0.0010283801, %v743_v52  ;;  %v919_v34 = vadd.f32 %v867_v3, %v866_v56  ;;  %v5755_v12 = vadd.f32 %v9852_v18, %v5697_v40  ;;  %v920_v54 = vadd.f32 %v866_v56, %v5749_v4 }
 0x1a2   :  { %v950_v24 = vmul.f32 0.007598758, %v915_v28  ;;  %v951_v53 = vmul.f32 0.007598758, %v916_v15  ;;  %v811_v41 = vadd.f32 %v776_v61, %v635_v51  ;;  %v952_v31 = vmul.f32 0.007598758, %v917_v26  ;;  %v5767_v15 = vpop.permute.xlu0 %2180 }
 0x1a3   :  { %v1129_v48 = vrot.slane %v5635_v19, 3  ;;  %v1200_v42 = vrot.slane %v5635_v19, 7  ;;  %v5760_v17 = vadd.f32 %v1543_v14, %v1331_v36  ;;  %v812_v45 = vadd.f32 %v777_v27, %v636_v63 }
 0x1a4   :  { %v953_v52 = vmul.f32 0.007598758, %v918_v6  ;;  %v1023_v3 = vadd.f32 %v692_v37, %v5635_v19  ;;  %v5763_v1 = vadd.f32 %v1544_v43, %v1332_v57  ;;  %v813_v18 = vadd.f32 %v778_v47, %v637_v62  ;;  %v2489_v37 = vpop.permute.xlu1 %2488 }
 0x1a5   :  { %9853 = vst [vmem:[#allocation56_spill] sm:$0xff] %v5760_v17  ;;  %v814_v56 = vadd.f32 %v5023_v33, %v9855_v49  ;;  %v954_v28 = vmul.f32 0.007598758, %v919_v34  ;;  %v955_v61 = vmul.f32 0.007598758, %v920_v54  ;;  %v985_v51 = vadd.f32 %v950_v24, %v5254_v0 }
 0x1a6   :  { %9854 = vst [vmem:[#allocation165_spill] sm:$0xff] %v5763_v1  ;;  %v986_v26 = vadd.f32 %v951_v53, %v5474_v55  ;;  %v1024_v36 = vadd.f32 %v691_v59, %v4685_v10  ;;  %v987_v63 = vadd.f32 %v952_v31, %v811_v41  ;;  %v1025_v27 = vadd.f32 %v690_v35, %v4776_v5 }
 0x1a7   :  { %v9856_v6 = vrot.slane %v5310_v60, 3  ;;  %v9857_v33 = vrot.slane %v5310_v60, 7  ;;  %v9278_v54 = vrot.slane %v5633_v50, 7  ;;  %v5783_v0 = vmul.f32 2.0, %v5633_v50 }
 0x1a8   :  { %v988_v55 = vadd.f32 %v953_v52, %v812_v45  ;;  %v1058_v59 = vmul.f32 0.036000773, %v1023_v3  ;;  %v9858_v35 = vrot.slane %v4685_v10, 3  ;;  %v9859_v14 = vrot.slane %v4685_v10, 7  ;;  %v2529_v45 = vpop.permute.xlu2 %2528  ;;  %v10138_v32 = vld [vmem:[#allocation57_spill] sm:$0xff] }
 0x1a9   :  { %v1149_v47 = vsel %vm1139_vm8, %v9856_v6, %v1129_v48  ;;  %v1220_v49 = vsel %vm9421_vm9, %v9857_v33, %v1200_v42  ;;  %v1376_v62 = vrot.slane %v5635_v19, 4  ;;  %v1447_v34 = vrot.slane %v5635_v19, 6  ;;  %v5802_v33 = vpop.f32.mrf.mxu3 }
 0x1aa   :  { %v1148_v57 = vsel %vm1139_vm8, %v1129_v48, %v9858_v35  ;;  %v1219_v43 = vsel %vm9421_vm9, %v1200_v42, %v9859_v14  ;;  %v989_v24 = vadd.f32 %v954_v28, %v813_v18  ;;  %v990_v53 = vadd.f32 %v955_v61, %v814_v56  ;;  %9862 = vst [vmem:[#allocation167_spill] sm:$0xff] %v5802_v33  ;;  %v9863_v18 = vld [vmem:[#allocation18_spill] sm:$0xff]  ;;  %v9864_v56 = vld [vmem:[#allocation48_spill] sm:$0xff] }
 0x1ab   :  { %v1059_v41 = vmul.f32 0.036000773, %v1024_v36  ;;  %v1270_v31 = vadd.f32 %v1220_v49, %v1149_v47  ;;  %v1060_v52 = vmul.f32 0.036000773, %v1025_v27  ;;  %v5796_v3 = vadd.f32 %v5066_v11, %v985_v51 }
 0x1ac   :  { %v5799_v48 = vadd.f32 %v5238_v23, %v986_v26  ;;  %v1092_v6 = vadd.f32 %v5465_v13, %v987_v63  ;;  %v1093_v42 = vadd.f32 %v1058_v59, %v988_v55  ;;  %v1271_v35 = vadd.f32 %v1219_v43, %v1148_v57 }
 0x1ad   :  { %9860 = vst [vmem:[#allocation103_spill] sm:$0xff] %v5796_v3  ;;  %v9277_v19 = vrot.slane %v5751_v44, 2  ;;  %v166_v28 = vmul.f32 %v9864_v56, %v9863_v18  ;;  %v9865_v61 = vrot.slane %v5310_v60, 4  ;;  %v9866_v51 = vrot.slane %v5310_v60, 6 }
 0x1ae   :  { %9861 = vst [vmem:[#allocation166_spill] sm:$0xff] %v5799_v48  ;;  %v573_v13 = vrot.slane %v5751_v44, 5  ;;  %v2271_v26 = vsel %vm9423_vm13, %v4305_v29, %v2251_v8  ;;  %v5819_v36 = vadd.f32 %v1059_v41, %v989_v24  ;;  %v1305_v63 = vmul.f32 0.10936069, %v1270_v31  ;;  %v2493_v8 = vpop.permute.xlu0 %2492 }
 0x1af   :  { %v1396_v11 = vsel %vm1386_vm1, %v9865_v61, %v1376_v62  ;;  %v1467_v23 = vsel %vm1457_vm10, %v9866_v51, %v1447_v34  ;;  %v173_v27 = vfloor.f32 %v166_v28  ;;  %v5822_v47 = vadd.f32 %v2271_v26, %v4957_v16  ;;  %v2501_v61 = vpop.permute.xlu1 %2500 }
 0x1b0   :  { %9867 = vst [vmem:[#allocation18_spill] sm:$0xff] %v5819_v36  ;;  %v5824_v49 = vadd.f32 %v1060_v52, %v990_v53  ;;  %v5827_v60 = vadd.f32 %v5476_v7, %v1092_v6  ;;  %v9871_v55 = vrot.slane %v4685_v10, 4  ;;  %v9872_v57 = vrot.slane %v4685_v10, 6 }
 0x1b1   :  { %9868 = vst [vmem:[#allocation168_spill] sm:$0xff] %v5822_v47  ;;  %v1517_v14 = vadd.f32 %v1467_v23, %v1396_v11  ;;  %v9873_v16 = vrot.slane %v5482_v38, 2  ;;  %v180_v43 = vmul.f32 28.0, %v173_v27  ;;  %v9276_v24 = vrot.slane %v5822_v47, 7  ;;  %v2541_v27 = vpop.permute.xlu2 %2540 }
 0x1b2   :  { %9869 = vst [vmem:[#allocation169_spill] sm:$0xff] %v5824_v49  ;;  %v1395_v59 = vsel %vm1386_vm1, %v1376_v62, %v9871_v55  ;;  %v1466_v29 = vsel %vm1457_vm10, %v1447_v34, %v9872_v57  ;;  %v5844_v53 = vmul.f32 0.10936069, %v1271_v35  ;;  %v9875_v62 = vrot.slane %v5482_v38, 5 }
 0x1b3   :  { %9870 = vst [vmem:[#allocation170_spill] sm:$0xff] %v5827_v60  ;;  %v685_v7 = vsel %vm682_vm6, %v9873_v16, %v9277_v19  ;;  %v855_v34 = vrot.slane %v5751_v44, 1  ;;  %v1340_v52 = vadd.f32 %v1305_v63, %v1093_v42  ;;  %v1518_v6 = vadd.f32 %v1466_v29, %v1395_v59  ;;  %v9879_v59 = vld [vmem:[#allocation37_spill] sm:$0xff]  ;;  %v9880_v29 = vld [vmem:[#allocation40_spill] sm:$0xff]  ;;  %v9911_v60 = vld [vmem:[#allocation22_spill] sm:$0xff] }
 0x1b4   :  { %9874 = vst [vmem:[#allocation171_spill] sm:$0xff] %v5844_v53  ;;  %v5850_v41 = vsel %vm576_vm5, %v9875_v62, %v573_v13  ;;  %v5855_v28 = vsub.f32 %v9863_v18, %v180_v43  ;;  %v2308_v35 = vsel %vm9421_vm9, %v9278_v54, %v9276_v24  ;;  %v748_v11 = vadd.f32 %v685_v7, %v5173_v30  ;;  %v9885_v24 = vld [vmem:[#allocation136_spill] sm:$0xff] }
 0x1b5   :  { %9876 = vst [vmem:[#allocation172_spill] sm:$0xff] %v5850_v41  ;;  %v5865_v51 = vadd.f32 %v685_v7, %v5751_v44  ;;  %v1552_v26 = vmul.f32 0.21300554, %v1517_v14  ;;  %v2369_v18 = vmul.f32 2.0, %v5822_v47  ;;  %v2556_v63 = vsel %vm9423_vm13, %v4308_v2, %v2529_v45  ;;  %v5885_v7 = vpop.f32.mrf.mxu3  ;;  %v9889_v2 = vld [vmem:[#allocation59_spill] sm:$0xff] }
 0x1b6   :  { %9877 = vst [vmem:[#allocation173_spill] sm:$0xff] %v5855_v28  ;;  %vm264_vm14 = vcmp.lt.f32.partialorder %v5855_v28, 0.5  ;;  %v2200_v57 = vsel %vm9422_vm11, %v9879_v59, %v5767_v15  ;;  %v2515_v14 = vsel %vm9422_vm11, %v9880_v29, %v2489_v37  ;;  %v574_v16 = vrot.slane %v5802_v33, 5  ;;  %v9886_v37 = vld [vmem:[#allocation43_spill] sm:$0xff] }
 0x1b7   :  { %9878 = vst [vmem:[#allocation174_spill] sm:$0xff] %v5865_v51  ;;  %v2355_v55 = vsel %vm264_vm14, %v5822_v47, %v2308_v35  ;;  %v5887_v43 = vmul.f32 0.21300554, %v1518_v6  ;;  %v9280_v62 = vrot.slane %v5885_v7, 5  ;;  %v5893_v35 = vmul.f32 0.0010283801, %v748_v11 }
 0x1b8   :  { %9881 = vst [vmem:[#allocation40_spill] sm:$0xff] %v5885_v7  ;;  %v5890_v45 = vadd.f32 %v2369_v18, %v2355_v55  ;;  %v5896_v15 = vadd.f32 %v5226_v9, %v2556_v63  ;;  %v5899_v42 = vsub.f32 %v2556_v63, %v9885_v24  ;;  %v5904_v23 = vsel %vm9422_vm11, %v9886_v37, %v2493_v8  ;;  %v9891_v55 = vld [vmem:[#allocation60_spill] sm:$0xff]  ;;  %v9892_v11 = vld [vmem:[#allocation47_spill] sm:$0xff]  ;;  %v9895_v24 = vld [vmem:[#allocation58_spill] sm:$0xff] }
 0x1b9   :  { %9882 = vst [vmem:[#allocation175_spill] sm:$0xff] %v5887_v43  ;;  %v5906_v6 = vadd.f32 %v1552_v26, %v1340_v52  ;;  %v5909_v18 = vadd.f32 %v9889_v2, %v2200_v57  ;;  %v2585_v31 = vadd.f32 %v9891_v55, %v2515_v14  ;;  %v5915_v9 = vsel %vm9422_vm11, %v9892_v11, %v2501_v61  ;;  %v2531_v52 = vpop.permute.xlu0 %2530  ;;  %v9893_v2 = vld [vmem:[#allocation61_spill] sm:$0xff]  ;;  %v9902_v37 = vld [vmem:[#allocation143_spill] sm:$0xff] }
 0x1ba   :  { %9883 = vst [vmem:[#allocation176_spill] sm:$0xff] %v5890_v45  ;;  %v578_v8 = vsel %vm576_vm5, %v573_v13, %v574_v16  ;;  %v5926_v55 = vadd.f32 %v9893_v2, %v5904_v23  ;;  %v577_v61 = vsel %vm576_vm5, %v574_v16, %v9280_v62  ;;  %v2591_v26 = vadd.f32 %v9895_v24, %v5915_v9  ;;  %v9898_v62 = vld [vmem:[#allocation29_spill] sm:$0xff]  ;;  %v9906_v2 = vld [vmem:[#allocation52_spill] sm:$0xff] }
 0x1bb   :  { %9884 = vst [vmem:[#allocation177_spill] sm:$0xff] %v5893_v35  ;;  %v5938_v57 = vmul.f32 2.0, %v5899_v42  ;;  %v5941_v63 = vmul.f32 0.26601171, %v578_v8  ;;  %v5946_v16 = vmul.f32 0.26601171, %v577_v61  ;;  %v5950_v19 = vmul.f32 %v9864_v56, %v9898_v62 }
 0x1bc   :  { %9887 = vst [vmem:[#allocation136_spill] sm:$0xff] %v5904_v23  ;;  %v9900_v13 = vld [vmem:[#allocation49_spill] sm:$0xff]  ;;  %v9903_v45 = vrot.slane %v9902_v37, 7  ;;  %v9907_v23 = vrot.slane %v9906_v2, 2  ;;  %v9910_v43 = vrot.slane %v5802_v33, 1  ;;  %v9912_v49 = vrot.slane %v5482_v38, 1 }
 0x1bd   :  { %9888 = vst [vmem:[#allocation178_spill] sm:$0xff] %v5906_v6  ;;  %v9901_v54 = vfloor.f32 %v9900_v13  ;;  %v9908_v6 = vld [vmem:[#allocation41_spill] sm:$0xff]  ;;  %v9915_v36 = vrot.slane %v5885_v7, 2  ;;  %v9916_v48 = vrot.slane %v5802_v33, 2  ;;  %v9926_v5 = vrot.slane %v5899_v42, 7 }
 0x1be   :  { %9890 = vst [vmem:[#allocation59_spill] sm:$0xff] %v5909_v18  ;;  %v9904_v18 = vld [vmem:[#allocation116_spill] sm:$0xff]  ;;  %v9909_v1 = vrot.slane %v9908_v6, 2  ;;  %v861_v53 = vsel %vm9424_vm12, %v9912_v49, %v855_v34  ;;  %v9939_v38 = vld [vmem:[#allocation13_spill] sm:$0xff] }
 0x1bf   :  { %9894 = vst [vmem:[#allocation60_spill] sm:$0xff] %v5926_v55  ;;  %v5944_v55 = vpop.permute.xlu1 %2512  ;;  %v150_v24 = vmul.f32 28.0, %v9901_v54  ;;  %v9905_v59 = vrot.slane %v9904_v18, 7  ;;  %v5973_v54 = vsel %vm9424_vm12, %v855_v34, %v9910_v43  ;;  %v2557_v43 = vsel %vm9423_vm13, %v9880_v29, %v2531_v52 }
 0x1c0   :  { %9896 = vst [vmem:[#allocation47_spill] sm:$0xff] %v5941_v63  ;;  %v5966_v61 = vsel %vm682_vm6, %v9909_v1, %v9907_v23  ;;  %v9283_v1 = vfloor.f32 %v5950_v19  ;;  %v9913_v23 = vld [vmem:[#allocation27_spill] sm:$0xff]  ;;  %v6001_v34 = vadd.f32 %v2585_v31, %v2557_v43  ;;  %v6077_v35 = vadd.f32 %v5567_v21, %v861_v53 }
 0x1c1   :  { %9897 = vst [vmem:[#allocation61_spill] sm:$0xff] %v5946_v16  ;;  %v2316_v8 = vsel %vm9421_vm9, %v9905_v59, %v9903_v45  ;;  %v2562_v59 = vsel %vm9423_vm13, %v9911_v60, %v2541_v27  ;;  %v2547_v45 = vpop.permute.xlu2 %2546  ;;  %v5984_v17 = vsub.f32 %v9913_v23, %v150_v24  ;;  %v5995_v60 = vsel %vm682_vm6, %v9916_v48, %v9915_v36  ;;  %v9917_v24 = vld [vmem:[#allocation55_spill] sm:$0xff]  ;;  %v9919_v36 = vld [vmem:[#allocation150_spill] sm:$0xff]  ;;  %v2543_v10 = vpop.permute.xlu0 %2542 }
 0x1c2   :  { %9899 = vst [vmem:[#allocation58_spill] sm:$0xff] %v5950_v19  ;;  %v5999_v49 = vadd.f32 %v5966_v61, %v5885_v7  ;;  %v6003_v27 = vsub.f32 %v2557_v43, %v2515_v14  ;;  %v6006_v23 = vadd.f32 %v9917_v24, %v2562_v59  ;;  %v151_v29 = vmul.f32 28.0, %v9283_v1  ;;  %v9953_v63 = vld [vmem:[#allocation127_spill] sm:$0xff] }
 0x1c3   :  { %9914 = vst [vmem:[#allocation29_spill] sm:$0xff] %v5984_v17  ;;  %vm269_vm15 = vcmp.gt.f32.partialorder %v5984_v17, 26.5  ;;  %v2565_v48 = vsel %vm9423_vm13, %v9835_v58, %v2547_v45  ;;  %v9290_v14 = vrot.slane %v6001_v34, 1  ;;  %v9921_v58 = vld [vmem:[#allocation24_spill] sm:$0xff]  ;;  %v9923_v43 = vrot.slane %v6001_v34, 7 }
 0x1c4   :  { %9918 = vst [vmem:[#allocation143_spill] sm:$0xff] %v6006_v23  ;;  %v6018_v31 = vsel %vm269_vm15, %v9904_v18, %v9919_v36  ;;  %v6024_v24 = vsub.f32 %v9898_v62, %v151_v29  ;;  %v2795_v1 = vmul.f32 2.0, %v6003_v27  ;;  %v164_v45 = vmul.f32 %v9864_v56, %v9921_v58 }
 0x1c5   :  { %v9922_v36 = vrot.slane %v5896_v15, 1  ;;  %v9924_v62 = vrot.slane %v5896_v15, 7  ;;  %v9925_v3 = vrot.slane %v6003_v27, 7  ;;  %v6049_v51 = vadd.f32 %v5755_v12, %v2565_v48  ;;  %9929 = vst [vmem:[#allocation22_spill] sm:$0xff] %v6077_v35 }
 0x1c6   :  { %9920 = vst [vmem:[#allocation116_spill] sm:$0xff] %v6024_v24  ;;  %vm256_vm0 = vcmp.lt.f32.partialorder %v6024_v24, 0.5  ;;  %v6064_v4 = vsub.f32 %v2565_v48, %v5697_v40  ;;  %v9932_v40 = vld [vmem:[#allocation156_spill] sm:$0xff]  ;;  %v2563_v41 = vsel %vm9423_vm13, %v9892_v11, %v2543_v10  ;;  %v9944_v10 = vrot.slane %v9904_v18, 1  ;;  %v9945_v11 = vld [vmem:[#allocation123_spill] sm:$0xff] }
 0x1c7   :  { %v2652_v52 = vsel %vm9424_vm12, %v9922_v36, %v9290_v14  ;;  %v2694_v29 = vsel %vm9421_vm9, %v9924_v62, %v9923_v43  ;;  %v2778_v30 = vsel %vm9421_vm9, %v9926_v5, %v9925_v3  ;;  %v9927_v14 = vrot.slane %v6003_v27, 1  ;;  %v2237_v16 = vpop.permute.xlu1 %2236 }
 0x1c8   :  { %v6055_v36 = vsel %vm269_vm15, %v5896_v15, %v2652_v52  ;;  %v9928_v43 = vrot.slane %v5899_v42, 1  ;;  %v2347_v5 = vsel %vm256_vm0, %v9902_v37, %v2316_v8  ;;  %v6068_v12 = vsel %vm256_vm0, %v6001_v34, %v2694_v29 }
 0x1c9   :  { %v2781_v3 = vsel %vm256_vm0, %v6003_v27, %v2778_v30  ;;  %v6083_v48 = vadd.f32 %v9932_v40, %v2347_v5  ;;  %v6089_v30 = vadd.f32 %v5995_v60, %v5751_v44  ;;  %v9933_v29 = vrot.slane %v5885_v7, 1  ;;  %v9941_v5 = vld [vmem:[#allocation140_spill] sm:$0xff] }
 0x1ca   :  { %v2848_v62 = vsel %vm9424_vm12, %v9928_v43, %v9927_v14  ;;  %v9930_v14 = vld [vmem:[#allocation149_spill] sm:$0xff]  ;;  %v6085_v8 = vadd.f32 %v2795_v1, %v2781_v3  ;;  %v9936_v1 = vrot.slane %v5089_v20, 7  ;;  %v9937_v3 = vld [vmem:[#allocation115_spill] sm:$0xff]  ;;  %vm255_vm2 = vcmp.lt.f32.partialorder %v5984_v17, 0.5 }
 0x1cb   :  { %v6074_v52 = vsel %vm269_vm15, %v5899_v42, %v2848_v62  ;;  %v6080_v43 = vsub.f32 %v2562_v59, %v9930_v14  ;;  %v9934_v62 = vrot.slane %v5802_v33, 1  ;;  %v6100_v59 = vadd.f32 %v861_v53, %v5973_v54 }
 0x1cc   :  { %v171_v14 = vfloor.f32 %v164_v45  ;;  %v9938_v40 = vrot.slane %v9937_v3, 7  ;;  %v6118_v45 = vsub.f32 %v2563_v41, %v5915_v9  ;;  %v9301_v3 = vrot.slane %v6006_v23, 7 }
 0x1cd   :  { %9931 = vst [vmem:[#allocation27_spill] sm:$0xff] %v6080_v43  ;;  %v6097_v21 = vsel %vm9424_vm12, %v9934_v62, %v9933_v29  ;;  %v2264_v29 = vsel %vm9423_vm13, %v9939_v38, %v2237_v16  ;;  %v6115_v62 = vadd.f32 %v2591_v26, %v2563_v41  ;;  %v9946_v33 = vrot.slane %v9945_v11, 1 }
 0x1ce   :  { %9935 = vst [vmem:[#allocation55_spill] sm:$0xff] %v6100_v59  ;;  %v2310_v35 = vsel %vm9421_vm9, %v9938_v40, %v9936_v1  ;;  %v178_v53 = vmul.f32 28.0, %v171_v14  ;;  %v6121_v59 = vadd.f32 %v2264_v29, %v9941_v5  ;;  %v9943_v40 = vld [vmem:[#allocation53_spill] sm:$0xff]  ;;  %v2801_v5 = vmul.f32 2.0, %v6118_v45 }
 0x1cf   :  { %9940 = vst [vmem:[#allocation150_spill] sm:$0xff] %v6118_v45  ;;  %v2583_v44 = vmul.f32 2.0, %v9943_v40  ;;  %v2415_v38 = vsel %vm9424_vm12, %v9946_v33, %v9944_v10  ;;  %v9298_v41 = vrot.slane %v6115_v62, 1  ;;  %v9302_v9 = vrot.slane %v6115_v62, 7  ;;  %v9947_v29 = vld [vmem:[#allocation25_spill] sm:$0xff]  ;;  %v2555_v33 = vpop.permute.xlu0 %2554 }
 0x1d0   :  { %9942 = vst [vmem:[#allocation24_spill] sm:$0xff] %v6121_v59  ;;  %v6133_v26 = vsub.f32 %v9921_v58, %v178_v53  ;;  %v2527_v14 = vsel %vm9422_vm11, %v9943_v40, %v5944_v55  ;;  %v170_v1 = vmul.f32 %v9864_v56, %v9947_v29  ;;  %v9948_v58 = vrot.slane %v6006_v23, 1 }
 0x1d1   :  { %v2688_v55 = vsel %vm9421_vm9, %v9301_v3, %v9302_v9  ;;  %v2597_v3 = vadd.f32 %v2583_v44, %v2527_v14  ;;  %v9952_v9 = vld [vmem:[#allocation138_spill] sm:$0xff]  ;;  %v9310_v13 = vrot.slane %v6121_v59, 1  ;;  %vm270_vm15 = vcmp.gt.f32.partialorder %v6024_v24, 26.5 }
 0x1d2   :  { %vm262_vm4 = vcmp.lt.f32.partialorder %v6133_v26, 0.5  ;;  %vm276_vm3 = vcmp.gt.f32.partialorder %v6133_v26, 26.5  ;;  %v6154_v53 = vsel %vm9424_vm12, %v9948_v58, %v9298_v41  ;;  %v9950_v58 = vrot.slane %v6118_v45, 7  ;;  %v10017_v26 = vld [vmem:[#allocation47_spill] sm:$0xff] }
 0x1d3   :  { %9949 = vst [vmem:[#allocation149_spill] sm:$0xff] %v6154_v53  ;;  %v2353_v10 = vsel %vm262_vm4, %v5089_v20, %v2310_v35  ;;  %v2451_v16 = vsel %vm276_vm3, %v5089_v20, %v5672_v22  ;;  %v6168_v6 = vsel %vm262_vm4, %v6115_v62, %v2688_v55  ;;  %v9951_v41 = vrot.slane %v6080_v43, 7  ;;  %v6176_v53 = vpop.permute.xlu2 %2182 }
 0x1d4   :  { %v2381_v35 = vadd.f32 %v9952_v9, %v2353_v10  ;;  %v177_v55 = vfloor.f32 %v170_v1  ;;  %v2346_v43 = vsel %vm255_vm2, %v9904_v18, %v9953_v63  ;;  %v9955_v1 = vld [vmem:[#allocation129_spill] sm:$0xff]  ;;  %v6203_v18 = vadd.f32 %v5966_v61, %v9906_v2 }
 0x1d5   :  { %v2772_v23 = vsel %vm9421_vm9, %v9951_v41, %v9950_v58  ;;  %v2569_v41 = vsel %vm9423_vm13, %v9943_v40, %v2555_v33  ;;  %v2507_v58 = vpop.permute.xlu1 %2506  ;;  %v2374_v9 = vadd.f32 %v9955_v1, %v2346_v43  ;;  %v6207_v63 = vadd.f32 %v5995_v60, %v5885_v7 }
 0x1d6   :  { %v2787_v19 = vsel %vm262_vm4, %v6118_v45, %v2772_v23  ;;  %v6190_v44 = vadd.f32 %v2451_v16, %v2381_v35  ;;  %v9954_v23 = vrot.slane %v9902_v37, 1  ;;  %v184_v40 = vmul.f32 28.0, %v177_v55 }
 0x1d7   :  { %v6181_v22 = vadd.f32 %v2801_v5, %v2787_v19  ;;  %v6199_v5 = vadd.f32 %v2597_v3, %v2569_v41  ;;  %v6209_v16 = vsub.f32 %v2569_v41, %v2527_v14  ;;  %v6212_v33 = vmul.f32 0.0010283801, %v5999_v49 }
 0x1d8   :  { %v2413_v19 = vsel %vm9424_vm12, %v9954_v23, %v9310_v13  ;;  %v2458_v10 = vadd.f32 %v6018_v31, %v2374_v9  ;;  %v6219_v61 = vadd.f32 %v5973_v54, %v6097_v21  ;;  %v6222_v35 = vsub.f32 %v9947_v29, %v184_v40 }
 0x1d9   :  { %9956 = vst [vmem:[#allocation156_spill] sm:$0xff] %v6199_v5  ;;  %v9306_v43 = vrot.slane %v6199_v5, 1  ;;  %v9307_v3 = vrot.slane %v6199_v5, 7  ;;  %v9308_v60 = vrot.slane %v6209_v16, 7  ;;  %v9309_v14 = vrot.slane %v6209_v16, 1 }
 0x1da   :  { %9957 = vst [vmem:[#allocation13_spill] sm:$0xff] %v6209_v16  ;;  %v9959_v31 = vrot.slane %v5896_v15, 1  ;;  %v9960_v54 = vrot.slane %v5896_v15, 7  ;;  %v9311_v23 = vrot.slane %v6121_v59, 7  ;;  %vm282_vm7 = vcmp.gt.f32.partialorder %v6222_v35, 26.5 }
 0x1db   :  { %9958 = vst [vmem:[#allocation140_spill] sm:$0xff] %v6222_v35  ;;  %v9961_v9 = vrot.slane %v5899_v42, 7  ;;  %v2472_v55 = vmul.f32 %v2458_v10, %v2458_v10  ;;  %v9967_v10 = vld [vmem:[#allocation28_spill] sm:$0xff]  ;;  %vm9419_vm4 = vcmp.gt.f32.partialorder %v5855_v28, 26.5 }
 0x1dc   :  { %v2653_v41 = vsel %vm9424_vm12, %v9306_v43, %v9959_v31  ;;  %v2695_v29 = vsel %vm9421_vm9, %v9307_v3, %v9960_v54  ;;  %v2239_v31 = vpop.permute.xlu0 %2238  ;;  %v6252_v43 = vsel %vm282_vm7, %v9945_v11, %v2415_v38  ;;  %v9976_v11 = vld [vmem:[#allocation54_spill] sm:$0xff] }
 0x1dd   :  { %v2696_v1 = vsel %vm255_vm2, %v5896_v15, %v2695_v29  ;;  %v2779_v40 = vsel %vm9421_vm9, %v9308_v60, %v9961_v9  ;;  %9962 = vst [vmem:[#allocation53_spill] sm:$0xff] %v6252_v43  ;;  %v6255_v54 = vsel %vm282_vm7, %v6199_v5, %v2653_v41  ;;  %v6262_v29 = vmul.f32 0.0010283801, %v6089_v30  ;;  %v6271_v41 = vpop.permute.xlu2 %2494  ;;  %v9968_v60 = vld [vmem:[#allocation139_spill] sm:$0xff]  ;;  %v9972_v43 = vld [vmem:[#allocation46_spill] sm:$0xff] }
 0x1de   :  { %9963 = vst [vmem:[#allocation25_spill] sm:$0xff] %v6255_v54  ;;  %v2710_v3 = vsub.f32 %v6055_v36, %v2696_v1  ;;  %v2780_v15 = vsel %vm255_vm2, %v5899_v42, %v2779_v40  ;;  %v9964_v9 = vrot.slane %v5899_v42, 1  ;;  %v9966_v40 = vld [vmem:[#allocation42_spill] sm:$0xff] }
 0x1df   :  { %v2808_v49 = vadd.f32 %v5938_v57, %v2780_v15  ;;  %v2265_v30 = vsel %vm9423_vm13, %v9966_v40, %v2239_v31  ;;  %v6281_v57 = vmul.f32 %v9864_v56, %v9967_v10  ;;  %v9970_v31 = vrot.slane %v9902_v37, 7 }
 0x1e0   :  { %v2849_v38 = vsel %vm9424_vm12, %v9309_v14, %v9964_v9  ;;  %v2724_v36 = vmul.f32 %v2710_v3, %v2710_v3  ;;  %v6286_v9 = vadd.f32 %v2265_v30, %v9968_v60  ;;  %v2533_v3 = vpop.permute.xlu1 %2532  ;;  %v9971_v60 = vld [vmem:[#allocation44_spill] sm:$0xff] }
 0x1e1   :  { %v6274_v1 = vsel %vm282_vm7, %v6209_v16, %v2849_v38  ;;  %v2864_v15 = vadd.f32 %v6074_v52, %v2808_v49  ;;  %v9313_v14 = vfloor.f32 %v6281_v57  ;;  %v2315_v40 = vsel %vm9421_vm9, %v9970_v31, %v9311_v23  ;;  %v9973_v23 = vld [vmem:[#allocation32_spill] sm:$0xff] }
 0x1e2   :  { %9965 = vst [vmem:[#allocation138_spill] sm:$0xff] %v6274_v1  ;;  %v2738_v38 = vadd.f32 %v2724_v36, %v2472_v55  ;;  %v2445_v52 = vsel %vm270_vm15, %v9902_v37, %v2413_v19  ;;  %v2580_v30 = vmul.f32 2.0, %v9971_v60  ;;  %v2524_v55 = vsel %vm9422_vm11, %v9971_v60, %v2507_v58 }
 0x1e3   :  { %9969 = vst [vmem:[#allocation127_spill] sm:$0xff] %v6286_v9  ;;  %v2878_v49 = vmul.f32 %v2864_v15, %v2864_v15  ;;  %v9315_v36 = vrot.slane %v6286_v9, 1  ;;  %v152_v42 = vmul.f32 28.0, %v9313_v14  ;;  %v2459_v13 = vadd.f32 %v2445_v52, %v6083_v48  ;;  %v9978_v48 = vld [vmem:[#allocation148_spill] sm:$0xff] }
 0x1e4   :  { %v2558_v31 = vsel %vm9423_vm13, %v9972_v43, %v2533_v3  ;;  %v167_v37 = vmul.f32 %v9864_v56, %v9973_v23  ;;  %v9975_v58 = vrot.slane %v6121_v59, 1  ;;  %v2362_v43 = vmul.f32 2.0, %v6121_v59 }
 0x1e5   :  { %v6312_v19 = vadd.f32 %v2878_v49, %v2738_v38  ;;  %v6321_v14 = vadd.f32 %v9976_v11, %v2558_v31  ;;  %v6324_v52 = vsub.f32 %v2558_v31, %v9978_v48  ;;  %v2594_v3 = vadd.f32 %v2580_v30, %v2524_v55 }
 0x1e6   :  { %v2412_v15 = vsel %vm9424_vm12, %v9975_v58, %v9315_v36  ;;  %v6328_v1 = vsub.f32 %v9967_v10, %v152_v42  ;;  %v174_v38 = vfloor.f32 %v167_v37  ;;  %v9981_v42 = vrot.slane %v6001_v34, 1  ;;  %v2549_v36 = vpop.permute.xlu2 %2548 }
 0x1e7   :  { %9974 = vst [vmem:[#allocation129_spill] sm:$0xff] %v6312_v19  ;;  %v9316_v49 = vrot.slane %v6321_v14, 1  ;;  %v9319_v19 = vrot.slane %v6321_v14, 7  ;;  %v9320_v54 = vrot.slane %v6324_v52, 7  ;;  %v2796_v58 = vmul.f32 2.0, %v6324_v52 }
 0x1e8   :  { %9977 = vst [vmem:[#allocation42_spill] sm:$0xff] %v6321_v14  ;;  %vm257_vm0 = vcmp.lt.f32.partialorder %v6328_v1, 0.5  ;;  %vm9418_vm2 = vcmp.gt.f32.partialorder %v6328_v1, 26.5  ;;  %v181_v31 = vmul.f32 28.0, %v174_v38  ;;  %v9982_v48 = vrot.slane %v6001_v34, 7 }
 0x1e9   :  { %9979 = vst [vmem:[#allocation28_spill] sm:$0xff] %v6324_v52  ;;  %v2348_v30 = vsel %vm257_vm0, %v6121_v59, %v2315_v40  ;;  %v2446_v10 = vsel %vm9418_vm2, %v6121_v59, %v2412_v15  ;;  %v2651_v37 = vsel %vm9424_vm12, %v9981_v42, %v9316_v49  ;;  %v9984_v42 = vrot.slane %v6003_v27, 7 }
 0x1ea   :  { %9980 = vst [vmem:[#allocation139_spill] sm:$0xff] %v6328_v1  ;;  %v2693_v38 = vsel %vm9421_vm9, %v9982_v48, %v9319_v19  ;;  %v2376_v40 = vadd.f32 %v2362_v43, %v2348_v30  ;;  %v2655_v15 = vsel %vm270_vm15, %v6001_v34, %v2651_v37  ;;  %v9985_v43 = vrot.slane %v6324_v52, 1 }
 0x1eb   :  { %v6357_v11 = vsel %vm257_vm0, %v6321_v14, %v2693_v38  ;;  %v2777_v49 = vsel %vm9421_vm9, %v9984_v42, %v9320_v54  ;;  %v2711_v5 = vsub.f32 %v2655_v15, %v6068_v12  ;;  %v9986_v30 = vrot.slane %v6003_v27, 1 }
 0x1ec   :  { %9983 = vst [vmem:[#allocation44_spill] sm:$0xff] %v6357_v11  ;;  %v2782_v48 = vsel %vm257_vm0, %v6324_v52, %v2777_v49  ;;  %v6374_v37 = vsub.f32 %v9973_v23, %v181_v31  ;;  %v6376_v38 = vadd.f32 %v2446_v10, %v2376_v40  ;;  %v2566_v49 = vsel %vm9423_vm13, %v9971_v60, %v2549_v36 }
 0x1ed   :  { %v2847_v34 = vsel %vm9424_vm12, %v9986_v30, %v9985_v43  ;;  %v6378_v19 = vadd.f32 %v2796_v58, %v2782_v48  ;;  %v2677_v15 = vrot.slane %v6049_v51, 7  ;;  %v2473_v42 = vmul.f32 %v2459_v13, %v2459_v13  ;;  %v9991_v48 = vld [vmem:[#allocation26_spill] sm:$0xff] }
 0x1ee   :  { %9987 = vst [vmem:[#allocation46_spill] sm:$0xff] %v6374_v37  ;;  %v2851_v12 = vsel %vm270_vm15, %v6003_v27, %v2847_v34  ;;  %v2725_v54 = vmul.f32 %v2711_v5, %v2711_v5  ;;  %v9324_v23 = vrot.slane %v6064_v4, 7  ;;  %v9327_v31 = vrot.slane %v6064_v4, 1 }
 0x1ef   :  { %9988 = vst [vmem:[#allocation32_spill] sm:$0xff] %v6378_v19  ;;  %v2865_v43 = vadd.f32 %v2851_v12, %v6085_v8  ;;  %v6390_v58 = vadd.f32 %v2594_v3, %v2566_v49  ;;  %v6392_v10 = vsub.f32 %v2566_v49, %v2524_v55  ;;  %v165_v60 = vmul.f32 %v9864_v56, %v9991_v48 }
 0x1f0   :  { %v2739_v40 = vadd.f32 %v2725_v54, %v2473_v42  ;;  %vm9420_vm7 = vcmp.lt.f32.partialorder %v6374_v37, 0.5  ;;  %v9993_v30 = vrot.slane %v6049_v51, 1  ;;  %v9994_v42 = vrot.slane %v5633_v50, 7 }
 0x1f1   :  { %9989 = vst [vmem:[#allocation54_spill] sm:$0xff] %v6390_v58  ;;  %v2879_v27 = vmul.f32 %v2865_v43, %v2865_v43  ;;  %v9323_v13 = vrot.slane %v6390_v58, 1  ;;  %v9322_v8 = vrot.slane %v6390_v58, 7  ;;  %v9321_v5 = vrot.slane %v6392_v10, 7 }
 0x1f2   :  { %9990 = vst [vmem:[#allocation148_spill] sm:$0xff] %v6392_v10  ;;  %v2804_v55 = vmul.f32 2.0, %v6392_v10  ;;  %v9326_v54 = vrot.slane %v6392_v10, 1  ;;  %v172_v3 = vfloor.f32 %v165_v60  ;;  %v9995_v43 = vrot.slane %v5089_v20, 7 }
 0x1f3   :  { %v6401_v36 = vadd.f32 %v2879_v27, %v2739_v40  ;;  %v2643_v34 = vsel %vm9424_vm12, %v9993_v30, %v9323_v13  ;;  %v2685_v12 = vsel %vm9421_vm9, %v2677_v15, %v9322_v8  ;;  %v2769_v49 = vsel %vm9421_vm9, %v9324_v23, %v9321_v5  ;;  %v2545_v27 = vpop.permute.xlu1 %2544 }
 0x1f4   :  { %v2309_v40 = vsel %vm9421_vm9, %v9995_v43, %v9994_v42  ;;  %v2663_v60 = vsel %vm9419_vm4, %v6049_v51, %v2643_v34  ;;  %v6433_v30 = vsel %vm9420_vm7, %v6390_v58, %v2685_v12  ;;  %v2790_v5 = vsel %vm9420_vm7, %v6392_v10, %v2769_v49 }
 0x1f5   :  { %9992 = vst [vmem:[#allocation26_spill] sm:$0xff] %v6401_v36  ;;  %v2839_v42 = vsel %vm9424_vm12, %v9327_v31, %v9326_v54  ;;  %v6444_v43 = vadd.f32 %v2804_v55, %v2790_v5  ;;  %v179_v8 = vmul.f32 28.0, %v172_v3  ;;  %v9998_v12 = vrot.slane %v5822_v47, 1  ;;  %v10002_v31 = vld [vmem:[#allocation51_spill] sm:$0xff] }
 0x1f6   :  { %9996 = vst [vmem:[#allocation179_spill] sm:$0xff] %v6433_v30  ;;  %v2859_v34 = vsel %vm9419_vm4, %v6064_v4, %v2839_v42  ;;  %v9999_v13 = vrot.slane %v5633_v50, 1  ;;  %v6456_v23 = vmul.f32 0.036000773, %v6203_v18  ;;  %v6459_v36 = vmul.f32 0.036000773, %v6207_v63 }
 0x1f7   :  { %9997 = vst [vmem:[#allocation180_spill] sm:$0xff] %v6444_v43  ;;  %v2803_v5 = vmul.f32 2.0, %v6064_v4  ;;  %v2564_v55 = vsel %vm9423_vm13, %v9826_v46, %v2545_v27  ;;  %v186_v42 = vsub.f32 %v9991_v48, %v179_v8  ;;  %v2479_v18 = vmul.f32 %v6190_v44, %v6190_v44  ;;  %v10004_v43 = vld [vmem:[#allocation35_spill] sm:$0xff]  ;;  %v10005_v46 = vld [vmem:[#allocation36_spill] sm:$0xff] }
 0x1f8   :  { %v2406_v49 = vsel %vm9424_vm12, %v9999_v13, %v9998_v12  ;;  %10000 = vst [vmem:[#allocation181_spill] sm:$0xff] %v6456_v23  ;;  %v2606_v54 = vadd.f32 %v5686_v39, %v2564_v55  ;;  %v2620_v13 = vsub.f32 %v2564_v55, %v10002_v31  ;;  %v10003_v12 = vld [vmem:[#allocation30_spill] sm:$0xff]  ;;  %v6477_v10 = vmul.f32 %v9864_v56, %v10004_v43 }
 0x1f9   :  { %10001 = vst [vmem:[#allocation182_spill] sm:$0xff] %v6459_v36  ;;  %v6473_v63 = vmul.f32 %v9864_v56, %v10003_v12  ;;  %v6481_v27 = vmul.f32 %v9864_v56, %v10005_v46  ;;  %vm263_vm15 = vcmp.lt.f32.partialorder %v186_v42, 0.5  ;;  %vm277_vm0 = vcmp.gt.f32.partialorder %v186_v42, 26.5  ;;  %v10136_v36 = vld [vmem:[#allocation105_spill] sm:$0xff]  ;;  %v10137_v23 = vld [vmem:[#allocation130_spill] sm:$0xff] }
 0x1fa   :  { %v2634_v39 = vrot.slane %v2606_v54, 1  ;;  %v2676_v48 = vrot.slane %v2606_v54, 7  ;;  %v2354_v31 = vsel %vm263_vm15, %v5633_v50, %v2309_v40  ;;  %v2452_v44 = vsel %vm277_vm0, %v5633_v50, %v2406_v49 }
 0x1fb   :  { %v2760_v8 = vrot.slane %v2620_v13, 7  ;;  %v2802_v55 = vmul.f32 2.0, %v2620_v13  ;;  %v2382_v3 = vadd.f32 %v5783_v0, %v2354_v31  ;;  %v10006_v30 = vrot.slane %v6049_v51, 1 }
 0x1fc   :  { %v10007_v19 = vrot.slane %v6115_v62, 1  ;;  %v2686_v40 = vsel %vm9421_vm9, %v2676_v48, %v2677_v15  ;;  %v10008_v0 = vrot.slane %v6115_v62, 7  ;;  %v146_v42 = vfloor.f32 %v6473_v63 }
 0x1fd   :  { %v2644_v58 = vsel %vm9424_vm12, %v2634_v39, %v10006_v30  ;;  %v2705_v30 = vsel %vm264_vm14, %v6049_v51, %v2686_v40  ;;  %v2466_v11 = vadd.f32 %v2452_v44, %v2382_v3  ;;  %v10012_v44 = vld [vmem:[#allocation21_spill] sm:$0xff]  ;;  %v10034_v63 = vfloor.f32 %v6281_v57 }
 0x1fe   :  { %v2645_v52 = vsel %vm9424_vm12, %v10007_v19, %v2634_v39  ;;  %v2662_v49 = vsel %vm277_vm0, %v2606_v54, %v2644_v58  ;;  %v2687_v31 = vsel %vm9421_vm9, %v10008_v0, %v2676_v48  ;;  %v6511_v39 = vsub.f32 %v2663_v60, %v2705_v30 }
 0x1ff   :  { %v2661_v50 = vsel %vm276_vm3, %v6115_v62, %v2645_v52  ;;  %v2704_v19 = vsel %vm263_vm15, %v2606_v54, %v2687_v31  ;;  %v10010_v52 = vrot.slane %v6064_v4, 7  ;;  %v10011_v58 = vrot.slane %v6118_v45, 7 }
 0x200   :  { %v2717_v15 = vsub.f32 %v2661_v50, %v6168_v6  ;;  %10009 = vst [vmem:[#allocation51_spill] sm:$0xff] %v6511_v39  ;;  %v2718_v14 = vsub.f32 %v2662_v49, %v2704_v19  ;;  %v2830_v0 = vrot.slane %v2620_v13, 1  ;;  %v2480_v51 = vmul.f32 %v2466_v11, %v2466_v11 }
 0x201   :  { %v2770_v62 = vsel %vm9421_vm9, %v2760_v8, %v10010_v52  ;;  %v2771_v48 = vsel %vm9421_vm9, %v10011_v58, %v2760_v8  ;;  %v142_v6 = vmul.f32 %v9864_v56, %v10012_v44  ;;  %v10013_v49 = vrot.slane %v6064_v4, 1  ;;  %v10069_v56 = vld [vmem:[#allocation167_spill] sm:$0xff] }
 0x202   :  { %v2731_v3 = vmul.f32 %v2717_v15, %v2717_v15  ;;  %v2788_v54 = vsel %vm263_vm15, %v2620_v13, %v2771_v48  ;;  %v2732_v60 = vmul.f32 %v2718_v14, %v2718_v14  ;;  %v2789_v40 = vsel %vm264_vm14, %v6064_v4, %v2770_v62  ;;  %v10015_v14 = vld [vmem:[#allocation16_spill] sm:$0xff] }
 0x203   :  { %v2816_v50 = vadd.f32 %v2802_v55, %v2788_v54  ;;  %v2840_v31 = vsel %vm9424_vm12, %v2830_v0, %v10013_v49  ;;  %v2817_v30 = vadd.f32 %v2803_v5, %v2789_v40  ;;  %v10014_v11 = vrot.slane %v6118_v45, 1 }
 0x204   :  { %v2745_v8 = vadd.f32 %v2731_v3, %v2479_v18  ;;  %v2858_v15 = vsel %vm277_vm0, %v2620_v13, %v2840_v31  ;;  %v2215_v52 = vmul.f32 2.0, %v10015_v14  ;;  %v2746_v58 = vadd.f32 %v2732_v60, %v2480_v51  ;;  %v2509_v60 = vpop.permute.xlu0 %2508 }
 0x205   :  { %v2841_v19 = vsel %vm9424_vm12, %v10014_v11, %v2830_v0  ;;  %v2872_v4 = vadd.f32 %v2858_v15, %v2816_v50  ;;  %v2201_v5 = vsel %vm9422_vm11, %v10015_v14, %v6176_v53  ;;  %v6545_v62 = vadd.f32 %v2859_v34, %v2817_v30  ;;  %v10018_v34 = vld [vmem:[#allocation27_spill] sm:$0xff]  ;;  %v10025_v30 = vld [vmem:[#allocation45_spill] sm:$0xff]  ;;  %v10084_v14 = vld [vmem:[#allocation158_spill] sm:$0xff] }
 0x206   :  { %v2857_v55 = vsel %vm276_vm3, %v6118_v45, %v2841_v19  ;;  %v147_v48 = vfloor.f32 %v6477_v10  ;;  %v148_v0 = vfloor.f32 %v6481_v27  ;;  %v149_v51 = vfloor.f32 %v142_v6  ;;  %v10022_v27 = vld [vmem:[#allocation14_spill] sm:$0xff] }
 0x207   :  { %v2871_v18 = vadd.f32 %v2857_v55, %v6181_v22  ;;  %10016 = vst [vmem:[#allocation30_spill] sm:$0xff] %v6545_v62  ;;  %v2886_v13 = vmul.f32 %v2872_v4, %v2872_v4  ;;  %v6552_v3 = vadd.f32 %v6262_v29, %v10017_v26  ;;  %v6557_v40 = vmul.f32 2.0, %v10018_v34  ;;  %v10028_v4 = vld [vmem:[#allocation49_spill] sm:$0xff] }
 0x208   :  { %v6560_v50 = vadd.f32 %v2215_v52, %v2201_v5  ;;  %v2574_v6 = vmul.f32 2.0, %v10022_v27  ;;  %v6569_v29 = vsel %vm9422_vm11, %v10022_v27, %v6271_v41  ;;  %v153_v31 = vmul.f32 28.0, %v146_v42 }
 0x209   :  { %v2885_v22 = vmul.f32 %v2871_v18, %v2871_v18  ;;  %10019 = vst [vmem:[#allocation35_spill] sm:$0xff] %v6557_v40  ;;  %v6562_v10 = vadd.f32 %v2886_v13, %v2746_v58  ;;  %v6576_v11 = vsel %vm9422_vm11, %v10025_v30, %v2509_v60  ;;  %v154_v19 = vmul.f32 28.0, %v147_v48  ;;  %v10030_v18 = vld [vmem:[#allocation58_spill] sm:$0xff]  ;;  %v10056_v40 = vld [vmem:[#allocation131_spill] sm:$0xff] }
 0x20a   :  { %10020 = vst [vmem:[#allocation36_spill] sm:$0xff] %v6560_v50  ;;  %v155_v15 = vmul.f32 28.0, %v148_v0  ;;  %v156_v52 = vmul.f32 28.0, %v149_v51  ;;  %v6579_v58 = vmul.f32 2.0, %v6209_v16  ;;  %v2581_v55 = vmul.f32 2.0, %v10025_v30 }
 0x20b   :  { %10021 = vst [vmem:[#allocation21_spill] sm:$0xff] %v6562_v10  ;;  %v6571_v49 = vadd.f32 %v2885_v22, %v2745_v8  ;;  %v10029_v5 = vfloor.f32 %v10028_v4  ;;  %v10031_v8 = vfloor.f32 %v10030_v18  ;;  %v6587_v26 = vadd.f32 %v2574_v6, %v6569_v29  ;;  %v10041_v10 = vld [vmem:[#allocation64_spill] sm:$0xff] }
 0x20c   :  { %10023 = vst [vmem:[#allocation47_spill] sm:$0xff] %v6569_v29  ;;  %v6591_v22 = vmul.f32 2.0, %v6286_v9  ;;  %v330_v53 = vmul.f32 4.0, %v10034_v63  ;;  %v6597_v54 = vmul.f32 %v6376_v38, %v6376_v38  ;;  %v6600_v4 = vadd.f32 %v2581_v55, %v6576_v11  ;;  %v10071_v29 = vld [vmem:[#allocation39_spill] sm:$0xff] }
 0x20d   :  { %10024 = vst [vmem:[#allocation183_spill] sm:$0xff] %v6571_v49  ;;  %v328_v41 = vmul.f32 4.0, %v10029_v5  ;;  %v329_v13 = vmul.f32 4.0, %v10031_v8  ;;  %v6603_v5 = vsub.f32 %v10003_v12, %v153_v31  ;;  %v331_v6 = vmul.f32 4.0, %v146_v42  ;;  %v10047_v31 = vld [vmem:[#allocation119_spill] sm:$0xff] }
 0x20e   :  { %10026 = vst [vmem:[#allocation184_spill] sm:$0xff] %v6576_v11  ;;  %v6606_v18 = vsub.f32 %v10004_v43, %v154_v19  ;;  %v6609_v8 = vsub.f32 %v10005_v46, %v155_v15  ;;  %v6612_v57 = vsub.f32 %v10012_v44, %v156_v52  ;;  %v332_v63 = vmul.f32 4.0, %v147_v48  ;;  %v10045_v43 = vld [vmem:[#allocation137_spill] sm:$0xff]  ;;  %v10053_v52 = vld [vmem:[#allocation88_spill] sm:$0xff] }
 0x20f   :  { %10027 = vst [vmem:[#allocation185_spill] sm:$0xff] %v6579_v58  ;;  %v333_v60 = vmul.f32 4.0, %v148_v0  ;;  %v334_v38 = vmul.f32 4.0, %v149_v51  ;;  %v6615_v49 = vadd.f32 %v328_v41, %v10041_v10  ;;  %v6618_v55 = vadd.f32 %v329_v13, %v10041_v10  ;;  %v10050_v0 = vld [vmem:[#allocation101_spill] sm:$0xff] }
 0x210   :  { %10032 = vst [vmem:[#allocation49_spill] sm:$0xff] %v6587_v26  ;;  %v6621_v12 = vadd.f32 %v330_v53, %v10041_v10  ;;  %v10046_v42 = vrot.slane %v10045_v43, 5  ;;  %v10048_v46 = vrot.slane %v10047_v31, 5  ;;  %v10051_v51 = vrot.slane %v10050_v0, 5 }
 0x211   :  { %10033 = vst [vmem:[#allocation58_spill] sm:$0xff] %v6591_v22  ;;  %v10054_v41 = vrot.slane %v10053_v52, 5  ;;  %v6642_v13 = vadd.f32 %v331_v6, %v10041_v10  ;;  %v10057_v11 = vrot.slane %v10056_v40, 5  ;;  %v10068_v22 = vrot.slane %v5885_v7, 5 }
 0x212   :  { %10035 = vst [vmem:[#allocation186_spill] sm:$0xff] %v6597_v54  ;;  %v604_v44 = vsel %vm576_vm5, %v10048_v46, %v10046_v42  ;;  %v10049_v48 = vmov %v10048_v46  ;;  %v10052_v15 = vmov %v10051_v51  ;;  %v10058_v42 = vld [vmem:[#allocation117_spill] sm:$0xff]  ;;  %v10070_v59 = vrot.slane %v10069_v56, 2 }
 0x213   :  { %10036 = vst [vmem:[#allocation187_spill] sm:$0xff] %v6600_v4  ;;  %v605_v19 = vsel %vm576_vm5, %v10051_v51, %v10049_v48  ;;  %v606_v53 = vsel %vm576_vm5, %v10054_v41, %v10052_v15  ;;  %v10059_v46 = vrot.slane %v10058_v42, 5  ;;  %v10061_v48 = vld [vmem:[#allocation97_spill] sm:$0xff]  ;;  %v10072_v26 = vrot.slane %v10071_v29, 2  ;;  %v10135_v29 = vld [vmem:[#allocation122_spill] sm:$0xff] }
 0x214   :  { %10037 = vst [vmem:[#allocation188_spill] sm:$0xff] %v6603_v5  ;;  %v10062_v51 = vrot.slane %v10061_v48, 5  ;;  %v10064_v15 = vld [vmem:[#allocation81_spill] sm:$0xff]  ;;  %v617_v28 = vmul.f32 0.26601171, %v605_v19  ;;  %v6731_v34 = vadd.f32 %v332_v63, %v10041_v10 }
 0x215   :  { %10038 = vst [vmem:[#allocation189_spill] sm:$0xff] %v6606_v18  ;;  %v597_v4 = vsel %vm576_vm5, %v10059_v46, %v10057_v11  ;;  %v10060_v30 = vmov %v10059_v46  ;;  %v10065_v41 = vrot.slane %v10064_v15, 5  ;;  %v10066_v54 = vld [vmem:[#allocation41_spill] sm:$0xff]  ;;  %v616_v46 = vmul.f32 0.26601171, %v606_v53 }
 0x216   :  { %10039 = vst [vmem:[#allocation190_spill] sm:$0xff] %v6609_v8  ;;  %v598_v58 = vsel %vm576_vm5, %v10062_v51, %v10060_v30  ;;  %v10063_v16 = vmov %v10062_v51  ;;  %v10067_v35 = vrot.slane %v10066_v54, 5  ;;  %v6674_v30 = vsel %vm682_vm6, %v10072_v26, %v10070_v59 }
 0x217   :  { %10040 = vst [vmem:[#allocation191_spill] sm:$0xff] %v6612_v57  ;;  %v599_v6 = vsel %vm576_vm5, %v10065_v41, %v10063_v16  ;;  %v10073_v51 = vrot.slane %v10056_v40, 2  ;;  %v10074_v16 = vrot.slane %v10058_v42, 2  ;;  %v618_v47 = vmul.f32 0.26601171, %v604_v44 }
 0x218   :  { %10042 = vst [vmem:[#allocation64_spill] sm:$0xff] %v6615_v49  ;;  %v611_v11 = vsel %vm576_vm5, %v10068_v22, %v10067_v35  ;;  %v10076_v22 = vrot.slane %v10061_v48, 2  ;;  %v10077_v59 = vrot.slane %v10045_v43, 2  ;;  %v10078_v26 = vrot.slane %v10047_v31, 2 }
 0x219   :  { %10043 = vst [vmem:[#allocation192_spill] sm:$0xff] %v6618_v55  ;;  %v6682_v41 = vsel %vm682_vm6, %v10074_v16, %v10073_v51  ;;  %v10075_v35 = vmov %v10074_v16  ;;  %v10080_v44 = vrot.slane %v10050_v0, 2  ;;  %v10081_v16 = vrot.slane %v10066_v54, 2  ;;  %v10090_v55 = vld [vmem:[#allocation78_spill] sm:$0xff] }
 0x21a   :  { %10044 = vst [vmem:[#allocation193_spill] sm:$0xff] %v6621_v12  ;;  %v6690_v53 = vsel %vm682_vm6, %v10076_v22, %v10075_v35  ;;  %v6698_v9 = vsel %vm682_vm6, %v10078_v26, %v10077_v59  ;;  %v10079_v51 = vmov %v10078_v26  ;;  %v10082_v35 = vrot.slane %v5885_v7, 2 }
 0x21b   :  { %10055 = vst [vmem:[#allocation194_spill] sm:$0xff] %v6642_v13  ;;  %v6706_v19 = vsel %vm682_vm6, %v10080_v44, %v10079_v51  ;;  %v723_v59 = vadd.f32 %v6698_v9, %v10050_v0  ;;  %v729_v26 = vadd.f32 %v6690_v53, %v10064_v15  ;;  %v730_v51 = vadd.f32 %v6682_v41, %v10061_v48  ;;  %v10083_v44 = vld [vmem:[#allocation145_spill] sm:$0xff] }
 0x21c   :  { %v6714_v22 = vsel %vm682_vm6, %v10082_v35, %v10081_v16  ;;  %v722_v27 = vadd.f32 %v6706_v19, %v10053_v52  ;;  %v731_v50 = vadd.f32 %v10083_v44, %v10058_v42  ;;  %v749_v37 = vadd.f32 %v6674_v30, %v10084_v14  ;;  %10085 = vst [vmem:[#allocation145_spill] sm:$0xff] %v6731_v34  ;;  %v10087_v44 = vld [vmem:[#allocation172_spill] sm:$0xff]  ;;  %v10091_v34 = vld [vmem:[#allocation99_spill] sm:$0xff] }
 0x21d   :  { %v623_v16 = vmul.f32 0.26601171, %v599_v6  ;;  %v624_v35 = vmul.f32 0.26601171, %v598_v58  ;;  %v751_v62 = vadd.f32 %v6714_v22, %v10069_v56  ;;  %v758_v39 = vmul.f32 0.0010283801, %v723_v59 }
 0x21e   :  { %v757_v45 = vmul.f32 0.0010283801, %v722_v27  ;;  %v764_v20 = vmul.f32 0.0010283801, %v729_v26  ;;  %v765_v8 = vmul.f32 0.0010283801, %v730_v51  ;;  %v6734_v18 = vadd.f32 %v333_v60, %v10041_v10 }
 0x21f   :  { %v625_v5 = vmul.f32 0.26601171, %v597_v4  ;;  %v643_v1 = vmul.f32 0.26601171, %v10087_v44  ;;  %v766_v57 = vmul.f32 0.0010283801, %v731_v50  ;;  %v6738_v6 = vadd.f32 %v334_v38, %v10041_v10 }
 0x220   :  { %10086 = vst [vmem:[#allocation195_spill] sm:$0xff] %v6734_v18  ;;  %v646_v58 = vmul.f32 0.26601171, %v611_v11  ;;  %v784_v13 = vmul.f32 0.0010283801, %v749_v37  ;;  %v10089_v59 = vld [vmem:[#allocation66_spill] sm:$0xff]  ;;  %v6744_v51 = vadd.f32 %v758_v39, %v617_v28  ;;  %v6749_v4 = vadd.f32 %v757_v45, %v616_v46 }
 0x221   :  { %10088 = vst [vmem:[#allocation172_spill] sm:$0xff] %v6738_v6  ;;  %v786_v12 = vmul.f32 0.0010283801, %v751_v62  ;;  %v788_v63 = vadd.f32 %v10090_v55, %v10089_v59  ;;  %v10092_v27 = vld [vmem:[#allocation113_spill] sm:$0xff]  ;;  %v10093_v60 = vld [vmem:[#allocation92_spill] sm:$0xff]  ;;  %v10094_v50 = vld [vmem:[#allocation91_spill] sm:$0xff]  ;;  %v6755_v38 = vadd.f32 %v764_v20, %v623_v16  ;;  %v6757_v37 = vadd.f32 %v765_v8, %v624_v35 }
 0x222   :  { %v791_v26 = vadd.f32 %v10092_v27, %v10091_v34  ;;  %v6747_v18 = vadd.f32 %v10093_v60, %v618_v47  ;;  %v10095_v44 = vld [vmem:[#allocation108_spill] sm:$0xff]  ;;  %v6759_v62 = vadd.f32 %v766_v57, %v625_v5  ;;  %v10096_v55 = vld [vmem:[#allocation107_spill] sm:$0xff]  ;;  %v10097_v11 = vld [vmem:[#allocation121_spill] sm:$0xff]  ;;  %v6773_v27 = vadd.f32 %v784_v13, %v643_v1 }
 0x223   :  { %v6753_v10 = vadd.f32 %v10095_v44, %v10094_v50  ;;  %v6763_v34 = vadd.f32 %v10097_v11, %v10096_v55  ;;  %v10098_v28 = vld [vmem:[#allocation114_spill] sm:$0xff]  ;;  %v10099_v39 = vld [vmem:[#allocation132_spill] sm:$0xff]  ;;  %v10100_v45 = vld [vmem:[#allocation163_spill] sm:$0xff]  ;;  %v10104_v5 = vrot.slane %v10053_v52, 1  ;;  %v10110_v1 = vrot.slane %v10047_v31, 1 }
 0x224   :  { %v6767_v47 = vadd.f32 %v10099_v39, %v10098_v28  ;;  %v10101_v46 = vld [vmem:[#allocation177_spill] sm:$0xff]  ;;  %v10105_v8 = vld [vmem:[#allocation75_spill] sm:$0xff]  ;;  %v10111_v13 = vrot.slane %v10050_v0, 1  ;;  %v6827_v49 = vadd.f32 %v6212_v33, %v646_v58  ;;  %v10130_v25 = vrot.slane %v10066_v54, 1 }
 0x225   :  { %v6771_v59 = vadd.f32 %v10101_v46, %v10100_v45  ;;  %v10102_v20 = vld [vmem:[#allocation61_spill] sm:$0xff]  ;;  %v10106_v57 = vrot.slane %v10105_v8, 1  ;;  %v10113_v28 = vmov %v10104_v5  ;;  %v10115_v46 = vrot.slane %v9906_v2, 1  ;;  %v10132_v52 = vld [vmem:[#allocation155_spill] sm:$0xff] }
 0x226   :  { %v6776_v16 = vadd.f32 %v786_v12, %v10102_v20  ;;  %v10108_v50 = vld [vmem:[#allocation65_spill] sm:$0xff]  ;;  %v887_v12 = vsel %vm9424_vm12, %v10111_v13, %v10110_v1  ;;  %v10112_v11 = vmov %v10111_v13  ;;  %v10119_v1 = vrot.slane %v10064_v15, 1  ;;  %10122 = vst [vmem:[#allocation78_spill] sm:$0xff] %v6827_v49 }
 0x227   :  { %v889_v35 = vsel %vm9424_vm12, %v10106_v57, %v10104_v5  ;;  %v10107_v60 = vmov %v10106_v57  ;;  %v10109_v44 = vrot.slane %v10108_v50, 1  ;;  %v888_v39 = vsel %vm9424_vm12, %v10113_v28, %v10112_v11 }
 0x228   :  { %10103 = vst [vmem:[#allocation66_spill] sm:$0xff] %v6776_v16  ;;  %v10116_v5 = vmov %v10115_v46  ;;  %v10117_v57 = vrot.slane %v10066_v54, 1  ;;  %v10120_v11 = vrot.slane %v10045_v43, 1  ;;  %v10121_v28 = vrot.slane %v10047_v31, 1  ;;  %v10144_v16 = vld [vmem:[#allocation22_spill] sm:$0xff] }
 0x229   :  { %v890_v55 = vsel %vm9424_vm12, %v10109_v44, %v10107_v60  ;;  %v10114_v45 = vmov %v10109_v44  ;;  %v10118_v44 = vrot.slane %v10061_v48, 1  ;;  %v10131_v2 = vrot.slane %v5885_v7, 1 }
 0x22a   :  { %v891_v20 = vsel %vm9424_vm12, %v10115_v46, %v10114_v45  ;;  %v892_v60 = vsel %vm9424_vm12, %v10117_v57, %v10116_v5  ;;  %v886_v45 = vsel %vm9424_vm12, %v10121_v28, %v10120_v11  ;;  %v10123_v5 = vrot.slane %v10056_v40, 1  ;;  %v10127_v28 = vld [vmem:[#allocation142_spill] sm:$0xff] }
 0x22b   :  { %v881_v13 = vsel %vm9424_vm12, %v10119_v1, %v10118_v44  ;;  %v894_v46 = vadd.f32 %v892_v60, %v891_v20  ;;  %v895_v6 = vadd.f32 %v891_v20, %v890_v55  ;;  %v10124_v57 = vrot.slane %v10058_v42, 1 }
 0x22c   :  { %v10126_v1 = vrot.slane %v10061_v48, 1  ;;  %v896_v11 = vadd.f32 %v890_v55, %v889_v35  ;;  %v10128_v20 = vrot.slane %v10127_v28, 1  ;;  %v10129_v33 = vmov %v10123_v5  ;;  %v10133_v55 = vld [vmem:[#allocation154_spill] sm:$0xff] }
 0x22d   :  { %v879_v24 = vsel %vm9424_vm12, %v10124_v57, %v10123_v5  ;;  %v10125_v44 = vmov %v10124_v57  ;;  %v893_v5 = vsel %vm9424_vm12, %v10131_v2, %v10130_v25  ;;  %v897_v57 = vadd.f32 %v889_v35, %v888_v39 }
 0x22e   :  { %v880_v17 = vsel %vm9424_vm12, %v10126_v1, %v10125_v44  ;;  %v878_v58 = vsel %vm9424_vm12, %v10129_v33, %v10128_v20  ;;  %v898_v50 = vadd.f32 %v888_v39, %v887_v12  ;;  %v899_v8 = vadd.f32 %v887_v12, %v886_v45  ;;  %v10134_v20 = vld [vmem:[#allocation160_spill] sm:$0xff] }
 0x22f   :  { %v900_v44 = vadd.f32 %v886_v45, %v10132_v52  ;;  %v904_v1 = vadd.f32 %v10133_v55, %v881_v13  ;;  %v929_v0 = vmul.f32 0.007598758, %v894_v46  ;;  %v905_v15 = vadd.f32 %v881_v13, %v880_v17  ;;  %v10139_v39 = vld [vmem:[#allocation96_spill] sm:$0xff]  ;;  %v10140_v45 = vld [vmem:[#allocation19_spill] sm:$0xff] }
 0x230   :  { %v906_v48 = vadd.f32 %v880_v17, %v879_v24  ;;  %v907_v28 = vadd.f32 %v879_v24, %v878_v58  ;;  %v930_v14 = vmul.f32 0.007598758, %v895_v6  ;;  %v908_v33 = vadd.f32 %v878_v58, %v10134_v20 }
 0x231   :  { %v914_v7 = vadd.f32 %v10136_v36, %v10135_v29  ;;  %v921_v25 = vadd.f32 %v10138_v32, %v10137_v23  ;;  %v931_v2 = vmul.f32 0.007598758, %v896_v11  ;;  %v927_v35 = vadd.f32 %v893_v5, %v6097_v21  ;;  %v10141_v36 = vld [vmem:[#allocation90_spill] sm:$0xff]  ;;  %v10142_v23 = vld [vmem:[#allocation109_spill] sm:$0xff] }
 0x232   :  { %v928_v12 = vadd.f32 %v893_v5, %v892_v60  ;;  %v932_v52 = vmul.f32 0.007598758, %v897_v57  ;;  %v6863_v46 = vadd.f32 %v10140_v45, %v10139_v39  ;;  %v933_v17 = vmul.f32 0.007598758, %v898_v50  ;;  %v10143_v21 = vld [vmem:[#allocation102_spill] sm:$0xff]  ;;  %v10145_v50 = vld [vmem:[#allocation55_spill] sm:$0xff] }
 0x233   :  { %v934_v24 = vmul.f32 0.007598758, %v899_v8  ;;  %v935_v6 = vmul.f32 0.007598758, %v900_v44  ;;  %v964_v13 = vadd.f32 %v929_v0, %v788_v63  ;;  %v939_v58 = vmul.f32 0.007598758, %v904_v1 }
 0x234   :  { %v940_v55 = vmul.f32 0.007598758, %v905_v15  ;;  %v941_v20 = vmul.f32 0.007598758, %v906_v48  ;;  %v965_v29 = vadd.f32 %v930_v14, %v10141_v36  ;;  %v942_v49 = vmul.f32 0.007598758, %v907_v28 }
 0x235   :  { %v943_v32 = vmul.f32 0.007598758, %v908_v33  ;;  %v948_v11 = vmul.f32 0.007598758, %v10142_v23  ;;  %v966_v60 = vadd.f32 %v931_v2, %v10143_v21  ;;  %v949_v5 = vmul.f32 0.007598758, %v914_v7 }
 0x236   :  { %v956_v57 = vmul.f32 0.007598758, %v921_v25  ;;  %v959_v39 = vmul.f32 0.007598758, %v10144_v16  ;;  %v967_v45 = vadd.f32 %v932_v52, %v791_v26  ;;  %v960_v8 = vmul.f32 0.007598758, %v10145_v50 }
 0x237   :  { %v961_v0 = vmul.f32 0.007598758, %v6219_v61  ;;  %v962_v63 = vmul.f32 0.007598758, %v927_v35  ;;  %v968_v48 = vadd.f32 %v933_v17, %v6749_v4  ;;  %v963_v15 = vmul.f32 0.007598758, %v928_v12 }
 0x238   :  { %v969_v14 = vadd.f32 %v934_v24, %v6744_v51  ;;  %v970_v28 = vadd.f32 %v935_v6, %v6747_v18  ;;  %v974_v44 = vadd.f32 %v939_v58, %v6753_v10  ;;  %v975_v7 = vadd.f32 %v940_v55, %v6755_v38  ;;  %v10146_v16 = vld [vmem:[#allocation70_spill] sm:$0xff]  ;;  %v10147_v25 = vld [vmem:[#allocation111_spill] sm:$0xff]  ;;  %v10148_v10 = vld [vmem:[#allocation152_spill] sm:$0xff] }
 0x239   :  { %v976_v1 = vadd.f32 %v941_v20, %v6757_v37  ;;  %v977_v26 = vadd.f32 %v942_v49, %v6759_v62  ;;  %v978_v33 = vadd.f32 %v943_v32, %v10146_v16  ;;  %v983_v61 = vadd.f32 %v948_v11, %v10147_v25  ;;  %v10149_v38 = vld [vmem:[#allocation147_spill] sm:$0xff]  ;;  %v10150_v62 = vld [vmem:[#allocation69_spill] sm:$0xff]  ;;  %v10152_v17 = vld [vmem:[#allocation112_spill] sm:$0xff] }
 0x23a   :  { %v984_v2 = vadd.f32 %v949_v5, %v6763_v34  ;;  %v1004_v4 = vadd.f32 %v6706_v19, %v10047_v31  ;;  %v1005_v18 = vadd.f32 %v6698_v9, %v10045_v43  ;;  %v991_v51 = vadd.f32 %v956_v57, %v6767_v47  ;;  %v10151_v12 = vld [vmem:[#allocation85_spill] sm:$0xff]  ;;  %v10154_v32 = vld [vmem:[#allocation66_spill] sm:$0xff] }
 0x23b   :  { %v992_v35 = vadd.f32 %v10149_v38, %v10148_v10  ;;  %v1011_v49 = vadd.f32 %v6690_v53, %v10058_v42  ;;  %v1012_v37 = vadd.f32 %v6682_v41, %v10056_v40  ;;  %v993_v34 = vadd.f32 %v10151_v12, %v10150_v62  ;;  %v10153_v41 = vld [vmem:[#allocation106_spill] sm:$0xff] }
 0x23c   :  { %v994_v52 = vadd.f32 %v959_v39, %v6771_v59  ;;  %v1031_v19 = vadd.f32 %v6674_v30, %v10069_v56  ;;  %v1033_v9 = vadd.f32 %v6714_v22, %v10066_v54  ;;  %v995_v47 = vadd.f32 %v960_v8, %v6773_v27  ;;  %v10155_v23 = vld [vmem:[#allocation78_spill] sm:$0xff]  ;;  %v10156_v30 = vld [vmem:[#allocation181_spill] sm:$0xff]  ;;  %v10158_v22 = vld [vmem:[#allocation79_spill] sm:$0xff] }
 0x23d   :  { %v1038_v24 = vmul.f32 0.036000773, %v10152_v17  ;;  %v1039_v6 = vmul.f32 0.036000773, %v1004_v4  ;;  %v1040_v53 = vmul.f32 0.036000773, %v1005_v18  ;;  %v996_v58 = vadd.f32 %v961_v0, %v6552_v3 }
 0x23e   :  { %v1045_v55 = vmul.f32 0.036000773, %v10153_v41  ;;  %v1046_v20 = vmul.f32 0.036000773, %v1011_v49  ;;  %v1047_v36 = vmul.f32 0.036000773, %v1012_v37  ;;  %v997_v59 = vadd.f32 %v962_v63, %v10154_v32 }
 0x23f   :  { %v998_v11 = vadd.f32 %v963_v15, %v10155_v23  ;;  %v6906_v21 = vadd.f32 %v10156_v30, %v964_v13  ;;  %v6909_v5 = vadd.f32 %v10158_v22, %v965_v29  ;;  %v10160_v27 = vld [vmem:[#allocation174_spill] sm:$0xff]  ;;  %v1066_v39 = vmul.f32 0.036000773, %v1031_v19  ;;  %v10161_v8 = vld [vmem:[#allocation89_spill] sm:$0xff]  ;;  %v10163_v0 = vld [vmem:[#allocation100_spill] sm:$0xff] }
 0x240   :  { %v1065_v57 = vmul.f32 0.036000773, %v10160_v27  ;;  %v1068_v50 = vmul.f32 0.036000773, %v1033_v9  ;;  %v6913_v3 = vadd.f32 %v10161_v8, %v966_v60  ;;  %v6916_v16 = vadd.f32 %v10163_v0, %v967_v45  ;;  %v10168_v13 = vld [vmem:[#allocation93_spill] sm:$0xff]  ;;  %v10175_v45 = vld [vmem:[#allocation86_spill] sm:$0xff] }
 0x241   :  { %10157 = vst [vmem:[#allocation99_spill] sm:$0xff] %v6906_v21  ;;  %v6918_v25 = vadd.f32 %v1038_v24, %v968_v48  ;;  %v6920_v63 = vadd.f32 %v1039_v6, %v969_v14  ;;  %v6922_v15 = vadd.f32 %v1040_v53, %v970_v28  ;;  %v6925_v4 = vadd.f32 %v10168_v13, %v974_v44  ;;  %v10173_v60 = vld [vmem:[#allocation153_spill] sm:$0xff]  ;;  %v10177_v14 = vld [vmem:[#allocation95_spill] sm:$0xff]  ;;  %v10179_v28 = vld [vmem:[#allocation110_spill] sm:$0xff] }
 0x242   :  { %10159 = vst [vmem:[#allocation113_spill] sm:$0xff] %v6909_v5  ;;  %v6927_v29 = vadd.f32 %v1045_v55, %v975_v7  ;;  %v6929_v18 = vadd.f32 %v1046_v20, %v976_v1  ;;  %v6931_v10 = vadd.f32 %v1047_v36, %v977_v26  ;;  %v6934_v38 = vadd.f32 %v10173_v60, %v978_v33  ;;  %v10181_v44 = vld [vmem:[#allocation118_spill] sm:$0xff]  ;;  %v10183_v1 = vld [vmem:[#allocation133_spill] sm:$0xff]  ;;  %v10185_v26 = vld [vmem:[#allocation151_spill] sm:$0xff] }
 0x243   :  { %10162 = vst [vmem:[#allocation92_spill] sm:$0xff] %v6913_v3  ;;  %v6938_v48 = vadd.f32 %v10175_v45, %v6863_v46  ;;  %v6941_v49 = vadd.f32 %v10177_v14, %v983_v61  ;;  %v6944_v37 = vadd.f32 %v10179_v28, %v984_v2  ;;  %v6947_v7 = vadd.f32 %v10181_v44, %v991_v51  ;;  %v10187_v33 = vld [vmem:[#allocation67_spill] sm:$0xff]  ;;  %v10191_v61 = vld [vmem:[#allocation182_spill] sm:$0xff]  ;;  %v10194_v6 = vld [vmem:[#allocation40_spill] sm:$0xff] }
 0x244   :  { %10164 = vst [vmem:[#allocation91_spill] sm:$0xff] %v6916_v16  ;;  %v6950_v62 = vadd.f32 %v10183_v1, %v992_v35  ;;  %v6953_v12 = vadd.f32 %v10185_v26, %v993_v34  ;;  %v6956_v19 = vadd.f32 %v10187_v33, %v994_v52  ;;  %v6958_v46 = vadd.f32 %v1065_v57, %v995_v47  ;;  %v10200_v55 = vld [vmem:[#allocation39_spill] sm:$0xff]  ;;  %v10214_v60 = vld [vmem:[#allocation104_spill] sm:$0xff]  ;;  %v10217_v44 = vld [vmem:[#allocation94_spill] sm:$0xff] }
 0x245   :  { %10165 = vst [vmem:[#allocation108_spill] sm:$0xff] %v6918_v25  ;;  %v6960_v9 = vadd.f32 %v1066_v39, %v996_v58  ;;  %v6963_v17 = vadd.f32 %v10191_v61, %v997_v59  ;;  %v1118_v2 = vrot.slane %v10056_v40, 3  ;;  %v6966_v51 = vadd.f32 %v1068_v50, %v998_v11  ;;  %v10204_v59 = vld [vmem:[#allocation158_spill] sm:$0xff]  ;;  %v10208_v22 = vld [vmem:[#allocation135_spill] sm:$0xff]  ;;  %v10211_v50 = vld [vmem:[#allocation120_spill] sm:$0xff] }
 0x246   :  { %10166 = vst [vmem:[#allocation107_spill] sm:$0xff] %v6920_v63  ;;  %v1104_v35 = vrot.slane %v10066_v54, 3  ;;  %v1110_v24 = vrot.slane %v10047_v31, 3  ;;  %v1117_v34 = vrot.slane %v10058_v42, 3  ;;  %v10195_v52 = vrot.slane %v10194_v6, 3  ;;  %v10220_v61 = vld [vmem:[#allocation87_spill] sm:$0xff] }
 0x247   :  { %10167 = vst [vmem:[#allocation121_spill] sm:$0xff] %v6922_v15  ;;  %v10196_v47 = vrot.slane %v10069_v56, 3  ;;  %v10201_v20 = vrot.slane %v10200_v55, 3  ;;  %v10205_v23 = vrot.slane %v10204_v59, 3  ;;  %v10209_v27 = vrot.slane %v10208_v22, 3 }
 0x248   :  { %10169 = vst [vmem:[#allocation114_spill] sm:$0xff] %v6925_v4  ;;  %v10212_v8 = vrot.slane %v10211_v50, 3  ;;  %v10215_v45 = vrot.slane %v10214_v60, 3  ;;  %v10218_v1 = vrot.slane %v10217_v44, 3  ;;  %v10256_v63 = vrot.slane %v10194_v6, 3 }
 0x249   :  { %10170 = vst [vmem:[#allocation132_spill] sm:$0xff] %v6927_v29  ;;  %v6977_v58 = vsel %vm1139_vm8, %v10196_v47, %v10195_v52  ;;  %v10199_v41 = vmov %v10196_v47  ;;  %v10203_v32 = vmov %v10201_v20  ;;  %v10207_v30 = vmov %v10205_v23 }
 0x24a   :  { %10171 = vst [vmem:[#allocation163_spill] sm:$0xff] %v6929_v18  ;;  %v6985_v36 = vsel %vm1139_vm8, %v10201_v20, %v10199_v41  ;;  %v6993_v11 = vsel %vm1139_vm8, %v10205_v23, %v10203_v32  ;;  %v7001_v57 = vsel %vm1139_vm8, %v10209_v27, %v10207_v30  ;;  %v10210_v39 = vmov %v10209_v27  ;;  %v10222_v41 = vld [vmem:[#allocation98_spill] sm:$0xff]  ;;  %v10224_v32 = vld [vmem:[#allocation84_spill] sm:$0xff]  ;;  %v10252_v18 = vld [vmem:[#allocation65_spill] sm:$0xff] }
 0x24b   :  { %10172 = vst [vmem:[#allocation177_spill] sm:$0xff] %v6931_v10  ;;  %v7009_v0 = vsel %vm1139_vm8, %v10212_v8, %v10210_v39  ;;  %v10213_v13 = vmov %v10212_v8  ;;  %v10216_v28 = vmov %v10215_v45  ;;  %v10219_v33 = vmov %v10218_v1  ;;  %v10227_v39 = vld [vmem:[#allocation72_spill] sm:$0xff] }
 0x24c   :  { %10174 = vst [vmem:[#allocation61_spill] sm:$0xff] %v6934_v38  ;;  %v7017_v14 = vsel %vm1139_vm8, %v10215_v45, %v10213_v13  ;;  %v1146_v26 = vsel %vm1139_vm8, %v10218_v1, %v10216_v28  ;;  %v10221_v52 = vrot.slane %v10220_v61, 3  ;;  %v10223_v20 = vrot.slane %v10222_v41, 3  ;;  %v10229_v45 = vld [vmem:[#allocation142_spill] sm:$0xff] }
 0x24d   :  { %10176 = vst [vmem:[#allocation155_spill] sm:$0xff] %v6938_v48  ;;  %v10225_v23 = vrot.slane %v10224_v32, 3  ;;  %v10228_v8 = vrot.slane %v10227_v39, 3  ;;  %v10230_v28 = vrot.slane %v10229_v45, 3  ;;  %v10253_v29 = vrot.slane %v10252_v18, 3 }
 0x24e   :  { %10178 = vst [vmem:[#allocation154_spill] sm:$0xff] %v6941_v49  ;;  %v1147_v47 = vsel %vm1139_vm8, %v10221_v52, %v10219_v33  ;;  %v1160_v33 = vsel %vm1139_vm8, %v1117_v34, %v1118_v2  ;;  %v10231_v52 = vld [vmem:[#allocation97_spill] sm:$0xff]  ;;  %v1188_v25 = vrot.slane %v10058_v42, 7  ;;  %v10264_v3 = vrot.slane %v10208_v22, 7 }
 0x24f   :  { %10180 = vst [vmem:[#allocation160_spill] sm:$0xff] %v6944_v37  ;;  %v1153_v30 = vsel %vm1139_vm8, %v10225_v23, %v10223_v20  ;;  %v10226_v27 = vmov %v10225_v23  ;;  %v1159_v1 = vsel %vm1139_vm8, %v1118_v2, %v10230_v28  ;;  %v10272_v22 = vrot.slane %v10220_v61, 7 }
 0x250   :  { %10182 = vst [vmem:[#allocation122_spill] sm:$0xff] %v6947_v7  ;;  %v1154_v13 = vsel %vm1139_vm8, %v10228_v8, %v10226_v27 }
 0x251   :  { %10184 = vst [vmem:[#allocation105_spill] sm:$0xff] %v6950_v62 }
 0x252   :  { %10186 = vst [vmem:[#allocation130_spill] sm:$0xff] %v6953_v12  ;;  %v10240_v12 = vld [vmem:[#allocation62_spill] sm:$0xff] }
 0x253   :  { %10188 = vst [vmem:[#allocation57_spill] sm:$0xff] %v6956_v19  ;;  %v10241_v62 = vrot.slane %v10240_v12, 3 }
 0x254   :  { %10189 = vst [vmem:[#allocation96_spill] sm:$0xff] %v6958_v46  ;;  %v10237_v46 = vld [vmem:[#allocation71_spill] sm:$0xff] }
 0x255   :  { %10190 = vst [vmem:[#allocation19_spill] sm:$0xff] %v6960_v9  ;;  %v10238_v19 = vrot.slane %v10237_v46, 3 }
 0x256   :  { %10192 = vst [vmem:[#allocation90_spill] sm:$0xff] %v6963_v17  ;;  %v10234_v17 = vld [vmem:[#allocation81_spill] sm:$0xff] }
 0x257   :  { %10193 = vst [vmem:[#allocation109_spill] sm:$0xff] %v6966_v51  ;;  %v10232_v51 = vrot.slane %v10231_v52, 3  ;;  %v10235_v9 = vrot.slane %v10234_v17, 3  ;;  %v10239_v2 = vmov %v10238_v19 }
 0x258   :  { %10198 = vst [vmem:[#allocation102_spill] sm:$0xff] %v6977_v58 }
 0x259   :  { %10202 = vst [vmem:[#allocation22_spill] sm:$0xff] %v6985_v36  ;;  %v1161_v20 = vsel %vm1139_vm8, %v10232_v51, %v1117_v34  ;;  %v10233_v23 = vmov %v10232_v51  ;;  %v10236_v8 = vmov %v10235_v9  ;;  %v1164_v51 = vsel %vm1139_vm8, %v10241_v62, %v10239_v2  ;;  %v10249_v62 = vld [vmem:[#allocation75_spill] sm:$0xff] }
 0x25a   :  { %10206 = vst [vmem:[#allocation55_spill] sm:$0xff] %v6993_v11  ;;  %v1162_v27 = vsel %vm1139_vm8, %v10235_v9, %v10233_v23  ;;  %v1163_v28 = vsel %vm1139_vm8, %v10238_v19, %v10236_v8  ;;  %v10242_v34 = vrot.slane %v10045_v43, 3  ;;  %v10243_v9 = vld [vmem:[#allocation101_spill] sm:$0xff]  ;;  %v10246_v19 = vld [vmem:[#allocation88_spill] sm:$0xff]  ;;  %v10250_v2 = vrot.slane %v10249_v62, 3 }
 0x25b   :  { %v10244_v23 = vrot.slane %v10243_v9, 3  ;;  %v10247_v8 = vrot.slane %v10246_v19, 3 }
 0x25c   :  { %v1167_v7 = vsel %vm1139_vm8, %v1110_v24, %v10242_v34  ;;  %v10251_v34 = vmov %v10250_v2 }
 0x25d   :  { %v1168_v37 = vsel %vm1139_vm8, %v10244_v23, %v1110_v24  ;;  %v10245_v49 = vmov %v10244_v23  ;;  %v10248_v38 = vmov %v10247_v8  ;;  %v1171_v24 = vsel %vm1139_vm8, %v10253_v29, %v10251_v34  ;;  %v10254_v23 = vld [vmem:[#allocation52_spill] sm:$0xff] }
 0x25e   :  { %v1169_v48 = vsel %vm1139_vm8, %v10247_v8, %v10245_v49  ;;  %v1170_v10 = vsel %vm1139_vm8, %v10250_v2, %v10248_v38  ;;  %v10255_v4 = vrot.slane %v10254_v23, 3  ;;  %v1181_v49 = vrot.slane %v10047_v31, 7 }
 0x25f   :  { %v1189_v8 = vrot.slane %v10056_v40, 7  ;;  %v1174_v38 = vsel %vm1139_vm8, %v10256_v63, %v1104_v35  ;;  %v1175_v2 = vrot.slane %v10066_v54, 7  ;;  %v10257_v29 = vrot.slane %v10194_v6, 7 }
 0x260   :  { %v1173_v15 = vsel %vm1139_vm8, %v1104_v35, %v10255_v4  ;;  %v10258_v34 = vrot.slane %v10069_v56, 7  ;;  %v10260_v40 = vrot.slane %v10200_v55, 7  ;;  %v10262_v35 = vrot.slane %v10204_v59, 7 }
 0x261   :  { %v10266_v56 = vrot.slane %v10211_v50, 7  ;;  %v10268_v55 = vrot.slane %v10214_v60, 7  ;;  %v10270_v59 = vrot.slane %v10217_v44, 7  ;;  %v10274_v50 = vrot.slane %v10224_v32, 7 }
 0x262   :  { %v1211_v4 = vsel %vm9421_vm9, %v10258_v34, %v10257_v29  ;;  %v10259_v31 = vmov %v10258_v34  ;;  %v10261_v63 = vmov %v10260_v40  ;;  %v10263_v54 = vmov %v10262_v35 }
 0x263   :  { %v1212_v16 = vsel %vm9421_vm9, %v10260_v40, %v10259_v31  ;;  %v1213_v42 = vsel %vm9421_vm9, %v10262_v35, %v10261_v63  ;;  %v1214_v29 = vsel %vm9421_vm9, %v10264_v3, %v10263_v54  ;;  %v10265_v34 = vmov %v10264_v3 }
 0x264   :  { %v1215_v40 = vsel %vm9421_vm9, %v10266_v56, %v10265_v34  ;;  %v10267_v31 = vmov %v10266_v56  ;;  %v10269_v35 = vmov %v10268_v55  ;;  %v10271_v3 = vmov %v10270_v59 }
 0x265   :  { %v1216_v63 = vsel %vm9421_vm9, %v10268_v55, %v10267_v31  ;;  %v1217_v54 = vsel %vm9421_vm9, %v10270_v59, %v10269_v35  ;;  %v1218_v56 = vsel %vm9421_vm9, %v10272_v22, %v10271_v3  ;;  %v10273_v34 = vrot.slane %v10222_v41, 7 }
 0x266   :  { %v10275_v31 = vmov %v10274_v50  ;;  %v10276_v60 = vrot.slane %v10227_v39, 7  ;;  %v10277_v35 = vrot.slane %v10229_v45, 7  ;;  %v1231_v22 = vsel %vm9421_vm9, %v1188_v25, %v1189_v8 }
 0x267   :  { %v1224_v55 = vsel %vm9421_vm9, %v10274_v50, %v10273_v34  ;;  %v10278_v3 = vrot.slane %v10243_v9, 7  ;;  %v10280_v39 = vrot.slane %v10246_v19, 7  ;;  %v10282_v45 = vrot.slane %v10249_v62, 7 }
 0x268   :  { %v1225_v59 = vsel %vm9421_vm9, %v10276_v60, %v10275_v31  ;;  %v1230_v61 = vsel %vm9421_vm9, %v1189_v8, %v10277_v35  ;;  %v10284_v32 = vrot.slane %v10252_v18, 7  ;;  %v10285_v41 = vrot.slane %v10254_v23, 7 }
 0x269   :  { %v1239_v50 = vsel %vm9421_vm9, %v10278_v3, %v1181_v49  ;;  %v10279_v34 = vmov %v10278_v3  ;;  %v10281_v31 = vmov %v10280_v39  ;;  %v10283_v8 = vmov %v10282_v45 }
 0x26a   :  { %v1240_v60 = vsel %vm9421_vm9, %v10280_v39, %v10279_v34  ;;  %v1241_v35 = vsel %vm9421_vm9, %v10282_v45, %v10281_v31  ;;  %v1242_v3 = vsel %vm9421_vm9, %v10284_v32, %v10283_v8  ;;  %v1244_v44 = vsel %vm9421_vm9, %v1175_v2, %v10285_v41 }
 0x26b   :  { %v10286_v39 = vrot.slane %v10231_v52, 7  ;;  %v10287_v34 = vrot.slane %v10234_v17, 7  ;;  %v10289_v31 = vrot.slane %v10237_v46, 7  ;;  %v10291_v8 = vrot.slane %v10240_v12, 7  ;;  %v10294_v12 = vld [vmem:[#allocation76_spill] sm:$0xff]  ;;  %v10295_v46 = vld [vmem:[#allocation77_spill] sm:$0xff] }
 0x26c   :  { %v10292_v23 = vrot.slane %v10045_v43, 7  ;;  %v10293_v17 = vrot.slane %v10194_v6, 7  ;;  %v1247_v9 = vadd.f32 %v10295_v46, %v10294_v12  ;;  %v1250_v43 = vadd.f32 %v1240_v60, %v1169_v48  ;;  %v10297_v6 = vld [vmem:[#allocation83_spill] sm:$0xff]  ;;  %v10299_v46 = vld [vmem:[#allocation22_spill] sm:$0xff] }
 0x26d   :  { %v1233_v19 = vsel %vm9421_vm9, %v10287_v34, %v10286_v39  ;;  %v10288_v45 = vmov %v10287_v34  ;;  %v10290_v32 = vmov %v10289_v31  ;;  %v1232_v34 = vsel %vm9421_vm9, %v10286_v39, %v1188_v25  ;;  %v10296_v39 = vld [vmem:[#allocation82_spill] sm:$0xff] }
 0x26e   :  { %v1234_v18 = vsel %vm9421_vm9, %v10289_v31, %v10288_v45  ;;  %v1235_v41 = vsel %vm9421_vm9, %v10291_v8, %v10290_v32  ;;  %v1238_v62 = vsel %vm9421_vm9, %v1181_v49, %v10292_v23  ;;  %v1245_v45 = vsel %vm9421_vm9, %v10293_v17, %v1175_v2 }
 0x26f   :  { %v1246_v31 = vadd.f32 %v1244_v44, %v1173_v15  ;;  %v1248_v32 = vadd.f32 %v1242_v3, %v1171_v24  ;;  %v1249_v8 = vadd.f32 %v1241_v35, %v1170_v10  ;;  %v1251_v5 = vadd.f32 %v1239_v50, %v1168_v37 }
 0x270   :  { %v1252_v21 = vadd.f32 %v1238_v62, %v1167_v7  ;;  %v1255_v23 = vadd.f32 %v1235_v41, %v1164_v51  ;;  %v1256_v49 = vadd.f32 %v1234_v18, %v1163_v28  ;;  %v1257_v52 = vadd.f32 %v1233_v19, %v1162_v27  ;;  %v10298_v18 = vld [vmem:[#allocation55_spill] sm:$0xff]  ;;  %v10306_v19 = vld [vmem:[#allocation113_spill] sm:$0xff] }
 0x271   :  { %v1258_v58 = vadd.f32 %v1232_v34, %v1161_v20  ;;  %v1259_v36 = vadd.f32 %v1231_v22, %v1160_v33  ;;  %v1260_v25 = vadd.f32 %v1230_v61, %v1159_v1  ;;  %v1264_v11 = vadd.f32 %v10297_v6, %v10296_v39  ;;  %v10300_v1 = vld [vmem:[#allocation102_spill] sm:$0xff]  ;;  %v10318_v34 = vld [vmem:[#allocation157_spill] sm:$0xff] }
 0x272   :  { %v1265_v53 = vadd.f32 %v1225_v59, %v1154_v13  ;;  %v1266_v17 = vadd.f32 %v1224_v55, %v1153_v30  ;;  %v1272_v15 = vadd.f32 %v1218_v56, %v1147_v47  ;;  %v1281_v44 = vmul.f32 0.10936069, %v1246_v31  ;;  %v10301_v30 = vld [vmem:[#allocation50_spill] sm:$0xff]  ;;  %v10302_v47 = vld [vmem:[#allocation159_spill] sm:$0xff]  ;;  %v10312_v59 = vld [vmem:[#allocation108_spill] sm:$0xff] }
 0x273   :  { %v1273_v2 = vadd.f32 %v1217_v54, %v1146_v26  ;;  %v1274_v12 = vadd.f32 %v1216_v63, %v7017_v14  ;;  %v1275_v10 = vadd.f32 %v1215_v40, %v7009_v0  ;;  %v1282_v48 = vmul.f32 0.10936069, %v1247_v9  ;;  %v10304_v0 = vld [vmem:[#allocation99_spill] sm:$0xff]  ;;  %v10320_v31 = vld [vmem:[#allocation114_spill] sm:$0xff]  ;;  %v10326_v39 = vld [vmem:[#allocation177_spill] sm:$0xff] }
 0x274   :  { %v1276_v37 = vadd.f32 %v1214_v29, %v7001_v57  ;;  %v1277_v7 = vadd.f32 %v1213_v42, %v10298_v18  ;;  %v1278_v33 = vadd.f32 %v1212_v16, %v10299_v46  ;;  %v1283_v61 = vmul.f32 0.10936069, %v1248_v32  ;;  %v10337_v46 = vld [vmem:[#allocation124_spill] sm:$0xff] }
 0x275   :  { %v1279_v20 = vadd.f32 %v1211_v4, %v10300_v1  ;;  %v1280_v6 = vadd.f32 %v1245_v45, %v1174_v38  ;;  %v1284_v13 = vmul.f32 0.10936069, %v1249_v8  ;;  %v7243_v27 = vadd.f32 %v10302_v47, %v10301_v30  ;;  %v10308_v4 = vld [vmem:[#allocation92_spill] sm:$0xff]  ;;  %v10340_v1 = vld [vmem:[#allocation141_spill] sm:$0xff] }
 0x276   :  { %v1285_v26 = vmul.f32 0.10936069, %v1250_v43  ;;  %v1286_v14 = vmul.f32 0.10936069, %v1251_v5  ;;  %v1287_v28 = vmul.f32 0.10936069, %v1252_v21  ;;  %v7246_v51 = vadd.f32 %v1281_v44, %v10304_v0 }
 0x277   :  { %10303 = vst [vmem:[#allocation70_spill] sm:$0xff] %v7243_v27  ;;  %v1290_v57 = vmul.f32 0.10936069, %v1255_v23  ;;  %v1291_v9 = vmul.f32 0.10936069, %v1256_v49  ;;  %v7249_v16 = vadd.f32 %v1282_v48, %v10306_v19  ;;  %v7252_v29 = vadd.f32 %v1283_v61, %v10308_v4  ;;  %v10310_v5 = vld [vmem:[#allocation91_spill] sm:$0xff] }
 0x278   :  { %10305 = vst [vmem:[#allocation111_spill] sm:$0xff] %v7246_v51  ;;  %v1292_v42 = vmul.f32 0.10936069, %v1257_v52  ;;  %v1293_v62 = vmul.f32 0.10936069, %v1258_v58  ;;  %v7255_v21 = vadd.f32 %v1284_v13, %v10310_v5  ;;  %v7258_v52 = vadd.f32 %v1285_v26, %v10312_v59  ;;  %v10322_v8 = vld [vmem:[#allocation132_spill] sm:$0xff] }
 0x279   :  { %10307 = vst [vmem:[#allocation152_spill] sm:$0xff] %v7249_v16  ;;  %v1294_v24 = vmul.f32 0.10936069, %v1259_v36  ;;  %v1295_v38 = vmul.f32 0.10936069, %v1260_v25  ;;  %v10314_v36 = vld [vmem:[#allocation107_spill] sm:$0xff]  ;;  %v7267_v45 = vadd.f32 %v1290_v57, %v10318_v34  ;;  %v7270_v32 = vadd.f32 %v1291_v9, %v10320_v31 }
 0x27a   :  { %10309 = vst [vmem:[#allocation147_spill] sm:$0xff] %v7252_v29  ;;  %v1299_v40 = vmul.f32 0.10936069, %v1264_v11  ;;  %v1300_v63 = vmul.f32 0.10936069, %v1265_v53  ;;  %v7261_v60 = vadd.f32 %v1286_v14, %v10314_v36  ;;  %v10316_v53 = vld [vmem:[#allocation121_spill] sm:$0xff]  ;;  %v7273_v23 = vadd.f32 %v1292_v42, %v10322_v8 }
 0x27b   :  { %v1301_v43 = vmul.f32 0.10936069, %v1266_v17  ;;  %10311 = vst [vmem:[#allocation69_spill] sm:$0xff] %v7255_v21  ;;  %v1307_v54 = vmul.f32 0.10936069, %v1272_v15  ;;  %v7264_v41 = vadd.f32 %v1287_v28, %v10316_v53  ;;  %v10324_v49 = vld [vmem:[#allocation163_spill] sm:$0xff]  ;;  %v7279_v17 = vadd.f32 %v1294_v24, %v10326_v39 }
 0x27c   :  { %v1308_v56 = vmul.f32 0.10936069, %v1273_v2  ;;  %v1309_v55 = vmul.f32 0.10936069, %v1274_v12  ;;  %10313 = vst [vmem:[#allocation85_spill] sm:$0xff] %v7258_v52  ;;  %v7276_v25 = vadd.f32 %v1293_v62, %v10324_v49  ;;  %v10328_v15 = vld [vmem:[#allocation61_spill] sm:$0xff] }
 0x27d   :  { %v1310_v22 = vmul.f32 0.10936069, %v1275_v10  ;;  %v1311_v50 = vmul.f32 0.10936069, %v1276_v37  ;;  %v1312_v58 = vmul.f32 0.10936069, %v1277_v7  ;;  %v7282_v44 = vadd.f32 %v1295_v38, %v10328_v15 }
 0x27e   :  { %10315 = vst [vmem:[#allocation112_spill] sm:$0xff] %v7261_v60  ;;  %v1313_v35 = vmul.f32 0.10936069, %v1278_v33  ;;  %v1314_v3 = vmul.f32 0.10936069, %v1279_v20  ;;  %v10330_v2 = vld [vmem:[#allocation155_spill] sm:$0xff] }
 0x27f   :  { %v1315_v11 = vmul.f32 0.10936069, %v1280_v6  ;;  %10317 = vst [vmem:[#allocation106_spill] sm:$0xff] %v7264_v41  ;;  %v7285_v12 = vadd.f32 %v1299_v40, %v10330_v2  ;;  %v10332_v10 = vld [vmem:[#allocation154_spill] sm:$0xff]  ;;  %v10334_v37 = vld [vmem:[#allocation160_spill] sm:$0xff]  ;;  %v10336_v7 = vld [vmem:[#allocation103_spill] sm:$0xff] }
 0x280   :  { %10319 = vst [vmem:[#allocation66_spill] sm:$0xff] %v7267_v45  ;;  %v7288_v48 = vadd.f32 %v1300_v63, %v10332_v10  ;;  %v7291_v18 = vadd.f32 %v1301_v43, %v10334_v37  ;;  %v7295_v33 = vadd.f32 %v10337_v46, %v10336_v7  ;;  %v10339_v61 = vld [vmem:[#allocation166_spill] sm:$0xff]  ;;  %v10343_v13 = vld [vmem:[#allocation171_spill] sm:$0xff]  ;;  %v10345_v47 = vld [vmem:[#allocation169_spill] sm:$0xff] }
 0x281   :  { %10321 = vst [vmem:[#allocation78_spill] sm:$0xff] %v7270_v32  ;;  %v7299_v20 = vadd.f32 %v10340_v1, %v10339_v61  ;;  %v10342_v6 = vld [vmem:[#allocation18_spill] sm:$0xff]  ;;  %v7306_v26 = vadd.f32 %v1307_v54, %v10345_v47  ;;  %v10349_v0 = vld [vmem:[#allocation105_spill] sm:$0xff]  ;;  %v10355_v24 = vld [vmem:[#allocation96_spill] sm:$0xff] }
 0x282   :  { %10323 = vst [vmem:[#allocation181_spill] sm:$0xff] %v7273_v23  ;;  %v7303_v30 = vadd.f32 %v10343_v13, %v10342_v6  ;;  %v10347_v14 = vld [vmem:[#allocation122_spill] sm:$0xff]  ;;  %v7312_v57 = vadd.f32 %v1309_v55, %v10349_v0  ;;  %v10353_v19 = vld [vmem:[#allocation57_spill] sm:$0xff]  ;;  %v7321_v38 = vadd.f32 %v1312_v58, %v10355_v24  ;;  %v10357_v4 = vld [vmem:[#allocation19_spill] sm:$0xff] }
 0x283   :  { %10325 = vst [vmem:[#allocation79_spill] sm:$0xff] %v7276_v25  ;;  %v7309_v28 = vadd.f32 %v1308_v56, %v10347_v14  ;;  %v10351_v9 = vld [vmem:[#allocation130_spill] sm:$0xff]  ;;  %v7318_v62 = vadd.f32 %v1311_v50, %v10353_v19  ;;  %v7324_v40 = vadd.f32 %v1313_v35, %v10357_v4  ;;  %v10361_v5 = vld [vmem:[#allocation109_spill] sm:$0xff]  ;;  %v10365_v36 = vld [vmem:[#allocation167_spill] sm:$0xff] }
 0x284   :  { %10327 = vst [vmem:[#allocation174_spill] sm:$0xff] %v7279_v17  ;;  %v7315_v42 = vadd.f32 %v1310_v22, %v10351_v9  ;;  %v10359_v63 = vld [vmem:[#allocation90_spill] sm:$0xff]  ;;  %v7330_v54 = vadd.f32 %v1315_v11, %v10361_v5  ;;  %v10363_v56 = vld [vmem:[#allocation41_spill] sm:$0xff]  ;;  %v1384_v53 = vrot.slane %v10365_v36, 4  ;;  %v10366_v50 = vld [vmem:[#allocation119_spill] sm:$0xff] }
 0x285   :  { %10329 = vst [vmem:[#allocation89_spill] sm:$0xff] %v7282_v44  ;;  %v7327_v43 = vadd.f32 %v1314_v3, %v10359_v63  ;;  %v1351_v55 = vrot.slane %v10363_v56, 4  ;;  %v10364_v59 = vld [vmem:[#allocation101_spill] sm:$0xff]  ;;  %v1357_v34 = vrot.slane %v10366_v50, 4  ;;  %v10369_v35 = vld [vmem:[#allocation131_spill] sm:$0xff]  ;;  %v10373_v11 = vld [vmem:[#allocation158_spill] sm:$0xff] }
 0x286   :  { %10331 = vst [vmem:[#allocation100_spill] sm:$0xff] %v7285_v12  ;;  %v1356_v22 = vrot.slane %v10364_v59, 4  ;;  %v10367_v31 = vld [vmem:[#allocation97_spill] sm:$0xff]  ;;  %v1365_v39 = vrot.slane %v10369_v35, 4  ;;  %v10371_v2 = vld [vmem:[#allocation39_spill] sm:$0xff]  ;;  %v10374_v37 = vrot.slane %v10373_v11, 4 }
 0x287   :  { %10333 = vst [vmem:[#allocation93_spill] sm:$0xff] %v7288_v48  ;;  %v1363_v58 = vrot.slane %v10367_v31, 4  ;;  %v10368_v8 = vld [vmem:[#allocation117_spill] sm:$0xff]  ;;  %v10372_v10 = vrot.slane %v10371_v2, 4  ;;  %v10378_v1 = vld [vmem:[#allocation135_spill] sm:$0xff]  ;;  %v10382_v14 = vld [vmem:[#allocation120_spill] sm:$0xff] }
 0x288   :  { %10335 = vst [vmem:[#allocation153_spill] sm:$0xff] %v7291_v18  ;;  %v1364_v49 = vrot.slane %v10368_v8, 4  ;;  %v10370_v15 = vld [vmem:[#allocation137_spill] sm:$0xff]  ;;  %v10377_v61 = vmov %v10374_v37  ;;  %v10379_v6 = vrot.slane %v10378_v1, 4  ;;  %v10383_v0 = vrot.slane %v10382_v14, 4  ;;  %v10386_v24 = vld [vmem:[#allocation104_spill] sm:$0xff] }
 0x289   :  { %10338 = vst [vmem:[#allocation86_spill] sm:$0xff] %v7295_v33  ;;  %v1358_v3 = vrot.slane %v10370_v15, 4  ;;  %v7346_v46 = vsel %vm1386_vm1, %v10374_v37, %v10372_v10  ;;  %v10387_v4 = vrot.slane %v10386_v24, 4  ;;  %v10390_v10 = vld [vmem:[#allocation94_spill] sm:$0xff]  ;;  %v10423_v41 = vld [vmem:[#allocation88_spill] sm:$0xff]  ;;  %v10426_v52 = vld [vmem:[#allocation75_spill] sm:$0xff] }
 0x28a   :  { %10341 = vst [vmem:[#allocation95_spill] sm:$0xff] %v7299_v20  ;;  %v7354_v13 = vsel %vm1386_vm1, %v10379_v6, %v10377_v61  ;;  %v10381_v47 = vmov %v10379_v6  ;;  %v10385_v19 = vmov %v10383_v0  ;;  %v10391_v37 = vrot.slane %v10390_v10, 4  ;;  %v10411_v20 = vld [vmem:[#allocation142_spill] sm:$0xff]  ;;  %v10429_v21 = vld [vmem:[#allocation65_spill] sm:$0xff]  ;;  %v10432_v16 = vld [vmem:[#allocation52_spill] sm:$0xff] }
 0x28b   :  { %10344 = vst [vmem:[#allocation110_spill] sm:$0xff] %v7303_v30  ;;  %v7362_v9 = vsel %vm1386_vm1, %v10383_v0, %v10381_v47  ;;  %v7370_v63 = vsel %vm1386_vm1, %v10387_v4, %v10385_v19  ;;  %v10389_v5 = vmov %v10387_v4  ;;  %v10394_v47 = vld [vmem:[#allocation87_spill] sm:$0xff]  ;;  %v10398_v19 = vld [vmem:[#allocation84_spill] sm:$0xff]  ;;  %v10412_v18 = vrot.slane %v10411_v20, 4  ;;  %v10419_v25 = vld [vmem:[#allocation62_spill] sm:$0xff] }
 0x28c   :  { %10346 = vst [vmem:[#allocation118_spill] sm:$0xff] %v7306_v26  ;;  %v7378_v61 = vsel %vm1386_vm1, %v10391_v37, %v10389_v5  ;;  %v10393_v6 = vmov %v10391_v37  ;;  %v10395_v0 = vrot.slane %v10394_v47, 4  ;;  %v10399_v4 = vrot.slane %v10398_v19, 4  ;;  %v10409_v26 = vld [vmem:[#allocation63_spill] sm:$0xff] }
 0x28d   :  { %10348 = vst [vmem:[#allocation133_spill] sm:$0xff] %v7309_v28  ;;  %v10403_v37 = vrot.slane %v10371_v2, 4  ;;  %v10410_v30 = vrot.slane %v10409_v26, 4  ;;  %v10420_v23 = vrot.slane %v10419_v25, 4  ;;  %v10430_v29 = vrot.slane %v10429_v21, 4 }
 0x28e   :  { %10350 = vst [vmem:[#allocation151_spill] sm:$0xff] %v7312_v57  ;;  %v10406_v57 = vld [vmem:[#allocation72_spill] sm:$0xff]  ;;  %v10433_v51 = vrot.slane %v10432_v16, 4  ;;  %v1427_v27 = vrot.slane %v10364_v59, 6  ;;  %v10440_v59 = vrot.slane %v10378_v1, 6 }
 0x28f   :  { %10352 = vst [vmem:[#allocation67_spill] sm:$0xff] %v7315_v42  ;;  %v10407_v28 = vrot.slane %v10406_v57, 4 }
 0x290   :  { %10354 = vst [vmem:[#allocation182_spill] sm:$0xff] %v7318_v62  ;;  %v10400_v62 = vld [vmem:[#allocation40_spill] sm:$0xff] }
 0x291   :  { %10356 = vst [vmem:[#allocation76_spill] sm:$0xff] %v7321_v38  ;;  %v10401_v42 = vrot.slane %v10400_v62, 4  ;;  %v10447_v1 = vrot.slane %v10400_v62, 6 }
 0x292   :  { %10358 = vst [vmem:[#allocation77_spill] sm:$0xff] %v7324_v40 }
 0x293   :  { %10360 = vst [vmem:[#allocation82_spill] sm:$0xff] %v7327_v43  ;;  %v10396_v43 = vld [vmem:[#allocation98_spill] sm:$0xff]  ;;  %v7400_v5 = vsel %vm1386_vm1, %v1384_v53, %v10401_v42 }
 0x294   :  { %10362 = vst [vmem:[#allocation83_spill] sm:$0xff] %v7330_v54  ;;  %v7386_v54 = vsel %vm1386_vm1, %v10395_v0, %v10393_v6  ;;  %v10397_v40 = vrot.slane %v10396_v43, 4  ;;  %v7406_v6 = vsel %vm1386_vm1, %v10403_v37, %v1384_v53  ;;  %v10405_v0 = vmov %v10399_v4 }
 0x295   :  { %10376 = vst [vmem:[#allocation55_spill] sm:$0xff] %v7346_v46  ;;  %v1406_v53 = vsel %vm1386_vm1, %v1365_v39, %v10412_v18  ;;  %v1407_v37 = vsel %vm1386_vm1, %v1364_v49, %v1365_v39  ;;  %v10437_v46 = vrot.slane %v10371_v2, 6 }
 0x296   :  { %10380 = vst [vmem:[#allocation22_spill] sm:$0xff] %v7354_v13  ;;  %v7394_v38 = vsel %vm1386_vm1, %v10399_v4, %v10397_v40  ;;  %v7414_v40 = vsel %vm1386_vm1, %v10407_v28, %v10405_v0  ;;  %v10408_v4 = vmov %v10407_v28  ;;  %v1408_v28 = vsel %vm1386_vm1, %v1363_v58, %v1364_v49  ;;  %v10413_v0 = vld [vmem:[#allocation81_spill] sm:$0xff]  ;;  %v10421_v49 = vld [vmem:[#allocation146_spill] sm:$0xff] }
 0x297   :  { %10384 = vst [vmem:[#allocation102_spill] sm:$0xff] %v7362_v9  ;;  %v7422_v42 = vsel %vm1386_vm1, %v10410_v30, %v10408_v4  ;;  %v10414_v48 = vrot.slane %v10413_v0, 4  ;;  %v10416_v30 = vld [vmem:[#allocation71_spill] sm:$0xff]  ;;  %v10422_v32 = vrot.slane %v10421_v49, 4 }
 0x298   :  { %10388 = vst [vmem:[#allocation50_spill] sm:$0xff] %v7370_v63  ;;  %v10417_v4 = vrot.slane %v10416_v30, 4 }
 0x299   :  { %10392 = vst [vmem:[#allocation159_spill] sm:$0xff] %v7378_v61  ;;  %v1409_v12 = vsel %vm1386_vm1, %v10414_v48, %v1363_v58  ;;  %v10415_v44 = vmov %v10414_v48  ;;  %v1413_v45 = vsel %vm1386_vm1, %v1358_v3, %v10422_v32  ;;  %v1414_v48 = vsel %vm1386_vm1, %v1357_v34, %v1358_v3 }
 0x29a   :  { %10402 = vst [vmem:[#allocation99_spill] sm:$0xff] %v7400_v5  ;;  %v1410_v17 = vsel %vm1386_vm1, %v10417_v4, %v10415_v44  ;;  %v10418_v18 = vmov %v10417_v4  ;;  %v1415_v58 = vsel %vm1386_vm1, %v1356_v22, %v1357_v34  ;;  %v10424_v44 = vrot.slane %v10423_v41, 4 }
 0x29b   :  { %10404 = vst [vmem:[#allocation113_spill] sm:$0xff] %v7406_v6  ;;  %v1411_v39 = vsel %vm1386_vm1, %v10420_v23, %v10418_v18  ;;  %v10427_v23 = vrot.slane %v10426_v52, 4  ;;  %v10431_v34 = vmov %v10430_v29  ;;  %v1428_v5 = vrot.slane %v10366_v50, 6 }
 0x29c   :  { %v1416_v4 = vsel %vm1386_vm1, %v10424_v44, %v1356_v22  ;;  %v10425_v60 = vmov %v10424_v44  ;;  %v1419_v22 = vsel %vm1386_vm1, %v10433_v51, %v10431_v34  ;;  %v10434_v44 = vmov %v10433_v51 }
 0x29d   :  { %v1417_v18 = vsel %vm1386_vm1, %v10427_v23, %v10425_v60  ;;  %v10428_v32 = vmov %v10427_v23  ;;  %v1420_v33 = vsel %vm1386_vm1, %v1351_v55, %v10434_v44  ;;  %v10435_v60 = vrot.slane %v10400_v62, 4 }
 0x29e   :  { %v1418_v3 = vsel %vm1386_vm1, %v10430_v29, %v10428_v32  ;;  %v1455_v29 = vrot.slane %v10365_v36, 6  ;;  %v1422_v32 = vrot.slane %v10363_v56, 6  ;;  %v1436_v51 = vrot.slane %v10369_v35, 6 }
 0x29f   :  { %v7486_v23 = vsel %vm1386_vm1, %v10435_v60, %v1351_v55  ;;  %v1429_v34 = vrot.slane %v10370_v15, 6  ;;  %v1434_v44 = vrot.slane %v10367_v31, 6  ;;  %v1435_v6 = vrot.slane %v10368_v8, 6 }
 0x2a0   :  { %10436 = vst [vmem:[#allocation92_spill] sm:$0xff] %v7486_v23  ;;  %v10438_v55 = vrot.slane %v10373_v11, 6  ;;  %v10441_v35 = vmov %v10440_v59  ;;  %v10442_v31 = vrot.slane %v10382_v14, 6  ;;  %v10444_v60 = vrot.slane %v10386_v24, 6 }
 0x2a2   :  { %v1460_v36 = vsel %vm1457_vm10, %v10438_v55, %v10437_v46  ;;  %v10439_v56 = vmov %v10438_v55  ;;  %v1462_v8 = vsel %vm1457_vm10, %v10442_v31, %v10441_v35  ;;  %v10443_v15 = vmov %v10442_v31 }
 0x2a3   :  { %v1461_v50 = vsel %vm1457_vm10, %v10440_v59, %v10439_v56  ;;  %v1463_v46 = vsel %vm1457_vm10, %v10444_v60, %v10443_v15  ;;  %v10445_v11 = vmov %v10444_v60  ;;  %v10446_v55 = vrot.slane %v10390_v10, 6 }
 0x2a4   :  { %v1458_v59 = vsel %vm1457_vm10, %v1455_v29, %v10447_v1  ;;  %v10448_v35 = vrot.slane %v10371_v2, 6  ;;  %v10450_v15 = vrot.slane %v10394_v47, 6  ;;  %v10451_v60 = vrot.slane %v10396_v43, 6 }
 0x2a5   :  { %v1464_v56 = vsel %vm1457_vm10, %v10446_v55, %v10445_v11  ;;  %v10449_v31 = vmov %v10446_v55  ;;  %v10452_v11 = vrot.slane %v10398_v19, 6  ;;  %v10454_v2 = vrot.slane %v10406_v57, 6 }
 0x2a6   :  { %v1459_v14 = vsel %vm1457_vm10, %v10448_v35, %v1455_v29  ;;  %v1465_v24 = vsel %vm1457_vm10, %v10450_v15, %v10449_v31  ;;  %v10456_v47 = vrot.slane %v10409_v26, 6  ;;  %v10457_v43 = vrot.slane %v10411_v20, 6 }
 0x2a7   :  { %v1471_v55 = vsel %vm1457_vm10, %v10452_v11, %v10451_v60  ;;  %v10453_v1 = vmov %v10452_v11  ;;  %v10455_v10 = vmov %v10454_v2  ;;  %v1478_v19 = vsel %vm1457_vm10, %v1435_v6, %v1436_v51 }
 0x2a8   :  { %v1472_v29 = vsel %vm1457_vm10, %v10454_v2, %v10453_v1  ;;  %v1473_v35 = vsel %vm1457_vm10, %v10456_v47, %v10455_v10  ;;  %v1477_v31 = vsel %vm1457_vm10, %v1436_v51, %v10457_v43  ;;  %v1479_v15 = vsel %vm1457_vm10, %v1434_v44, %v1435_v6 }
 0x2a9   :  { %v10458_v60 = vrot.slane %v10426_v52, 6  ;;  %v10459_v57 = vrot.slane %v10429_v21, 6  ;;  %v10461_v20 = vrot.slane %v10432_v16, 6  ;;  %v1485_v6 = vsel %vm1457_vm10, %v1428_v5, %v1429_v34 }
 0x2aa   :  { %v1486_v10 = vsel %vm1457_vm10, %v1427_v27, %v1428_v5  ;;  %v10463_v47 = vrot.slane %v10423_v41, 6  ;;  %v10467_v5 = vrot.slane %v10416_v30, 6  ;;  %v10469_v41 = vrot.slane %v10419_v25, 6 }
 0x2ab   :  { %v1489_v26 = vsel %vm1457_vm10, %v10459_v57, %v10458_v60  ;;  %v10460_v11 = vmov %v10459_v57  ;;  %v10462_v2 = vmov %v10461_v20  ;;  %v10465_v57 = vrot.slane %v10413_v0, 6 }
 0x2ac   :  { %v1490_v1 = vsel %vm1457_vm10, %v10461_v20, %v10460_v11  ;;  %v1491_v51 = vsel %vm1457_vm10, %v1422_v32, %v10462_v2  ;;  %v1487_v21 = vsel %vm1457_vm10, %v10463_v47, %v1427_v27  ;;  %v10464_v43 = vmov %v10463_v47 }
 0x2ad   :  { %v1488_v16 = vsel %vm1457_vm10, %v10458_v60, %v10464_v43  ;;  %v1480_v11 = vsel %vm1457_vm10, %v10465_v57, %v1434_v44  ;;  %v10466_v20 = vmov %v10465_v57  ;;  %v10468_v27 = vmov %v10467_v5 }
 0x2ae   :  { %v1481_v2 = vsel %vm1457_vm10, %v10467_v5, %v10466_v20  ;;  %v1482_v52 = vsel %vm1457_vm10, %v10469_v41, %v10468_v27  ;;  %v10470_v47 = vrot.slane %v10421_v49, 6  ;;  %v10471_v44 = vrot.slane %v10400_v62, 6 }
 0x2af   :  { %v1493_v60 = vadd.f32 %v1491_v51, %v1420_v33  ;;  %v1494_v57 = vadd.f32 %v1490_v1, %v1419_v22  ;;  %v1495_v20 = vadd.f32 %v1489_v26, %v1418_v3  ;;  %v1496_v5 = vadd.f32 %v1488_v16, %v1417_v18  ;;  %v10478_v18 = vld [vmem:[#allocation55_spill] sm:$0xff]  ;;  %v10485_v26 = vld [vmem:[#allocation128_spill] sm:$0xff] }
 0x2b0   :  { %v1484_v43 = vsel %vm1457_vm10, %v1429_v34, %v10470_v47  ;;  %v1492_v0 = vsel %vm1457_vm10, %v10471_v44, %v1422_v32  ;;  %v1497_v30 = vadd.f32 %v1487_v21, %v1416_v4  ;;  %v1498_v23 = vadd.f32 %v1486_v10, %v1415_v58  ;;  %v10472_v34 = vld [vmem:[#allocation73_spill] sm:$0xff]  ;;  %v10473_v47 = vld [vmem:[#allocation74_spill] sm:$0xff]  ;;  %v10474_v58 = vld [vmem:[#allocation159_spill] sm:$0xff] }
 0x2b1   :  { %v1499_v25 = vadd.f32 %v1485_v6, %v1414_v48  ;;  %v1500_v13 = vadd.f32 %v1484_v43, %v1413_v45  ;;  %v1502_v9 = vadd.f32 %v1482_v52, %v1411_v39  ;;  %v1503_v27 = vadd.f32 %v1481_v2, %v1410_v17  ;;  %v10475_v45 = vld [vmem:[#allocation50_spill] sm:$0xff]  ;;  %v10479_v32 = vld [vmem:[#allocation113_spill] sm:$0xff]  ;;  %v10486_v51 = vld [vmem:[#allocation111_spill] sm:$0xff] }
 0x2b2   :  { %v1504_v41 = vadd.f32 %v1480_v11, %v1409_v12  ;;  %v1505_v49 = vadd.f32 %v1479_v15, %v1408_v28  ;;  %v1506_v63 = vadd.f32 %v1478_v19, %v1407_v37  ;;  %v1507_v61 = vadd.f32 %v1477_v31, %v1406_v53  ;;  %v10476_v17 = vld [vmem:[#allocation102_spill] sm:$0xff]  ;;  %v10487_v16 = vld [vmem:[#allocation152_spill] sm:$0xff]  ;;  %v10488_v44 = vld [vmem:[#allocation147_spill] sm:$0xff] }
 0x2b3   :  { %v1510_v62 = vadd.f32 %v10473_v47, %v10472_v34  ;;  %v1511_v7 = vadd.f32 %v1473_v35, %v7422_v42  ;;  %v1512_v33 = vadd.f32 %v1472_v29, %v7414_v40  ;;  %v1513_v3 = vadd.f32 %v1471_v55, %v7394_v38  ;;  %v10477_v37 = vld [vmem:[#allocation22_spill] sm:$0xff]  ;;  %v10480_v35 = vld [vmem:[#allocation99_spill] sm:$0xff]  ;;  %v10481_v29 = vld [vmem:[#allocation92_spill] sm:$0xff] }
 0x2b4   :  { %v1519_v4 = vadd.f32 %v1465_v24, %v7386_v54  ;;  %v1520_v48 = vadd.f32 %v1464_v56, %v10474_v58  ;;  %v1521_v39 = vadd.f32 %v1463_v46, %v10475_v45  ;;  %v1522_v12 = vadd.f32 %v1462_v8, %v10476_v17  ;;  %v10482_v54 = vld [vmem:[#allocation70_spill] sm:$0xff]  ;;  %v10491_v34 = vld [vmem:[#allocation85_spill] sm:$0xff]  ;;  %v10492_v58 = vld [vmem:[#allocation112_spill] sm:$0xff] }
 0x2b5   :  { %v1528_v28 = vmul.f32 0.21300554, %v1493_v60  ;;  %v1523_v53 = vadd.f32 %v1461_v50, %v10477_v37  ;;  %v1524_v22 = vadd.f32 %v1460_v36, %v10478_v18  ;;  %v1525_v31 = vadd.f32 %v1459_v14, %v10479_v32  ;;  %v10483_v24 = vld [vmem:[#allocation162_spill] sm:$0xff] }
 0x2b6   :  { %v1529_v42 = vmul.f32 0.21300554, %v1494_v57  ;;  %v1526_v40 = vadd.f32 %v1458_v59, %v10480_v35  ;;  %v1527_v38 = vadd.f32 %v1492_v0, %v10481_v29  ;;  %v1530_v55 = vmul.f32 0.21300554, %v1495_v20  ;;  %v10484_v15 = vld [vmem:[#allocation86_spill] sm:$0xff]  ;;  %v10489_v20 = vld [vmem:[#allocation69_spill] sm:$0xff] }
 0x2b7   :  { %v7636_v56 = vadd.f32 %v10483_v24, %v10482_v54  ;;  %v1531_v46 = vmul.f32 0.21300554, %v1496_v5  ;;  %v1532_v19 = vmul.f32 0.21300554, %v1497_v30  ;;  %v1533_v8 = vmul.f32 0.21300554, %v1498_v23 }
 0x2b8   :  { %v7640_v50 = vadd.f32 %v10485_v26, %v10484_v15  ;;  %v1534_v36 = vmul.f32 0.21300554, %v1499_v25  ;;  %v1535_v1 = vmul.f32 0.21300554, %v1500_v13  ;;  %v1537_v14 = vmul.f32 0.21300554, %v1502_v9 }
 0x2b9   :  { %v7643_v6 = vadd.f32 %v1528_v28, %v10486_v51  ;;  %v1538_v59 = vmul.f32 0.21300554, %v1503_v27  ;;  %v1539_v10 = vmul.f32 0.21300554, %v1504_v41  ;;  %v1540_v21 = vmul.f32 0.21300554, %v1505_v49 }
 0x2ba   :  { %v1564_v11 = vadd.f32 %v1529_v42, %v10487_v16  ;;  %v1541_v2 = vmul.f32 0.21300554, %v1506_v63  ;;  %v1542_v52 = vmul.f32 0.21300554, %v1507_v61  ;;  %v1545_v43 = vmul.f32 0.21300554, %v1510_v62 }
 0x2bb   :  { %v1565_v23 = vadd.f32 %v1530_v55, %v10488_v44  ;;  %v1546_v0 = vmul.f32 0.21300554, %v1511_v7  ;;  %v1547_v60 = vmul.f32 0.21300554, %v1512_v33  ;;  %v1548_v57 = vmul.f32 0.21300554, %v1513_v3 }
 0x2bc   :  { %v1566_v5 = vadd.f32 %v1531_v46, %v10489_v20  ;;  %v10490_v13 = vld [vmem:[#allocation80_spill] sm:$0xff]  ;;  %v1554_v30 = vmul.f32 0.21300554, %v1519_v4  ;;  %v1555_v25 = vmul.f32 0.21300554, %v1520_v48  ;;  %v1567_v27 = vadd.f32 %v1532_v19, %v10491_v34  ;;  %v10493_v17 = vld [vmem:[#allocation106_spill] sm:$0xff] }
 0x2bd   :  { %v1551_v9 = vmul.f32 0.21300554, %v10490_v13  ;;  %v1556_v41 = vmul.f32 0.21300554, %v1521_v39  ;;  %v1557_v49 = vmul.f32 0.21300554, %v1522_v12  ;;  %v1568_v63 = vadd.f32 %v1533_v8, %v10492_v58 }
 0x2be   :  { %v1558_v47 = vmul.f32 0.21300554, %v1523_v53  ;;  %v1559_v61 = vmul.f32 0.21300554, %v1524_v22  ;;  %v1560_v62 = vmul.f32 0.21300554, %v1525_v31  ;;  %v1569_v7 = vadd.f32 %v1534_v36, %v10493_v17 }
 0x2bf   :  { %v1561_v45 = vmul.f32 0.21300554, %v1526_v40  ;;  %v1562_v33 = vmul.f32 0.21300554, %v1527_v38  ;;  %v10494_v3 = vld [vmem:[#allocation161_spill] sm:$0xff]  ;;  %v10495_v37 = vld [vmem:[#allocation66_spill] sm:$0xff] }
 0x2c0   :  { %v1570_v28 = vadd.f32 %v1535_v1, %v10494_v3  ;;  %v1572_v18 = vadd.f32 %v1537_v14, %v10495_v37  ;;  %v10496_v32 = vld [vmem:[#allocation78_spill] sm:$0xff]  ;;  %v10497_v48 = vld [vmem:[#allocation181_spill] sm:$0xff]  ;;  %v10498_v35 = vld [vmem:[#allocation79_spill] sm:$0xff]  ;;  %v7721_v37 = vmul.f32 %v1569_v7, %v1569_v7 }
 0x2c1   :  { %v1573_v4 = vadd.f32 %v1538_v59, %v10496_v32  ;;  %v1574_v42 = vadd.f32 %v1539_v10, %v10497_v48  ;;  %v1575_v39 = vadd.f32 %v1540_v21, %v10498_v35  ;;  %v10499_v12 = vld [vmem:[#allocation174_spill] sm:$0xff]  ;;  %v10500_v29 = vld [vmem:[#allocation89_spill] sm:$0xff]  ;;  %v10501_v22 = vld [vmem:[#allocation164_spill] sm:$0xff] }
 0x2c2   :  { %v1576_v53 = vadd.f32 %v1541_v2, %v10499_v12  ;;  %v7659_v55 = vadd.f32 %v1542_v52, %v10500_v29  ;;  %v7662_v31 = vadd.f32 %v1545_v43, %v10501_v22  ;;  %v10502_v40 = vld [vmem:[#allocation100_spill] sm:$0xff]  ;;  %v10503_v54 = vld [vmem:[#allocation93_spill] sm:$0xff]  ;;  %v10505_v8 = vld [vmem:[#allocation95_spill] sm:$0xff]  ;;  %v7729_v32 = vmul.f32 %v1572_v18, %v1572_v18 }
 0x2c3   :  { %v7665_v38 = vadd.f32 %v1546_v0, %v10502_v40  ;;  %v7668_v24 = vadd.f32 %v1547_v60, %v10503_v54  ;;  %v10504_v46 = vld [vmem:[#allocation153_spill] sm:$0xff]  ;;  %v10506_v15 = vld [vmem:[#allocation144_spill] sm:$0xff]  ;;  %v10507_v36 = vld [vmem:[#allocation170_spill] sm:$0xff]  ;;  %v7731_v48 = vmul.f32 %v1573_v4, %v1573_v4  ;;  %v7733_v35 = vmul.f32 %v1574_v42, %v1574_v42 }
 0x2c4   :  { %v7671_v19 = vadd.f32 %v1548_v57, %v10504_v46  ;;  %v7675_v26 = vadd.f32 %v10506_v15, %v10505_v8  ;;  %v7678_v1 = vadd.f32 %v1551_v9, %v10507_v36  ;;  %v10508_v14 = vld [vmem:[#allocation110_spill] sm:$0xff]  ;;  %v10509_v51 = vld [vmem:[#allocation175_spill] sm:$0xff]  ;;  %v10511_v16 = vld [vmem:[#allocation133_spill] sm:$0xff]  ;;  %v7735_v12 = vmul.f32 %v1575_v39, %v1575_v39 }
 0x2c5   :  { %v7682_v59 = vadd.f32 %v10509_v51, %v10508_v14  ;;  %v10510_v10 = vld [vmem:[#allocation118_spill] sm:$0xff]  ;;  %v7688_v2 = vadd.f32 %v1555_v25, %v10511_v16  ;;  %v10512_v52 = vld [vmem:[#allocation151_spill] sm:$0xff]  ;;  %v10515_v20 = vld [vmem:[#allocation76_spill] sm:$0xff]  ;;  %v7709_v25 = vmul.f32 %v7643_v6, %v7643_v6  ;;  %v7737_v29 = vmul.f32 %v1576_v53, %v1576_v53 }
 0x2c6   :  { %v7685_v21 = vadd.f32 %v1554_v30, %v10510_v10  ;;  %v1591_v43 = vadd.f32 %v1556_v41, %v10512_v52  ;;  %v10513_v44 = vld [vmem:[#allocation67_spill] sm:$0xff]  ;;  %v10514_v60 = vld [vmem:[#allocation182_spill] sm:$0xff]  ;;  %v7696_v13 = vadd.f32 %v1559_v61, %v10515_v20  ;;  %v10516_v9 = vld [vmem:[#allocation77_spill] sm:$0xff]  ;;  %v7711_v41 = vmul.f32 %v1564_v11, %v1564_v11 }
 0x2c7   :  { %v1592_v0 = vadd.f32 %v1557_v49, %v10513_v44  ;;  %v7693_v57 = vadd.f32 %v1558_v47, %v10514_v60  ;;  %v7699_v34 = vadd.f32 %v1560_v62, %v10516_v9  ;;  %v10517_v58 = vld [vmem:[#allocation82_spill] sm:$0xff]  ;;  %v10518_v30 = vld [vmem:[#allocation83_spill] sm:$0xff]  ;;  %v7713_v49 = vmul.f32 %v1565_v23, %v1565_v23  ;;  %v10519_v51 = vld [vmem:[#allocation56_spill] sm:$0xff] }
 0x2c8   :  { %v7702_v17 = vadd.f32 %v1561_v45, %v10517_v58  ;;  %v7705_v3 = vadd.f32 %v1562_v33, %v10518_v30  ;;  %v7715_v47 = vmul.f32 %v1566_v5, %v1566_v5  ;;  %v7717_v61 = vmul.f32 %v1567_v27, %v1567_v27  ;;  %v10520_v16 = vld [vmem:[#allocation165_spill] sm:$0xff] }
 0x2c9   :  { %v7719_v62 = vmul.f32 %v1568_v63, %v1568_v63  ;;  %v7723_v45 = vmul.f32 %v1570_v28, %v1570_v28  ;;  %v7727_v33 = vmul.f32 %v7636_v56, %v7636_v56  ;;  %v1612_v22 = vmul.f32 %v1570_v28, %v7643_v6 }
 0x2ca   :  { %v1613_v40 = vmul.f32 %v7636_v56, %v1564_v11  ;;  %v1614_v54 = vmul.f32 %v1572_v18, %v1565_v23  ;;  %v1615_v46 = vmul.f32 %v1573_v4, %v1566_v5  ;;  %v1616_v8 = vmul.f32 %v1574_v42, %v1567_v27  ;;  %v10521_v18 = vld [vmem:[#allocation178_spill] sm:$0xff] }
 0x2cb   :  { %v1617_v15 = vmul.f32 %v1575_v39, %v1568_v63  ;;  %v1618_v36 = vmul.f32 %v1576_v53, %v1569_v7  ;;  %v1619_v14 = vsub.f32 %v7659_v55, %v7709_v25  ;;  %v1620_v10 = vsub.f32 %v10519_v51, %v7711_v41 }
 0x2cc   :  { %v1626_v27 = vsub.f32 %v7640_v50, %v7723_v45  ;;  %v1627_v63 = vsub.f32 %v7675_v26, %v7727_v33  ;;  %v1628_v7 = vsub.f32 %v7678_v1, %v7729_v32  ;;  %v1633_v28 = vsub.f32 %v1591_v43, %v1612_v22 }
 0x2cd   :  { %v1629_v4 = vsub.f32 %v10521_v18, %v7731_v48  ;;  %v1630_v42 = vsub.f32 %v7682_v59, %v7733_v35  ;;  %v1631_v39 = vsub.f32 %v7685_v21, %v7735_v12  ;;  %v1634_v53 = vsub.f32 %v1592_v0, %v1613_v40 }
 0x2ce   :  { %v1635_v50 = vsub.f32 %v7693_v57, %v1614_v54  ;;  %v1640_v52 = vmul.f32 2.0, %v1612_v22  ;;  %v1641_v44 = vmul.f32 2.0, %v1613_v40  ;;  %v1642_v26 = vmul.f32 2.0, %v1614_v54 }
 0x2cf   :  { %v1632_v1 = vsub.f32 %v7688_v2, %v7737_v29  ;;  %v1636_v43 = vsub.f32 %v7696_v13, %v1615_v46  ;;  %v1637_v60 = vsub.f32 %v7699_v34, %v1616_v8  ;;  %v1638_v20 = vsub.f32 %v7702_v17, %v1617_v15 }
 0x2d0   :  { %v1639_v59 = vsub.f32 %v7705_v3, %v1618_v36  ;;  %v1643_v9 = vmul.f32 2.0, %v1615_v46  ;;  %v1644_v21 = vmul.f32 2.0, %v1616_v8  ;;  %v1655_v0 = vmul.f32 2.0, %v1633_v28 }
 0x2d1   :  { %v1645_v58 = vmul.f32 2.0, %v1617_v15  ;;  %v1646_v57 = vmul.f32 2.0, %v1618_v36  ;;  %v1647_v30 = vstv %s395_s3  ;;  %v1656_v22 = vmul.f32 2.0, %v1634_v53 }
 0x2d2   :  { %v1648_v40 = vadd.f32 %v1647_v30, %v1640_v52  ;;  %v1649_v54 = vadd.f32 %v1647_v30, %v1641_v44  ;;  %v1650_v18 = vadd.f32 %v1647_v30, %v1642_v26  ;;  %v1657_v5 = vmul.f32 2.0, %v1635_v50 }
 0x2d3   :  { %v1658_v2 = vmul.f32 2.0, %v1636_v43  ;;  %v1659_v23 = vmul.f32 2.0, %v1637_v60  ;;  %v1660_v13 = vmul.f32 2.0, %v1638_v20  ;;  %v1662_v11 = vstv %s397_s13 }
 0x2d4   :  { %v1651_v34 = vadd.f32 %v1647_v30, %v1643_v9  ;;  %v1652_v56 = vadd.f32 %v1647_v30, %v1644_v21  ;;  %v1661_v17 = vmul.f32 2.0, %v1639_v59  ;;  %v1663_v6 = vadd.f32 %v1662_v11, %v1655_v0 }
 0x2d5   :  { %v1653_v3 = vadd.f32 %v1647_v30, %v1645_v58  ;;  %v1677_v46 = vadd.f32 %v7723_v45, %v7709_v25  ;;  %v1678_v8 = vadd.f32 %v7727_v33, %v7711_v41  ;;  %v1679_v15 = vadd.f32 %v7729_v32, %v7713_v49 }
 0x2d6   :  { %v1654_v36 = vadd.f32 %v1647_v30, %v1646_v57  ;;  %v1664_v28 = vadd.f32 %v1662_v11, %v1656_v22  ;;  %v1665_v53 = vadd.f32 %v1662_v11, %v1657_v5  ;;  %v1680_v50 = vadd.f32 %v7731_v48, %v7715_v47 }
 0x2d7   :  { %v1666_v52 = vadd.f32 %v1662_v11, %v1658_v2  ;;  %v1667_v44 = vadd.f32 %v1662_v11, %v1659_v23  ;;  %v1668_v26 = vadd.f32 %v1662_v11, %v1660_v13  ;;  %v1681_v43 = vadd.f32 %v7733_v35, %v7717_v61  ;;  %v10527_v13 = vld [vmem:[#allocation68_spill] sm:$0xff] }
 0x2d8   :  { %v1669_v60 = vadd.f32 %v1662_v11, %v1661_v17  ;;  %v7790_v45 = vmul.f32 %v1663_v6, %v1648_v40  ;;  %v1682_v33 = vadd.f32 %v7735_v12, %v7719_v62  ;;  %v1683_v32 = vadd.f32 %v7737_v29, %v7721_v37 }
 0x2d9   :  { %v1684_v20 = vadd.f32 %v1677_v46, %v1647_v30  ;;  %v1685_v5 = vadd.f32 %v1678_v8, %v1647_v30  ;;  %v1686_v59 = vadd.f32 %v1679_v15, %v1647_v30  ;;  %v1691_v48 = vadd.f32 %v1626_v27, %v1619_v14 }
 0x2da   :  { %v1687_v23 = vadd.f32 %v1680_v50, %v1647_v30  ;;  %v1688_v9 = vadd.f32 %v1681_v43, %v1647_v30  ;;  %v1692_v35 = vadd.f32 %v1627_v63, %v1620_v10  ;;  %v10522_v6 = vsub.f32 %v10520_v16, %v7713_v49 }
 0x2db   :  { %v10523_v29 = vsub.f32 %v7662_v31, %v7715_v47  ;;  %v10524_v0 = vsub.f32 %v7665_v38, %v7717_v61  ;;  %v10525_v55 = vsub.f32 %v7668_v24, %v7719_v62  ;;  %v10526_v41 = vsub.f32 %v7671_v19, %v7721_v37 }
 0x2dc   :  { %v1693_v12 = vadd.f32 %v1628_v7, %v10522_v6  ;;  %v1689_v51 = vadd.f32 %v1682_v33, %v1647_v30  ;;  %v1698_v10 = vadd.f32 %v1691_v48, %v1662_v11  ;;  %v1699_v49 = vadd.f32 %v1692_v35, %v1662_v11  ;;  %v10535_v33 = vld [vmem:[#allocation116_spill] sm:$0xff] }
 0x2dd   :  { %v1694_v21 = vadd.f32 %v1629_v4, %v10523_v29  ;;  %v1695_v58 = vadd.f32 %v1630_v42, %v10524_v0  ;;  %v1696_v25 = vadd.f32 %v1631_v39, %v10525_v55  ;;  %v1697_v14 = vadd.f32 %v1632_v1, %v10526_v41  ;;  %v10542_v55 = vld [vmem:[#allocation193_spill] sm:$0xff] }
 0x2de   :  { %v1700_v16 = vadd.f32 %v1693_v12, %v1662_v11  ;;  %v1690_v27 = vadd.f32 %v1683_v32, %v1647_v30  ;;  %v7817_v4 = vmul.f32 %v1698_v10, %v1684_v20  ;;  %v7819_v38 = vmul.f32 %v1699_v49, %v1685_v5  ;;  %v10536_v5 = vld [vmem:[#allocation64_spill] sm:$0xff]  ;;  %v10544_v10 = vld [vmem:[#allocation145_spill] sm:$0xff] }
 0x2df   :  { %v1701_v63 = vadd.f32 %v1694_v21, %v1662_v11  ;;  %v1702_v31 = vadd.f32 %v1695_v58, %v1662_v11  ;;  %v1703_v47 = vadd.f32 %v1696_v25, %v1662_v11  ;;  %v1704_v7 = vadd.f32 %v1697_v14, %v1662_v11  ;;  %v10539_v12 = vld [vmem:[#allocation192_spill] sm:$0xff] }
 0x2e0   :  { %v7821_v61 = vmul.f32 %v1700_v16, %v1686_v59  ;;  %v7823_v24 = vmul.f32 %v1664_v28, %v1649_v54  ;;  %v7825_v62 = vmul.f32 %v1665_v53, %v1650_v18  ;;  %v7827_v19 = vmul.f32 %v1666_v52, %v1651_v34 }
 0x2e1   :  { %v7829_v37 = vmul.f32 %v1667_v44, %v1652_v56  ;;  %v7831_v42 = vmul.f32 %v1668_v26, %v1653_v3  ;;  %v7833_v39 = vmul.f32 %v1701_v63, %v1687_v23  ;;  %3330 = vrcp.f32 %v7817_v4  ;;  %v10528_v3 = vld [vmem:[#allocation29_spill] sm:$0xff] }
 0x2e2   :  { %v1723_v11 = vand.u32 2147483648, %v7817_v4  ;;  %v7837_v1 = vmul.f32 %v1669_v60, %v1654_v36  ;;  %v7839_v57 = vmul.f32 %v1702_v31, %v1688_v9  ;;  %3332 = vrcp.f32 %v7819_v38  ;;  %v10547_v31 = vld [vmem:[#allocation195_spill] sm:$0xff] }
 0x2e3   :  { %v1737_v30 = vand.u32 2147483648, %v7819_v38  ;;  %v7843_v22 = vmul.f32 %v1703_v47, %v1689_v51  ;;  %v7845_v56 = vmul.f32 %v1704_v7, %v1690_v27  ;;  %v1721_v40 = vand.u32 2147483647, %v7817_v4  ;;  %v10543_v51 = vld [vmem:[#allocation194_spill] sm:$0xff] }
 0x2e4   :  { %3334 = vrcp.f32 %v7821_v61  ;;  %vm1717_vm1 = vweird.f32 %v7817_v4  ;;  %v1735_v54 = vand.u32 2147483647, %v7819_v38  ;;  %v1749_v18 = vand.u32 2147483647, %v7821_v61 }
 0x2e5   :  { %v1751_v2 = vand.u32 2147483648, %v7821_v61  ;;  %v7854_v34 = vor.u32 1.1754944e-38, %v1723_v11  ;;  %vm1731_vm6 = vweird.f32 %v7819_v38  ;;  %3336 = vrcp.f32 %v7833_v39 }
 0x2e6   :  { %v1765_v17 = vand.u32 2147483648, %v7833_v39  ;;  %v7860_v46 = vor.u32 1.1754944e-38, %v1737_v30  ;;  %vm1745_vm10 = vweird.f32 %v7821_v61  ;;  %v1763_v8 = vand.u32 2147483647, %v7833_v39  ;;  %v10613_v30 = vld [vmem:[#allocation190_spill] sm:$0xff] }
 0x2e7   :  { %3338 = vrcp.f32 %v7839_v57  ;;  %v7865_v15 = vpop.eup %3330  ;;  %vm7867_vm14 = vcmp.eq.f32.partialorder %v1721_v40, 8.507059e+37  ;;  %v7871_v28 = vor.u32 1.1754944e-38, %v1751_v2  ;;  %v1777_v53 = vand.u32 2147483647, %v7839_v57 }
 0x2e8   :  { %v1779_v50 = vand.u32 2147483648, %v7839_v57  ;;  %v7876_v52 = vpop.eup %3332  ;;  %v1713_v44 = vmul.f32 %v7865_v15, %v7817_v4  ;;  %vm7880_vm15 = vcmp.eq.f32.partialorder %v1735_v54, 8.507059e+37  ;;  %vm7884_vm0 = vcmp.eq.f32.partialorder %v1749_v18, 8.507059e+37  ;;  %v10606_v54 = vld [vmem:[#allocation139_spill] sm:$0xff] }
 0x2e9   :  { %v7888_v60 = vor.u32 1.1754944e-38, %v1765_v17  ;;  %3340 = vrcp.f32 %v7843_v22  ;;  %vm1718_vm7 = vweird.f32 %v7865_v15  ;;  %v1727_v20 = vmul.f32 %v7876_v52, %v7819_v38  ;;  %v10554_v17 = vld [vmem:[#allocation191_spill] sm:$0xff] }
 0x2ea   :  { %v7893_v32 = vpop.eup %3334  ;;  %vm1732_vm9 = vweird.f32 %v7876_v52  ;;  %v1714_v59 = vsub.f32 1.0, %v1713_v44  ;;  %vm7903_vm12 = vcmp.eq.f32.partialorder %v1763_v8, 8.507059e+37  ;;  %v7907_v9 = vor.u32 1.1754944e-38, %v1779_v50  ;;  %vm7934_vm5 = vmor %vm1717_vm1, %vm1718_vm7 }
 0x2eb   :  { %v1741_v48 = vmul.f32 %v7893_v32, %v7821_v61  ;;  %v1791_v35 = vand.u32 2147483647, %v7843_v22  ;;  %v7910_v6 = vpop.eup %3336  ;;  %v1728_v29 = vsub.f32 1.0, %v1727_v20  ;;  %vm1746_vm13 = vweird.f32 %v7893_v32  ;;  %vm7951_vm7 = vmor %vm1731_vm6, %vm1732_vm9 }
 0x2ec   :  { %vm7915_vm2 = vcmp.eq.f32.partialorder %v1777_v53, 8.507059e+37  ;;  %v1793_v0 = vand.u32 2147483648, %v7843_v22  ;;  %3342 = vrcp.f32 %v7845_v56  ;;  %v1715_v25 = vmul.f32 %v7865_v15, %v1714_v59  ;;  %vm7965_vm8 = vmor %vm1745_vm10, %vm1746_vm13 }
 0x2ed   :  { %v7921_v58 = vpop.eup %3338  ;;  %v1742_v41 = vsub.f32 1.0, %v1741_v48  ;;  %v1755_v14 = vmul.f32 %v7910_v6, %v7833_v39  ;;  %v1729_v16 = vmul.f32 %v7876_v52, %v1728_v29  ;;  %vm1760_vm3 = vweird.f32 %v7910_v6 }
 0x2ee   :  { %v1769_v27 = vmul.f32 %v7921_v58, %v7839_v57  ;;  %vm1774_vm11 = vweird.f32 %v7921_v58  ;;  %v1716_v47 = vadd.f32 %v7865_v15, %v1715_v25  ;;  %vm7956_vm1 = vcmp.eq.f32.partialorder %v1791_v35, 8.507059e+37  ;;  %v7999_v35 = vpop.permute.xlu2 %2240 }
 0x2ef   :  { %v7943_v63 = vpop.eup %3340  ;;  %v1743_v4 = vmul.f32 %v7893_v32, %v1742_v41  ;;  %v1756_v11 = vsub.f32 1.0, %v1755_v14  ;;  %v1730_v40 = vadd.f32 %v7876_v52, %v1729_v16  ;;  %v1794_v2 = vor.u32 1.1754944e-38, %v1793_v0  ;;  %v8047_v14 = vpop.permute.xlu1 %2168  ;;  %v10657_v0 = vld [vmem:[#allocation30_spill] sm:$0xff] }
 0x2f0   :  { %v1770_v38 = vsub.f32 1.0, %v1769_v27  ;;  %v1783_v18 = vmul.f32 %v7943_v63, %v7843_v22  ;;  %v1720_v8 = vsel %vm7934_vm5, %v7865_v15, %v1716_v47  ;;  %vm1788_vm13 = vweird.f32 %v7943_v63  ;;  %v10620_v15 = vld [vmem:[#allocation126_spill] sm:$0xff] }
 0x2f1   :  { %v1744_v53 = vadd.f32 %v7893_v32, %v1743_v4  ;;  %v1757_v50 = vmul.f32 %v7910_v6, %v1756_v11  ;;  %vm10555_vm6 = vcmp.lt.f32.partialorder %v10527_v13, 17.5  ;;  %vm10556_vm10 = vcmp.lt.f32.partialorder %v10528_v3, 17.5  ;;  %v10588_v11 = vld [vmem:[#allocation172_spill] sm:$0xff]  ;;  %v3376_v27 = vld [vmem:[#allocation6 + $0x8] sm:$0xff] }
 0x2f2   :  { %vm7982_vm4 = vmand %vm10556_vm10, %vm10555_vm6  ;;  %v3343_v44 = vpop.eup %3342  ;;  %v1734_v20 = vsel %vm7951_vm7, %v7876_v52, %v1730_v40  ;;  %vm10559_vm5 = vweird.f32 %v7833_v39  ;;  %v1771_v59 = vmul.f32 %v7921_v58, %v1770_v38  ;;  %v1784_v3 = vsub.f32 1.0, %v1783_v18  ;;  %v10607_v38 = vld [vmem:[#allocation188_spill] sm:$0xff] }
 0x2f3   :  { %vm7993_vm9 = vmor %vm10559_vm5, %vm1760_vm3  ;;  %v1805_v48 = vand.u32 2147483647, %v7845_v56  ;;  %v1725_v29 = vsel %vm7867_vm14, %v7854_v34, %v1720_v8  ;;  %v1748_v52 = vsel %vm7965_vm8, %v7893_v32, %v1744_v53  ;;  %v1758_v39 = vadd.f32 %v7910_v6, %v1757_v50  ;;  %v10612_v53 = vld [vmem:[#allocation189_spill] sm:$0xff] }
 0x2f4   :  { %vm10562_vm3 = vweird.f32 %v7839_v57  ;;  %v1797_v25 = vmul.f32 %v3343_v44, %v7845_v56  ;;  %v1739_v34 = vsel %vm7880_vm15, %v7860_v46, %v1734_v20  ;;  %v1753_v36 = vsel %vm7884_vm0, %v7871_v28, %v1748_v52  ;;  %vm10565_vm8 = vmmov %vm10555_vm6  ;;  %v3378_v4 = vld [vmem:[#allocation3 + $0x10] sm:$0xff] }
 0x2f5   :  { %vm8012_vm7 = vmor %vm10562_vm3, %vm1774_vm11  ;;  %v1772_v32 = vadd.f32 %v7921_v58, %v1771_v59  ;;  %v1785_v41 = vmul.f32 %v7943_v63, %v1784_v3  ;;  %vm10566_vm11 = vcmp.lt.f32.partialorder %v10535_v33, 17.5  ;;  %v1762_v46 = vsel %vm7993_vm9, %v7910_v6, %v1758_v39  ;;  %v8045_v33 = vpop.permute.xlu0 %2170  ;;  %v10622_v3 = vld [vmem:[#allocation115_spill] sm:$0xff] }
 0x2f6   :  { %vm8029_vm14 = vmand %vm10566_vm11, %vm10565_vm8  ;;  %vm10569_vm15 = vweird.f32 %v7843_v22  ;;  %v1798_v26 = vsub.f32 1.0, %v1797_v25  ;;  %vm1802_vm6 = vweird.f32 %v3343_v44  ;;  %v1807_v43 = vand.u32 2147483648, %v7845_v56 }
 0x2f7   :  { %vm8040_vm0 = vmor %vm10569_vm15, %vm1788_vm13  ;;  %v1767_v6 = vsel %vm7903_vm12, %v7888_v60, %v1762_v46  ;;  %v1776_v22 = vsel %vm8012_vm7, %v7921_v58, %v1772_v32  ;;  %v1786_v49 = vadd.f32 %v7943_v63, %v1785_v41  ;;  %vm8056_vm9 = vcmp.eq.f32.partialorder %v1805_v48, 8.507059e+37  ;;  %v8202_v41 = vpop.permute.xlu2 %2510  ;;  %v10636_v46 = vld [vmem:[#allocation150_spill] sm:$0xff] }
 0x2f8   :  { %vm10574_vm13 = vcmp.lt.f32.partialorder %v10536_v5, 1.5  ;;  %vm10578_vm5 = vcmp.lt.f32.partialorder %v10527_v13, 27.5  ;;  %vm10581_vm7 = vcmp.lt.f32.partialorder %v10539_v12, 1.5  ;;  %v1781_v58 = vsel %vm7915_vm2, %v7907_v9, %v1776_v22  ;;  %v3374_v22 = vld [vmem:[#allocation6] sm:$0xff] }
 0x2f9   :  { %vm8064_vm10 = vmand %vm7982_vm4, %vm10574_vm13  ;;  %v1799_v47 = vmul.f32 %v3343_v44, %v1798_v26  ;;  %v1810_v5 = vmul.f32 %v1725_v29, %v7790_v45  ;;  %v1811_v7 = vmul.f32 %v1739_v34, %v7823_v24  ;;  %v10590_v9 = vmov 0  ;;  %v10624_v29 = vld [vmem:[#allocation17_spill] sm:$0xff]  ;;  %v10638_v26 = vld [vmem:[#allocation27_spill] sm:$0xff] }
 0x2fa   :  { %vm10577_vm12 = vmmov %vm10574_vm13  ;;  %v1790_v45 = vsel %vm8040_vm0, %v7943_v63, %v1786_v49  ;;  %v1808_v12 = vor.u32 1.1754944e-38, %v1807_v43  ;;  %v8117_v21 = vmul.f32 %v1753_v36, %v7825_v62  ;;  %v8120_v40 = vmul.f32 %v1767_v6, %v7827_v19  ;;  %v10630_v34 = vld [vmem:[#allocation149_spill] sm:$0xff]  ;;  %v10631_v36 = vld [vmem:[#allocation143_spill] sm:$0xff] }
 0x2fb   :  { %vm8072_vm3 = vmand %vm10578_vm5, %vm10577_vm12  ;;  %vm10589_vm12 = vcmp.lt.f32.partialorder %v10542_v55, 1.5  ;;  %v10598_v63 = vmov 0  ;;  %vm10601_vm0 = vcmp.lt.f32.partialorder %v10544_v10, 1.5  ;;  %v1795_v62 = vsel %vm7956_vm1, %v1794_v2, %v1790_v45  ;;  %v3375_v49 = vld [vmem:[#allocation3] sm:$0xff]  ;;  %v3379_v45 = vld [vmem:[#allocation6 + $0x10] sm:$0xff] }
 0x2fc   :  { %vm10582_vm8 = vmmov %vm10578_vm5  ;;  %v1800_v19 = vadd.f32 %v3343_v44, %v1799_v47  ;;  %vm1820_vm13 = vcmp.lt.f32.partialorder %v10607_v38, 17.5  ;;  %v10609_v18 = vmov 0  ;;  %v8151_v8 = vmul.f32 %v1781_v58, %v7829_v37  ;;  %v3377_v58 = vld [vmem:[#allocation3 + $0x8] sm:$0xff] }
 0x2fd   :  { %vm8080_vm11 = vmand %vm10582_vm8, %vm10581_vm7  ;;  %vm10596_vm8 = vcmp.lt.f32.partialorder %v10543_v51, 1.5  ;;  %vm1822_vm1 = vcmp.lt.f32.partialorder %v10613_v30, 17.5  ;;  %v1854_v61 = vsel %vm8064_vm10, %v1810_v5, 0.0  ;;  %v10621_v59 = vrot.slane %v10620_v15, 1 }
 0x2fe   :  { %vm10585_vm4 = vmmov %vm10581_vm7  ;;  %v10623_v48 = vrot.slane %v10622_v3, 1  ;;  %v8183_v39 = vmul.f32 %v1795_v62, %v7831_v42  ;;  %vm10629_vm10 = vcmp.gt.f32.partialorder %v10554_v17, 26.5  ;;  %v10637_v28 = vrot.slane %v10636_v46, 1  ;;  %v3381_v62 = vld [vmem:[#allocation6 + $0x18] sm:$0xff]  ;;  %v3387_v46 = vld [vmem:[#allocation6 + $0x30] sm:$0xff] }
 0x2ff   :  { %vm8093_vm15 = vmand %vm8029_vm14, %vm10585_vm4  ;;  %vm10593_vm14 = vweird.f32 %v7845_v56  ;;  %v10603_v56 = vmov 0  ;;  %v10639_v43 = vrot.slane %v10638_v26, 1  ;;  %v358_v16 = vsub.f32 %v3375_v49, %v3374_v22  ;;  %v2255_v22 = vpop.permute.xlu0 %2254  ;;  %v2253_v49 = vpop.permute.xlu1 %2252 }
 0x300   :  { %vm8102_vm2 = vmand %vm10578_vm5, %vm10589_vm12  ;;  %v1855_v20 = vsel %vm8093_vm15, %v1811_v7, 0.0  ;;  %v359_v47 = vsub.f32 %v3377_v58, %v3376_v27  ;;  %v360_v24 = vsub.f32 %v3378_v4, %v3379_v45 }
 0x301   :  { %v10591_v9 = vsel %vm8102_vm2, 4294967295, %v10590_v9  ;;  %vm8112_vm7 = vmor %vm10593_vm14, %vm1802_vm6  ;;  %vm1819_vm14 = vcmp.lt.f32.partialorder %v10606_v54, 17.5  ;;  %v1861_v57 = vadd.f32 %v1855_v20, %v1854_v61  ;;  %v3383_v61 = vld [vmem:[#allocation6 + $0x20] sm:$0xff] }
 0x302   :  { %10592 = vst [vmem:[#allocation91_spill] sm:$0xff] %v10591_v9  ;;  %vm10597_vm4 = vmmov %vm10578_vm5  ;;  %v1804_v50 = vsel %vm8112_vm7, %v3343_v44, %v1800_v19  ;;  %v367_v27 = vmul.f32 %v360_v24, %v360_v24 }
 0x303   :  { %vm8126_vm12 = vmand %vm10597_vm4, %vm10596_vm8  ;;  %vm10608_vm8 = vcmp.lt.f32.partialorder %v10547_v31, 1.5  ;;  %v1809_v44 = vsel %vm8056_vm9, %v1808_v12, %v1804_v50  ;;  %v3380_v12 = vld [vmem:[#allocation3 + $0x18] sm:$0xff]  ;;  %v3382_v50 = vld [vmem:[#allocation3 + $0x20] sm:$0xff] }
 0x304   :  { %v10599_v63 = vsel %vm8126_vm12, 4294967295, %v10598_v63  ;;  %vm10602_vm6 = vmmov %vm10597_vm4  ;;  %v361_v19 = vsub.f32 %v3380_v12, %v3381_v62  ;;  %v362_v20 = vsub.f32 %v3382_v50, %v3383_v61 }
 0x305   :  { %10600 = vst [vmem:[#allocation108_spill] sm:$0xff] %v10599_v63  ;;  %vm8134_vm5 = vmand %vm10602_vm6, %vm10601_vm0  ;;  %vm1821_vm0 = vcmp.lt.f32.partialorder %v10612_v53, 17.5  ;;  %vm1823_vm6 = vcmp.lt.f32.partialorder %v10554_v17, 17.5 }
 0x306   :  { %v10604_v56 = vsel %vm8134_vm5, 4294967295, %v10603_v56  ;;  %vm8146_vm12 = vmand %vm10597_vm4, %vm10608_vm8  ;;  %vm10614_vm5 = vcmp.lt.f32.partialorder %v10527_v13, 17.5  ;;  %v368_v58 = vmul.f32 %v361_v19, %v361_v19  ;;  %v369_v4 = vmul.f32 %v362_v20, %v362_v20 }
 0x307   :  { %10605 = vst [vmem:[#allocation107_spill] sm:$0xff] %v10604_v56  ;;  %v10610_v18 = vsel %vm8146_vm12, 4294967295, %v10609_v18  ;;  %vm8158_vm2 = vmand %vm1819_vm14, %vm10614_vm5 }
 0x308   :  { %10611 = vst [vmem:[#allocation121_spill] sm:$0xff] %v10610_v18  ;;  %vm10617_vm8 = vmmov %vm10614_vm5  ;;  %vm10625_vm5 = vcmp.lt.s32.totalorder %v10624_v29, 7 }
 0x309   :  { %vm8166_vm4 = vmand %vm1820_vm13, %vm10617_vm8  ;;  %v2408_v52 = vsel %vm10625_vm5, %v10623_v48, %v10621_v59  ;;  %v3384_v59 = vld [vmem:[#allocation3 + $0x28] sm:$0xff]  ;;  %v3385_v48 = vld [vmem:[#allocation6 + $0x28] sm:$0xff] }
 0x30a   :  { %vm10626_vm13 = vmmov %vm10617_vm8  ;;  %v8194_v25 = vsel %vm10629_vm10, %v10622_v3, %v2408_v52  ;;  %v363_v52 = vsub.f32 %v3384_v59, %v3385_v48  ;;  %v10664_v59 = vld [vmem:[#allocation38_spill] sm:$0xff] }
 0x30b   :  { %vm8187_vm7 = vmand %vm1821_vm0, %vm10626_vm13  ;;  %vm10644_vm13 = vcmp.lt.f32.partialorder %v10542_v55, 1.5 }
 0x30c   :  { %vm10632_vm15 = vmmov %vm10629_vm10  ;;  %v370_v45 = vmul.f32 %v363_v52, %v363_v52  ;;  %v10666_v52 = vld [vmem:[#allocation31_spill] sm:$0xff] }
 0x30d   :  { %v8200_v32 = vsel %vm10632_vm15, %v10631_v36, %v10630_v34  ;;  %vm10633_vm9 = vmmov %vm10617_vm8  ;;  %v3386_v34 = vld [vmem:[#allocation3 + $0x30] sm:$0xff]  ;;  %v2209_v55 = vmul.f32 2.0, %v10666_v52 }
 0x30e   :  { %vm8206_vm14 = vmand %vm1822_vm1, %vm10633_vm9  ;;  %v377_v15 = vsel %vm8146_vm12, %v370_v45, 0.0 }
 0x30f   :  { %vm10640_vm0 = vmmov %vm10625_vm5 }
 0x310   :  { %v2842_v6 = vsel %vm10640_vm0, %v10639_v43, %v10637_v28  ;;  %vm8220_vm1 = vmand %vm1823_vm6, %vm10617_vm8  ;;  %v364_v28 = vsub.f32 %v3386_v34, %v3387_v46  ;;  %v365_v43 = vmul.f32 %v358_v16, %v358_v16  ;;  %v1816_v16 = vmul.f32 %v1809_v44, %v7837_v1 }
 0x311   :  { %vm10643_vm5 = vmmov %vm10629_vm10  ;;  %vm10647_vm10 = vcmp.lt.f32.partialorder %v10543_v51, 1.5  ;;  %vm10661_vm8 = vnez %v10591_v9  ;;  %v2208_v46 = vmul.f32 2.0, %v10664_v59  ;;  %v10679_v51 = vld [vmem:[#allocation36_spill] sm:$0xff] }
 0x312   :  { %v8227_v7 = vsel %vm10643_vm5, %v10638_v26, %v2842_v6  ;;  %vm8233_vm6 = vmand %vm8158_vm2, %vm10644_vm13  ;;  %v366_v6 = vmul.f32 %v359_v47, %v359_v47  ;;  %vm10650_vm2 = vcmp.lt.f32.partialorder %v10544_v10, 1.5  ;;  %v374_v12 = vsel %vm10661_vm8, %v367_v27, 0.0 }
 0x313   :  { %vm8241_vm15 = vmand %vm8166_vm4, %vm10647_vm10  ;;  %v1856_v2 = vsel %vm8233_vm6, %v8117_v21, 0.0  ;;  %v10653_v21 = vld [vmem:[#allocation51_spill] sm:$0xff]  ;;  %vm10654_vm4 = vcmp.lt.f32.partialorder %v10547_v31, 1.5  ;;  %vm259_vm5 = vcmp.lt.f32.partialorder %v10612_v53, 0.5  ;;  %vm10662_vm13 = vnez %v10599_v63 }
 0x314   :  { %vm8253_vm9 = vmand %vm8187_vm7, %vm10650_vm2  ;;  %v1857_v37 = vsel %vm8241_vm15, %v8120_v40, 0.0  ;;  %v1862_v47 = vadd.f32 %v1861_v57, %v1856_v2  ;;  %v8262_v24 = vmul.f32 %v10653_v21, %v10653_v21  ;;  %v372_v40 = vsel %vm8072_vm3, %v365_v43, 0.0  ;;  %v2243_v43 = vpop.permute.xlu2 %2242  ;;  %v10675_v2 = vld [vmem:[#allocation33_spill] sm:$0xff] }
 0x315   :  { %vm8268_vm0 = vmand %vm8206_vm14, %vm10654_vm4  ;;  %v1858_v10 = vsel %vm8253_vm9, %v8151_v8, 0.0  ;;  %v373_v44 = vsel %vm8080_vm11, %v366_v6, 0.0  ;;  %v8281_v57 = vmul.f32 %v10657_v0, %v10657_v0  ;;  %vm10658_vm7 = vcmp.lt.f32.partialorder %v10588_v11, 1.5  ;;  %v10669_v6 = vld [vmem:[#allocation46_spill] sm:$0xff]  ;;  %v10680_v21 = vld [vmem:[#allocation37_spill] sm:$0xff] }
 0x316   :  { %vm8287_vm14 = vmand %vm8220_vm1, %vm10658_vm7  ;;  %v1863_v42 = vadd.f32 %v1862_v47, %v1857_v37  ;;  %v371_v8 = vmul.f32 %v364_v28, %v364_v28  ;;  %v1859_v62 = vsel %vm8268_vm0, %v8183_v39, 0.0  ;;  %v375_v19 = vsel %vm10662_vm13, %v368_v58, 0.0  ;;  %v10676_v58 = vld [vmem:[#allocation16_spill] sm:$0xff] }
 0x317   :  { %vm10663_vm6 = vnez %v10604_v56  ;;  %v379_v50 = vadd.f32 %v373_v44, %v372_v40  ;;  %v1860_v61 = vsel %vm8287_vm14, %v1816_v16, 0.0  ;;  %vm10665_vm1 = vcmp.gt.f32.partialorder %v10527_v13, 26.5  ;;  %vm10670_vm4 = vmmov %vm10658_vm7  ;;  %v2535_v40 = vpop.permute.xlu1 %2534 }
 0x318   :  { %v376_v5 = vsel %vm10663_vm6, %v369_v4, 0.0  ;;  %v1864_v20 = vadd.f32 %v1863_v42, %v1858_v10  ;;  %v2266_v48 = vsel %vm10665_vm1, %v10664_v59, %v7999_v35  ;;  %vm10667_vm10 = vcmp.lt.f32.partialorder %v10527_v13, 0.5  ;;  %vm10677_vm14 = vmmov %vm10665_vm1  ;;  %v2537_v10 = vpop.permute.xlu0 %2536  ;;  %v10683_v42 = vld [vmem:[#allocation59_spill] sm:$0xff] }
 0x319   :  { %v380_v39 = vadd.f32 %v379_v50, %v374_v12  ;;  %v2195_v34 = vsel %vm10667_vm10, %v10666_v52, %v8045_v33  ;;  %vm10668_vm15 = vmmov %vm10667_vm10  ;;  %vm279_vm2 = vcmp.gt.f32.partialorder %v10669_v6, 26.5  ;;  %vm9433_vm9 = vcmp.gt.f32.partialorder %v10612_v53, 26.5 }
 0x31a   :  { %v2194_v28 = vsel %vm10668_vm15, %v10664_v59, %v8047_v14  ;;  %vm10671_vm0 = vcmp.lt.f32.partialorder %v10527_v13, 27.5  ;;  %v10672_v35 = vmov 0  ;;  %v1865_v33 = vadd.f32 %v1864_v20, %v1859_v62  ;;  %vm10678_vm1 = vmmov %vm10667_vm10 }
 0x31b   :  { %vm8324_vm7 = vmand %vm10671_vm0, %vm10670_vm4  ;;  %v2582_v27 = vmul.f32 2.0, %v10675_v2  ;;  %v2273_v14 = vsel %vm10677_vm14, %v10676_v58, %v2255_v22  ;;  %v381_v4 = vadd.f32 %v380_v39, %v375_v19  ;;  %v2222_v16 = vadd.f32 %v2208_v46, %v2194_v28 }
 0x31c   :  { %v10673_v35 = vsel %vm8324_vm7, 4294967295, %v10672_v35  ;;  %v8337_v11 = vsel %vm10678_vm1, %v10675_v2, %v8202_v41  ;;  %v8340_v37 = vadd.f32 %v2273_v14, %v10679_v51  ;;  %v1866_v47 = vadd.f32 %v1865_v33, %v1860_v61  ;;  %vm10681_vm10 = vmmov %vm10677_vm14 }
 0x31d   :  { %10674 = vst [vmem:[#allocation157_spill] sm:$0xff] %v10673_v35  ;;  %v2223_v45 = vadd.f32 %v2209_v55, %v2195_v34  ;;  %v2272_v1 = vsel %vm10681_vm10, %v10680_v21, %v2253_v49  ;;  %vm10682_vm15 = vmmov %vm10681_vm10  ;;  %vm9432_vm4 = vcmp.lt.f32.partialorder %v10554_v17, 0.5  ;;  %v378_v41 = vsel %vm8324_vm7, %v371_v8, 0.0  ;;  %v10684_v8 = vld [vmem:[#allocation14_spill] sm:$0xff]  ;;  %v10689_v55 = vld [vmem:[#allocation168_spill] sm:$0xff] }
 0x31e   :  { %v2267_v22 = vsel %vm10682_vm15, %v10666_v52, %v2243_v43  ;;  %v382_v44 = vadd.f32 %v381_v4, %v376_v5  ;;  %v8351_v0 = vadd.f32 %v2266_v48, %v2222_v16  ;;  %1867 = vadd.xlane.f32.xlu1 %v1866_v47  ;;  %v8354_v31 = vadd.f32 %v2582_v27, %v8337_v11  ;;  %vm10685_vm0 = vmmov %vm10681_vm10 }
 0x31f   :  { %v9428_v49 = vrot.slane %v8340_v37, 1  ;;  %v8358_v12 = vadd.f32 %v2272_v1, %v10683_v42  ;;  %v8360_v62 = vadd.f32 %v2267_v22, %v2223_v45  ;;  %v2560_v5 = vsel %vm10685_vm0, %v10684_v8, %v2537_v10  ;;  %v10696_v45 = vld [vmem:[#allocation173_spill] sm:$0xff] }
 0x320   :  { %v383_v19 = vadd.f32 %v382_v44, %v377_v15  ;;  %v9430_v50 = vrot.slane %v8351_v0, 7  ;;  %v2392_v20 = vrot.slane %v8351_v0, 1  ;;  %v10686_v15 = vld [vmem:[#allocation127_spill] sm:$0xff]  ;;  %vm10688_vm14 = vcmp.lt.s32.totalorder %v10624_v29, 1  ;;  %v10698_v1 = vld [vmem:[#allocation49_spill] sm:$0xff] }
 0x321   :  { %v9435_v59 = vrot.slane %v8358_v12, 7  ;;  %v2398_v48 = vrot.slane %v8358_v12, 1  ;;  %v9431_v39 = vrot.slane %v8360_v62, 7  ;;  %v10687_v34 = vrot.slane %v10686_v15, 7  ;;  %vm10691_vm1 = vmmov %vm10688_vm14 }
 0x322   :  { %v384_v52 = vadd.f32 %v383_v19, %v378_v41  ;;  %v2370_v28 = vmul.f32 2.0, %v8358_v12  ;;  %v9429_v43 = vrot.slane %v8360_v62, 1  ;;  %v10690_v27 = vrot.slane %v10689_v55, 7  ;;  %v10699_v41 = vld [vmem:[#allocation176_spill] sm:$0xff] }
 0x323   :  { %v2313_v46 = vsel %vm10688_vm14, %v10687_v34, %v9430_v50  ;;  %vm10692_vm10 = vcmp.lt.s32.totalorder %v10624_v29, 7  ;;  %v10693_v4 = vrot.slane %v10689_v55, 1  ;;  %v2364_v51 = vmul.f32 2.0, %v8351_v0  ;;  %v10717_v50 = vld [vmem:[#allocation140_spill] sm:$0xff] }
 0x324   :  { %v2350_v33 = vsel %vm259_vm5, %v8351_v0, %v2313_v46  ;;  %v2307_v58 = vsel %vm10691_vm1, %v10690_v27, %v9435_v59  ;;  %v2404_v14 = vsel %vm10692_vm10, %v2398_v48, %v9428_v49  ;;  %vm10694_vm15 = vmmov %vm10692_vm10  ;;  %385 = vadd.xlane.f32.xlu0 %v384_v52  ;;  %vm10695_vm0 = vcmp.lt.f32.partialorder %v10669_v6, 0.5 }
 0x325   :  { %v2405_v16 = vsel %vm10694_vm15, %v10693_v4, %v2398_v48  ;;  %v2356_v47 = vsel %vm10695_vm0, %v8358_v12, %v2307_v58  ;;  %vm10697_vm14 = vcmp.gt.f32.partialorder %v10696_v45, 26.5  ;;  %v8404_v22 = vadd.f32 %v10698_v1, %v2560_v5  ;;  %v8434_v58 = vpop.permute.xlu1 %2184 }
 0x326   :  { %v2453_v21 = vsel %vm10697_vm14, %v10689_v55, %v2405_v16  ;;  %v2384_v10 = vadd.f32 %v2370_v28, %v2356_v47  ;;  %v10700_v42 = vrot.slane %v10622_v3, 7  ;;  %v2410_v8 = vsel %vm10692_vm10, %v2392_v20, %v9429_v43  ;;  %vm10706_vm14 = vmmov %vm10691_vm1 }
 0x327   :  { %v2467_v44 = vadd.f32 %v2453_v21, %v10699_v41  ;;  %v2378_v48 = vadd.f32 %v2364_v51, %v2350_v33  ;;  %v2454_v52 = vsel %vm279_vm2, %v8358_v12, %v2404_v14  ;;  %v2448_v46 = vsel %vm9433_vm9, %v8351_v0, %v2410_v8  ;;  %v10701_v14 = vld [vmem:[#allocation125_spill] sm:$0xff]  ;;  %v10702_v51 = vld [vmem:[#allocation47_spill] sm:$0xff] }
 0x328   :  { %v2311_v19 = vsel %vm10691_vm1, %v9431_v39, %v10700_v42  ;;  %v8427_v28 = vmul.f32 2.0, %v8340_v37  ;;  %v8429_v55 = vadd.f32 %v2454_v52, %v2384_v10  ;;  %v8432_v33 = vmul.f32 2.0, %v8360_v62  ;;  %v2553_v10 = vpop.permute.xlu2 %2552  ;;  %vm10708_vm1 = vmmov %vm10692_vm10  ;;  %v10711_v52 = vld [vmem:[#allocation23_spill] sm:$0xff] }
 0x329   :  { %v2352_v34 = vsel %vm9432_vm4, %v10622_v3, %v2311_v19  ;;  %v2481_v27 = vmul.f32 %v2467_v44, %v2467_v44  ;;  %v8439_v16 = vadd.f32 %v2448_v46, %v2378_v48  ;;  %v8442_v47 = vsub.f32 %v2560_v5, %v10702_v51  ;;  %v10704_v44 = vld [vmem:[#allocation24_spill] sm:$0xff] }
 0x32a   :  { %v8437_v4 = vadd.f32 %v10701_v14, %v2352_v34  ;;  %v9434_v45 = vrot.slane %v8404_v22, 1  ;;  %v9436_v1 = vrot.slane %v8404_v22, 7  ;;  %vm258_vm15 = vcmp.lt.f32.partialorder %v10607_v38, 0.5  ;;  %v10712_v34 = vld [vmem:[#allocation48_spill] sm:$0xff] }
 0x32b   :  { %v2747_v21 = vadd.f32 %v8262_v24, %v2481_v27  ;;  %vm272_vm0 = vcmp.gt.f32.partialorder %v10607_v38, 26.5  ;;  %v10703_v41 = vrot.slane %v10686_v15, 7  ;;  %v10705_v42 = vrot.slane %v10704_v44, 7  ;;  %v10709_v24 = vld [vmem:[#allocation43_spill] sm:$0xff] }
 0x32c   :  { %v10707_v5 = vrot.slane %v10686_v15, 1  ;;  %vm10710_vm10 = vcmp.gt.f32.partialorder %v10527_v13, 26.5  ;;  %v169_v46 = vmul.f32 %v10712_v34, %v10711_v52  ;;  %vm10723_vm4 = vcmp.lt.s32.totalorder %v10624_v29, 1 }
 0x32d   :  { %v2314_v19 = vsel %vm10706_vm14, %v10705_v42, %v10703_v41  ;;  %v2559_v48 = vsel %vm10710_vm10, %v10709_v24, %v2535_v40  ;;  %v8465_v27 = vadd.f32 %v8281_v57, %v2747_v21  ;;  %v10713_v41 = vld [vmem:[#allocation60_spill] sm:$0xff]  ;;  %v10714_v42 = vld [vmem:[#allocation58_spill] sm:$0xff]  ;;  %vm10716_vm14 = vmmov %vm10710_vm10  ;;  %v2798_v21 = vmul.f32 2.0, %v8442_v47  ;;  %v2497_v44 = vpop.permute.xlu1 %2496 }
 0x32e   :  { %v2411_v8 = vsel %vm10708_vm1, %v10707_v5, %v2392_v20  ;;  %v2349_v14 = vsel %vm258_vm15, %v10686_v15, %v2314_v19  ;;  %v2601_v20 = vadd.f32 %v10713_v41, %v2559_v48  ;;  %v10715_v5 = vld [vmem:[#allocation136_spill] sm:$0xff]  ;;  %v2568_v57 = vsel %vm10716_vm14, %v10675_v2, %v2553_v10 }
 0x32f   :  { %v2447_v51 = vsel %vm272_vm0, %v10686_v15, %v2411_v8  ;;  %v2377_v40 = vadd.f32 %v10714_v42, %v2349_v14  ;;  %v2615_v24 = vsub.f32 %v2559_v48, %v10715_v5  ;;  %vm268_vm1 = vcmp.lt.f32.partialorder %v10717_v50, 0.5  ;;  %v10719_v14 = vld [vmem:[#allocation42_spill] sm:$0xff] }
 0x330   :  { %v2629_v49 = vrot.slane %v2601_v20, 1  ;;  %v2671_v43 = vrot.slane %v2601_v20, 7  ;;  %v176_v39 = vfloor.f32 %v169_v46  ;;  %vm10718_vm10 = vcmp.lt.s32.totalorder %v10624_v29, 7 }
 0x331   :  { %v2461_v15 = vadd.f32 %v2447_v51, %v2377_v40  ;;  %v2755_v8 = vrot.slane %v2615_v24, 7  ;;  %v2825_v41 = vrot.slane %v2615_v24, 1  ;;  %v10720_v42 = vrot.slane %v10719_v14, 1  ;;  %vm10721_vm14 = vmmov %vm10718_vm10 }
 0x332   :  { %v2649_v48 = vsel %vm10718_vm10, %v2629_v49, %v9434_v45  ;;  %v10722_v10 = vrot.slane %v10719_v14, 7  ;;  %v8496_v51 = vadd.f32 %v8354_v31, %v2568_v57  ;;  %vm10724_vm9 = vcmp.gt.f32.partialorder %v10606_v54, 26.5  ;;  %v10725_v31 = vld [vmem:[#allocation44_spill] sm:$0xff] }
 0x333   :  { %v2650_v2 = vsel %vm10721_vm14, %v10720_v42, %v2629_v49  ;;  %v2657_v40 = vsel %vm272_vm0, %v2601_v20, %v2649_v48  ;;  %v8506_v49 = vsub.f32 %v2568_v57, %v8337_v11  ;;  %v2691_v42 = vsel %vm10723_vm4, %v2671_v43, %v9436_v1  ;;  %vm10731_vm14 = vmmov %vm10718_vm10 }
 0x334   :  { %v2692_v5 = vsel %vm10723_vm4, %v10722_v10, %v2671_v43  ;;  %v2656_v46 = vsel %vm10724_vm9, %v10719_v14, %v2650_v2  ;;  %v2797_v61 = vmul.f32 2.0, %v2615_v24  ;;  %v2475_v14 = vmul.f32 %v2461_v15, %v2461_v15  ;;  %v10726_v2 = vld [vmem:[#allocation28_spill] sm:$0xff]  ;;  %vm10728_vm9 = vmmov %vm10723_vm4 }
 0x335   :  { %v2699_v45 = vsel %vm258_vm15, %v2601_v20, %v2692_v5  ;;  %v2712_v10 = vsub.f32 %v2656_v46, %v10725_v31  ;;  %v10727_v19 = vrot.slane %v10726_v2, 7  ;;  %v10729_v20 = vrot.slane %v8442_v47, 1 }
 0x336   :  { %v2713_v59 = vsub.f32 %v2657_v40, %v2699_v45  ;;  %v10730_v57 = vrot.slane %v10726_v2, 1  ;;  %v10732_v46 = vrot.slane %v8442_v47, 7  ;;  %v183_v1 = vmul.f32 28.0, %v176_v39 }
 0x337   :  { %v2776_v48 = vsel %vm10728_vm9, %v10727_v19, %v2755_v8  ;;  %v2845_v11 = vsel %vm10718_vm10, %v2825_v41, %v10729_v20  ;;  %v2726_v5 = vmul.f32 %v2712_v10, %v2712_v10  ;;  %vm10733_vm9 = vcmp.gt.f32.partialorder %v10606_v54, 26.5 }
 0x338   :  { %v2846_v43 = vsel %vm10731_vm14, %v10730_v57, %v2825_v41  ;;  %v2727_v45 = vmul.f32 %v2713_v59, %v2713_v59  ;;  %v2775_v15 = vsel %vm10723_vm4, %v2755_v8, %v10732_v46  ;;  %v2783_v19 = vsel %vm258_vm15, %v2615_v24, %v2776_v48  ;;  %v10734_v41 = vld [vmem:[#allocation186_spill] sm:$0xff]  ;;  %v10735_v57 = vld [vmem:[#allocation32_spill] sm:$0xff]  ;;  %vm10738_vm15 = vmmov %vm10718_vm10 }
 0x339   :  { %v2811_v40 = vadd.f32 %v2797_v61, %v2783_v19  ;;  %v2852_v31 = vsel %vm10733_vm9, %v10726_v2, %v2846_v43  ;;  %v2853_v20 = vsel %vm272_vm0, %v2615_v24, %v2845_v11  ;;  %v2740_v10 = vadd.f32 %v2726_v5, %v10734_v41  ;;  %v10736_v2 = vld [vmem:[#allocation156_spill] sm:$0xff]  ;;  %vm10740_vm0 = vmmov %vm10723_vm4  ;;  %v10741_v5 = vld [vmem:[#allocation13_spill] sm:$0xff] }
 0x33a   :  { %v2741_v59 = vadd.f32 %v2727_v45, %v2475_v14  ;;  %v2866_v35 = vadd.f32 %v2852_v31, %v10735_v57  ;;  %v9444_v18 = vrot.slane %v8496_v51, 1  ;;  %v8540_v46 = vsub.f32 %v10711_v52, %v183_v1  ;;  %v2257_v57 = vpop.permute.xlu0 %2256 }
 0x33b   :  { %v2867_v8 = vadd.f32 %v2853_v20, %v2811_v40  ;;  %v9443_v61 = vrot.slane %v8496_v51, 7  ;;  %v9442_v54 = vrot.slane %v8506_v49, 7  ;;  %v8546_v38 = vmul.f32 %v8429_v55, %v8429_v55  ;;  %v10744_v40 = vld [vmem:[#allocation25_spill] sm:$0xff] }
 0x33c   :  { %v8551_v39 = vsel %vm259_vm5, %v8404_v22, %v2691_v42  ;;  %v2880_v24 = vmul.f32 %v2866_v35, %v2866_v35  ;;  %v9441_v14 = vrot.slane %v8506_v49, 1  ;;  %v2784_v1 = vsel %vm259_vm5, %v8442_v47, %v2775_v15  ;;  %vm10743_vm5 = vmmov %vm10740_vm0 }
 0x33d   :  { %v2881_v52 = vmul.f32 %v2867_v8, %v2867_v8  ;;  %v10737_v48 = vrot.slane %v10736_v2, 1  ;;  %v10739_v11 = vrot.slane %v10736_v2, 7  ;;  %vm281_vm10 = vcmp.gt.f32.partialorder %v8540_v46, 26.5 }
 0x33e   :  { %v8569_v42 = vadd.f32 %v2880_v24, %v2740_v10  ;;  %v10742_v45 = vrot.slane %v10741_v5, 7  ;;  %v10745_v41 = vrot.slane %v10741_v5, 1  ;;  %v8593_v8 = vadd.f32 %v2798_v21, %v2784_v1 }
 0x33f   :  { %v2640_v55 = vsel %vm10738_vm15, %v9444_v18, %v10737_v48  ;;  %v2682_v35 = vsel %vm10740_vm0, %v9443_v61, %v10739_v11  ;;  %v8581_v19 = vadd.f32 %v2881_v52, %v2741_v59  ;;  %v8596_v24 = vmul.f32 2.0, %v8506_v49  ;;  %v10746_v59 = vld [vmem:[#allocation185_spill] sm:$0xff]  ;;  %v2551_v11 = vpop.permute.xlu1 %2550 }
 0x340   :  { %v2709_v43 = vsel %vm268_vm1, %v10736_v2, %v2682_v35  ;;  %v2766_v15 = vsel %vm10743_vm5, %v9442_v54, %v10742_v45  ;;  %v2836_v10 = vsel %vm10731_vm14, %v9441_v14, %v10745_v41  ;;  %v10747_v2 = vld [vmem:[#allocation15_spill] sm:$0xff]  ;;  %vm267_vm4 = vcmp.lt.f32.partialorder %v8540_v46, 0.5  ;;  %v10752_v41 = vld [vmem:[#allocation20_spill] sm:$0xff] }
 0x341   :  { %v2723_v31 = vsub.f32 %v10744_v40, %v2709_v43  ;;  %v2793_v20 = vsel %vm268_vm1, %v10741_v5, %v2766_v15  ;;  %v2216_v48 = vmul.f32 2.0, %v10747_v2  ;;  %v8604_v35 = vsel %vm281_vm10, %v8496_v51, %v2640_v55  ;;  %v10749_v43 = vld [vmem:[#allocation138_spill] sm:$0xff] }
 0x342   :  { %v2821_v52 = vadd.f32 %v10746_v59, %v2793_v20  ;;  %v8609_v21 = vsel %vm281_vm10, %v8506_v49, %v2836_v10  ;;  %vm10748_vm9 = vcmp.lt.f32.partialorder %v10527_v13, 0.5  ;;  %vm10750_vm15 = vcmp.gt.f32.partialorder %v10527_v13, 26.5  ;;  %v10751_v55 = vld [vmem:[#allocation34_spill] sm:$0xff] }
 0x343   :  { %v2202_v1 = vsel %vm10748_vm9, %v10747_v2, %v8434_v58  ;;  %v2274_v45 = vsel %vm10750_vm15, %v10747_v2, %v2257_v57  ;;  %v168_v40 = vmul.f32 %v10712_v34, %v10751_v55  ;;  %v2737_v20 = vmul.f32 %v2723_v31, %v2723_v31  ;;  %vm10753_vm0 = vmmov %vm10748_vm9  ;;  %v10754_v58 = vld [vmem:[#allocation45_spill] sm:$0xff]  ;;  %v10759_v31 = vld [vmem:[#allocation187_spill] sm:$0xff] }
 0x344   :  { %v8616_v5 = vadd.f32 %v10749_v43, %v2821_v52  ;;  %v2230_v15 = vadd.f32 %v2216_v48, %v2202_v1  ;;  %v8624_v10 = vmul.f32 2.0, %v10752_v41  ;;  %v8629_v59 = vsel %vm10753_vm0, %v10752_v41, %v2497_v44  ;;  %vm10755_vm5 = vmmov %vm10750_vm15  ;;  %v10760_v1 = vld [vmem:[#allocation184_spill] sm:$0xff] }
 0x345   :  { %v2567_v52 = vsel %vm10755_vm5, %v10754_v58, %v2551_v11  ;;  %v175_v14 = vfloor.f32 %v168_v40  ;;  %v10756_v57 = vrot.slane %v8340_v37, 7  ;;  %v10757_v2 = vrot.slane %v8358_v12, 7 }
 0x346   :  { %v2288_v43 = vadd.f32 %v2274_v45, %v2230_v15  ;;  %vm10758_vm14 = vcmp.lt.s32.totalorder %v10624_v29, 1  ;;  %v2609_v48 = vadd.f32 %v10759_v31, %v2567_v52  ;;  %v8642_v54 = vsub.f32 %v2567_v52, %v10760_v1 }
 0x347   :  { %v2306_v34 = vsel %vm10758_vm14, %v10757_v2, %v10756_v57  ;;  %v10761_v44 = vrot.slane %v8360_v62, 7  ;;  %v10762_v61 = vrot.slane %v8351_v0, 7  ;;  %vm10763_vm9 = vmmov %vm10758_vm14  ;;  %v10764_v45 = vrot.slane %v10622_v3, 1  ;;  %v10767_v3 = vld [vmem:[#allocation123_spill] sm:$0xff]  ;;  %v2539_v46 = vpop.permute.xlu1 %2538 }
 0x348   :  { %v10765_v15 = vrot.slane %v8360_v62, 1  ;;  %vm10766_vm15 = vcmp.lt.s32.totalorder %v10624_v29, 7  ;;  %v8658_v40 = vadd.f32 %v8194_v25, %v8437_v4  ;;  %v2302_v58 = vrot.slane %v2288_v43, 7  ;;  %vm10769_vm0 = vmmov %vm10763_vm9 }
 0x349   :  { %v2312_v11 = vsel %vm10763_vm9, %v10762_v61, %v10761_v44  ;;  %v2372_v52 = vmul.f32 2.0, %v2288_v43  ;;  %v2400_v57 = vrot.slane %v2288_v43, 1  ;;  %v182_v2 = vmul.f32 28.0, %v175_v14  ;;  %vm10771_vm5 = vmmov %vm10769_vm0 }
 0x34a   :  { %v2409_v12 = vsel %vm10766_vm15, %v10765_v15, %v10764_v45  ;;  %v2637_v31 = vrot.slane %v2609_v48, 1  ;;  %v2679_v0 = vrot.slane %v2609_v48, 7  ;;  %v2763_v1 = vrot.slane %v8642_v54, 7  ;;  %vm10773_vm14 = vmmov %vm10766_vm15 }
 0x34b   :  { %v2805_v61 = vmul.f32 2.0, %v8642_v54  ;;  %v10768_v44 = vrot.slane %v10767_v3, 7  ;;  %v10770_v45 = vrot.slane %v8340_v37, 7  ;;  %v10772_v4 = vrot.slane %v10767_v3, 1 }
 0x34c   :  { %v189_v15 = vsub.f32 %v10751_v55, %v182_v2  ;;  %vm260_vm9 = vcmp.lt.f32.partialorder %v10613_v30, 0.5  ;;  %vm274_vm15 = vcmp.gt.f32.partialorder %v10613_v30, 26.5  ;;  %v10776_v2 = vld [vmem:[#allocation134_spill] sm:$0xff]  ;;  %v2478_v6 = vmul.f32 %v8658_v40, %v8658_v40 }
 0x34d   :  { %v2304_v18 = vsel %vm10769_vm0, %v2302_v58, %v10768_v44  ;;  %v2305_v25 = vsel %vm10771_vm5, %v10770_v45, %v2302_v58  ;;  %v2402_v14 = vsel %vm10773_vm14, %v2400_v57, %v10772_v4  ;;  %v10774_v45 = vrot.slane %v8340_v37, 1  ;;  %vm10775_vm0 = vmmov %vm10773_vm14 }
 0x34e   :  { %v2358_v56 = vsel %vm267_vm4, %v2288_v43, %v2305_v25  ;;  %v2359_v44 = vsel %vm268_vm1, %v10767_v3, %v2304_v18  ;;  %v2456_v58 = vsel %vm281_vm10, %v2288_v43, %v2402_v14  ;;  %vm266_vm5 = vcmp.lt.f32.partialorder %v189_v15, 0.5  ;;  %vm10778_vm1 = vmmov %vm10775_vm0  ;;  %v10779_v3 = vld [vmem:[#allocation54_spill] sm:$0xff] }
 0x34f   :  { %v2403_v4 = vsel %vm10775_vm0, %v10774_v45, %v2400_v57  ;;  %v2386_v55 = vadd.f32 %v2372_v52, %v2358_v56  ;;  %v2387_v63 = vadd.f32 %v10776_v2, %v2359_v44  ;;  %vm280_vm14 = vcmp.gt.f32.partialorder %v189_v15, 26.5  ;;  %vm10781_vm10 = vmmov %vm10775_vm0  ;;  %v10782_v57 = vld [vmem:[#allocation53_spill] sm:$0xff] }
 0x350   :  { %v2357_v25 = vsel %vm266_vm5, %v8340_v37, %v2306_v34  ;;  %v2455_v50 = vsel %vm280_vm14, %v8340_v37, %v2403_v4  ;;  %v10777_v18 = vrot.slane %v8496_v51, 1  ;;  %v10780_v14 = vrot.slane %v10779_v3, 1 }
 0x351   :  { %v2470_v52 = vadd.f32 %v2456_v58, %v2386_v55  ;;  %v2471_v44 = vadd.f32 %v10782_v57, %v2387_v63  ;;  %v2385_v45 = vadd.f32 %v8427_v28, %v2357_v25  ;;  %v10783_v4 = vrot.slane %v8496_v51, 7  ;;  %v10787_v58 = vld [vmem:[#allocation179_spill] sm:$0xff] }
 0x352   :  { %v2641_v43 = vsel %vm10778_vm1, %v2637_v31, %v10777_v18  ;;  %v2642_v56 = vsel %vm10781_vm10, %v10780_v14, %v2637_v31  ;;  %vm10784_vm0 = vcmp.lt.s32.totalorder %v10624_v29, 1  ;;  %v10785_v18 = vrot.slane %v10779_v3, 7 }
 0x353   :  { %v2664_v34 = vsel %vm279_vm2, %v10779_v3, %v2642_v56  ;;  %v2665_v37 = vsel %vm280_vm14, %v2609_v48, %v2641_v43  ;;  %v2683_v2 = vsel %vm10784_vm0, %v2679_v0, %v10783_v4  ;;  %vm10786_vm1 = vmmov %vm10784_vm0  ;;  %v2484_v55 = vmul.f32 %v2470_v52, %v2470_v52 }
 0x354   :  { %v2684_v31 = vsel %vm10786_vm1, %v10785_v18, %v2679_v0  ;;  %v2720_v63 = vsub.f32 %v2664_v34, %v10787_v58  ;;  %v2485_v28 = vmul.f32 %v2471_v44, %v2471_v44  ;;  %v2469_v25 = vadd.f32 %v2455_v50, %v2385_v45  ;;  %vm10789_vm10 = vmmov %vm10784_vm0  ;;  %v10790_v44 = vld [vmem:[#allocation148_spill] sm:$0xff] }
 0x355   :  { %v2707_v14 = vsel %vm266_vm5, %v2609_v48, %v2684_v31  ;;  %v2708_v43 = vsel %vm267_vm4, %v8496_v51, %v2683_v2  ;;  %v10788_v4 = vrot.slane %v8506_v49, 7  ;;  %v10791_v50 = vrot.slane %v10790_v44, 7 }
 0x356   :  { %v2721_v56 = vsub.f32 %v2665_v37, %v2707_v14  ;;  %v2734_v57 = vmul.f32 %v2720_v63, %v2720_v63  ;;  %v8724_v9 = vadd.f32 %v2737_v20, %v2485_v28  ;;  %v2483_v0 = vmul.f32 %v2469_v25, %v2469_v25 }
 0x357   :  { %v2767_v3 = vsel %vm10789_vm10, %v2763_v1, %v10788_v4  ;;  %v2722_v52 = vsub.f32 %v8604_v35, %v2708_v43  ;;  %v2768_v48 = vsel %vm10784_vm0, %v10791_v50, %v2763_v1  ;;  %v2833_v35 = vrot.slane %v8642_v54, 1  ;;  %vm10804_vm10 = vmmov %vm10784_vm0 }
 0x358   :  { %v2735_v45 = vmul.f32 %v2721_v56, %v2721_v56  ;;  %v2748_v51 = vadd.f32 %v2734_v57, %v8546_v38  ;;  %v2791_v34 = vsel %vm266_vm5, %v8642_v54, %v2768_v48  ;;  %v2792_v37 = vsel %vm267_vm4, %v8506_v49, %v2767_v3 }
 0x359   :  { %v2736_v20 = vmul.f32 %v2722_v52, %v2722_v52  ;;  %v2819_v2 = vadd.f32 %v2805_v61, %v2791_v34  ;;  %v2820_v18 = vadd.f32 %v8596_v24, %v2792_v37  ;;  %v2589_v31 = vadd.f32 %v8624_v10, %v8629_v59 }
 0x35a   :  { %v2749_v1 = vadd.f32 %v2735_v45, %v2483_v0  ;;  %v2351_v38 = vsel %vm260_vm9, %v8360_v62, %v2312_v11  ;;  %v2449_v58 = vsel %vm274_vm15, %v8360_v62, %v2409_v12  ;;  %v10792_v61 = vrot.slane %v8506_v49, 1 }
 0x35b   :  { %v2750_v63 = vadd.f32 %v2736_v20, %v2484_v55  ;;  %vm10793_vm4 = vcmp.lt.s32.totalorder %v10624_v29, 7  ;;  %v10794_v28 = vrot.slane %v10790_v44, 1  ;;  %v2876_v25 = vadd.f32 %v8609_v21, %v2820_v18  ;;  %v10796_v55 = vld [vmem:[#allocation180_spill] sm:$0xff] }
 0x35c   :  { %v2837_v24 = vsel %vm10793_vm4, %v2833_v35, %v10792_v61  ;;  %vm10795_vm5 = vmmov %vm10793_vm4  ;;  %v2379_v12 = vadd.f32 %v8432_v33, %v2351_v38  ;;  %v2476_v49 = vmul.f32 %v8439_v16, %v8439_v16  ;;  %vm10797_vm1 = vcmp.gt.f32.partialorder %v10527_v13, 26.5  ;;  %v10798_v16 = vld [vmem:[#allocation129_spill] sm:$0xff] }
 0x35d   :  { %v2838_v10 = vsel %vm10795_vm5, %v10794_v28, %v2833_v35  ;;  %v2861_v62 = vsel %vm280_vm14, %v8642_v54, %v2837_v24  ;;  %v2890_v56 = vmul.f32 %v2876_v25, %v2876_v25  ;;  %v2561_v21 = vsel %vm10797_vm1, %v10752_v41, %v2539_v46  ;;  %vm10809_vm1 = vmmov %vm10784_vm0 }
 0x35e   :  { %v2860_v11 = vsel %vm279_vm2, %v10790_v44, %v2838_v10  ;;  %v2875_v43 = vadd.f32 %v2861_v62, %v2819_v2  ;;  %v2463_v57 = vadd.f32 %v2449_v58, %v2379_v12  ;;  %v2603_v4 = vadd.f32 %v2589_v31, %v2561_v21  ;;  %vm10800_vm2 = vmmov %vm10793_vm4 }
 0x35f   :  { %v2874_v14 = vadd.f32 %v2860_v11, %v10796_v55  ;;  %v2617_v54 = vsub.f32 %v2561_v21, %v8629_v59  ;;  %v8771_v3 = vadd.f32 %v2890_v56, %v2750_v63  ;;  %3344 = vrsqrt.f32 %v10798_v16  ;;  %vm10802_vm14 = vmmov %vm10800_vm2  ;;  %v10817_v56 = vld [vmem:[#allocation35_spill] sm:$0xff] }
 0x360   :  { %v2889_v33 = vmul.f32 %v2875_v43, %v2875_v43  ;;  %v2477_v0 = vmul.f32 %v2463_v57, %v2463_v57  ;;  %v2631_v52 = vrot.slane %v2603_v4, 1  ;;  %v2673_v44 = vrot.slane %v2603_v4, 7 }
 0x361   :  { %v2888_v15 = vmul.f32 %v2874_v14, %v2874_v14  ;;  %v2757_v50 = vrot.slane %v2617_v54, 7  ;;  %v2799_v41 = vmul.f32 2.0, %v2617_v54  ;;  %v2827_v45 = vrot.slane %v2617_v54, 1 }
 0x362   :  { %v8776_v13 = vadd.f32 %v2889_v33, %v2749_v1  ;;  %v10799_v40 = vrot.slane %v10631_v36, 1  ;;  %v10801_v34 = vrot.slane %v8404_v22, 1  ;;  %v10803_v20 = vrot.slane %v10631_v36, 7 }
 0x363   :  { %v8774_v48 = vadd.f32 %v2888_v15, %v2748_v51  ;;  %v10805_v2 = vrot.slane %v8404_v22, 7  ;;  %vm10806_vm4 = vcmp.gt.f32.partialorder %v10612_v53, 26.5  ;;  %vm10807_vm5 = vcmp.lt.f32.partialorder %v10554_v17, 0.5 }
 0x364   :  { %v2647_v59 = vsel %vm10800_vm2, %v2631_v52, %v10799_v40  ;;  %v2648_v37 = vsel %vm10802_vm14, %v10801_v34, %v2631_v52  ;;  %v2689_v51 = vsel %vm10804_vm10, %v2673_v44, %v10803_v20  ;;  %v10808_v61 = vrot.slane %v10638_v26, 7  ;;  %vm10811_vm2 = vmmov %vm10784_vm0 }
 0x365   :  { %v2690_v18 = vsel %vm10784_vm0, %v10805_v2, %v2673_v44  ;;  %v2658_v35 = vsel %vm10806_vm4, %v8404_v22, %v2648_v37  ;;  %v2659_v31 = vsel %vm274_vm15, %v2603_v4, %v2647_v59  ;;  %v2702_v38 = vsel %vm10807_vm5, %v10631_v36, %v2689_v51  ;;  %v3345_v24 = vpop.eup %3344  ;;  %vm10812_vm14 = vmmov %vm10807_vm5 }
 0x366   :  { %v2701_v1 = vsel %vm260_vm9, %v2603_v4, %v2690_v18  ;;  %v2714_v58 = vsub.f32 %v2658_v35, %v8551_v39  ;;  %v2716_v63 = vsub.f32 %v8200_v32, %v2702_v38  ;;  %v2773_v22 = vsel %vm10809_vm1, %v2757_v50, %v10808_v61 }
 0x367   :  { %v2715_v46 = vsub.f32 %v2659_v31, %v2701_v1  ;;  %v10810_v28 = vrot.slane %v8442_v47, 7  ;;  %v2786_v36 = vsel %vm10812_vm14, %v10638_v26, %v2773_v22  ;;  %v10813_v39 = vrot.slane %v10638_v26, 1  ;;  %v10819_v31 = vld [vmem:[#allocation183_spill] sm:$0xff] }
 0x368   :  { %vm10814_vm10 = vcmp.lt.s32.totalorder %v10624_v29, 7  ;;  %v10815_v25 = vrot.slane %v8442_v47, 1  ;;  %v2728_v62 = vmul.f32 %v2714_v58, %v2714_v58  ;;  %v2730_v55 = vmul.f32 %v2716_v63, %v2716_v63 }
 0x369   :  { %v2774_v10 = vsel %vm10811_vm2, %v10810_v28, %v2757_v50  ;;  %v2843_v32 = vsel %vm10814_vm10, %v2827_v45, %v10813_v39  ;;  %vm10816_vm0 = vmmov %vm10814_vm10  ;;  %v2729_v12 = vmul.f32 %v2715_v46, %v2715_v46  ;;  %v2814_v17 = vadd.f32 %v10817_v56, %v2786_v36 }
 0x36a   :  { %v2844_v11 = vsel %vm10816_vm0, %v10815_v25, %v2827_v45  ;;  %v2785_v14 = vsel %vm260_vm9, %v2617_v54, %v2774_v10  ;;  %v2855_v21 = vsel %vm274_vm15, %v2617_v54, %v2843_v32  ;;  %v2742_v57 = vadd.f32 %v2728_v62, %v2476_v49 }
 0x36b   :  { %v2813_v43 = vadd.f32 %v2799_v41, %v2785_v14  ;;  %v2854_v26 = vsel %vm10806_vm4, %v8442_v47, %v2844_v11  ;;  %v2743_v4 = vadd.f32 %v2729_v12, %v2477_v0  ;;  %v2744_v29 = vadd.f32 %v2730_v55, %v2478_v6  ;;  %v10818_v41 = vld [vmem:[#allocation26_spill] sm:$0xff] }
 0x36c   :  { %v2868_v15 = vadd.f32 %v2854_v26, %v8593_v8  ;;  %v2870_v52 = vadd.f32 %v8227_v7, %v2814_v17  ;;  %v2907_v44 = vmul.f32 %v3345_v24, %v10798_v16  ;;  %3346 = vrsqrt.f32 %v10818_v41 }
 0x36d   :  { %v2869_v33 = vadd.f32 %v2855_v21, %v2813_v43  ;;  %3348 = vrsqrt.f32 %v8569_v42  ;;  %v2891_v54 = vmul.f32 %v8616_v5, %v8616_v5  ;;  %vm2913_vm9 = vcmp.eq.f32.partialorder %v10798_v16, inf }
 0x36e   :  { %v2882_v50 = vmul.f32 %v2868_v15, %v2868_v15  ;;  %v2884_v40 = vmul.f32 %v2870_v52, %v2870_v52  ;;  %v2908_v53 = vmul.f32 %v3345_v24, %v2907_v44  ;;  %3350 = vrsqrt.f32 %v8581_v19 }
 0x36f   :  { %v2883_v45 = vmul.f32 %v2869_v33, %v2869_v33  ;;  %vm2915_vm15 = vcmp.eq.f32.partialorder %v10798_v16, 0.0  ;;  %v8856_v2 = vadd.f32 %v2891_v54, %v8724_v9  ;;  %v2916_v5 = vand.u32 2147483648, %v10798_v16 }
 0x370   :  { %v8837_v47 = vadd.f32 %v2882_v50, %v2742_v57  ;;  %v8842_v49 = vadd.f32 %v2884_v40, %v2744_v29  ;;  %v2909_v8 = vmul.f32 0.5, %v2908_v53  ;;  %vm2925_vm5 = vcmp.eq.f32.partialorder %v10818_v41, inf  ;;  %v10820_v57 = vld [vmem:[#allocation21_spill] sm:$0xff] }
 0x371   :  { %v8840_v30 = vadd.f32 %v2883_v45, %v2743_v4  ;;  %v2928_v35 = vand.u32 2147483648, %v10818_v41  ;;  %vm2927_vm1 = vcmp.eq.f32.partialorder %v10818_v41, 0.0  ;;  %vm2937_vm2 = vcmp.eq.f32.partialorder %v8569_v42, inf }
 0x372   :  { %v2910_v7 = vsub.f32 1.5, %v2909_v8  ;;  %3352 = vrsqrt.f32 %v8837_v47  ;;  %v3347_v6 = vpop.eup %3346  ;;  %v2940_v22 = vand.u32 2147483648, %v8569_v42  ;;  %vm2939_vm14 = vcmp.eq.f32.partialorder %v8569_v42, 0.0 }
 0x373   :  { %3354 = vrsqrt.f32 %v8840_v30  ;;  %v2919_v59 = vmul.f32 %v3347_v6, %v10818_v41  ;;  %v3349_v34 = vpop.eup %3348  ;;  %vm2949_vm10 = vcmp.eq.f32.partialorder %v8581_v19, inf  ;;  %v2964_v11 = vand.u32 2147483648, %v8837_v47 }
 0x374   :  { %v2911_v0 = vmul.f32 %v3345_v24, %v2910_v7  ;;  %3356 = vrsqrt.f32 %v8842_v49  ;;  %v2931_v51 = vmul.f32 %v3349_v34, %v8569_v42  ;;  %v3351_v18 = vpop.eup %3350  ;;  %v2976_v62 = vand.u32 2147483648, %v8840_v30 }
 0x375   :  { %v2920_v20 = vmul.f32 %v3347_v6, %v2919_v59  ;;  %3358 = vrsqrt.f32 %v10819_v31  ;;  %v2943_v63 = vmul.f32 %v3351_v18, %v8581_v19  ;;  %vm2951_vm0 = vcmp.eq.f32.partialorder %v8581_v19, 0.0 }
 0x376   :  { %v2912_v37 = vmul.f32 %v2911_v0, %v10798_v16  ;;  %v2932_v46 = vmul.f32 %v3349_v34, %v2931_v51  ;;  %3360 = vrsqrt.f32 %v10820_v57  ;;  %vm2975_vm4 = vcmp.eq.f32.partialorder %v8840_v30, 0.0 }
 0x377   :  { %v2921_v58 = vmul.f32 0.5, %v2920_v20  ;;  %v2944_v36 = vmul.f32 %v3351_v18, %v2943_v63  ;;  %3362 = vrsqrt.f32 %v8465_v27 }
 0x378   :  { %v3353_v1 = vpop.eup %3352  ;;  %v2914_v38 = vsel %vm2913_vm9, %v10798_v16, %v2912_v37  ;;  %v2933_v10 = vmul.f32 0.5, %v2932_v46  ;;  %v2952_v16 = vand.u32 2147483648, %v8581_v19  ;;  %vm2963_vm9 = vcmp.eq.f32.partialorder %v8837_v47, 0.0 }
 0x379   :  { %v3355_v9 = vpop.eup %3354  ;;  %v8867_v61 = vsel %vm2915_vm15, %v2916_v5, %v2914_v38  ;;  %v2955_v24 = vmul.f32 %v3353_v1, %v8837_v47  ;;  %v2922_v28 = vsub.f32 1.5, %v2921_v58  ;;  %v2945_v14 = vmul.f32 0.5, %v2944_v36 }
 0x37a   :  { %v2967_v39 = vmul.f32 %v3355_v9, %v8840_v30  ;;  %v3357_v32 = vpop.eup %3356  ;;  %v2934_v55 = vsub.f32 1.5, %v2933_v10  ;;  %v3074_v21 = vsel %vm8072_vm3, %v8867_v61, 0.0  ;;  %vm2985_vm15 = vcmp.eq.f32.partialorder %v8842_v49, inf }
 0x37b   :  { %v2956_v25 = vmul.f32 %v3353_v1, %v2955_v24  ;;  %v2923_v12 = vmul.f32 %v3347_v6, %v2922_v28  ;;  %v3359_v56 = vpop.eup %3358  ;;  %v2979_v26 = vmul.f32 %v3357_v32, %v8842_v49  ;;  %v2946_v15 = vsub.f32 1.5, %v2945_v14 }
 0x37c   :  { %v2968_v43 = vmul.f32 %v3355_v9, %v2967_v39  ;;  %v2935_v29 = vmul.f32 %v3349_v34, %v2934_v55  ;;  %v2991_v50 = vmul.f32 %v3359_v56, %v10819_v31  ;;  %v3361_v51 = vpop.eup %3360  ;;  %v2988_v55 = vand.u32 2147483648, %v8842_v49 }
 0x37d   :  { %v2957_v17 = vmul.f32 0.5, %v2956_v25  ;;  %v2924_v4 = vmul.f32 %v2923_v12, %v10818_v41  ;;  %v2980_v44 = vmul.f32 %v3357_v32, %v2979_v26  ;;  %v2947_v53 = vmul.f32 %v3351_v18, %v2946_v15 }
 0x37e   :  { %v2969_v33 = vmul.f32 0.5, %v2968_v43  ;;  %v2936_v40 = vmul.f32 %v2935_v29, %v8569_v42  ;;  %v2992_v0 = vmul.f32 %v3359_v56, %v2991_v50  ;;  %v3003_v43 = vmul.f32 %v3361_v51, %v10820_v57 }
 0x37f   :  { %v2958_v52 = vsub.f32 1.5, %v2957_v17  ;;  %v2926_v45 = vsel %vm2925_vm5, %v10818_v41, %v2924_v4  ;;  %v2981_v54 = vmul.f32 0.5, %v2980_v44  ;;  %v2948_v34 = vmul.f32 %v2947_v53, %v8581_v19 }
 0x380   :  { %v2970_v8 = vsub.f32 1.5, %v2969_v33  ;;  %v8898_v7 = vsel %vm2927_vm1, %v2928_v35, %v2926_v45  ;;  %v2938_v59 = vsel %vm2937_vm2, %v8569_v42, %v2936_v40  ;;  %v2993_v63 = vmul.f32 0.5, %v2992_v0 }
 0x381   :  { %v2959_v6 = vmul.f32 %v3353_v1, %v2958_v52  ;;  %v3075_v20 = vsel %vm8080_vm11, %v8898_v7, 0.0  ;;  %v8909_v41 = vsel %vm2939_vm14, %v2940_v22, %v2938_v59  ;;  %v2982_v5 = vsub.f32 1.5, %v2981_v54 }
 0x382   :  { %v2971_v37 = vmul.f32 %v3355_v9, %v2970_v8  ;;  %v3081_v35 = vadd.f32 %v3075_v20, %v3074_v21  ;;  %v2950_v1 = vsel %vm2949_vm10, %v8581_v19, %v2948_v34  ;;  %v3076_v46 = vsel %vm10661_vm8, %v8909_v41, 0.0  ;;  %v3363_v9 = vpop.eup %3362 }
 0x383   :  { %v2960_v18 = vmul.f32 %v2959_v6, %v8837_v47  ;;  %v8921_v42 = vsel %vm2951_vm0, %v2952_v16, %v2950_v1  ;;  %vm10822_vm5 = vcmp.eq.f32.partialorder %v8837_v47, inf  ;;  %v2983_v24 = vmul.f32 %v3357_v32, %v2982_v5 }
 0x384   :  { %v2972_v38 = vmul.f32 %v2971_v37, %v8840_v30  ;;  %v3082_v28 = vadd.f32 %v3081_v35, %v3076_v46  ;;  %vm10823_vm1 = vcmp.eq.f32.partialorder %v8840_v30, inf  ;;  %v3077_v19 = vsel %vm10662_vm13, %v8921_v42, 0.0 }
 0x385   :  { %v2962_v22 = vsel %vm10822_vm5, %v8837_v47, %v2960_v18  ;;  %v2994_v16 = vsub.f32 1.5, %v2993_v63  ;;  %v2984_v32 = vmul.f32 %v2983_v24, %v8842_v49  ;;  %v3015_v17 = vmul.f32 %v3363_v9, %v8465_v27 }
 0x386   :  { %v8928_v10 = vsel %vm2963_vm9, %v2964_v11, %v2962_v22  ;;  %v2974_v36 = vsel %vm10823_vm1, %v8840_v30, %v2972_v38  ;;  %v3083_v11 = vadd.f32 %v3082_v28, %v3077_v19  ;;  %vm2987_vm2 = vcmp.eq.f32.partialorder %v8842_v49, 0.0 }
 0x387   :  { %v8938_v25 = vsel %vm2975_vm4, %v2976_v62, %v2974_v36  ;;  %v3078_v47 = vsel %vm10663_vm6, %v8928_v10, 0.0  ;;  %v2995_v14 = vmul.f32 %v3359_v56, %v2994_v16  ;;  %v2986_v30 = vsel %vm2985_vm15, %v8842_v49, %v2984_v32 }
 0x388   :  { %v3084_v62 = vadd.f32 %v3083_v11, %v3078_v47  ;;  %3364 = vrsqrt.f32 %v8774_v48  ;;  %v8952_v26 = vsel %vm2987_vm2, %v2988_v55, %v2986_v30  ;;  %v3079_v4 = vsel %vm8146_vm12, %v8938_v25, 0.0 }
 0x389   :  { %v3004_v56 = vmul.f32 %v3361_v51, %v3003_v43  ;;  %v3016_v29 = vmul.f32 %v3363_v9, %v3015_v17  ;;  %v2996_v33 = vmul.f32 %v2995_v14, %v10819_v31  ;;  %v3080_v44 = vsel %vm8324_vm7, %v8952_v26, 0.0 }
 0x38a   :  { %v3085_v15 = vadd.f32 %v3084_v62, %v3079_v4  ;;  %3366 = vrsqrt.f32 %v8776_v13  ;;  %vm2997_vm14 = vcmp.eq.f32.partialorder %v10819_v31, inf  ;;  %vm2999_vm10 = vcmp.eq.f32.partialorder %v10819_v31, 0.0 }
 0x38b   :  { %v3005_v50 = vmul.f32 0.5, %v3004_v56  ;;  %v3017_v49 = vmul.f32 0.5, %v3016_v29  ;;  %v2998_v6 = vsel %vm2997_vm14, %v10819_v31, %v2996_v33  ;;  %3368 = vrsqrt.f32 %v8771_v3 }
 0x38c   :  { %v3086_v45 = vadd.f32 %v3085_v15, %v3080_v44  ;;  %3370 = vrsqrt.f32 %v8856_v2  ;;  %v3000_v34 = vand.u32 2147483648, %v10819_v31  ;;  %vm3009_vm0 = vcmp.eq.f32.partialorder %v10820_v57, inf }
 0x38d   :  { %v3006_v40 = vsub.f32 1.5, %v3005_v50  ;;  %v3018_v53 = vsub.f32 1.5, %v3017_v49  ;;  %vm3011_vm4 = vcmp.eq.f32.partialorder %v10820_v57, 0.0  ;;  %vm3021_vm9 = vcmp.eq.f32.partialorder %v8465_v27, inf }
 0x38e   :  { %v3365_v8 = vpop.eup %3364  ;;  %3087 = vadd.xlane.f32.xlu2 %v3086_v45  ;;  %v8972_v35 = vsel %vm2999_vm10, %v3000_v34, %v2998_v6  ;;  %v3024_v22 = vand.u32 2147483648, %v8465_v27  ;;  %vm3023_vm15 = vcmp.eq.f32.partialorder %v8465_v27, 0.0  ;;  %vm3033_vm5 = vcmp.eq.f32.partialorder %v8774_v48, inf }
 0x38f   :  { %v3007_v54 = vmul.f32 %v3361_v51, %v3006_v40  ;;  %v3019_v0 = vmul.f32 %v3363_v9, %v3018_v53  ;;  %v3027_v59 = vmul.f32 %v3365_v8, %v8774_v48  ;;  %v3012_v51 = vand.u32 2147483648, %v10820_v57 }
 0x390   :  { %v3367_v5 = vpop.eup %3366  ;;  %v3097_v32 = vsel %vm8072_vm3, %v8972_v35, 0.0  ;;  %v3036_v4 = vand.u32 2147483648, %v8774_v48  ;;  %vm3035_vm1 = vcmp.eq.f32.partialorder %v8774_v48, 0.0  ;;  %vm3045_vm2 = vcmp.eq.f32.partialorder %v8776_v13, inf }
 0x391   :  { %v3008_v37 = vmul.f32 %v3007_v54, %v10820_v57  ;;  %v3020_v20 = vmul.f32 %v3019_v0, %v8465_v27  ;;  %v3028_v18 = vmul.f32 %v3365_v8, %v3027_v59  ;;  %v3039_v46 = vmul.f32 %v3367_v5, %v8776_v13  ;;  %v3369_v63 = vpop.eup %3368 }
 0x392   :  { %v3371_v24 = vpop.eup %3370  ;;  %v3051_v19 = vmul.f32 %v3369_v63, %v8771_v3  ;;  %vm3047_vm14 = vcmp.eq.f32.partialorder %v8776_v13, 0.0  ;;  %v3048_v6 = vand.u32 2147483648, %v8776_v13  ;;  %vm3057_vm10 = vcmp.eq.f32.partialorder %v8771_v3, inf }
 0x393   :  { %v3010_v1 = vsel %vm3009_vm0, %v10820_v57, %v3008_v37  ;;  %v3022_v31 = vsel %vm3021_vm9, %v8465_v27, %v3020_v20  ;;  %v3029_v38 = vmul.f32 0.5, %v3028_v18  ;;  %v3040_v36 = vmul.f32 %v3367_v5, %v3039_v46  ;;  %v1868_v18 = vpop.xlane.xlu1 %1867 }
 0x394   :  { %v8980_v9 = vsel %vm3011_vm4, %v3012_v51, %v3010_v1  ;;  %v8985_v16 = vsel %vm3023_vm15, %v3024_v22, %v3022_v31  ;;  %v3063_v57 = vmul.f32 %v3371_v24, %v8856_v2  ;;  %v3052_v55 = vmul.f32 %v3369_v63, %v3051_v19 }
 0x395   :  { %v3030_v28 = vsub.f32 1.5, %v3029_v38  ;;  %v3041_v11 = vmul.f32 0.5, %v3040_v36  ;;  %v3098_v14 = vsel %vm8080_vm11, %v8980_v9, 0.0  ;;  %v3099_v62 = vsel %vm10661_vm8, %v8985_v16, 0.0 }
 0x396   :  { %v3064_v27 = vmul.f32 %v3371_v24, %v3063_v57  ;;  %v3053_v30 = vmul.f32 0.5, %v3052_v55  ;;  %v3104_v29 = vadd.f32 %v3098_v14, %v3097_v32  ;;  %vm3059_vm0 = vcmp.eq.f32.partialorder %v8771_v3, 0.0 }
 0x397   :  { %v3031_v47 = vmul.f32 %v3365_v8, %v3030_v28  ;;  %v3042_v17 = vsub.f32 1.5, %v3041_v11  ;;  %v3060_v37 = vand.u32 2147483648, %v8771_v3  ;;  %vm3069_vm4 = vcmp.eq.f32.partialorder %v8856_v2, inf  ;;  %v386_v19 = vpop.xlane.xlu0 %385 }
 0x398   :  { %v3065_v56 = vmul.f32 0.5, %v3064_v27  ;;  %v3054_v44 = vsub.f32 1.5, %v3053_v30  ;;  %v3105_v45 = vadd.f32 %v3104_v29, %v3099_v62  ;;  %v3072_v51 = vand.u32 2147483648, %v8856_v2 }
 0x399   :  { %v3032_v43 = vmul.f32 %v3031_v47, %v8774_v48  ;;  %v3043_v33 = vmul.f32 %v3367_v5, %v3042_v17  ;;  %v1869_v1 = vrot.slane %v1868_v18, 4  ;;  %vm3071_vm9 = vcmp.eq.f32.partialorder %v8856_v2, 0.0 }
 0x39a   :  { %v3066_v49 = vsub.f32 1.5, %v3065_v56  ;;  %v3055_v53 = vmul.f32 %v3369_v63, %v3054_v44  ;;  %v387_v32 = vrot.slane %v386_v19, 4 }
 0x39b   :  { %v3034_v15 = vsel %vm3033_vm5, %v8774_v48, %v3032_v43  ;;  %v3044_v40 = vmul.f32 %v3043_v33, %v8776_v13  ;;  %v1870_v22 = vadd.f32 %v1869_v1, %v1868_v18 }
 0x39c   :  { %v9002_v50 = vsel %vm3035_vm1, %v3036_v4, %v3034_v15  ;;  %v3067_v48 = vmul.f32 %v3371_v24, %v3066_v49  ;;  %v3056_v59 = vmul.f32 %v3055_v53, %v8771_v3 }
 0x39d   :  { %v3100_v8 = vsel %vm10662_vm13, %v9002_v50, 0.0  ;;  %v3046_v0 = vsel %vm3045_vm2, %v8776_v13, %v3044_v40  ;;  %v1871_v36 = vrot.slane %v1870_v22, 2 }
 0x39e   :  { %v3106_v54 = vadd.f32 %v3105_v45, %v3100_v8  ;;  %v9015_v34 = vsel %vm3047_vm14, %v3048_v6, %v3046_v0  ;;  %v3068_v20 = vmul.f32 %v3067_v48, %v8856_v2  ;;  %v3058_v5 = vsel %vm3057_vm10, %v8771_v3, %v3056_v59 }
 0x39f   :  { %v3101_v13 = vsel %vm10663_vm6, %v9015_v34, 0.0  ;;  %v9025_v31 = vsel %vm3059_vm0, %v3060_v37, %v3058_v5  ;;  %v1872_v47 = vadd.f32 %v1871_v36, %v1870_v22 }
 0x3a0   :  { %v3070_v38 = vsel %vm3069_vm4, %v8856_v2, %v3068_v20  ;;  %v3107_v46 = vadd.f32 %v3106_v54, %v3101_v13  ;;  %v3102_v3 = vsel %vm8146_vm12, %v9025_v31, 0.0  ;;  %v388_v2 = vadd.f32 %v387_v32, %v386_v19 }
 0x3a1   :  { %v9029_v63 = vsel %vm3071_vm9, %v3072_v51, %v3070_v38  ;;  %v1873_v55 = vrot.slane %v1872_v47, 1 }
 0x3a2   :  { %v3108_v24 = vadd.f32 %v3107_v46, %v3102_v3  ;;  %v3103_v28 = vsel %vm8324_vm7, %v9029_v63, 0.0  ;;  %v389_v11 = vrot.slane %v388_v2, 2 }
 0x3a3   :  { %v1874_v43 = vadd.f32 %v1873_v55, %v1872_v47 }
 0x3a4   :  { %v3109_v57 = vadd.f32 %v3108_v24, %v3103_v28  ;;  %v390_v14 = vadd.f32 %v389_v11, %v388_v2 }
 0x3a6   :  { %3110 = vadd.xlane.f32.xlu2 %v3109_v57  ;;  %v391_v27 = vrot.slane %v390_v14, 1 }
 0x3a8   :  { %v392_v17 = vadd.f32 %v391_v27, %v390_v14 }
 0x3aa   :  { %3297 = vpush %v392_v17 }
 0x3ab   :  { %3299 = vpush %v1874_v43 }
 0x3db   :  { %s9037_s14 = spop %3297 }
 0x3dc   :  { %s9039_s15 = spop %3299 }
 0x401   :  { %v3088_v30 = vpop.xlane.xlu2 %3087 }
 0x402   :  { %v3089_v62 = vrot.slane %v3088_v30, 4 }
 0x404   :  { %v3090_v4 = vadd.f32 %v3089_v62, %v3088_v30 }
 0x406   :  { %v3091_v56 = vrot.slane %v3090_v4, 2 }
 0x408   :  { %v3092_v29 = vadd.f32 %v3091_v56, %v3090_v4 }
 0x40a   :  { %v3093_v15 = vrot.slane %v3092_v29, 1 }
 0x40c   :  { %v3094_v33 = vadd.f32 %v3093_v15, %v3092_v29 }
 0x40e   :  { %3301 = vpush %v3094_v33 }
 0x419   :  { %v3111_v44 = vpop.xlane.xlu2 %3110 }
 0x41a   :  { %v3112_v49 = vrot.slane %v3111_v44, 4 }
 0x41c   :  { %v3113_v45 = vadd.f32 %v3112_v49, %v3111_v44 }
 0x41e   :  { %v3114_v40 = vrot.slane %v3113_v45, 2 }
 0x420   :  { %v3115_v53 = vadd.f32 %v3114_v40, %v3113_v45 }
 0x422   :  { %v3116_v8 = vrot.slane %v3115_v53, 1 }
 0x424   :  { %v3117_v6 = vadd.f32 %v3116_v8, %v3115_v53 }
 0x426   :  { %3303 = vpush %v3117_v6 }
 0x43f   :  { %s3302_s16 = spop %3301 }
 0x440   :  { %s3096_s17 = smul.f32 0.0006377551, %s3302_s16 }
 0x442   :  { %v3120_v48 = vstv %s3096_s17 }
 0x443   :  { %v3121_v54 = vsub.f32 %v8867_v61, %v3120_v48  ;;  %v3122_v0 = vsub.f32 %v8898_v7, %v3120_v48  ;;  %v3123_v59 = vsub.f32 %v8909_v41, %v3120_v48  ;;  %v3124_v37 = vsub.f32 %v8921_v42, %v3120_v48 }
 0x444   :  { %v3125_v5 = vsub.f32 %v8928_v10, %v3120_v48  ;;  %v3126_v61 = vsub.f32 %v8938_v25, %v3120_v48  ;;  %v3127_v38 = vsub.f32 %v8952_v26, %v3120_v48 }
 0x445   :  { %v3128_v20 = vsel %vm8072_vm3, %v3121_v54, 0.0  ;;  %v3129_v18 = vsel %vm8080_vm11, %v3122_v0, 0.0  ;;  %v3130_v51 = vsel %vm10661_vm8, %v3123_v59, 0.0  ;;  %v3131_v7 = vsel %vm10662_vm13, %v3124_v37, 0.0 }
 0x446   :  { %v3172_v13 = vmul.f32 %v3128_v20, %v3128_v20  ;;  %v3173_v1 = vmul.f32 %v3129_v18, %v3129_v18  ;;  %v3174_v41 = vmul.f32 %v3130_v51, %v3130_v51  ;;  %v3132_v46 = vsel %vm10663_vm6, %v3125_v5, 0.0 }
 0x447   :  { %v3175_v3 = vmul.f32 %v3131_v7, %v3131_v7  ;;  %v3133_v10 = vsel %vm8146_vm12, %v3126_v61, 0.0  ;;  %v3176_v24 = vmul.f32 %v3132_v46, %v3132_v46  ;;  %v3134_v25 = vsel %vm8324_vm7, %v3127_v38, 0.0 }
 0x448   :  { %v3179_v42 = vadd.f32 %v3173_v1, %v3172_v13  ;;  %v3177_v36 = vmul.f32 %v3133_v10, %v3133_v10  ;;  %v3178_v57 = vmul.f32 %v3134_v25, %v3134_v25 }
 0x44a   :  { %v3180_v22 = vadd.f32 %v3179_v42, %v3174_v41 }
 0x44c   :  { %v3181_v28 = vadd.f32 %v3180_v22, %v3175_v3 }
 0x44e   :  { %v3182_v19 = vadd.f32 %v3181_v28, %v3176_v24 }
 0x450   :  { %v3183_v32 = vadd.f32 %v3182_v19, %v3177_v36 }
 0x452   :  { %v3184_v47 = vadd.f32 %v3183_v32, %v3178_v57  ;;  %v3216_v32 = vstv %s9037_s14 }
 0x454   :  { %3185 = vadd.xlane.f32.xlu1 %v3184_v47  ;;  %v3217_v47 = vstv %s9039_s15 }
 0x457   :  { %s3304_s18 = spop %3303 }
 0x458   :  { %s3119_s19 = smul.f32 0.0006377551, %s3304_s18 }
 0x45a   :  { %v3135_v26 = vstv %s3119_s19 }
 0x45b   :  { %v3136_v2 = vsub.f32 %v8972_v35, %v3135_v26  ;;  %v3137_v11 = vsub.f32 %v8980_v9, %v3135_v26  ;;  %v3138_v55 = vsub.f32 %v8985_v16, %v3135_v26  ;;  %v3139_v14 = vsub.f32 %v9002_v50, %v3135_v26 }
 0x45c   :  { %v3140_v17 = vsub.f32 %v9015_v34, %v3135_v26  ;;  %v3141_v35 = vsub.f32 %v9025_v31, %v3135_v26  ;;  %v3142_v29 = vsub.f32 %v9029_v63, %v3135_v26 }
 0x45d   :  { %v3143_v27 = vsel %vm8072_vm3, %v3136_v2, 0.0  ;;  %v3144_v43 = vsel %vm8080_vm11, %v3137_v11, 0.0  ;;  %v3145_v30 = vsel %vm10661_vm8, %v3138_v55, 0.0  ;;  %v3146_v9 = vsel %vm10662_vm13, %v3139_v14, 0.0 }
 0x45e   :  { %v3194_v62 = vmul.f32 %v3143_v27, %v3143_v27  ;;  %v3195_v4 = vmul.f32 %v3144_v43, %v3144_v43  ;;  %v3150_v16 = vmul.f32 %v3143_v27, %v3128_v20  ;;  %v3151_v50 = vmul.f32 %v3144_v43, %v3129_v18 }
 0x45f   :  { %v3196_v56 = vmul.f32 %v3145_v30, %v3145_v30  ;;  %v3147_v23 = vsel %vm10663_vm6, %v3140_v17, 0.0  ;;  %v3152_v34 = vmul.f32 %v3145_v30, %v3130_v51  ;;  %v3197_v58 = vmul.f32 %v3146_v9, %v3146_v9 }
 0x460   :  { %v3201_v60 = vadd.f32 %v3195_v4, %v3194_v62  ;;  %v3157_v15 = vadd.f32 %v3151_v50, %v3150_v16  ;;  %v3148_v44 = vsel %vm8146_vm12, %v3141_v35, 0.0  ;;  %v3153_v31 = vmul.f32 %v3146_v9, %v3131_v7 }
 0x461   :  { %v3198_v39 = vmul.f32 %v3147_v23, %v3147_v23  ;;  %v3149_v40 = vsel %vm8324_vm7, %v3142_v29, 0.0  ;;  %v3154_v53 = vmul.f32 %v3147_v23, %v3132_v46  ;;  %v3199_v63 = vmul.f32 %v3148_v44, %v3148_v44 }
 0x462   :  { %v3202_v33 = vadd.f32 %v3201_v60, %v3196_v56  ;;  %v3158_v49 = vadd.f32 %v3157_v15, %v3152_v34  ;;  %v3155_v12 = vmul.f32 %v3148_v44, %v3133_v10  ;;  %v3200_v54 = vmul.f32 %v3149_v40, %v3149_v40 }
 0x463   :  { %v3156_v59 = vmul.f32 %v3149_v40, %v3134_v25  ;;  %vm3221_vm3 = vcmask 7168   ;;  %vm3223_vm11 = vcmask 15360   ;;  %vm3225_vm12 = vcmask 23552  }
 0x464   :  { %v3203_v45 = vadd.f32 %v3202_v33, %v3197_v58  ;;  %v3159_v8 = vadd.f32 %v3158_v49, %v3153_v31  ;;  %v3222_v26 = vsel %vm3221_vm3, %v3216_v32, %v3217_v47  ;;  %vm3227_vm8 = vcmask 31744  }
 0x465   :  { %vm3229_vm13 = vcmask 32768  }
 0x466   :  { %v3204_v6 = vadd.f32 %v3203_v45, %v3198_v39  ;;  %v3160_v48 = vadd.f32 %v3159_v8, %v3154_v53 }
 0x468   :  { %v3205_v0 = vadd.f32 %v3204_v6, %v3199_v63  ;;  %v3161_v37 = vadd.f32 %v3160_v48, %v3155_v12 }
 0x46a   :  { %v3206_v20 = vadd.f32 %v3205_v0, %v3200_v54  ;;  %v3162_v21 = vadd.f32 %v3161_v37, %v3156_v59 }
 0x46c   :  { %3207 = vadd.xlane.f32.xlu2 %v3206_v20  ;;  %3163 = vadd.xlane.f32.xlu0 %v3162_v21 }
 0x4c7   :  { %v3186_v18 = vpop.xlane.xlu1 %3185 }
 0x4c8   :  { %v3187_v5 = vrot.slane %v3186_v18, 4 }
 0x4ca   :  { %v3188_v51 = vadd.f32 %v3187_v5, %v3186_v18 }
 0x4cc   :  { %v3189_v52 = vrot.slane %v3188_v51, 2 }
 0x4ce   :  { %v3190_v38 = vadd.f32 %v3189_v52, %v3188_v51 }
 0x4d0   :  { %v3191_v24 = vrot.slane %v3190_v38, 1 }
 0x4d2   :  { %v3192_v57 = vadd.f32 %v3191_v24, %v3190_v38 }
 0x4df   :  { %v3208_v13 = vpop.xlane.xlu2 %3207  ;;  %v3164_v61 = vpop.xlane.xlu0 %3163 }
 0x4e0   :  { %v3209_v1 = vrot.slane %v3208_v13, 4  ;;  %v3165_v7 = vrot.slane %v3164_v61, 4 }
 0x4e2   :  { %v3210_v41 = vadd.f32 %v3209_v1, %v3208_v13  ;;  %v3166_v42 = vadd.f32 %v3165_v7, %v3164_v61 }
 0x4e4   :  { %v3211_v46 = vrot.slane %v3210_v41, 2  ;;  %v3167_v3 = vrot.slane %v3166_v42, 2 }
 0x4e6   :  { %v3212_v22 = vadd.f32 %v3211_v46, %v3210_v41  ;;  %v3168_v10 = vadd.f32 %v3167_v3, %v3166_v42 }
 0x4e8   :  { %v3213_v28 = vrot.slane %v3212_v22, 1  ;;  %v3169_v25 = vrot.slane %v3168_v10, 1 }
 0x4ea   :  { %v3170_v36 = vadd.f32 %v3169_v25, %v3168_v10  ;;  %v3214_v19 = vadd.f32 %v3213_v28, %v3212_v22 }
 0x4ec   :  { %3305 = vpush %v3170_v36 }
 0x4ed   :  { %3307 = vpush %v3192_v57 }
 0x4ee   :  { %3309 = vpush %v3214_v19 }
 0x51d   :  { %s3306_s23 = spop %3305 }
 0x51e   :  { %v3218_v2 = vstv %s3306_s23  ;;  %s3308_s26 = spop %3307 }
 0x51f   :  { %v3224_v11 = vsel %vm3223_vm11, %v3222_v26, %v3218_v2  ;;  %v3219_v55 = vstv %s3308_s26  ;;  %s3310_s27 = spop %3309 }
 0x520   :  { %v3226_v14 = vsel %vm3225_vm12, %v3224_v11, %v3219_v55  ;;  %v3220_v27 = vstv %s3310_s27 }
 0x521   :  { %v3228_v43 = vsel %vm3227_vm8, %v3226_v14, %v3220_v27 }
 0x522   :  { %3230 = vst.msk [vmem:[#allocation9] sm:$0x1] %vm3229_vm13, %v3228_v43 }
 0x523   :  { %3241 = dma.vmem_to_hbm [thread:$0]  %s3237_s25, 16, %s3239_s22, [#allocation5]  }
 0x524   :  { %3488 = dma.done.wait [#allocation5], 16  }
 0x525   :  { %3489 = vsyncadd [#allocation5], 4294967280 }
 0x526   :  { %3246 = vsyncpa [#allocation4], 1 }
 0x527   :  { %3247 = vsyncpa [#allocation7], 1 }
 0x528   :  { %3248 = vsyncpa [#allocation5], 1 }

</bundles_post_ra>
